<compile_context>
chip_gen: v5e
topology: v5e:2x2
jax: 0.10.0
libtpu: 0.0.40
codegen_flags: <defaults>
</compile_context>

<pallas_src>
import functools

import numpy as np
import jax
import jax.numpy as jnp
from jax.experimental import pallas as pl
from jax.experimental.pallas import tpu as pltpu

LANE = 128
FC_HIDDEN = 128


# ----------------------------------------------------------------------------
# Shape bookkeeping for the three convolutions.
# ----------------------------------------------------------------------------
def _conv_dims(obs_shape):
    c, h, w = obs_shape
    h1, w1 = h + 2 - 3 + 1, w + 2 - 3 + 1      # conv1: k=3, s=1, p=1
    h2, w2 = h1 + 2 - 2 + 1, w1 + 2 - 2 + 1    # conv2: k=2, s=1, p=1
    h3, w3 = h2 - 2 + 1, w2 - 2 + 1            # conv3: k=2, s=1, p=0
    return dict(c0=c, h=h, w=w, c1=24, h1=h1, w1=w1,
                c2=32, h2=h2, w2=w2, c3=32, h3=h3, w3=w3)


# ----------------------------------------------------------------------------
# Parameter init (PyTorch-style layouts; kaiming_normal on conv weights).
# ----------------------------------------------------------------------------
def _kaiming_normal(key, shape, fan_in):
    return (2.0 / fan_in) ** 0.5 * jax.random.normal(key, shape, jnp.float32)


def _uniform(key, shape, fan_in):
    b = 1.0 / fan_in ** 0.5
    return jax.random.uniform(key, shape, jnp.float32, -b, b)


def init_params(key, obs_shape, num_outputs):
    d = _conv_dims(obs_shape)
    cos = d["c3"] * d["h3"] * d["w3"]
    ks = jax.random.split(key, 10)
    return {
        "w1": _kaiming_normal(ks[0], (24, d["c0"], 3, 3), d["c0"] * 9),
        "b1": _uniform(ks[1], (24,), d["c0"] * 9),
        "w2": _kaiming_normal(ks[2], (32, 24, 2, 2), 24 * 4),
        "b2": _uniform(ks[3], (32,), 24 * 4),
        "w3": _kaiming_normal(ks[4], (32, 32, 2, 2), 32 * 4),
        "b3": _uniform(ks[5], (32,), 32 * 4),
        "fc1_w": _uniform(ks[6], (FC_HIDDEN, cos), cos),
        "fc1_b": _uniform(ks[7], (FC_HIDDEN,), cos),
        "fc2_w": _uniform(ks[8], (num_outputs, FC_HIDDEN), FC_HIDDEN),
        "fc2_b": _uniform(ks[9], (num_outputs,), FC_HIDDEN),
    }


# ----------------------------------------------------------------------------
# One-time weight layout work (done at init, NOT per forward).
# ----------------------------------------------------------------------------
def _toeplitz_taps(w_oihw, w_in, pad_w):
    """(Co,Ci,K,K) conv weight -> (K, w_in*Ci, w_out*Co) row-GEMM weights.

    T[kh, wi*Ci+ci, ow*Co+co] = w[co, ci, kh, wi - ow + pad_w]  (if valid kw)
    so that one matmul over the (w, ci) lane dim implements the W part of the
    convolution (incl. zero W-padding); the H part is a row shift handled by
    slicing rows [kh : kh+OH] of the (H-padded) activation buffer.
    """
    w_np = np.asarray(w_oihw, np.float32)
    co, ci, k, _ = w_np.shape
    w_out = w_in + 2 * pad_w - k + 1
    t = np.zeros((k, w_in * ci, w_out * co), np.float32)
    for kh in range(k):
        for ow in range(w_out):
            for kw in range(k):
                wi = ow + kw - pad_w
                if 0 <= wi < w_in:
                    t[kh, wi * ci:(wi + 1) * ci, ow * co:(ow + 1) * co] = \
                        w_np[:, :, kh, kw].T
    return t


def prepare_params(params, obs_shape, num_outputs):
    d = _conv_dims(obs_shape)
    bf16 = jnp.bfloat16

    def tile_bias(b, w_out):  # per-lane bias for lanes packed as (w, c)
        return jnp.tile(jnp.asarray(b, jnp.float32), w_out).reshape(1, -1)

    t1 = jnp.asarray(_toeplitz_taps(params["w1"], d["w"], 1), bf16)
    t2 = jnp.asarray(_toeplitz_taps(params["w2"], d["w1"], 1), bf16)
    t3 = jnp.asarray(_toeplitz_taps(params["w3"], d["w2"], 0), bf16)

    # fc1: PyTorch flattens NCHW as (c, h, w); our conv3 activation has rows=h
    # and lanes=(w, c).  Pre-permute the weight to [h, (w, c), out].
    wf1 = jnp.transpose(
        params["fc1_w"].reshape(FC_HIDDEN, d["c3"], d["h3"], d["w3"]),
        (2, 3, 1, 0)).reshape(d["h3"], d["w3"] * d["c3"], FC_HIDDEN)

    # fc2: transpose + zero-pad the output dim to a full 128-lane register.
    wf2 = jnp.zeros((FC_HIDDEN, LANE), jnp.float32)
    wf2 = wf2.at[:, :num_outputs].set(params["fc2_w"].T)
    bf2 = jnp.zeros((1, LANE), jnp.float32).at[0, :num_outputs].set(
        params["fc2_b"])

    return {
        "t1": t1, "b1": tile_bias(params["b1"], d["w1"]),
        "t2": t2, "b2": tile_bias(params["b2"], d["w2"]),
        "t3": t3, "b3": tile_bias(params["b3"], d["w3"]),
        "wf1": jnp.asarray(wf1, bf16),
        "bf1": params["fc1_b"].reshape(1, FC_HIDDEN).astype(jnp.float32),
        "wf2": jnp.asarray(wf2, bf16),
        "bf2": bf2,
    }


# ----------------------------------------------------------------------------
# Fused forward kernel: conv1+conv2+conv3+fc1+fc2 for one batch element.
# ----------------------------------------------------------------------------
def _fused_forward_kernel(x_ref, t1_ref, b1_ref, t2_ref, b2_ref, t3_ref,
                          b3_ref, wf1_ref, bf1_ref, wf2_ref, bf2_ref,
                          o_ref, a1_ref, a2_ref, a3_ref, *, dims):
    d = dims
    f32 = jnp.float32

    def mm(lhs, rhs):
        # bf16 x bf16 on the MXU, f32 accumulation (no Precision.HIGHEST).
        return jnp.dot(lhs.astype(jnp.bfloat16), rhs,
                       preferred_element_type=f32)

    l1 = d["w1"] * d["c1"]

    # ---- conv1 (3x3, pad 1): input rows are already H-padded by the wrapper;
    #      W-padding lives inside the Toeplitz weights.
    acc = mm(x_ref[0, 0:d["h1"], :], t1_ref[0])
    for kh in range(1, 3):
        acc += mm(x_ref[0, kh:kh + d["h1"], :], t1_ref[kh])
    acc = jnp.maximum(acc + b1_ref[...], 0.0)
    # a1 = conv1 output with one zero H-pad row on each side (conv2 has p=1).
    a1_ref[0:1, :] = jnp.zeros((1, l1), f32)
    a1_ref[d["h1"] + 1:d["h1"] + 2, :] = jnp.zeros((1, l1), f32)
    a1_ref[1:1 + d["h1"], :] = acc

    # ---- conv2 (2x2, pad 1)
    acc = mm(a1_ref[0:d["h2"], :], t2_ref[0])
    acc += mm(a1_ref[1:1 + d["h2"], :], t2_ref[1])
    a2_ref[...] = jnp.maximum(acc + b2_ref[...], 0.0)

    # ---- conv3 (2x2, no pad)
    acc = mm(a2_ref[0:d["h3"], :], t3_ref[0])
    acc += mm(a2_ref[1:1 + d["h3"], :], t3_ref[1])
    a3_ref[...] = jnp.maximum(acc + b3_ref[...], 0.0)   # rows=h, lanes=(w,c)

    # ---- fc1: contraction over (h, w, c); wf1 is pre-permuted to
    #      [h, (w, c), out] so each conv3 row is one K=W*C matmul.
    accf = mm(a3_ref[0:1, :], wf1_ref[0])
    for hh in range(1, d["h3"]):
        accf += mm(a3_ref[hh:hh + 1, :], wf1_ref[hh])
    hfc = jnp.maximum(accf + bf1_ref[...], 0.0)          # (1, 128)

    # ---- fc2 (lane-dense 128-wide output; sliced to num_outputs outside)
    o_ref[0] = mm(hfc, wf2_ref[...]) + bf2_ref[...]


# ----------------------------------------------------------------------------
# Wrapper: one pallas_call for the whole network, batch on the grid.
# ----------------------------------------------------------------------------
def simple_smallcnn_forward(kparams, x_nchw, dims, num_outputs):
    d = dims
    n = x_nchw.shape[0]
    lane_in = d["w"] * d["c0"]
    l1, l2, l3 = d["w1"] * d["c1"], d["w2"] * d["c2"], d["w3"] * d["c3"]
    hp = d["h"] + 2

    # NCHW -> rows=h, lanes=(w, c); H-pad by 1 for conv1 (tiny one-time glue).
    xr = jnp.transpose(x_nchw.astype(jnp.float32), (0, 2, 3, 1))
    xr = xr.reshape(n, d["h"], lane_in)
    xr = jnp.pad(xr, ((0, 0), (1, 1), (0, 0)))

    flops_per_sample = 2 * (3 * d["h1"] * lane_in * l1
                            + 2 * d["h2"] * l1 * l2
                            + 2 * d["h3"] * l2 * l3
                            + d["h3"] * l3 * FC_HIDDEN
                            + FC_HIDDEN * LANE)
    bytes_accessed = int(sum(int(np.prod(v.shape)) * v.dtype.itemsize
                             for v in kparams.values())
                         + xr.size * 4 + n * LANE * 4)

    kernel = functools.partial(_fused_forward_kernel, dims=d)

    out = pl.pallas_call(
        kernel,
        out_shape=jax.ShapeDtypeStruct((n, 1, LANE), jnp.float32),
        grid=(n,),
        in_specs=[
            pl.BlockSpec((1, hp, lane_in), lambda i: (i, 0, 0)),
            pl.BlockSpec(kparams["t1"].shape, lambda i: (0, 0, 0)),
            pl.BlockSpec(kparams["b1"].shape, lambda i: (0, 0)),
            pl.BlockSpec(kparams["t2"].shape, lambda i: (0, 0, 0)),
            pl.BlockSpec(kparams["b2"].shape, lambda i: (0, 0)),
            pl.BlockSpec(kparams["t3"].shape, lambda i: (0, 0, 0)),
            pl.BlockSpec(kparams["b3"].shape, lambda i: (0, 0)),
            pl.BlockSpec(kparams["wf1"].shape, lambda i: (0, 0, 0)),
            pl.BlockSpec(kparams["bf1"].shape, lambda i: (0, 0)),
            pl.BlockSpec(kparams["wf2"].shape, lambda i: (0, 0)),
            pl.BlockSpec(kparams["bf2"].shape, lambda i: (0, 0)),
        ],
        out_specs=pl.BlockSpec((1, 1, LANE), lambda i: (i, 0, 0)),
        scratch_shapes=[
            pltpu.VMEM((d["h1"] + 2, l1), jnp.float32),   # conv1 out (+H pad)
            pltpu.VMEM((d["h2"], l2), jnp.float32),       # conv2 out
            pltpu.VMEM((d["h3"], l3), jnp.float32),       # conv3 out
        ],
        compiler_params=pltpu.CompilerParams(
            dimension_semantics=("parallel",),
            vmem_limit_bytes=32 * 1024 * 1024),
        cost_estimate=pl.CostEstimate(
            flops=int(n * flops_per_sample),
            transcendentals=0,
            bytes_accessed=bytes_accessed),
    )(xr, kparams["t1"], kparams["b1"], kparams["t2"], kparams["b2"],
      kparams["t3"], kparams["b3"], kparams["wf1"], kparams["bf1"],
      kparams["wf2"], kparams["bf2"])

    return out[:, 0, :num_outputs]


# ----------------------------------------------------------------------------
# Pure-JAX reference (full f32) for correctness checking.
# ----------------------------------------------------------------------------
def reference_forward(params, x_nchw):
    x = x_nchw.astype(jnp.float32)

    def conv(inp, w, b, pad):
        y = jax.lax.conv_general_dilated(
            inp, w, (1, 1), ((pad, pad), (pad, pad)),
            dimension_numbers=("NCHW", "OIHW", "NCHW"),
            precision=jax.lax.Precision.HIGHEST)
        return jax.nn.relu(y + b[None, :, None, None])

    h = conv(x, params["w1"], params["b1"], 1)
    h = conv(h, params["w2"], params["b2"], 1)
    h = conv(h, params["w3"], params["b3"], 0)
    flat = h.reshape(h.shape[0], -1)
    h = jax.nn.relu(
        jnp.dot(flat, params["fc1_w"].T,
                precision=jax.lax.Precision.HIGHEST) + params["fc1_b"])
    return (jnp.dot(h, params["fc2_w"].T,
                    precision=jax.lax.Precision.HIGHEST) + params["fc2_b"])


if __name__ == "__main__":
    obs_shape = (4, 16, 16)     # (C, H, W)
    batch = 2
    num_outputs = 6

    key = jax.random.PRNGKey(0)
    k_param, k_x = jax.random.split(key)
    params = init_params(k_param, obs_shape, num_outputs)
    x = jax.random.normal(k_x, (batch,) + obs_shape, dtype=jnp.float32)

    dims = _conv_dims(obs_shape)
    kparams = prepare_params(params, obs_shape, num_outputs)   # one-time layout

    fwd = jax.jit(lambda p, xx: simple_smallcnn_forward(p, xx, dims,
                                                        num_outputs))
    out = jax.block_until_ready(fwd(kparams, x))
    assert out.shape == (batch, num_outputs), out.shape

    ref = jax.block_until_ready(reference_forward(params, x))
    # Kernel matmuls run bf16 x bf16 on the MXU with f32 accumulation (per the
    # perf guidance); the reference is full f32, hence the slightly loose tol.
    max_err = float(jnp.max(jnp.abs(out - ref)))
    assert jnp.allclose(out, ref, rtol=2e-2, atol=2e-2), ("mismatch", max_err)

    print("KERNEL_OK")
</pallas_src>

<mosaic_0001>
module attributes {stable_mosaic.version = 11 : i64} {
  func.func @_fused_forward_kernel(%arg0: i32, %arg1: memref<1x18x64xf32, #tpu.memory_space<vmem>>, %arg2: memref<3x64x384xbf16, #tpu.memory_space<vmem>>, %arg3: memref<1x384xf32, #tpu.memory_space<vmem>>, %arg4: memref<2x384x544xbf16, #tpu.memory_space<vmem>>, %arg5: memref<1x544xf32, #tpu.memory_space<vmem>>, %arg6: memref<2x544x512xbf16, #tpu.memory_space<vmem>>, %arg7: memref<1x512xf32, #tpu.memory_space<vmem>>, %arg8: memref<16x512x128xbf16, #tpu.memory_space<vmem>>, %arg9: memref<1x128xf32, #tpu.memory_space<vmem>>, %arg10: memref<128x128xbf16, #tpu.memory_space<vmem>>, %arg11: memref<1x128xf32, #tpu.memory_space<vmem>>, %arg12: memref<1x1x128xf32, #tpu.memory_space<vmem>>, %arg13: memref<18x384xf32, #tpu.memory_space<vmem>>, %arg14: memref<17x544xf32, #tpu.memory_space<vmem>>, %arg15: memref<16x512xf32, #tpu.memory_space<vmem>>) attributes {dimension_semantics = [#tpu.dimension_semantics<parallel>], iteration_bounds = array<i64: 2>, scalar_prefetch = 0 : i64, scratch_operands = 3 : i64, tpu.core_type = #tpu.core_type<tc>, window_params = [{transform_indices = @transform_0, window_bounds = array<i64: 1, 18, 64>}, {pipeline_mode = #tpu.pipeline_mode<synchronous>, transform_indices = @transform_1, window_bounds = array<i64: 3, 64, 384>}, {pipeline_mode = #tpu.pipeline_mode<synchronous>, transform_indices = @transform_2, window_bounds = array<i64: 1, 384>}, {pipeline_mode = #tpu.pipeline_mode<synchronous>, transform_indices = @transform_3, window_bounds = array<i64: 2, 384, 544>}, {pipeline_mode = #tpu.pipeline_mode<synchronous>, transform_indices = @transform_4, window_bounds = array<i64: 1, 544>}, {pipeline_mode = #tpu.pipeline_mode<synchronous>, transform_indices = @transform_5, window_bounds = array<i64: 2, 544, 512>}, {pipeline_mode = #tpu.pipeline_mode<synchronous>, transform_indices = @transform_6, window_bounds = array<i64: 1, 512>}, {pipeline_mode = #tpu.pipeline_mode<synchronous>, transform_indices = @transform_7, window_bounds = array<i64: 16, 512, 128>}, {pipeline_mode = #tpu.pipeline_mode<synchronous>, transform_indices = @transform_8, window_bounds = array<i64: 1, 128>}, {pipeline_mode = #tpu.pipeline_mode<synchronous>, transform_indices = @transform_9, window_bounds = array<i64: 128, 128>}, {pipeline_mode = #tpu.pipeline_mode<synchronous>, transform_indices = @transform_10, window_bounds = array<i64: 1, 128>}, {transform_indices = @transform_11, window_bounds = array<i64: 1, 1, 128>}]} {
    %c0 = arith.constant 0 : index
    %c0_0 = arith.constant 0 : index
    %c0_1 = arith.constant 0 : index
    %0 = vector.load %arg1[%c0, %c0_0, %c0_1] : memref<1x18x64xf32, #tpu.memory_space<vmem>>, vector<1x16x64xf32>
    %1 = vector.shape_cast %0 : vector<1x16x64xf32> to vector<16x64xf32>
    %c0_2 = arith.constant 0 : index
    %c0_3 = arith.constant 0 : index
    %c0_4 = arith.constant 0 : index
    %2 = vector.load %arg2[%c0_2, %c0_3, %c0_4] : memref<3x64x384xbf16, #tpu.memory_space<vmem>>, vector<1x64x384xbf16>
    %3 = vector.shape_cast %2 : vector<1x64x384xbf16> to vector<64x384xbf16>
    %4 = arith.truncf %1 : vector<16x64xf32> to vector<16x64xbf16>
    %cst = arith.constant dense<0.000000e+00> : vector<16x384xf32>
    %5 = tpu.matmul %4, %3, %cst {dimension_numbers = #tpu.dot_dimension_numbers<[1], [0], [0], [1], [0, 0, 1, 1], [], []>} : vector<16x64xbf16>, vector<64x384xbf16>, vector<16x384xf32> -> vector<16x384xf32>
    %c0_5 = arith.constant 0 : index
    %c1 = arith.constant 1 : index
    %c0_6 = arith.constant 0 : index
    %6 = vector.load %arg1[%c0_5, %c1, %c0_6] : memref<1x18x64xf32, #tpu.memory_space<vmem>>, vector<1x16x64xf32>
    %7 = vector.shape_cast %6 : vector<1x16x64xf32> to vector<16x64xf32>
    %c1_7 = arith.constant 1 : index
    %c0_8 = arith.constant 0 : index
    %c0_9 = arith.constant 0 : index
    %8 = vector.load %arg2[%c1_7, %c0_8, %c0_9] : memref<3x64x384xbf16, #tpu.memory_space<vmem>>, vector<1x64x384xbf16>
    %9 = vector.shape_cast %8 : vector<1x64x384xbf16> to vector<64x384xbf16>
    %10 = arith.truncf %7 : vector<16x64xf32> to vector<16x64xbf16>
    %cst_10 = arith.constant dense<0.000000e+00> : vector<16x384xf32>
    %11 = tpu.matmul %10, %9, %cst_10 {dimension_numbers = #tpu.dot_dimension_numbers<[1], [0], [0], [1], [0, 0, 1, 1], [], []>} : vector<16x64xbf16>, vector<64x384xbf16>, vector<16x384xf32> -> vector<16x384xf32>
    %12 = arith.addf %5, %11 : vector<16x384xf32>
    %c0_11 = arith.constant 0 : index
    %c2 = arith.constant 2 : index
    %c0_12 = arith.constant 0 : index
    %13 = vector.load %arg1[%c0_11, %c2, %c0_12] : memref<1x18x64xf32, #tpu.memory_space<vmem>>, vector<1x16x64xf32>
    %14 = vector.shape_cast %13 : vector<1x16x64xf32> to vector<16x64xf32>
    %c2_13 = arith.constant 2 : index
    %c0_14 = arith.constant 0 : index
    %c0_15 = arith.constant 0 : index
    %15 = vector.load %arg2[%c2_13, %c0_14, %c0_15] : memref<3x64x384xbf16, #tpu.memory_space<vmem>>, vector<1x64x384xbf16>
    %16 = vector.shape_cast %15 : vector<1x64x384xbf16> to vector<64x384xbf16>
    %17 = arith.truncf %14 : vector<16x64xf32> to vector<16x64xbf16>
    %cst_16 = arith.constant dense<0.000000e+00> : vector<16x384xf32>
    %18 = tpu.matmul %17, %16, %cst_16 {dimension_numbers = #tpu.dot_dimension_numbers<[1], [0], [0], [1], [0, 0, 1, 1], [], []>} : vector<16x64xbf16>, vector<64x384xbf16>, vector<16x384xf32> -> vector<16x384xf32>
    %19 = arith.addf %12, %18 : vector<16x384xf32>
    %c0_17 = arith.constant 0 : index
    %c0_18 = arith.constant 0 : index
    %20 = vector.load %arg3[%c0_17, %c0_18] : memref<1x384xf32, #tpu.memory_space<vmem>>, vector<1x384xf32>
    %21 = vector.broadcast %20 : vector<1x384xf32> to vector<16x384xf32>
    %22 = arith.addf %19, %21 : vector<16x384xf32>
    %cst_19 = arith.constant 0.000000e+00 : f32
    %23 = vector.broadcast %cst_19 : f32 to vector<16x384xf32>
    %24 = arith.maximumf %22, %23 : vector<16x384xf32>
    %cst_20 = arith.constant 0.000000e+00 : f32
    %25 = vector.broadcast %cst_20 : f32 to vector<1x384xf32>
    %c0_21 = arith.constant 0 : index
    %c0_22 = arith.constant 0 : index
    %26 = vector.load %arg13[%c0_21, %c0_22] : memref<18x384xf32, #tpu.memory_space<vmem>>, vector<1x384xf32>
    tpu.vector_store %arg13[%c0_21, %c0_22], %25 {strides = array<i32>} : memref<18x384xf32, #tpu.memory_space<vmem>>, vector<1x384xf32>,
    %cst_23 = arith.constant 0.000000e+00 : f32
    %27 = vector.broadcast %cst_23 : f32 to vector<1x384xf32>
    %c17 = arith.constant 17 : index
    %c0_24 = arith.constant 0 : index
    %28 = vector.load %arg13[%c17, %c0_24] : memref<18x384xf32, #tpu.memory_space<vmem>>, vector<1x384xf32>
    tpu.vector_store %arg13[%c17, %c0_24], %27 {strides = array<i32>} : memref<18x384xf32, #tpu.memory_space<vmem>>, vector<1x384xf32>,
    %c1_25 = arith.constant 1 : index
    %c0_26 = arith.constant 0 : index
    %29 = vector.load %arg13[%c1_25, %c0_26] : memref<18x384xf32, #tpu.memory_space<vmem>>, vector<16x384xf32>
    tpu.vector_store %arg13[%c1_25, %c0_26], %24 {strides = array<i32>} : memref<18x384xf32, #tpu.memory_space<vmem>>, vector<16x384xf32>,
    %c0_27 = arith.constant 0 : index
    %c0_28 = arith.constant 0 : index
    %30 = vector.load %arg13[%c0_27, %c0_28] : memref<18x384xf32, #tpu.memory_space<vmem>>, vector<17x384xf32>
    %c0_29 = arith.constant 0 : index
    %c0_30 = arith.constant 0 : index
    %c0_31 = arith.constant 0 : index
    %31 = vector.load %arg4[%c0_29, %c0_30, %c0_31] : memref<2x384x544xbf16, #tpu.memory_space<vmem>>, vector<1x384x544xbf16>
    %32 = vector.shape_cast %31 : vector<1x384x544xbf16> to vector<384x544xbf16>
    %33 = arith.truncf %30 : vector<17x384xf32> to vector<17x384xbf16>
    %cst_32 = arith.constant dense<0.000000e+00> : vector<17x544xf32>
    %34 = tpu.matmul %33, %32, %cst_32 {dimension_numbers = #tpu.dot_dimension_numbers<[1], [0], [0], [1], [0, 0, 1, 1], [], []>} : vector<17x384xbf16>, vector<384x544xbf16>, vector<17x544xf32> -> vector<17x544xf32>
    %c1_33 = arith.constant 1 : index
    %c0_34 = arith.constant 0 : index
    %35 = vector.load %arg13[%c1_33, %c0_34] : memref<18x384xf32, #tpu.memory_space<vmem>>, vector<17x384xf32>
    %c1_35 = arith.constant 1 : index
    %c0_36 = arith.constant 0 : index
    %c0_37 = arith.constant 0 : index
    %36 = vector.load %arg4[%c1_35, %c0_36, %c0_37] : memref<2x384x544xbf16, #tpu.memory_space<vmem>>, vector<1x384x544xbf16>
    %37 = vector.shape_cast %36 : vector<1x384x544xbf16> to vector<384x544xbf16>
    %38 = arith.truncf %35 : vector<17x384xf32> to vector<17x384xbf16>
    %cst_38 = arith.constant dense<0.000000e+00> : vector<17x544xf32>
    %39 = tpu.matmul %38, %37, %cst_38 {dimension_numbers = #tpu.dot_dimension_numbers<[1], [0], [0], [1], [0, 0, 1, 1], [], []>} : vector<17x384xbf16>, vector<384x544xbf16>, vector<17x544xf32> -> vector<17x544xf32>
    %40 = arith.addf %34, %39 : vector<17x544xf32>
    %c0_39 = arith.constant 0 : index
    %c0_40 = arith.constant 0 : index
    %41 = vector.load %arg5[%c0_39, %c0_40] : memref<1x544xf32, #tpu.memory_space<vmem>>, vector<1x544xf32>
    %42 = vector.broadcast %41 : vector<1x544xf32> to vector<17x544xf32>
    %43 = arith.addf %40, %42 : vector<17x544xf32>
    %cst_41 = arith.constant 0.000000e+00 : f32
    %44 = vector.broadcast %cst_41 : f32 to vector<17x544xf32>
    %45 = arith.maximumf %43, %44 : vector<17x544xf32>
    %c0_42 = arith.constant 0 : index
    %c0_43 = arith.constant 0 : index
    %46 = vector.load %arg14[%c0_42, %c0_43] : memref<17x544xf32, #tpu.memory_space<vmem>>, vector<17x544xf32>
    tpu.vector_store %arg14[%c0_42, %c0_43], %45 {strides = array<i32>} : memref<17x544xf32, #tpu.memory_space<vmem>>, vector<17x544xf32>,
    %c0_44 = arith.constant 0 : index
    %c0_45 = arith.constant 0 : index
    %47 = vector.load %arg14[%c0_44, %c0_45] : memref<17x544xf32, #tpu.memory_space<vmem>>, vector<16x544xf32>
    %c0_46 = arith.constant 0 : index
    %c0_47 = arith.constant 0 : index
    %c0_48 = arith.constant 0 : index
    %48 = vector.load %arg6[%c0_46, %c0_47, %c0_48] : memref<2x544x512xbf16, #tpu.memory_space<vmem>>, vector<1x544x512xbf16>
    %49 = vector.shape_cast %48 : vector<1x544x512xbf16> to vector<544x512xbf16>
    %50 = arith.truncf %47 : vector<16x544xf32> to vector<16x544xbf16>
    %cst_49 = arith.constant dense<0.000000e+00> : vector<16x512xf32>
    %51 = tpu.matmul %50, %49, %cst_49 {dimension_numbers = #tpu.dot_dimension_numbers<[1], [0], [0], [1], [0, 0, 1, 1], [], []>} : vector<16x544xbf16>, vector<544x512xbf16>, vector<16x512xf32> -> vector<16x512xf32>
    %c1_50 = arith.constant 1 : index
    %c0_51 = arith.constant 0 : index
    %52 = vector.load %arg14[%c1_50, %c0_51] : memref<17x544xf32, #tpu.memory_space<vmem>>, vector<16x544xf32>
    %c1_52 = arith.constant 1 : index
    %c0_53 = arith.constant 0 : index
    %c0_54 = arith.constant 0 : index
    %53 = vector.load %arg6[%c1_52, %c0_53, %c0_54] : memref<2x544x512xbf16, #tpu.memory_space<vmem>>, vector<1x544x512xbf16>
    %54 = vector.shape_cast %53 : vector<1x544x512xbf16> to vector<544x512xbf16>
    %55 = arith.truncf %52 : vector<16x544xf32> to vector<16x544xbf16>
    %cst_55 = arith.constant dense<0.000000e+00> : vector<16x512xf32>
    %56 = tpu.matmul %55, %54, %cst_55 {dimension_numbers = #tpu.dot_dimension_numbers<[1], [0], [0], [1], [0, 0, 1, 1], [], []>} : vector<16x544xbf16>, vector<544x512xbf16>, vector<16x512xf32> -> vector<16x512xf32>
    %57 = arith.addf %51, %56 : vector<16x512xf32>
    %c0_56 = arith.constant 0 : index
    %c0_57 = arith.constant 0 : index
    %58 = vector.load %arg7[%c0_56, %c0_57] : memref<1x512xf32, #tpu.memory_space<vmem>>, vector<1x512xf32>
    %59 = vector.broadcast %58 : vector<1x512xf32> to vector<16x512xf32>
    %60 = arith.addf %57, %59 : vector<16x512xf32>
    %cst_58 = arith.constant 0.000000e+00 : f32
    %61 = vector.broadcast %cst_58 : f32 to vector<16x512xf32>
    %62 = arith.maximumf %60, %61 : vector<16x512xf32>
    %c0_59 = arith.constant 0 : index
    %c0_60 = arith.constant 0 : index
    %63 = vector.load %arg15[%c0_59, %c0_60] : memref<16x512xf32, #tpu.memory_space<vmem>>, vector<16x512xf32>
    tpu.vector_store %arg15[%c0_59, %c0_60], %62 {strides = array<i32>} : memref<16x512xf32, #tpu.memory_space<vmem>>, vector<16x512xf32>,
    %c0_61 = arith.constant 0 : index
    %c0_62 = arith.constant 0 : index
    %64 = vector.load %arg15[%c0_61, %c0_62] : memref<16x512xf32, #tpu.memory_space<vmem>>, vector<1x512xf32>
    %c0_63 = arith.constant 0 : index
    %c0_64 = arith.constant 0 : index
    %c0_65 = arith.constant 0 : index
    %65 = vector.load %arg8[%c0_63, %c0_64, %c0_65] : memref<16x512x128xbf16, #tpu.memory_space<vmem>>, vector<1x512x128xbf16>
    %66 = vector.shape_cast %65 : vector<1x512x128xbf16> to vector<512x128xbf16>
    %67 = arith.truncf %64 : vector<1x512xf32> to vector<1x512xbf16>
    %cst_66 = arith.constant dense<0.000000e+00> : vector<1x128xf32>
    %68 = tpu.matmul %67, %66, %cst_66 {dimension_numbers = #tpu.dot_dimension_numbers<[1], [0], [0], [1], [0, 0, 1, 1], [], []>} : vector<1x512xbf16>, vector<512x128xbf16>, vector<1x128xf32> -> vector<1x128xf32>
    %c1_67 = arith.constant 1 : index
    %c0_68 = arith.constant 0 : index
    %69 = vector.load %arg15[%c1_67, %c0_68] : memref<16x512xf32, #tpu.memory_space<vmem>>, vector<1x512xf32>
    %c1_69 = arith.constant 1 : index
    %c0_70 = arith.constant 0 : index
    %c0_71 = arith.constant 0 : index
    %70 = vector.load %arg8[%c1_69, %c0_70, %c0_71] : memref<16x512x128xbf16, #tpu.memory_space<vmem>>, vector<1x512x128xbf16>
    %71 = vector.shape_cast %70 : vector<1x512x128xbf16> to vector<512x128xbf16>
    %72 = arith.truncf %69 : vector<1x512xf32> to vector<1x512xbf16>
    %cst_72 = arith.constant dense<0.000000e+00> : vector<1x128xf32>
    %73 = tpu.matmul %72, %71, %cst_72 {dimension_numbers = #tpu.dot_dimension_numbers<[1], [0], [0], [1], [0, 0, 1, 1], [], []>} : vector<1x512xbf16>, vector<512x128xbf16>, vector<1x128xf32> -> vector<1x128xf32>
    %74 = arith.addf %68, %73 : vector<1x128xf32>
    %c2_73 = arith.constant 2 : index
    %c0_74 = arith.constant 0 : index
    %75 = vector.load %arg15[%c2_73, %c0_74] : memref<16x512xf32, #tpu.memory_space<vmem>>, vector<1x512xf32>
    %c2_75 = arith.constant 2 : index
    %c0_76 = arith.constant 0 : index
    %c0_77 = arith.constant 0 : index
    %76 = vector.load %arg8[%c2_75, %c0_76, %c0_77] : memref<16x512x128xbf16, #tpu.memory_space<vmem>>, vector<1x512x128xbf16>
    %77 = vector.shape_cast %76 : vector<1x512x128xbf16> to vector<512x128xbf16>
    %78 = arith.truncf %75 : vector<1x512xf32> to vector<1x512xbf16>
    %cst_78 = arith.constant dense<0.000000e+00> : vector<1x128xf32>
    %79 = tpu.matmul %78, %77, %cst_78 {dimension_numbers = #tpu.dot_dimension_numbers<[1], [0], [0], [1], [0, 0, 1, 1], [], []>} : vector<1x512xbf16>, vector<512x128xbf16>, vector<1x128xf32> -> vector<1x128xf32>
    %80 = arith.addf %74, %79 : vector<1x128xf32>
    %c3 = arith.constant 3 : index
    %c0_79 = arith.constant 0 : index
    %81 = vector.load %arg15[%c3, %c0_79] : memref<16x512xf32, #tpu.memory_space<vmem>>, vector<1x512xf32>
    %c3_80 = arith.constant 3 : index
    %c0_81 = arith.constant 0 : index
    %c0_82 = arith.constant 0 : index
    %82 = vector.load %arg8[%c3_80, %c0_81, %c0_82] : memref<16x512x128xbf16, #tpu.memory_space<vmem>>, vector<1x512x128xbf16>
    %83 = vector.shape_cast %82 : vector<1x512x128xbf16> to vector<512x128xbf16>
    %84 = arith.truncf %81 : vector<1x512xf32> to vector<1x512xbf16>
    %cst_83 = arith.constant dense<0.000000e+00> : vector<1x128xf32>
    %85 = tpu.matmul %84, %83, %cst_83 {dimension_numbers = #tpu.dot_dimension_numbers<[1], [0], [0], [1], [0, 0, 1, 1], [], []>} : vector<1x512xbf16>, vector<512x128xbf16>, vector<1x128xf32> -> vector<1x128xf32>
    %86 = arith.addf %80, %85 : vector<1x128xf32>
    %c4 = arith.constant 4 : index
    %c0_84 = arith.constant 0 : index
    %87 = vector.load %arg15[%c4, %c0_84] : memref<16x512xf32, #tpu.memory_space<vmem>>, vector<1x512xf32>
    %c4_85 = arith.constant 4 : index
    %c0_86 = arith.constant 0 : index
    %c0_87 = arith.constant 0 : index
    %88 = vector.load %arg8[%c4_85, %c0_86, %c0_87] : memref<16x512x128xbf16, #tpu.memory_space<vmem>>, vector<1x512x128xbf16>
    %89 = vector.shape_cast %88 : vector<1x512x128xbf16> to vector<512x128xbf16>
    %90 = arith.truncf %87 : vector<1x512xf32> to vector<1x512xbf16>
    %cst_88 = arith.constant dense<0.000000e+00> : vector<1x128xf32>
    %91 = tpu.matmul %90, %89, %cst_88 {dimension_numbers = #tpu.dot_dimension_numbers<[1], [0], [0], [1], [0, 0, 1, 1], [], []>} : vector<1x512xbf16>, vector<512x128xbf16>, vector<1x128xf32> -> vector<1x128xf32>
    %92 = arith.addf %86, %91 : vector<1x128xf32>
    %c5 = arith.constant 5 : index
    %c0_89 = arith.constant 0 : index
    %93 = vector.load %arg15[%c5, %c0_89] : memref<16x512xf32, #tpu.memory_space<vmem>>, vector<1x512xf32>
    %c5_90 = arith.constant 5 : index
    %c0_91 = arith.constant 0 : index
    %c0_92 = arith.constant 0 : index
    %94 = vector.load %arg8[%c5_90, %c0_91, %c0_92] : memref<16x512x128xbf16, #tpu.memory_space<vmem>>, vector<1x512x128xbf16>
    %95 = vector.shape_cast %94 : vector<1x512x128xbf16> to vector<512x128xbf16>
    %96 = arith.truncf %93 : vector<1x512xf32> to vector<1x512xbf16>
    %cst_93 = arith.constant dense<0.000000e+00> : vector<1x128xf32>
    %97 = tpu.matmul %96, %95, %cst_93 {dimension_numbers = #tpu.dot_dimension_numbers<[1], [0], [0], [1], [0, 0, 1, 1], [], []>} : vector<1x512xbf16>, vector<512x128xbf16>, vector<1x128xf32> -> vector<1x128xf32>
    %98 = arith.addf %92, %97 : vector<1x128xf32>
    %c6 = arith.constant 6 : index
    %c0_94 = arith.constant 0 : index
    %99 = vector.load %arg15[%c6, %c0_94] : memref<16x512xf32, #tpu.memory_space<vmem>>, vector<1x512xf32>
    %c6_95 = arith.constant 6 : index
    %c0_96 = arith.constant 0 : index
    %c0_97 = arith.constant 0 : index
    %100 = vector.load %arg8[%c6_95, %c0_96, %c0_97] : memref<16x512x128xbf16, #tpu.memory_space<vmem>>, vector<1x512x128xbf16>
    %101 = vector.shape_cast %100 : vector<1x512x128xbf16> to vector<512x128xbf16>
    %102 = arith.truncf %99 : vector<1x512xf32> to vector<1x512xbf16>
    %cst_98 = arith.constant dense<0.000000e+00> : vector<1x128xf32>
    %103 = tpu.matmul %102, %101, %cst_98 {dimension_numbers = #tpu.dot_dimension_numbers<[1], [0], [0], [1], [0, 0, 1, 1], [], []>} : vector<1x512xbf16>, vector<512x128xbf16>, vector<1x128xf32> -> vector<1x128xf32>
    %104 = arith.addf %98, %103 : vector<1x128xf32>
    %c7 = arith.constant 7 : index
    %c0_99 = arith.constant 0 : index
    %105 = vector.load %arg15[%c7, %c0_99] : memref<16x512xf32, #tpu.memory_space<vmem>>, vector<1x512xf32>
    %c7_100 = arith.constant 7 : index
    %c0_101 = arith.constant 0 : index
    %c0_102 = arith.constant 0 : index
    %106 = vector.load %arg8[%c7_100, %c0_101, %c0_102] : memref<16x512x128xbf16, #tpu.memory_space<vmem>>, vector<1x512x128xbf16>
    %107 = vector.shape_cast %106 : vector<1x512x128xbf16> to vector<512x128xbf16>
    %108 = arith.truncf %105 : vector<1x512xf32> to vector<1x512xbf16>
    %cst_103 = arith.constant dense<0.000000e+00> : vector<1x128xf32>
    %109 = tpu.matmul %108, %107, %cst_103 {dimension_numbers = #tpu.dot_dimension_numbers<[1], [0], [0], [1], [0, 0, 1, 1], [], []>} : vector<1x512xbf16>, vector<512x128xbf16>, vector<1x128xf32> -> vector<1x128xf32>
    %110 = arith.addf %104, %109 : vector<1x128xf32>
    %c8 = arith.constant 8 : index
    %c0_104 = arith.constant 0 : index
    %111 = vector.load %arg15[%c8, %c0_104] : memref<16x512xf32, #tpu.memory_space<vmem>>, vector<1x512xf32>
    %c8_105 = arith.constant 8 : index
    %c0_106 = arith.constant 0 : index
    %c0_107 = arith.constant 0 : index
    %112 = vector.load %arg8[%c8_105, %c0_106, %c0_107] : memref<16x512x128xbf16, #tpu.memory_space<vmem>>, vector<1x512x128xbf16>
    %113 = vector.shape_cast %112 : vector<1x512x128xbf16> to vector<512x128xbf16>
    %114 = arith.truncf %111 : vector<1x512xf32> to vector<1x512xbf16>
    %cst_108 = arith.constant dense<0.000000e+00> : vector<1x128xf32>
    %115 = tpu.matmul %114, %113, %cst_108 {dimension_numbers = #tpu.dot_dimension_numbers<[1], [0], [0], [1], [0, 0, 1, 1], [], []>} : vector<1x512xbf16>, vector<512x128xbf16>, vector<1x128xf32> -> vector<1x128xf32>
    %116 = arith.addf %110, %115 : vector<1x128xf32>
    %c9 = arith.constant 9 : index
    %c0_109 = arith.constant 0 : index
    %117 = vector.load %arg15[%c9, %c0_109] : memref<16x512xf32, #tpu.memory_space<vmem>>, vector<1x512xf32>
    %c9_110 = arith.constant 9 : index
    %c0_111 = arith.constant 0 : index
    %c0_112 = arith.constant 0 : index
    %118 = vector.load %arg8[%c9_110, %c0_111, %c0_112] : memref<16x512x128xbf16, #tpu.memory_space<vmem>>, vector<1x512x128xbf16>
    %119 = vector.shape_cast %118 : vector<1x512x128xbf16> to vector<512x128xbf16>
    %120 = arith.truncf %117 : vector<1x512xf32> to vector<1x512xbf16>
    %cst_113 = arith.constant dense<0.000000e+00> : vector<1x128xf32>
    %121 = tpu.matmul %120, %119, %cst_113 {dimension_numbers = #tpu.dot_dimension_numbers<[1], [0], [0], [1], [0, 0, 1, 1], [], []>} : vector<1x512xbf16>, vector<512x128xbf16>, vector<1x128xf32> -> vector<1x128xf32>
    %122 = arith.addf %116, %121 : vector<1x128xf32>
    %c10 = arith.constant 10 : index
    %c0_114 = arith.constant 0 : index
    %123 = vector.load %arg15[%c10, %c0_114] : memref<16x512xf32, #tpu.memory_space<vmem>>, vector<1x512xf32>
    %c10_115 = arith.constant 10 : index
    %c0_116 = arith.constant 0 : index
    %c0_117 = arith.constant 0 : index
    %124 = vector.load %arg8[%c10_115, %c0_116, %c0_117] : memref<16x512x128xbf16, #tpu.memory_space<vmem>>, vector<1x512x128xbf16>
    %125 = vector.shape_cast %124 : vector<1x512x128xbf16> to vector<512x128xbf16>
    %126 = arith.truncf %123 : vector<1x512xf32> to vector<1x512xbf16>
    %cst_118 = arith.constant dense<0.000000e+00> : vector<1x128xf32>
    %127 = tpu.matmul %126, %125, %cst_118 {dimension_numbers = #tpu.dot_dimension_numbers<[1], [0], [0], [1], [0, 0, 1, 1], [], []>} : vector<1x512xbf16>, vector<512x128xbf16>, vector<1x128xf32> -> vector<1x128xf32>
    %128 = arith.addf %122, %127 : vector<1x128xf32>
    %c11 = arith.constant 11 : index
    %c0_119 = arith.constant 0 : index
    %129 = vector.load %arg15[%c11, %c0_119] : memref<16x512xf32, #tpu.memory_space<vmem>>, vector<1x512xf32>
    %c11_120 = arith.constant 11 : index
    %c0_121 = arith.constant 0 : index
    %c0_122 = arith.constant 0 : index
    %130 = vector.load %arg8[%c11_120, %c0_121, %c0_122] : memref<16x512x128xbf16, #tpu.memory_space<vmem>>, vector<1x512x128xbf16>
    %131 = vector.shape_cast %130 : vector<1x512x128xbf16> to vector<512x128xbf16>
    %132 = arith.truncf %129 : vector<1x512xf32> to vector<1x512xbf16>
    %cst_123 = arith.constant dense<0.000000e+00> : vector<1x128xf32>
    %133 = tpu.matmul %132, %131, %cst_123 {dimension_numbers = #tpu.dot_dimension_numbers<[1], [0], [0], [1], [0, 0, 1, 1], [], []>} : vector<1x512xbf16>, vector<512x128xbf16>, vector<1x128xf32> -> vector<1x128xf32>
    %134 = arith.addf %128, %133 : vector<1x128xf32>
    %c12 = arith.constant 12 : index
    %c0_124 = arith.constant 0 : index
    %135 = vector.load %arg15[%c12, %c0_124] : memref<16x512xf32, #tpu.memory_space<vmem>>, vector<1x512xf32>
    %c12_125 = arith.constant 12 : index
    %c0_126 = arith.constant 0 : index
    %c0_127 = arith.constant 0 : index
    %136 = vector.load %arg8[%c12_125, %c0_126, %c0_127] : memref<16x512x128xbf16, #tpu.memory_space<vmem>>, vector<1x512x128xbf16>
    %137 = vector.shape_cast %136 : vector<1x512x128xbf16> to vector<512x128xbf16>
    %138 = arith.truncf %135 : vector<1x512xf32> to vector<1x512xbf16>
    %cst_128 = arith.constant dense<0.000000e+00> : vector<1x128xf32>
    %139 = tpu.matmul %138, %137, %cst_128 {dimension_numbers = #tpu.dot_dimension_numbers<[1], [0], [0], [1], [0, 0, 1, 1], [], []>} : vector<1x512xbf16>, vector<512x128xbf16>, vector<1x128xf32> -> vector<1x128xf32>
    %140 = arith.addf %134, %139 : vector<1x128xf32>
    %c13 = arith.constant 13 : index
    %c0_129 = arith.constant 0 : index
    %141 = vector.load %arg15[%c13, %c0_129] : memref<16x512xf32, #tpu.memory_space<vmem>>, vector<1x512xf32>
    %c13_130 = arith.constant 13 : index
    %c0_131 = arith.constant 0 : index
    %c0_132 = arith.constant 0 : index
    %142 = vector.load %arg8[%c13_130, %c0_131, %c0_132] : memref<16x512x128xbf16, #tpu.memory_space<vmem>>, vector<1x512x128xbf16>
    %143 = vector.shape_cast %142 : vector<1x512x128xbf16> to vector<512x128xbf16>
    %144 = arith.truncf %141 : vector<1x512xf32> to vector<1x512xbf16>
    %cst_133 = arith.constant dense<0.000000e+00> : vector<1x128xf32>
    %145 = tpu.matmul %144, %143, %cst_133 {dimension_numbers = #tpu.dot_dimension_numbers<[1], [0], [0], [1], [0, 0, 1, 1], [], []>} : vector<1x512xbf16>, vector<512x128xbf16>, vector<1x128xf32> -> vector<1x128xf32>
    %146 = arith.addf %140, %145 : vector<1x128xf32>
    %c14 = arith.constant 14 : index
    %c0_134 = arith.constant 0 : index
    %147 = vector.load %arg15[%c14, %c0_134] : memref<16x512xf32, #tpu.memory_space<vmem>>, vector<1x512xf32>
    %c14_135 = arith.constant 14 : index
    %c0_136 = arith.constant 0 : index
    %c0_137 = arith.constant 0 : index
    %148 = vector.load %arg8[%c14_135, %c0_136, %c0_137] : memref<16x512x128xbf16, #tpu.memory_space<vmem>>, vector<1x512x128xbf16>
    %149 = vector.shape_cast %148 : vector<1x512x128xbf16> to vector<512x128xbf16>
    %150 = arith.truncf %147 : vector<1x512xf32> to vector<1x512xbf16>
    %cst_138 = arith.constant dense<0.000000e+00> : vector<1x128xf32>
    %151 = tpu.matmul %150, %149, %cst_138 {dimension_numbers = #tpu.dot_dimension_numbers<[1], [0], [0], [1], [0, 0, 1, 1], [], []>} : vector<1x512xbf16>, vector<512x128xbf16>, vector<1x128xf32> -> vector<1x128xf32>
    %152 = arith.addf %146, %151 : vector<1x128xf32>
    %c15 = arith.constant 15 : index
    %c0_139 = arith.constant 0 : index
    %153 = vector.load %arg15[%c15, %c0_139] : memref<16x512xf32, #tpu.memory_space<vmem>>, vector<1x512xf32>
    %c15_140 = arith.constant 15 : index
    %c0_141 = arith.constant 0 : index
    %c0_142 = arith.constant 0 : index
    %154 = vector.load %arg8[%c15_140, %c0_141, %c0_142] : memref<16x512x128xbf16, #tpu.memory_space<vmem>>, vector<1x512x128xbf16>
    %155 = vector.shape_cast %154 : vector<1x512x128xbf16> to vector<512x128xbf16>
    %156 = arith.truncf %153 : vector<1x512xf32> to vector<1x512xbf16>
    %cst_143 = arith.constant dense<0.000000e+00> : vector<1x128xf32>
    %157 = tpu.matmul %156, %155, %cst_143 {dimension_numbers = #tpu.dot_dimension_numbers<[1], [0], [0], [1], [0, 0, 1, 1], [], []>} : vector<1x512xbf16>, vector<512x128xbf16>, vector<1x128xf32> -> vector<1x128xf32>
    %158 = arith.addf %152, %157 : vector<1x128xf32>
    %c0_144 = arith.constant 0 : index
    %c0_145 = arith.constant 0 : index
    %159 = vector.load %arg9[%c0_144, %c0_145] : memref<1x128xf32, #tpu.memory_space<vmem>>, vector<1x128xf32>
    %160 = arith.addf %158, %159 : vector<1x128xf32>
    %cst_146 = arith.constant 0.000000e+00 : f32
    %161 = vector.broadcast %cst_146 : f32 to vector<1x128xf32>
    %162 = arith.maximumf %160, %161 : vector<1x128xf32>
    %c0_147 = arith.constant 0 : index
    %c0_148 = arith.constant 0 : index
    %163 = vector.load %arg10[%c0_147, %c0_148] : memref<128x128xbf16, #tpu.memory_space<vmem>>, vector<128x128xbf16>
    %164 = arith.truncf %162 : vector<1x128xf32> to vector<1x128xbf16>
    %cst_149 = arith.constant dense<0.000000e+00> : vector<1x128xf32>
    %165 = tpu.matmul %164, %163, %cst_149 {dimension_numbers = #tpu.dot_dimension_numbers<[1], [0], [0], [1], [0, 0, 1, 1], [], []>} : vector<1x128xbf16>, vector<128x128xbf16>, vector<1x128xf32> -> vector<1x128xf32>
    %c0_150 = arith.constant 0 : index
    %c0_151 = arith.constant 0 : index
    %166 = vector.load %arg11[%c0_150, %c0_151] : memref<1x128xf32, #tpu.memory_space<vmem>>, vector<1x128xf32>
    %167 = arith.addf %165, %166 : vector<1x128xf32>
    %c0_152 = arith.constant 0 : index
    %c0_153 = arith.constant 0 : index
    %c0_154 = arith.constant 0 : index
    %168 = vector.load %arg12[%c0_152, %c0_153, %c0_154] : memref<1x1x128xf32, #tpu.memory_space<vmem>>, vector<1x1x128xf32>
    %169 = vector.shape_cast %168 : vector<1x1x128xf32> to vector<1x128xf32>
    %170 = vector.shape_cast %167 : vector<1x128xf32> to vector<1x1x128xf32>
    tpu.vector_store %arg12[%c0_152, %c0_153, %c0_154], %170 {strides = array<i32>} : memref<1x1x128xf32, #tpu.memory_space<vmem>>, vector<1x1x128xf32>,
    return
  }
  func.func @transform_0(%arg0: i32) -> (i32, i32, i32) {
    %c0_i32 = arith.constant 0 : i32
    %c0_i32_0 = arith.constant 0 : i32
    %c0_i32_1 = arith.constant 0 : i32
    return %arg0, %c0_i32, %c0_i32_0 : i32, i32, i32
  }
  func.func @transform_1(%arg0: i32) -> (i32, i32, i32) {
    %c0_i32 = arith.constant 0 : i32
    %c0_i32_0 = arith.constant 0 : i32
    %c0_i32_1 = arith.constant 0 : i32
    %c0_i32_2 = arith.constant 0 : i32
    return %c0_i32, %c0_i32_0, %c0_i32_1 : i32, i32, i32
  }
  func.func @transform_2(%arg0: i32) -> (i32, i32) {
    %c0_i32 = arith.constant 0 : i32
    %c0_i32_0 = arith.constant 0 : i32
    %c0_i32_1 = arith.constant 0 : i32
    return %c0_i32, %c0_i32_0 : i32, i32
  }
  func.func @transform_3(%arg0: i32) -> (i32, i32, i32) {
    %c0_i32 = arith.constant 0 : i32
    %c0_i32_0 = arith.constant 0 : i32
    %c0_i32_1 = arith.constant 0 : i32
    %c0_i32_2 = arith.constant 0 : i32
    return %c0_i32, %c0_i32_0, %c0_i32_1 : i32, i32, i32
  }
  func.func @transform_4(%arg0: i32) -> (i32, i32) {
    %c0_i32 = arith.constant 0 : i32
    %c0_i32_0 = arith.constant 0 : i32
    %c0_i32_1 = arith.constant 0 : i32
    return %c0_i32, %c0_i32_0 : i32, i32
  }
  func.func @transform_5(%arg0: i32) -> (i32, i32, i32) {
    %c0_i32 = arith.constant 0 : i32
    %c0_i32_0 = arith.constant 0 : i32
    %c0_i32_1 = arith.constant 0 : i32
    %c0_i32_2 = arith.constant 0 : i32
    return %c0_i32, %c0_i32_0, %c0_i32_1 : i32, i32, i32
  }
  func.func @transform_6(%arg0: i32) -> (i32, i32) {
    %c0_i32 = arith.constant 0 : i32
    %c0_i32_0 = arith.constant 0 : i32
    %c0_i32_1 = arith.constant 0 : i32
    return %c0_i32, %c0_i32_0 : i32, i32
  }
  func.func @transform_7(%arg0: i32) -> (i32, i32, i32) {
    %c0_i32 = arith.constant 0 : i32
    %c0_i32_0 = arith.constant 0 : i32
    %c0_i32_1 = arith.constant 0 : i32
    %c0_i32_2 = arith.constant 0 : i32
    return %c0_i32, %c0_i32_0, %c0_i32_1 : i32, i32, i32
  }
  func.func @transform_8(%arg0: i32) -> (i32, i32) {
    %c0_i32 = arith.constant 0 : i32
    %c0_i32_0 = arith.constant 0 : i32
    %c0_i32_1 = arith.constant 0 : i32
    return %c0_i32, %c0_i32_0 : i32, i32
  }
  func.func @transform_9(%arg0: i32) -> (i32, i32) {
    %c0_i32 = arith.constant 0 : i32
    %c0_i32_0 = arith.constant 0 : i32
    %c0_i32_1 = arith.constant 0 : i32
    return %c0_i32, %c0_i32_0 : i32, i32
  }
  func.func @transform_10(%arg0: i32) -> (i32, i32) {
    %c0_i32 = arith.constant 0 : i32
    %c0_i32_0 = arith.constant 0 : i32
    %c0_i32_1 = arith.constant 0 : i32
    return %c0_i32, %c0_i32_0 : i32, i32
  }
  func.func @transform_11(%arg0: i32) -> (i32, i32, i32) {
    %c0_i32 = arith.constant 0 : i32
    %c0_i32_0 = arith.constant 0 : i32
    %c0_i32_1 = arith.constant 0 : i32
    return %arg0, %c0_i32, %c0_i32_0 : i32, i32, i32
  }
}

</mosaic_0001>

<bundles_post_ra>
// kernel: _lambda_.1
= control target key start
LH: loop header
LB: loop body
LE: loop exit
PB: predicated region body
PF: predicated region fallthrough
CT: control target
= control target key end

     0   :  { %s21014_s0 = inlined_call_operand.vmem [shape: f32[2,18,64], index: 0, kind: input, shape index: {}]   ;;  %s21015_s1 = inlined_call_operand.vmem [shape: bf16[3,64,384], index: 1, kind: input, shape index: {}]   ;;  %s21016_s2 = inlined_call_operand.hbm [shape: f32[1,384], index: 2, kind: input, shape index: {}]   ;;  %s21017_s3 = inlined_call_operand.vmem [shape: bf16[2,384,544], index: 3, kind: input, shape index: {}]   ;;  %s21018_s4 = inlined_call_operand.hbm [shape: f32[1,544], index: 4, kind: input, shape index: {}]   ;;  %s21019_s5 = inlined_call_operand.vmem [shape: bf16[2,544,512], index: 5, kind: input, shape index: {}]   ;;  %s21020_s6 = inlined_call_operand.hbm [shape: f32[1,512], index: 6, kind: input, shape index: {}]   ;;  %s21021_s7 = inlined_call_operand.hbm [shape: bf16[16,512,128], index: 7, kind: input, shape index: {}]   ;;  %s21022_s8 = inlined_call_operand.hbm [shape: f32[1,128], index: 8, kind: input, shape index: {}]   ;;  %s21023_s9 = inlined_call_operand.vmem [shape: bf16[128,128], index: 9, kind: input, shape index: {}]   ;;  %s21024_s10 = inlined_call_operand.hbm [shape: f32[1,128], index: 10, kind: input, shape index: {}]   ;;  %s21025_s11 = inlined_call_operand.hbm [shape: f32[2,1,128], index: 11, kind: output, shape index: {}]  }
   0x1   :  { %21030 = sst [smem:[#allocation26_spill]] %s21018_s4 }
   0x2   :  { %21031 = sst [smem:[#allocation27_spill]] %s21021_s7 }
   0x3   :  { %16 = vsyncpa [#allocation6], 0 }
   0x4   :  { %17 = vsyncpa [#allocation9], 0 }
   0x5   :  { %18 = vsyncpa [#allocation12], 0 }
   0x6   :  { %19 = vsyncpa [#allocation15], 0 }
   0x7   :  { %20 = vsyncpa [#allocation7], 0 }
   0x8   :  { %22 = vsyncpa [#allocation7 + $0x1], 0  ;;  %s17009_s17 = smov 0   ;;  %s17011_s18 = smov 0  }
   0x9   :  { %s17013_s19 = smov 0   ;;  %s17015_s20 = smov 0  }
   0xa LB: > { %21032 = sst [smem:[#allocation22_spill]] %s16934_s19  ;;  %s17030_s21 = sadd.s32 4294967295, %s16938_s20   ;;  %s16938_s20 = sphi %s17015_s20, %s21043_s20   ;;  %s16934_s19 = sphi %s17013_s19, %s21045_s19   ;;  %s16930_s18 = sphi %s17011_s18, %s21047_s18   ;;  %s16926_s17 = sphi %s17009_s17, %s21046_s17  }
   0xb   : > { %s10882_s22 = sadd.s32 4294967294, %s16938_s20   ;;  %s17034_s23 = sadd.s32 1, %s16938_s20  }
   0xc   : > { %21033 = sst [smem:[#allocation23_spill]] %s17034_s23  ;;  %s271_s24 = sadd.s32 1, %s16934_s19 }
   0xd   : > { %s268_s25 = ssub.s32 %s16938_s20, %s17034_s23  ;;  %p281_p0 = scmp.ne.s32.totalorder %s16934_s19, %s16930_s18 }
   0xe   : > { %p269_p1 = scmp.eq.s32.totalorder %s268_s25, 0  ;;  %p282_p2 = scmp.eq.s32.totalorder %s17030_s21, 1 }
   0xf   : > { %p287_p3 = scmp.ne.s32.totalorder %s16930_s18, %s16926_s17  ;;  %p288_p4 = scmp.eq.s32.totalorder %s10882_s22, 1 }
  0x10   : > { %s17045_s26 = scalar_select %p269_p1, %s16934_s19, %s271_s24  }
  0x11   : > { %p17047_p5 = por %p282_p2, %p281_p0  ;;  %p17051_p6 = por %p288_p4, %p287_p3 }
  0x12   : > { %21034 = sst [smem:[#allocation24_spill]] %s17045_s26  ;;  %p10883_p7 = scmp.ge.s32.totalorder %s16938_s20, 1 }
  0x13   : > { %s21036_s28 = scalar_select %p17051_p6, 1, 0 }
  0x14   : > { %p295_p8 = scmp.lt.s32.totalorder %s16938_s20, 3  ;;  %p16620_p9 = scmp.eq.s32.totalorder %s17030_s21, 0 }
  0x15   : > { %21037 = sst [smem:[#allocation25_spill]] %s21036_s28  ;;  %s16940_s14 = smov [#allocation8]  }
  0x16   : > { %p17058_p10 = pnand %p10883_p7, %p295_p8  ;;  %s21039_s4 = sld [smem:[#allocation26_spill]] }
  0x17   : > { %s327_s15 = sshll.u32 %s16940_s14, 4  ;;  %s21040_s7 = sld [smem:[#allocation27_spill]]  ;;  %s328_s15 = int_to_ptr.vmem [resolvable:$true] %s327_s15 }
  0x18   : > { %p16597_p11 = pneg %p17058_p10  ;;  %s16941_s30 = smov [#allocation11]  }
  0x19   : > { %s353_s12 = sshll.u32 %s16941_s30, 4  ;;  %s16942_s14 = smov 64   ;;  %s354_s12 = int_to_ptr.vmem [resolvable:$true] %s353_s12 }
  0x1a   : > { %p17072_p12 = pnand %p16620_p9, %p16597_p11  ;;  %s16944_s26 = smov [#allocation5]  }
  0x1b   : > { %s312_s19 = sshll.u32 %s16944_s26, 4  ;;  %s340_s30 = sshll.u32 %s21020_s6, 4  ;;  %s313_s19 = int_to_ptr.vmem [resolvable:$true] %s312_s19  ;;  %s341_s30 = int_to_ptr.hbm [resolvable:$true] %s340_s30 }
  0x1c   : > { %s325_s13 = sshll.u32 %s21039_s4, 4  ;;  %s16943_s4 = smov 4   ;;  %s326_s13 = int_to_ptr.hbm [resolvable:$true] %s325_s13 }
  0x1d   : > { %s351_s24 = sshll.u32 %s21040_s7, 4  ;;  %s310_s7 = sshll.u32 %s21016_s2, 4  ;;  %s352_s24 = int_to_ptr.hbm [resolvable:$true] %s351_s24  ;;  %s311_s7 = int_to_ptr.hbm [resolvable:$true] %s310_s7 }
  0x1e   : > { %16603 = dma.hbm_to_vmem [thread:$0]  (!%p17072_p12), %s326_s13, 80, %s328_s15, [#allocation9]  }
  0x1f   : > { %16609 = dma.hbm_to_vmem [thread:$0]  (!%p17072_p12), %s352_s24, 65536, %s354_s12, [#allocation12], %s16942_s14, %s16942_s14, %s16943_s4  }
  0x20   : > { %16600 = dma.hbm_to_vmem [thread:$0]  (!%p17072_p12), %s311_s7, 48, %s313_s19, [#allocation6]  }
  0x21   : > { %s16945_s13 = smov [#allocation10]   ;;  %s366_s12 = sshll.u32 %s21022_s8, 4  ;;  %s367_s12 = int_to_ptr.hbm [resolvable:$true] %s366_s12 }
  0x22   : > { %s342_s15 = sshll.u32 %s16945_s13, 4  ;;  %s381_s16 = sshll.u32 %s21024_s10, 4  ;;  %s343_s15 = int_to_ptr.vmem [resolvable:$true] %s342_s15  ;;  %s382_s16 = int_to_ptr.hbm [resolvable:$true] %s381_s16 }
  0x23   : > { %16606 = dma.hbm_to_vmem [thread:$0]  (!%p17072_p12), %s341_s30, 64, %s343_s15, [#allocation9]  }
  0x24   : > { %s16946_s23 = smov [#allocation13]   ;;  %s16947_s7 = smov [#allocation14]  }
  0x25   : > { %s368_s28 = sshll.u32 %s16946_s23, 4  ;;  %s383_s19 = sshll.u32 %s16947_s7, 4  ;;  %s369_s28 = int_to_ptr.vmem [resolvable:$true] %s368_s28  ;;  %s384_s19 = int_to_ptr.vmem [resolvable:$true] %s383_s19 }
  0x26   : > { %16612 = dma.hbm_to_vmem [thread:$0]  (!%p17072_p12), %s367_s12, 16, %s369_s28, [#allocation12]  }
  0x27   : > { %16615 = dma.hbm_to_vmem [thread:$0]  (!%p17072_p12), %s382_s16, 16, %s384_s19, [#allocation15]  }
  0x28   : > { %404 = sbr.rel (%p17058_p10) target bundleno = 1745 (0x6d1), region = 64 }
  0x2d   : > { %16905 = dma.done.wait (%p16620_p9), [#allocation6], 48  }
  0x2e   : > { %16907 = vsyncadd (%p16620_p9), [#allocation6], 4294967248 }
  0x2f   : > { %16909 = dma.done.wait (%p16620_p9), [#allocation9], 144  }
  0x30   : > { %16911 = vsyncadd (%p16620_p9), [#allocation9], 4294967152 }
  0x31   : > { %16913 = dma.done.wait (%p16620_p9), [#allocation12], 65552  }
  0x32   : > { %16915 = vsyncadd (%p16620_p9), [#allocation12], 4294901744 }
  0x33   : > { %16917 = dma.done.wait (%p16620_p9), [#allocation15], 16  }
  0x34   : > { %16919 = vsyncadd (%p16620_p9), [#allocation15], 4294967280  ;;  %p469_p13 = scmp.lt.s32.totalorder %s17030_s21, 1  ;;  %v10953_v0 = vld [vmem:[%s21015_s1 + $0xa8] sm:$0xf]  ;;  %vm578_vm0 = vcmask 523264   ;;  %s10763_s19 = scalar_lea.hbm %s21025_s11, %s17030_s21 }
  0x35   : > { %v15524_v1 = vld [vmem:[%s21015_s1 + $0xb0] sm:$0xf0]  ;;  %v15523_v2 = vld [vmem:[%s21015_s1 + $0xac] sm:$0xf]  ;;  %v10955_v4 = vld [vmem:[%s21015_s1 + $0xb4] sm:$0xf0] }
  0x36   : > { %s17120_s29 = scalar_select %p469_p13, %s17030_s21, 1  ;;  %v10954_v3 = vor.u32 %v15524_v1, %v10953_v0  ;;  %v11004_v5 = vld [vmem:[%s21015_s1 + $0x48] sm:$0xf]  ;;  %v15512_v6 = vld [vmem:[%s21015_s1 + $0x50] sm:$0xf0]  ;;  %v10958_v7 = vor.u32 %v15523_v2, %v10955_v4  ;;  %vm903_vm2 = vcmask 1040384  }
  0x37   : > { %v11005_v8 = vor.u32 %v15512_v6, %v11004_v5  ;;  %v10941_v9 = vld [vmem:[%s21015_s1 + $0x90] sm:$0xf]  ;;  %v15521_v10 = vld [vmem:[%s21015_s1 + $0x98] sm:$0xf0]  ;;  %v15520_v11 = vld [vmem:[%s21015_s1 + $0x94] sm:$0xf] }
  0x38   : > { %s16570_s25 = smul.u32 24, %s17120_s29  ;;  %586 = vmatpush.bf16.msra.mxu0 %v10954_v3  ;;  %v10942_v12 = vor.u32 %v15521_v10, %v10941_v9  ;;  %v10943_v13 = vld [vmem:[%s21015_s1 + $0x9c] sm:$0xf0]  ;;  %v10992_v14 = vld [vmem:[%s21015_s1 + $0x30] sm:$0xf]  ;;  %600 = vmatpush.bf16.msra.mxu2 %v10958_v7  ;;  %vm3130_vm4 = vcmask 261120  }
  0x39   : > { %v15509_v15 = vld [vmem:[%s21015_s1 + $0x38] sm:$0xf0]  ;;  %695 = vmatpush.bf16.msra.mxu3 %v11005_v8  ;;  %v10946_v16 = vor.u32 %v15520_v11, %v10943_v13  ;;  %v10929_v18 = vld [vmem:[%s21015_s1 + $0x78] sm:$0xf]  ;;  %v15518_v19 = vld [vmem:[%s21015_s1 + $0x80] sm:$0xf0] }
  0x3a   : > { %v10993_v17 = vor.u32 %v15509_v15, %v10992_v14  ;;  %v15517_v20 = vld [vmem:[%s21015_s1 + $0x7c] sm:$0xf]  ;;  %v10931_v21 = vld [vmem:[%s21015_s1 + $0x84] sm:$0xf0]  ;;  %v10980_v22 = vld [vmem:[%s21015_s1 + $0x18] sm:$0xf]  ;;  %s17180_s14 = scalar_lea.vmem %s21014_s0, %s16570_s25  ;;  %v10930_v24 = vor.u32 %v15518_v19, %v10929_v18 }
  0x3b   : > { %v15506_v23 = vld [vmem:[%s21015_s1 + $0x20] sm:$0xf0]  ;;  %v10917_v25 = vld [vmem:[%s21015_s1 + $0x60] sm:$0xf]  ;;  %v15515_v26 = vld [vmem:[%s21015_s1 + $0x68] sm:$0xf0]  ;;  %v10934_v27 = vor.u32 %v15517_v20, %v10931_v21 }
  0x3c   : > { %587 = vmatpush.bf16.msra.mxu0 %v10942_v12  ;;  %601 = vmatpush.bf16.msra.mxu2 %v10946_v16  ;;  %v10981_v28 = vor.u32 %v15506_v23, %v10980_v22  ;;  %v15514_v29 = vld [vmem:[%s21015_s1 + $0x64] sm:$0xf]  ;;  %v10919_v30 = vld [vmem:[%s21015_s1 + $0x6c] sm:$0xf0]  ;;  %v10968_v31 = vld [vmem:[%s21015_s1] sm:$0xf]  ;;  %v10918_v38 = vor.u32 %v15515_v26, %v10917_v25 }
  0x3d   : > { %696 = vmatpush.bf16.msra.mxu3 %v10993_v17  ;;  %v15503_v32 = vld [vmem:[%s21015_s1 + $0x8] sm:$0xf0]  ;;  %v494_v33 = vld [vmem:[%s17180_s14 + $0x1] sm:$0xff]  ;;  %v10961_v34 = vld [vmem:[%s21015_s1 + $0xb0] sm:$0xf]  ;;  %v10922_v42 = vor.u32 %v15514_v29, %v10919_v30  ;;  %vm3141_vm5 = vcmask 253952  }
  0x3e   : > { %v15525_v35 = vld [vmem:[%s21015_s1 + $0xb8] sm:$0xf0]  ;;  %v15511_v36 = vld [vmem:[%s21015_s1 + $0x4c] sm:$0xf]  ;;  %v11006_v37 = vld [vmem:[%s21015_s1 + $0x54] sm:$0xf0]  ;;  %v10969_v43 = vor.u32 %v15503_v32, %v10968_v31 }
  0x3f   : > { %v495_v39 = vld [vmem:[%s17180_s14 + $0x9] sm:$0xff]  ;;  %v11073_v41 = vld [vmem:[%s21015_s1 + $0x114] sm:$0xf0]  ;;  %v475_v44 = vld [vmem:[%s17180_s14] sm:$0xff]  ;;  %v10962_v46 = vor.u32 %v15525_v35, %v10961_v34  ;;  %v11009_v47 = vor.u32 %v15511_v36, %v11006_v37  ;;  %vm1247_vm3 = vsmask.f32 7424 }
  0x40   : > { %588 = vmatpush.bf16.msra.mxu0 %v10930_v24  ;;  %v15535_v40 = vld [vmem:[%s21015_s1 + $0x10c] sm:$0xf]  ;;  %602 = vmatpush.bf16.msra.mxu2 %v10934_v27  ;;  %v10949_v48 = vld [vmem:[%s21015_s1 + $0x98] sm:$0xf]  ;;  %v11012_v49 = vld [vmem:[%s21015_s1 + $0x50] sm:$0xf]  ;;  %v17231_v51 = vpack.c.bf16 %v495_v39, %v494_v33 }
  0x41   : > { %697 = vmatpush.bf16.msra.mxu3 %v10981_v28  ;;  %v476_v45 = vld [vmem:[%s17180_s14 + $0x8] sm:$0xff]  ;;  %v15513_v50 = vld [vmem:[%s21015_s1 + $0x58] sm:$0xf0]  ;;  %v11076_v52 = vor.u32 %v15535_v40, %v11073_v41  ;;  %v15522_v53 = vld [vmem:[%s21015_s1 + $0xa0] sm:$0xf0]  ;;  %s467_s28 = sand.u32 1, %s16930_s18  }
  0x42   : > { %v15508_v54 = vld [vmem:[%s21015_s1 + $0x34] sm:$0xf]  ;;  %v10994_v55 = vld [vmem:[%s21015_s1 + $0x3c] sm:$0xf0]  ;;  %v17242_v56 = vpack.c.bf16 %v476_v45, %v475_v44  ;;  %v11013_v59 = vor.u32 %v15513_v50, %v11012_v49  ;;  %v10950_v60 = vor.u32 %v15522_v53, %v10949_v48  ;;  %v11000_v63 = vld [vmem:[%s21015_s1 + $0x38] sm:$0xf] }
  0x43   : > { %v15532_v57 = vld [vmem:[%s21015_s1 + $0xf4] sm:$0xf]  ;;  %v11061_v58 = vld [vmem:[%s21015_s1 + $0xfc] sm:$0xf0]  ;;  %v10997_v61 = vor.u32 %v15508_v54, %v10994_v55  ;;  %v15510_v0 = vld [vmem:[%s21015_s1 + $0x40] sm:$0xf0] }
  0x44   : > { %589 = vmatpush.bf16.msra.mxu0 %v10918_v38  ;;  %603 = vmatpush.bf16.msra.mxu2 %v10922_v42  ;;  %v10937_v62 = vld [vmem:[%s21015_s1 + $0x80] sm:$0xf]  ;;  %v11064_v1 = vor.u32 %v15532_v57, %v11061_v58  ;;  %v15519_v2 = vld [vmem:[%s21015_s1 + $0x88] sm:$0xf0]  ;;  %v15505_v3 = vld [vmem:[%s21015_s1 + $0x1c] sm:$0xf]  ;;  %v11001_v7 = vor.u32 %v15510_v0, %v11000_v63 }
  0x45   : > { %698 = vmatpush.bf16.msra.mxu3 %v10969_v43  ;;  %v10982_v4 = vld [vmem:[%s21015_s1 + $0x24] sm:$0xf0]  ;;  %v15529_v5 = vld [vmem:[%s21015_s1 + $0xdc] sm:$0xf]  ;;  %723 = vmatpush.bf16.msra.mxu1 %v11013_v59  ;;  %v10938_v9 = vor.u32 %v15519_v2, %v10937_v62  ;;  %v15516_v11 = vld [vmem:[%s21015_s1 + $0x70] sm:$0xf0] }
  0x46   : > { %v11049_v6 = vld [vmem:[%s21015_s1 + $0xe4] sm:$0xf0]  ;;  %v10985_v10 = vor.u32 %v15505_v3, %v10982_v4  ;;  %v10988_v12 = vld [vmem:[%s21015_s1 + $0x20] sm:$0xf]  ;;  %v15507_v13 = vld [vmem:[%s21015_s1 + $0x28] sm:$0xf0] }
  0x47   : > { %10963 = vmatmul.msk.bf16.vlgmr.msra.gmra.mxu0 %vm578_vm0, %v17231_v51  ;;  %10964 = vmatmul.msk.bf16.vlgmr.msra.gmra.mxu2 %vm578_vm0, %v17231_v51  ;;  %v10925_v8 = vld [vmem:[%s21015_s1 + $0x68] sm:$0xf]  ;;  %v11052_v14 = vor.u32 %v15529_v5, %v11049_v6  ;;  %v15502_v15 = vld [vmem:[%s21015_s1 + $0x4] sm:$0xf]  ;;  %v10970_v16 = vld [vmem:[%s21015_s1 + $0xc] sm:$0xf0]  ;;  %v10989_v21 = vor.u32 %v15507_v13, %v10988_v12 }
  0x48   : > { %614 = vmatpush.bf16.msrb.mxu2 %v10962_v46  ;;  %709 = vmatpush.bf16.msrb.mxu0 %v11009_v47  ;;  %v15526_v17 = vld [vmem:[%s21015_s1 + $0xc4] sm:$0xf]  ;;  %v11037_v18 = vld [vmem:[%s21015_s1 + $0xcc] sm:$0xf0]  ;;  %v11071_v19 = vld [vmem:[%s21015_s1 + $0x108] sm:$0xf]  ;;  %v10926_v24 = vor.u32 %v15516_v11, %v10925_v8  ;;  %v10973_v25 = vor.u32 %v15502_v15, %v10970_v16 }
  0x49   : > { %838 = vmatpush.bf16.msrb.mxu3 %v11076_v52  ;;  %v15536_v20 = vld [vmem:[%s21015_s1 + $0x110] sm:$0xf0]  ;;  %724 = vmatpush.bf16.msra.mxu1 %v11001_v7  ;;  %v11079_v22 = vld [vmem:[%s21015_s1 + $0x110] sm:$0xf]  ;;  %v15537_v23 = vld [vmem:[%s21015_s1 + $0x118] sm:$0xf0]  ;;  %v11040_v28 = vor.u32 %v15526_v17, %v11037_v18 }
  0x4a   : > { %11014 = vmatmul.msk.bf16.vlgmr.msra.gmra.mxu3 %vm578_vm0, %v17242_v56  ;;  %v10976_v26 = vld [vmem:[%s21015_s1 + $0x8] sm:$0xf]  ;;  %v15504_v27 = vld [vmem:[%s21015_s1 + $0x10] sm:$0xf0]  ;;  %v11072_v29 = vor.u32 %v15536_v20, %v11071_v19  ;;  %v11080_v30 = vor.u32 %v15537_v23, %v11079_v22  ;;  %v11059_v31 = vld [vmem:[%s21015_s1 + $0xf0] sm:$0xf] }
  0x4b   : > { %v15533_v32 = vld [vmem:[%s21015_s1 + $0xf8] sm:$0xf0]  ;;  %v733_v33 = vld [vmem:[%s17180_s14 + $0x2] sm:$0xff]  ;;  %v734_v34 = vld [vmem:[%s17180_s14 + $0xa] sm:$0xff]  ;;  %v10977_v35 = vor.u32 %v15504_v27, %v10976_v26  ;;  %v16948_v3 = vmov 0.0   ;;  %s468_s29 = scalar_lea.vmem [#allocation16], %s467_s28 }
  0x4c   : > { %615 = vmatpush.bf16.msrb.mxu2 %v10950_v60  ;;  %710 = vmatpush.bf16.msrb.mxu0 %v10997_v61  ;;  %v11067_v36 = vld [vmem:[%s21015_s1 + $0xf8] sm:$0xf]  ;;  %v15534_v37 = vld [vmem:[%s21015_s1 + $0x100] sm:$0xf0]  ;;  %v11060_v38 = vor.u32 %v15533_v32, %v11059_v31  ;;  %v752_v39 = vpack.c.bf16 %v734_v34, %v733_v33  ;;  %v11055_v43 = vld [vmem:[%s21015_s1 + $0xe0] sm:$0xf]  ;;  %v888_v61 = vlaneseq }
  0x4d   : > { %839 = vmatpush.bf16.msrb.mxu3 %v11064_v1  ;;  %725 = vmatpush.bf16.msra.mxu1 %v10989_v21  ;;  %v11047_v40 = vld [vmem:[%s21015_s1 + $0xd8] sm:$0xf]  ;;  %v15530_v41 = vld [vmem:[%s21015_s1 + $0xe0] sm:$0xf0]  ;;  %v11068_v42 = vor.u32 %v15534_v37, %v11067_v36  ;;  %v15531_v44 = vld [vmem:[%s21015_s1 + $0xe8] sm:$0xf0] }
  0x4e   : > { %v11048_v45 = vor.u32 %v15530_v41, %v11047_v40  ;;  %v11035_v46 = vld [vmem:[%s21015_s1 + $0xc0] sm:$0xf]  ;;  %v15527_v47 = vld [vmem:[%s21015_s1 + $0xc8] sm:$0xf0]  ;;  %v11056_v48 = vor.u32 %v15531_v44, %v11055_v43  ;;  %v11043_v49 = vld [vmem:[%s21015_s1 + $0xc8] sm:$0xf] }
  0x4f   : > { %v15528_v50 = vld [vmem:[%s21015_s1 + $0xd0] sm:$0xf0]  ;;  %v11530_v53 = vld [vmem:[%s21017_s3 + $0x618] sm:$0xf]  ;;  %v15735_v54 = vld [vmem:[%s21017_s3 + $0x628] sm:$0xf0] }
  0x50   : > { %616 = vmatpush.bf16.msrb.mxu2 %v10938_v9  ;;  %711 = vmatpush.bf16.msrb.mxu0 %v10985_v10  ;;  %v11044_v52 = vor.u32 %v15528_v50, %v11043_v49  ;;  %v11531_v55 = vor.u32 %v15735_v54, %v11530_v53  ;;  %v15730_v57 = vld [vmem:[%s21017_s3 + $0x600] sm:$0xf0]  ;;  %v11490_v59 = vld [vmem:[%s21017_s3 + $0x5c8] sm:$0xf]  ;;  %v15725_v60 = vld [vmem:[%s21017_s3 + $0x5d8] sm:$0xf0] }
  0x51   : > { %840 = vmatpush.bf16.msrb.mxu3 %v11052_v14  ;;  %726 = vmatpush.bf16.msra.mxu1 %v10977_v35  ;;  %v11491_v62 = vor.u32 %v15725_v60, %v11490_v59  ;;  %v11690_v63 = vld [vmem:[%s21017_s3 + $0x758] sm:$0xf]  ;;  %v15775_v0 = vld [vmem:[%s21017_s3 + $0x768] sm:$0xf0]  ;;  %vm890_vm1 = vcmp.lt.s32.totalorder %v888_v61, 384  ;;  %s10765_s25 = sshll.u32 %s468_s29, 4  ;;  %s10766_s25 = int_to_ptr.vmem [resolvable:$true] %s10765_s25 }
  0x52   : > { %v11691_v2 = vor.u32 %v15775_v0, %v11690_v63  ;;  %895 = vst.msk [vmem:[#allocation2 + $0x31] ss:$8 sm:$0x7] %vm890_vm1, %v16948_v3  ;;  %v11470_v4 = vld [vmem:[%s21017_s3 + $0x5a0] sm:$0xf]  ;;  %s10767_s22 = sshll.u32 %s10763_s19, 4  ;;  %s10768_s22 = int_to_ptr.hbm [resolvable:$true] %s10767_s22 }
  0x53   : > { %v15720_v5 = vld [vmem:[%s21017_s3 + $0x5b0] sm:$0xf0]  ;;  %892 = vst.msk [vmem:[#allocation2] ss:$8 sm:$0x7] %vm890_vm1, %v16948_v3  ;;  %s10755_s30 = scalar_lea.sflag [#allocation7], %s467_s28 }
  0x54   : > { %617 = vmatpush.bf16.msrb.mxu2 %v10926_v24  ;;  %712 = vmatpush.bf16.msrb.mxu0 %v10973_v25  ;;  %v11471_v6 = vor.u32 %v15720_v5, %v11470_v4  ;;  %v11670_v7 = vld [vmem:[%s21017_s3 + $0x730] sm:$0xf]  ;;  %v15770_v8 = vld [vmem:[%s21017_s3 + $0x740] sm:$0xf0]  ;;  %v11370_v10 = vld [vmem:[%s21017_s3 + $0x4d8] sm:$0xf] }
  0x55   : > { %841 = vmatpush.bf16.msrb.mxu3 %v11040_v28  ;;  %11016 = vmatmul.msk.bf16.vlgmr.msra.gmra.mxu1 %vm578_vm0, %v17242_v56  ;;  %v11671_v9 = vor.u32 %v15770_v8, %v11670_v7  ;;  %v15695_v11 = vld [vmem:[%s21017_s3 + $0x4e8] sm:$0xf0]  ;;  %v11450_v12 = vld [vmem:[%s21017_s3 + $0x578] sm:$0xf]  ;;  %v15693_v15 = vld [vmem:[%s21017_s3 + $0x4dc] sm:$0xf] }
  0x56   : > { %v11371_v13 = vor.u32 %v15695_v11, %v11370_v10  ;;  %v15715_v14 = vld [vmem:[%s21017_s3 + $0x588] sm:$0xf0]  ;;  %v11372_v16 = vld [vmem:[%s21017_s3 + $0x4ec] sm:$0xf0]  ;;  %v11650_v21 = vld [vmem:[%s21017_s3 + $0x708] sm:$0xf] }
  0x57   : > { %11015 = vmatmul.msk.bf16.vlgmr.msrb.gmra.mxu0 %vm578_vm0, %v17242_v56  ;;  %10965 = vmatmul.msk.bf16.vlgmr.msrb.gmra.mxu2 %vm578_vm0, %v17231_v51  ;;  %v11036_v51 = vor.u32 %v15527_v47, %v11035_v46  ;;  %v11510_v56 = vld [vmem:[%s21017_s3 + $0x5f0] sm:$0xf]  ;;  %v11451_v19 = vor.u32 %v15715_v14, %v11450_v12  ;;  %v11375_v20 = vor.u32 %v15693_v15, %v11372_v16  ;;  %v15765_v22 = vld [vmem:[%s21017_s3 + $0x718] sm:$0xf0]  ;;  %v15690_v26 = vld [vmem:[%s21017_s3 + $0x4c0] sm:$0xf0] }
  0x58   : > { %824 = vmatpush.bf16.msra.mxu2 %v11072_v29  ;;  %852 = vmatpush.bf16.msra.mxu0 %v11080_v30  ;;  %v11511_v58 = vor.u32 %v15730_v57, %v11510_v56  ;;  %v11651_v24 = vor.u32 %v15765_v22, %v11650_v21  ;;  %v11350_v25 = vld [vmem:[%s21017_s3 + $0x4b0] sm:$0xf]  ;;  %v15710_v29 = vld [vmem:[%s21017_s3 + $0x560] sm:$0xf0]  ;;  %v15688_v30 = vld [vmem:[%s21017_s3 + $0x4b4] sm:$0xf] }
  0x59   : > { %1956 = vmatpush.bf16.msra.mxu3 %v11691_v2  ;;  %1920 = vmatpush.bf16.msrb.mxu1 %v11371_v13  ;;  %v11430_v27 = vld [vmem:[%s21017_s3 + $0x550] sm:$0xf]  ;;  %v11351_v28 = vor.u32 %v15690_v26, %v11350_v25  ;;  %v11352_v31 = vld [vmem:[%s21017_s3 + $0x4c4] sm:$0xf0]  ;;  %v11630_v34 = vld [vmem:[%s21017_s3 + $0x6e0] sm:$0xf] }
  0x5a   : > { %11082 = vmatmul.msk.bf16.vlgmr.msrb.gmra.mxu3 %vm578_vm0, %v752_v39  ;;  %v11431_v32 = vor.u32 %v15710_v29, %v11430_v27  ;;  %v11355_v33 = vor.u32 %v15688_v30, %v11352_v31  ;;  %v15760_v35 = vld [vmem:[%s21017_s3 + $0x6f0] sm:$0xf0]  ;;  %v11330_v37 = vld [vmem:[%s21017_s3 + $0x488] sm:$0xf]  ;;  %v15705_v41 = vld [vmem:[%s21017_s3 + $0x538] sm:$0xf0] }
  0x5b   : > { %v11631_v36 = vor.u32 %v15760_v35, %v11630_v34  ;;  %v11332_v43 = vld [vmem:[%s21017_s3 + $0x49c] sm:$0xf0]  ;;  %v15755_v49 = vld [vmem:[%s21017_s3 + $0x6c8] sm:$0xf0]  ;;  %v15680_v54 = vld [vmem:[%s21017_s3 + $0x470] sm:$0xf0] }
  0x5c   : > { %825 = vmatpush.bf16.msra.mxu2 %v11060_v38  ;;  %853 = vmatpush.bf16.msra.mxu0 %v11068_v42  ;;  %v15685_v38 = vld [vmem:[%s21017_s3 + $0x498] sm:$0xf0]  ;;  %v15683_v42 = vld [vmem:[%s21017_s3 + $0x48c] sm:$0xf]  ;;  %v11310_v53 = vld [vmem:[%s21017_s3 + $0x460] sm:$0xf] }
  0x5d   : > { %1957 = vmatpush.bf16.msra.mxu3 %v11671_v9  ;;  %1921 = vmatpush.bf16.msrb.mxu1 %v11351_v28  ;;  %v11331_v40 = vor.u32 %v15685_v38, %v11330_v37  ;;  %v11335_v47 = vor.u32 %v15683_v42, %v11332_v43  ;;  %v11311_v56 = vor.u32 %v15680_v54, %v11310_v53  ;;  %v15700_v57 = vld [vmem:[%s21017_s3 + $0x510] sm:$0xf0]  ;;  %v11312_v59 = vld [vmem:[%s21017_s3 + $0x474] sm:$0xf0]  ;;  %v15750_v63 = vld [vmem:[%s21017_s3 + $0x6a0] sm:$0xf0] }
  0x5e   : > { %v11290_v3 = vld [vmem:[%s21017_s3 + $0x438] sm:$0xf]  ;;  %v15675_v4 = vld [vmem:[%s21017_s3 + $0x448] sm:$0xf0]  ;;  %v15673_v7 = vld [vmem:[%s21017_s3 + $0x43c] sm:$0xf] }
  0x5f   : > { %v11292_v8 = vld [vmem:[%s21017_s3 + $0x44c] sm:$0xf0]  ;;  %v15773_v9 = vld [vmem:[%s21017_s3 + $0x75c] sm:$0xf]  ;;  %v11570_v14 = vld [vmem:[%s21017_s3 + $0x668] sm:$0xf] }
  0x60   : > { %826 = vmatpush.bf16.msra.mxu2 %v11048_v45  ;;  %854 = vmatpush.bf16.msra.mxu0 %v11056_v48  ;;  %v11610_v48 = vld [vmem:[%s21017_s3 + $0x6b8] sm:$0xf]  ;;  %v11295_v12 = vor.u32 %v15673_v7, %v11292_v8  ;;  %v11692_v13 = vld [vmem:[%s21017_s3 + $0x76c] sm:$0xf0]  ;;  %v15745_v15 = vld [vmem:[%s21017_s3 + $0x678] sm:$0xf0] }
  0x61   : > { %1958 = vmatpush.bf16.msra.mxu3 %v11651_v24  ;;  %1922 = vmatpush.bf16.msrb.mxu1 %v11331_v40  ;;  %v11270_v21 = vld [vmem:[%s21017_s3 + $0x410] sm:$0xf]  ;;  %v15670_v22 = vld [vmem:[%s21017_s3 + $0x420] sm:$0xf0]  ;;  %v15668_v24 = vld [vmem:[%s21017_s3 + $0x414] sm:$0xf] }
  0x62   : > { %v11271_v27 = vor.u32 %v15670_v22, %v11270_v21  ;;  %v11272_v28 = vld [vmem:[%s21017_s3 + $0x424] sm:$0xf0]  ;;  %v15768_v29 = vld [vmem:[%s21017_s3 + $0x734] sm:$0xf]  ;;  %v15665_v38 = vld [vmem:[%s21017_s3 + $0x3f8] sm:$0xf0] }
  0x63   : > { %v11672_v30 = vld [vmem:[%s21017_s3 + $0x744] sm:$0xf0]  ;;  %v11275_v31 = vor.u32 %v15668_v24, %v11272_v28  ;;  %v15740_v34 = vld [vmem:[%s21017_s3 + $0x650] sm:$0xf0]  ;;  %v15763_v42 = vld [vmem:[%s21017_s3 + $0x70c] sm:$0xf] }
  0x64   : > { %827 = vmatpush.bf16.msra.mxu2 %v11036_v51  ;;  %855 = vmatpush.bf16.msra.mxu0 %v11044_v52  ;;  %v17489_v51 = vld [vmem:[#allocation5] sm:$0x7]  ;;  %v11611_v52 = vor.u32 %v15755_v49, %v11610_v48  ;;  %v11250_v35 = vld [vmem:[%s21017_s3 + $0x3e8] sm:$0xf]  ;;  %v11358_v7 = vld [vmem:[%s21017_s3 + $0x4b8] sm:$0xf] }
  0x65   : > { %1959 = vmatpush.bf16.msra.mxu3 %v11631_v36  ;;  %1923 = vmatpush.bf16.msrb.mxu1 %v11311_v56  ;;  %v871_v2 = vperm.slane %v17489_v51, 1  ;;  %v11251_v40 = vor.u32 %v15665_v38, %v11250_v35  ;;  %v11652_v43 = vld [vmem:[%s21017_s3 + $0x71c] sm:$0xf0]  ;;  %v872_v54 = vperm.slane %v17489_v51, 2  ;;  %v15696_v56 = vld [vmem:[%s21017_s3 + $0x4f0] sm:$0xf0] }
  0x66   : > { %v11655_v49 = vor.u32 %v15763_v42, %v11652_v43  ;;  %v15691_v8 = vld [vmem:[%s21017_s3 + $0x4c8] sm:$0xf0]  ;;  %v11612_v28 = vld [vmem:[%s21017_s3 + $0x6cc] sm:$0xf0]  ;;  %v15728_v38 = vld [vmem:[%s21017_s3 + $0x5f4] sm:$0xf] }
  0x67   : > { %11083 = vmatmul.msk.bf16.vlgmr.msra.gmra.mxu0 %vm578_vm0, %v752_v39  ;;  %11081 = vmatmul.msk.bf16.vlgmr.msra.gmra.mxu2 %vm578_vm0, %v752_v39  ;;  %v11410_v39 = vld [vmem:[%s21017_s3 + $0x528] sm:$0xf]  ;;  %v15748_v43 = vld [vmem:[%s21017_s3 + $0x694] sm:$0xf]  ;;  %s16874_s13 = sshra.s32 %s10768_s22, 4  ;;  %s16880_s21 = scalar_lea.hbm %s21025_s11, 2  ;;  %s16875_s13 = int_to_ptr.hbm [resolvable:$true] %s16874_s13 }
  0x68   : > { %1938 = vmatpush.bf16.msrb.mxu2 %v11531_v55  ;;  %1974 = vmatpush.bf16.msrb.mxu0 %v11375_v20  ;;  %v11411_v46 = vor.u32 %v15705_v41, %v11410_v39  ;;  %v11390_v55 = vld [vmem:[%s21017_s3 + $0x500] sm:$0xf]  ;;  %v11571_v20 = vor.u32 %v15745_v15, %v11570_v14  ;;  %v15663_v39 = vld [vmem:[%s21017_s3 + $0x3ec] sm:$0xf]  ;;  %v11512_v42 = vld [vmem:[%s21017_s3 + $0x604] sm:$0xf0]  ;;  %p16881_p3 = scmp.lt.s32.totalorder %s16875_s13, %s21025_s11 }
  0x69   : > { %1960 = vmatpush.bf16.msra.mxu3 %v11611_v52  ;;  %v11391_v60 = vor.u32 %v15700_v57, %v11390_v55  ;;  %v11252_v41 = vld [vmem:[%s21017_s3 + $0x3fc] sm:$0xf0]  ;;  %s16876_s15 = scalar_lea.hbm %s16875_s13, 1 }
  0x6a   : > { %v11255_v48 = vor.u32 %v15663_v39, %v11252_v41  ;;  %v11378_v55 = vld [vmem:[%s21017_s3 + $0x4e0] sm:$0xf]  ;;  %p16877_p0 = scmp.ne.s32.totalorder %s16875_s13, %s16876_s15  ;;  %p16882_p4 = scmp.lt.s32.totalorder %s16880_s21, %s16876_s15 }
  0x6c   : > { %1939 = vmatpush.bf16.msrb.mxu2 %v11511_v58  ;;  %1975 = vmatpush.bf16.msrb.mxu0 %v11355_v33  ;;  %v15678_v58 = vld [vmem:[%s21017_s3 + $0x464] sm:$0xf]  ;;  %v11550_v33 = vld [vmem:[%s21017_s3 + $0x640] sm:$0xf]  ;;  %p16878_p1 = pnand %p16877_p0, %p17047_p5  ;;  %p16883_p7 = por %p16882_p4, %p16881_p3 }
  0x6d   : > { %v11315_v61 = vor.u32 %v15678_v58, %v11312_v59  ;;  %v11551_v37 = vor.u32 %v15740_v34, %v11550_v33  ;;  %v11379_v58 = vor.u32 %v15696_v56, %v11378_v55  ;;  %v11230_v59 = vld [vmem:[%s21017_s3 + $0x3c0] sm:$0xf]  ;;  %v15736_v33 = vld [vmem:[%s21017_s3 + $0x630] sm:$0xf0]  ;;  %v11338_v34 = vld [vmem:[%s21017_s3 + $0x490] sm:$0xf] }
  0x6e   : > { %p16879_p2 = pneg %p16878_p1 }
  0x70   : > { %1940 = vmatpush.bf16.msrb.mxu2 %v11491_v62  ;;  %1976 = vmatpush.bf16.msrb.mxu0 %v11335_v47  ;;  %v11590_v62 = vld [vmem:[%s21017_s3 + $0x690] sm:$0xf]  ;;  %p16884_p8 = pnand %p16883_p7, %p16879_p2 }
  0x71   : > { %v11591_v0 = vor.u32 %v15750_v63, %v11590_v62  ;;  %v15658_v63 = vld [vmem:[%s21017_s3 + $0x3c4] sm:$0xf] }
  0x73   : > { %1961 = vmatpush.bf16.msra.mxu3 %v11591_v0  ;;  %v11232_v0 = vld [vmem:[%s21017_s3 + $0x3d4] sm:$0xf0] }
  0x74   : > { %1941 = vmatpush.bf16.msrb.mxu2 %v11471_v6  ;;  %1977 = vmatpush.bf16.msrb.mxu0 %v11315_v61  ;;  %v11291_v6 = vor.u32 %v15675_v4, %v11290_v3  ;;  %v15758_v3 = vld [vmem:[%s21017_s3 + $0x6e4] sm:$0xf] }
  0x76   : > { %1924 = vmatpush.bf16.msrb.mxu1 %v11291_v6  ;;  %v11632_v6 = vld [vmem:[%s21017_s3 + $0x6f4] sm:$0xf0] }
  0x77   : > { %1962 = vmatpush.bf16.msra.mxu3 %v11571_v20 }
  0x78   : > { %1942 = vmatpush.bf16.msrb.mxu2 %v11451_v19  ;;  %v11695_v19 = vor.u32 %v15773_v9, %v11692_v13  ;;  %1978 = vmatpush.bf16.msrb.mxu0 %v11295_v12 }
  0x7a   : > { %1925 = vmatpush.bf16.msrb.mxu1 %v11271_v27 }
  0x7b   : > { %1963 = vmatpush.bf16.msra.mxu3 %v11551_v37  ;;  %v15686_v37 = vld [vmem:[%s21017_s3 + $0x4a0] sm:$0xf0] }
  0x7c   : > { %1943 = vmatpush.bf16.msrb.mxu2 %v11431_v32  ;;  %v11675_v32 = vor.u32 %v15768_v29, %v11672_v30  ;;  %1979 = vmatpush.bf16.msrb.mxu0 %v11275_v31  ;;  %v11538_v29 = vld [vmem:[%s21017_s3 + $0x620] sm:$0xf]  ;;  %v11339_v41 = vor.u32 %v15686_v37, %v11338_v34  ;;  %v15671_v34 = vld [vmem:[%s21017_s3 + $0x428] sm:$0xf0] }
  0x7e   : > { %1926 = vmatpush.bf16.msrb.mxu1 %v11251_v40 }
  0x7f   : > { %2028 = vmatpush.bf16.msrb.mxu3 %v11379_v58  ;;  %v15723_v58 = vld [vmem:[%s21017_s3 + $0x5cc] sm:$0xf] }
  0x80   : > { %1944 = vmatpush.bf16.msrb.mxu2 %v11411_v46  ;;  %1980 = vmatpush.bf16.msrb.mxu0 %v11255_v48  ;;  %v11592_v48 = vld [vmem:[%s21017_s3 + $0x6a4] sm:$0xf0] }
  0x84   : > { %1945 = vmatpush.bf16.msrb.mxu2 %v11391_v60  ;;  %v15660_v60 = vld [vmem:[%s21017_s3 + $0x3d0] sm:$0xf0] }
  0x85   : > { %v11231_v62 = vor.u32 %v15660_v60, %v11230_v59 }
  0x87   : > { %1927 = vmatpush.bf16.msrb.mxu1 %v11231_v62 }
  0x88   : > { %2010 = vmatpush.bf16.msra.mxu2 %v11695_v19  ;;  %v11532_v19 = vld [vmem:[%s21017_s3 + $0x62c] sm:$0xf0] }
  0x8c   : > { %2011 = vmatpush.bf16.msra.mxu2 %v11675_v32 }
  0x90   : > { %2012 = vmatpush.bf16.msra.mxu2 %v11655_v49  ;;  %v11518_v49 = vld [vmem:[%s21017_s3 + $0x5f8] sm:$0xf] }
  0xc4   : > { %v17393_v1 = vpop.f32.mrf.mxu0 }
  0xca   : > { %v17425_v17 = vpop.f32.mrf.mxu2 }
  0xcc   : > { %v17435_v23 = vpop.f32.mrf.mxu0 }
  0xcd   : > { %v17427_v18 = vpop.f32.mrf.mxu3 }
  0xce   : > { %v701_v14 = vadd.f32 %v17427_v18, %v17393_v1  ;;  %v15753_v1 = vld [vmem:[%s21017_s3 + $0x6bc] sm:$0xf] }
  0xcf   : > { %v11615_v32 = vor.u32 %v15753_v1, %v11612_v28  ;;  %v15738_v1 = vld [vmem:[%s21017_s3 + $0x644] sm:$0xf] }
  0xd2   : > { %v17479_v44 = vpop.f32.mrf.mxu2  ;;  %v728_v25 = vpop.f32.mrf.mxu1 }
  0xd4   : > { %v714_v50 = vpop.f32.mrf.mxu0 }
  0xd5   : > { %v17481_v45 = vpop.f32.mrf.mxu3  ;;  %v715_v5 = vadd.f32 %v714_v50, %v17425_v17 }
  0xd6   : > { %v703_v55 = vadd.f32 %v17481_v45, %v17435_v23  ;;  %v11492_v23 = vld [vmem:[%s21017_s3 + $0x5dc] sm:$0xf0] }
  0xda   : > { %v619_v10 = vpop.f32.mrf.mxu2 }
  0xdb   : > { %v729_v50 = vadd.f32 %v728_v25, %v619_v10  ;;  %v11635_v10 = vor.u32 %v15758_v3, %v11632_v6  ;;  %v11495_v3 = vor.u32 %v15723_v58, %v11492_v23  ;;  %v15708_v58 = vld [vmem:[%s21017_s3 + $0x554] sm:$0xf] }
  0xdc   : > { %v716_v17 = vpop.f32.mrf.mxu0 }
  0xdd   : > { %v843_v11 = vpop.f32.mrf.mxu3  ;;  %v717_v47 = vadd.f32 %v716_v17, %v17479_v44  ;;  %2013 = vmatpush.bf16.msra.mxu2 %v11635_v10  ;;  %v15733_v17 = vld [vmem:[%s21017_s3 + $0x61c] sm:$0xf] }
  0xde   : > { %v863_v16 = vadd.f32 %v843_v11, %v715_v5  ;;  %v11235_v5 = vor.u32 %v15658_v63, %v11232_v0  ;;  %v730_v11 = vpop.f32.mrf.mxu1  ;;  %v11535_v25 = vor.u32 %v15733_v17, %v11532_v19 }
  0xe0   : > { %v877_v26 = vadd.f32 %v871_v2, %v863_v16  ;;  %1981 = vmatpush.bf16.msrb.mxu0 %v11235_v5  ;;  %v870_v16 = vperm.slane %v17489_v51, 0  ;;  %1992 = vmatpush.bf16.msra.mxu1 %v11535_v25  ;;  %v11572_v5 = vld [vmem:[%s21017_s3 + $0x67c] sm:$0xf0]  ;;  %v15676_v51 = vld [vmem:[%s21017_s3 + $0x450] sm:$0xf0] }
  0xe1   : > { %2014 = vmatpush.bf16.msra.mxu2 %v11615_v32 }
  0xe2   : > { %v883_v36 = vmax.f32 %v877_v26, 0.0  ;;  %v621_v52 = vpop.f32.mrf.mxu2 }
  0xe3   : > { %v731_v20 = vadd.f32 %v730_v11, %v621_v52  ;;  %v11595_v52 = vor.u32 %v15748_v43, %v11592_v48 }
  0xe4   : > { %v905_v46 = vrot.slane %v883_v36, 7  ;;  %v857_v44 = vpop.f32.mrf.mxu0  ;;  %v11539_v36 = vor.u32 %v15736_v33, %v11538_v29 }
  0xe5   : > { %v845_v53 = vpop.f32.mrf.mxu3  ;;  %v864_v61 = vadd.f32 %v857_v44, %v729_v50  ;;  %v15681_v44 = vld [vmem:[%s21017_s3 + $0x478] sm:$0xf0]  ;;  %2015 = vmatpush.bf16.msra.mxu2 %v11595_v52  ;;  %v11258_v52 = vld [vmem:[%s21017_s3 + $0x3f0] sm:$0xf] }
  0xe6   : > { %923 = vst [vmem:[#allocation2 + $0x8] sm:$0xfe] %v905_v46  ;;  %v866_v57 = vadd.f32 %v845_v53, %v717_v47  ;;  %2046 = vmatpush.bf16.msra.mxu0 %v11539_v36  ;;  %v11515_v47 = vor.u32 %v15728_v38, %v11512_v42  ;;  %v15731_v53 = vld [vmem:[%s21017_s3 + $0x608] sm:$0xf0] }
  0xe7   : > { %v878_v9 = vadd.f32 %v872_v54, %v864_v61 }
  0xe8   : > { %v880_v4 = vadd.f32 %v871_v2, %v866_v57  ;;  %v11359_v2 = vor.u32 %v15691_v8, %v11358_v7  ;;  %1993 = vmatpush.bf16.msra.mxu1 %v11515_v47  ;;  %v11519_v57 = vor.u32 %v15731_v53, %v11518_v49  ;;  %v15716_v47 = vld [vmem:[%s21017_s3 + $0x590] sm:$0xf0]  ;;  %v15694_v49 = vld [vmem:[%s21017_s3 + $0x4e4] sm:$0xf] }
  0xe9   : > { %v884_v13 = vmax.f32 %v878_v9, 0.0  ;;  %v11498_v9 = vld [vmem:[%s21017_s3 + $0x5d0] sm:$0xf] }
  0xea   : > { %v886_v12 = vmax.f32 %v880_v4, 0.0  ;;  %2029 = vmatpush.bf16.msrb.mxu3 %v11359_v2  ;;  %v829_v22 = vpop.f32.mrf.mxu2  ;;  %2047 = vmatpush.bf16.msra.mxu0 %v11519_v57  ;;  %v15743_v4 = vld [vmem:[%s21017_s3 + $0x66c] sm:$0xf] }
  0xeb   : > { %v906_v21 = vrot.slane %v884_v13, 7  ;;  %v862_v26 = vadd.f32 %v829_v22, %v701_v14  ;;  %v11575_v8 = vor.u32 %v15743_v4, %v11572_v5  ;;  %v15726_v13 = vld [vmem:[%s21017_s3 + $0x5e0] sm:$0xf0]  ;;  %v11472_v22 = vld [vmem:[%s21017_s3 + $0x5b4] sm:$0xf0] }
  0xec   : > { %v909_v15 = vrot.slane %v886_v12, 7  ;;  %v859_v27 = vpop.f32.mrf.mxu0  ;;  %1994 = vmatpush.bf16.msra.mxu1 %v11495_v3  ;;  %v11499_v14 = vor.u32 %v15726_v13, %v11498_v9  ;;  %v15689_v3 = vld [vmem:[%s21017_s3 + $0x4bc] sm:$0xf]  ;;  %v11360_v5 = vld [vmem:[%s21017_s3 + $0x4cc] sm:$0xf0] }
  0xed   : > { %v1091_v24 = vld [vmem:[#allocation2 + $0x8] sm:$0xfe]  ;;  %v867_v30 = vadd.f32 %v859_v27, %v731_v20  ;;  %924 = vst [vmem:[#allocation2 + $0x10] sm:$0xfe] %v906_v21  ;;  %v876_v35 = vadd.f32 %v870_v16, %v862_v26  ;;  %2016 = vmatpush.bf16.msra.mxu2 %v11575_v8 }
  0xee   : > { %v910_v18 = vsel %vm903_vm2, %v905_v46, %v909_v15  ;;  %929 = vst [vmem:[#allocation2 + $0x38] sm:$0x1] %v909_v15  ;;  %2030 = vmatpush.bf16.msrb.mxu3 %v11339_v41  ;;  %v11298_v15 = vld [vmem:[%s21017_s3 + $0x440] sm:$0xf]  ;;  %2048 = vmatpush.bf16.msra.mxu0 %v11499_v14  ;;  %v11478_v26 = vld [vmem:[%s21017_s3 + $0x5a8] sm:$0xf] }
  0xef   : > { %926 = vst [vmem:[#allocation2 + $0x20] sm:$0xff] %v910_v18  ;;  %v17640_v31 = vpack.c.bf16 %v910_v18, %v1091_v24  ;;  %v881_v39 = vadd.f32 %v872_v54, %v867_v30  ;;  %v882_v46 = vmax.f32 %v876_v35, 0.0  ;;  %v11318_v54 = vld [vmem:[%s21017_s3 + $0x468] sm:$0xf]  ;;  %v11299_v24 = vor.u32 %v15676_v51, %v11298_v15  ;;  %v11552_v18 = vld [vmem:[%s21017_s3 + $0x654] sm:$0xf0] }
  0xf0   : > { %v11319_v63 = vor.u32 %v15681_v44, %v11318_v54  ;;  %v11555_v29 = vor.u32 %v15738_v1, %v11552_v18  ;;  %v15721_v30 = vld [vmem:[%s21017_s3 + $0x5b8] sm:$0xf0]  ;;  %v11418_v15 = vld [vmem:[%s21017_s3 + $0x530] sm:$0xf]  ;;  %v15706_v51 = vld [vmem:[%s21017_s3 + $0x540] sm:$0xf0] }
  0xf1   : > { %v1263_v40 = vshll.u32 %v17640_v31, 16  ;;  %v887_v50 = vmax.f32 %v881_v39, 0.0  ;;  %v904_v56 = vrot.slane %v882_v46, 7  ;;  %v1261_v2 = vshrl.u32 %v17640_v31, 16  ;;  %v11278_v31 = vld [vmem:[%s21017_s3 + $0x418] sm:$0xf] }
  0xf2   : > { %v831_v60 = vpop.f32.mrf.mxu2  ;;  %2031 = vmatpush.bf16.msrb.mxu3 %v11319_v63  ;;  %v11479_v33 = vor.u32 %v15721_v30, %v11478_v26  ;;  %v15713_v35 = vld [vmem:[%s21017_s3 + $0x57c] sm:$0xf]  ;;  %2017 = vmatpush.bf16.msra.mxu2 %v11555_v29  ;;  %v11279_v38 = vor.u32 %v15671_v34, %v11278_v31  ;;  %v11452_v39 = vld [vmem:[%s21017_s3 + $0x58c] sm:$0xf0]  ;;  %v11458_v46 = vld [vmem:[%s21017_s3 + $0x580] sm:$0xf] }
  0xf3   : > { %v911_v59 = vrot.slane %v887_v50, 7  ;;  %v1265_v62 = vrot.slane %v1263_v40, 1  ;;  %922 = vst [vmem:[#allocation2] sm:$0xfe] %v904_v56  ;;  %v865_v45 = vadd.f32 %v831_v60, %v703_v55  ;;  %v11455_v43 = vor.u32 %v15713_v35, %v11452_v39  ;;  %v11380_v50 = vld [vmem:[%s21017_s3 + $0x4f4] sm:$0xf0] }
  0xf4   : > { %v1092_v7 = vld [vmem:[#allocation2 + $0x10] sm:$0xfe]  ;;  %2049 = vmatpush.bf16.msra.mxu0 %v11479_v33  ;;  %v11459_v48 = vor.u32 %v15716_v47, %v11458_v46  ;;  %v11383_v57 = vor.u32 %v15694_v49, %v11380_v50  ;;  %v11438_v60 = vld [vmem:[%s21017_s3 + $0x558] sm:$0xf]  ;;  %v15698_v18 = vld [vmem:[%s21017_s3 + $0x504] sm:$0xf] }
  0xf5   : > { %v1094_v61 = vld [vmem:[#allocation2 + $0x38] sm:$0x3]  ;;  %v912_v6 = vsel %vm903_vm2, %v906_v21, %v911_v59  ;;  %930 = vst [vmem:[#allocation2 + $0x40] sm:$0x1] %v911_v59  ;;  %v879_v10 = vadd.f32 %v870_v16, %v865_v45  ;;  %v15718_v16 = vld [vmem:[%s21017_s3 + $0x5a4] sm:$0xf]  ;;  %v1266_v19 = vor.u32 %v1265_v62, %v1261_v2 }
  0xf6   : > { %v17688_v0 = vpack.c.bf16 %v1094_v61, %v1094_v61  ;;  %927 = vst [vmem:[#allocation2 + $0x28] sm:$0xff] %v912_v6  ;;  %v1243_v12 = vpack.c.bf16 %v912_v6, %v1092_v7  ;;  %v11475_v25 = vor.u32 %v15718_v16, %v11472_v22  ;;  %2032 = vmatpush.bf16.msrb.mxu3 %v11299_v24  ;;  %v11432_v59 = vld [vmem:[%s21017_s3 + $0x564] sm:$0xf0]  ;;  %v15711_v45 = vld [vmem:[%s21017_s3 + $0x568] sm:$0xf0] }
  0xf7   : > { %v885_v17 = vmax.f32 %v879_v10, 0.0  ;;  %v11435_v23 = vor.u32 %v15708_v58, %v11432_v59  ;;  %v11439_v4 = vor.u32 %v15711_v45, %v11438_v60  ;;  %v11238_v6 = vld [vmem:[%s21017_s3 + $0x3c8] sm:$0xf]  ;;  %v15661_v7 = vld [vmem:[%s21017_s3 + $0x3d8] sm:$0xf0]  ;;  %v11363_v10 = vor.u32 %v15689_v3, %v11360_v5 }
  0xf8   : > { %v1268_v11 = vshll.u32 %v17688_v0, 16  ;;  %v1275_v21 = vshll.u32 %v1243_v12, 16  ;;  %1995 = vmatpush.bf16.msra.mxu1 %v11475_v25  ;;  %v1273_v53 = vshrl.u32 %v1243_v12, 16  ;;  %2050 = vmatpush.bf16.msra.mxu0 %v11459_v48  ;;  %v11239_v2 = vor.u32 %v15661_v7, %v11238_v6  ;;  %v11412_v12 = vld [vmem:[%s21017_s3 + $0x53c] sm:$0xf0] }
  0xf9   : > { %v907_v27 = vrot.slane %v885_v17, 7  ;;  %v15684_v16 = vld [vmem:[%s21017_s3 + $0x494] sm:$0xf]  ;;  %v11419_v17 = vor.u32 %v15706_v51, %v11418_v15  ;;  %v11392_v26 = vld [vmem:[%s21017_s3 + $0x514] sm:$0xf0] }
  0xfa   : > { %v1270_v20 = vrot.slane %v1268_v11, 1  ;;  %v1090_v32 = vld [vmem:[#allocation2] sm:$0xfe]  ;;  %v1277_v41 = vrot.slane %v1275_v21, 1  ;;  %2033 = vmatpush.bf16.msrb.mxu3 %v11279_v38  ;;  %v15703_v11 = vld [vmem:[%s21017_s3 + $0x52c] sm:$0xf]  ;;  %v11395_v33 = vor.u32 %v15698_v18, %v11392_v26 }
  0xfb   : > { %v17745_v36 = vsel %vm903_vm2, %v904_v56, %v907_v27  ;;  %928 = vst [vmem:[#allocation2 + $0x30] sm:$0x1] %v907_v27  ;;  %v15666_v56 = vld [vmem:[%s21017_s3 + $0x400] sm:$0xf0]  ;;  %v11415_v14 = vor.u32 %v15703_v11, %v11412_v12  ;;  %v11540_v21 = vld [vmem:[%s21017_s3 + $0x634] sm:$0xf0] }
  0xfc   : > { %v17729_v28 = vsel %vm1247_vm3, %v1266_v19, %v1270_v20  ;;  %v1095_v37 = vld [vmem:[#allocation2 + $0x40] sm:$0x3]  ;;  %v17753_v42 = vpack.c.bf16 %v17745_v36, %v1090_v32  ;;  %1996 = vmatpush.bf16.msra.mxu1 %v11455_v43  ;;  %v11259_v44 = vor.u32 %v15666_v56, %v11258_v52  ;;  %v1278_v61 = vor.u32 %v1277_v41, %v1273_v53  ;;  %v11340_v19 = vld [vmem:[%s21017_s3 + $0x4a4] sm:$0xf0]  ;;  %v15734_v20 = vld [vmem:[%s21017_s3 + $0x624] sm:$0xf] }
  0xfd   : > { %1946 = vmatmul.bf16.vlgmr.msrb.gmra.mxu2 %v17729_v28  ;;  %v17750_v40 = vpack.c.bf16 %v1095_v37, %v1095_v37  ;;  %2051 = vmatpush.bf16.msra.mxu0 %v11439_v4  ;;  %v11343_v25 = vor.u32 %v15684_v16, %v11340_v19  ;;  %v11543_v1 = vor.u32 %v15734_v20, %v11540_v21  ;;  %v11398_v27 = vld [vmem:[%s21017_s3 + $0x508] sm:$0xf]  ;;  %v15701_v29 = vld [vmem:[%s21017_s3 + $0x518] sm:$0xf0]  ;;  %v15679_v30 = vld [vmem:[%s21017_s3 + $0x46c] sm:$0xf] }
  0xfe   : > { %v1251_v55 = vshll.u32 %v17753_v42, 16  ;;  %2082 = vmatpush.bf16.msrb.mxu2 %v11383_v57  ;;  %2034 = vmatpush.bf16.msrb.mxu3 %v11259_v44  ;;  %v1249_v22 = vshrl.u32 %v17753_v42, 16  ;;  %v11320_v34 = vld [vmem:[%s21017_s3 + $0x47c] sm:$0xf0]  ;;  %v15729_v35 = vld [vmem:[%s21017_s3 + $0x5fc] sm:$0xf]  ;;  %v11399_v38 = vor.u32 %v15701_v29, %v11398_v27 }
  0xff   : > { %v1280_v54 = vshll.u32 %v17750_v40, 16  ;;  %v17853_v37 = vshrl.u32 %v17688_v0, 16  ;;  %v11520_v39 = vld [vmem:[%s21017_s3 + $0x60c] sm:$0xf0]  ;;  %v11323_v42 = vor.u32 %v15679_v30, %v11320_v34  ;;  %v11698_v46 = vld [vmem:[%s21017_s3 + $0x760] sm:$0xf] }
 0x100   : > { %v1253_v63 = vrot.slane %v1251_v55, 1  ;;  %1997 = vmatpush.bf16.msra.mxu1 %v11435_v23  ;;  %v11523_v43 = vor.u32 %v15729_v35, %v11520_v39  ;;  %v15776_v0 = vld [vmem:[%s21017_s3 + $0x770] sm:$0xf0]  ;;  %v15674_v47 = vld [vmem:[%s21017_s3 + $0x444] sm:$0xf] }
 0x101   : > { %v1282_v62 = vrot.slane %v1280_v54, 1  ;;  %2052 = vmatpush.bf16.msra.mxu0 %v11419_v17  ;;  %v11699_v48 = vor.u32 %v15776_v0, %v11698_v46  ;;  %v11300_v49 = vld [vmem:[%s21017_s3 + $0x454] sm:$0xf0]  ;;  %v15774_v50 = vld [vmem:[%s21017_s3 + $0x764] sm:$0xf] }
 0x102   : > { %v1093_v9 = vld [vmem:[#allocation2 + $0x30] sm:$0x3]  ;;  %2083 = vmatpush.bf16.msrb.mxu2 %v11363_v10  ;;  %2035 = vmatpush.bf16.msrb.mxu3 %v11239_v2  ;;  %v1254_v31 = vor.u32 %v1253_v63, %v1249_v22  ;;  %v11700_v52 = vld [vmem:[%s21017_s3 + $0x774] sm:$0xf0]  ;;  %v15724_v54 = vld [vmem:[%s21017_s3 + $0x5d4] sm:$0xf]  ;;  %v11303_v60 = vor.u32 %v15674_v47, %v11300_v49 }
 0x103   : > { %v17800_v8 = vsel %vm1247_vm3, %v1278_v61, %v1282_v62  ;;  %v17809_v13 = vpack.c.bf16 %v1093_v9, %v1093_v9  ;;  %v11703_v53 = vor.u32 %v15774_v50, %v11700_v52  ;;  %v11500_v55 = vld [vmem:[%s21017_s3 + $0x5e4] sm:$0xf0]  ;;  %v11678_v56 = vld [vmem:[%s21017_s3 + $0x738] sm:$0xf]  ;;  %v15771_v44 = vld [vmem:[%s21017_s3 + $0x748] sm:$0xf0] }
 0x104   : > { %1964 = vmatmul.bf16.vlgmr.msra.gmra.mxu3 %v17800_v8  ;;  %1998 = vmatpush.bf16.msra.mxu1 %v11415_v14  ;;  %v11503_v57 = vor.u32 %v15724_v54, %v11500_v55  ;;  %v15669_v58 = vld [vmem:[%s21017_s3 + $0x41c] sm:$0xf]  ;;  %v11280_v59 = vld [vmem:[%s21017_s3 + $0x42c] sm:$0xf0]  ;;  %v11679_v61 = vor.u32 %v15771_v44, %v11678_v56  ;;  %v15719_v23 = vld [vmem:[%s21017_s3 + $0x5ac] sm:$0xf] }
 0x105   : > { %v1256_v24 = vshll.u32 %v17809_v13, 16  ;;  %2053 = vmatpush.bf16.msra.mxu0 %v11399_v38  ;;  %v15769_v62 = vld [vmem:[%s21017_s3 + $0x73c] sm:$0xf]  ;;  %v11680_v63 = vld [vmem:[%s21017_s3 + $0x74c] sm:$0xf0]  ;;  %v17925_v10 = vshrl.u32 %v17750_v40, 16  ;;  %v11283_v2 = vor.u32 %v15669_v58, %v11280_v59 }
 0x106   : > { %2100 = vmatpush.bf16.msra.mxu3 %v11543_v1  ;;  %2084 = vmatpush.bf16.msrb.mxu2 %v11343_v25  ;;  %v11683_v45 = vor.u32 %v15769_v62, %v11680_v63  ;;  %v11480_v3 = vld [vmem:[%s21017_s3 + $0x5bc] sm:$0xf0]  ;;  %v11658_v4 = vld [vmem:[%s21017_s3 + $0x710] sm:$0xf]  ;;  %v15766_v5 = vld [vmem:[%s21017_s3 + $0x720] sm:$0xf0] }
 0x107   : > { %v1258_v32 = vrot.slane %v1256_v24, 1  ;;  %v15764_v6 = vld [vmem:[%s21017_s3 + $0x714] sm:$0xf]  ;;  %v11483_v7 = vor.u32 %v15719_v23, %v11480_v3  ;;  %v11660_v9 = vld [vmem:[%s21017_s3 + $0x724] sm:$0xf0]  ;;  %v11659_v11 = vor.u32 %v15766_v5, %v11658_v4  ;;  %v17965_v27 = vshrl.u32 %v17809_v13, 16 }
 0x108   : > { %1999 = vmatpush.bf16.msra.mxu1 %v11395_v33  ;;  %v15664_v12 = vld [vmem:[%s21017_s3 + $0x3f4] sm:$0xf]  ;;  %v11260_v14 = vld [vmem:[%s21017_s3 + $0x404] sm:$0xf0]  ;;  %v11663_v15 = vor.u32 %v15764_v6, %v11660_v9  ;;  %v15714_v40 = vld [vmem:[%s21017_s3 + $0x584] sm:$0xf] }
 0x109   : > { %v17859_v41 = vsel %vm1247_vm3, %v1254_v31, %v1258_v32  ;;  %v11460_v51 = vld [vmem:[%s21017_s3 + $0x594] sm:$0xf0]  ;;  %v11638_v16 = vld [vmem:[%s21017_s3 + $0x6e8] sm:$0xf]  ;;  %v15761_v19 = vld [vmem:[%s21017_s3 + $0x6f8] sm:$0xf0]  ;;  %v11263_v20 = vor.u32 %v15664_v12, %v11260_v14 }
 0x10a   : > { %1928 = vmatmul.bf16.vlgmr.msrb.gmra.mxu1 %v17859_v41  ;;  %1982 = vmatmul.bf16.vlgmr.msrb.gmra.mxu0 %v17859_v41  ;;  %v11463_v17 = vor.u32 %v15714_v40, %v11460_v51  ;;  %v11639_v21 = vor.u32 %v15761_v19, %v11638_v16  ;;  %v15759_v22 = vld [vmem:[%s21017_s3 + $0x6ec] sm:$0xf]  ;;  %v11640_v24 = vld [vmem:[%s21017_s3 + $0x6fc] sm:$0xf0]  ;;  %v15709_v25 = vld [vmem:[%s21017_s3 + $0x55c] sm:$0xf] }
 0x10b   : > { %2101 = vmatpush.bf16.msra.mxu3 %v11523_v43  ;;  %2085 = vmatpush.bf16.msrb.mxu2 %v11323_v42  ;;  %v15659_v1 = vld [vmem:[%s21017_s3 + $0x3cc] sm:$0xf]  ;;  %v11240_v18 = vld [vmem:[%s21017_s3 + $0x3dc] sm:$0xf0]  ;;  %v11440_v26 = vld [vmem:[%s21017_s3 + $0x56c] sm:$0xf0]  ;;  %v11643_v29 = vor.u32 %v15759_v22, %v11640_v24 }
 0x10c   : > { %2064 = vmatpush.bf16.msrb.mxu1 %v11699_v48  ;;  %2118 = vmatpush.bf16.msrb.mxu0 %v11703_v53  ;;  %v11443_v30 = vor.u32 %v15709_v25, %v11440_v26  ;;  %v11243_v31 = vor.u32 %v15659_v1, %v11240_v18  ;;  %v11618_v32 = vld [vmem:[%s21017_s3 + $0x6c0] sm:$0xf]  ;;  %v15756_v33 = vld [vmem:[%s21017_s3 + $0x6d0] sm:$0xf0]  ;;  %v15754_v34 = vld [vmem:[%s21017_s3 + $0x6c4] sm:$0xf] }
 0x10d   : > { %1951 = vmatmul.bf16.gmra.mxu2 %v17853_v37  ;;  %v11619_v13 = vor.u32 %v15756_v33, %v11618_v32  ;;  %v11620_v35 = vld [vmem:[%s21017_s3 + $0x6d4] sm:$0xf0]  ;;  %v11546_v38 = vld [vmem:[%s21017_s3 + $0x628] sm:$0xf]  ;;  %v15737_v39 = vld [vmem:[%s21017_s3 + $0x638] sm:$0xf0] }
 0x10e   : > { %v11547_v42 = vor.u32 %v15737_v39, %v11546_v38  ;;  %v15704_v43 = vld [vmem:[%s21017_s3 + $0x534] sm:$0xf]  ;;  %v11420_v46 = vld [vmem:[%s21017_s3 + $0x544] sm:$0xf0]  ;;  %v11598_v0 = vld [vmem:[%s21017_s3 + $0x698] sm:$0xf]  ;;  %v11623_v47 = vor.u32 %v15754_v34, %v11620_v35 }
 0x10f   : > { %2102 = vmatpush.bf16.msra.mxu3 %v11503_v57  ;;  %2086 = vmatpush.bf16.msrb.mxu2 %v11303_v60  ;;  %v11423_v48 = vor.u32 %v15704_v43, %v11420_v46  ;;  %v15751_v49 = vld [vmem:[%s21017_s3 + $0x6a8] sm:$0xf0]  ;;  %v15749_v50 = vld [vmem:[%s21017_s3 + $0x69c] sm:$0xf]  ;;  %v11600_v52 = vld [vmem:[%s21017_s3 + $0x6ac] sm:$0xf0] }
 0x110   : > { %2065 = vmatpush.bf16.msrb.mxu1 %v11679_v61  ;;  %2119 = vmatpush.bf16.msrb.mxu0 %v11683_v45  ;;  %v11599_v53 = vor.u32 %v15751_v49, %v11598_v0  ;;  %v11526_v54 = vld [vmem:[%s21017_s3 + $0x600] sm:$0xf]  ;;  %v15732_v55 = vld [vmem:[%s21017_s3 + $0x610] sm:$0xf0]  ;;  %v15699_v56 = vld [vmem:[%s21017_s3 + $0x50c] sm:$0xf]  ;;  %v11603_v61 = vor.u32 %v15749_v50, %v11600_v52 }
 0x111   : > { %v11527_v57 = vor.u32 %v15732_v55, %v11526_v54  ;;  %v11400_v44 = vld [vmem:[%s21017_s3 + $0x51c] sm:$0xf0]  ;;  %v11578_v58 = vld [vmem:[%s21017_s3 + $0x670] sm:$0xf]  ;;  %v15746_v59 = vld [vmem:[%s21017_s3 + $0x680] sm:$0xf0] }
 0x112   : > { %v11506_v60 = vld [vmem:[%s21017_s3 + $0x5d8] sm:$0xf]  ;;  %v11403_v62 = vor.u32 %v15699_v56, %v11400_v44  ;;  %v15727_v63 = vld [vmem:[%s21017_s3 + $0x5e8] sm:$0xf0]  ;;  %v11579_v23 = vor.u32 %v15746_v59, %v11578_v58  ;;  %v15744_v45 = vld [vmem:[%s21017_s3 + $0x674] sm:$0xf] }
 0x113   : > { %2103 = vmatpush.bf16.msra.mxu3 %v11483_v7  ;;  %2087 = vmatpush.bf16.msrb.mxu2 %v11283_v2  ;;  %v11580_v3 = vld [vmem:[%s21017_s3 + $0x684] sm:$0xf0]  ;;  %v11507_v4 = vor.u32 %v15727_v63, %v11506_v60  ;;  %v15777_v6 = vld [vmem:[%s21017_s3 + $0x778] sm:$0xf0]  ;;  %v15739_v12 = vld [vmem:[%s21017_s3 + $0x64c] sm:$0xf] }
 0x114   : > { %1969 = vmatmul.bf16.gmra.mxu3 %v17925_v10  ;;  %2066 = vmatpush.bf16.msrb.mxu1 %v11659_v11  ;;  %v11706_v5 = vld [vmem:[%s21017_s3 + $0x768] sm:$0xf]  ;;  %v11583_v9 = vor.u32 %v15744_v45, %v11580_v3  ;;  %v15741_v11 = vld [vmem:[%s21017_s3 + $0x658] sm:$0xf0]  ;;  %v11560_v14 = vld [vmem:[%s21017_s3 + $0x65c] sm:$0xf0] }
 0x115   : > { %2120 = vmatpush.bf16.msrb.mxu0 %v11663_v15  ;;  %v11558_v7 = vld [vmem:[%s21017_s3 + $0x648] sm:$0xf]  ;;  %v11707_v2 = vor.u32 %v15777_v6, %v11706_v5  ;;  %v11486_v40 = vld [vmem:[%s21017_s3 + $0x5b0] sm:$0xf]  ;;  %v15722_v51 = vld [vmem:[%s21017_s3 + $0x5c0] sm:$0xf0] }
 0x116   : > { %v11559_v15 = vor.u32 %v15741_v11, %v11558_v7  ;;  %v11686_v16 = vld [vmem:[%s21017_s3 + $0x740] sm:$0xf]  ;;  %v11487_v19 = vor.u32 %v15722_v51, %v11486_v40  ;;  %v11386_v22 = vld [vmem:[%s21017_s3 + $0x4e8] sm:$0xf]  ;;  %v15697_v24 = vld [vmem:[%s21017_s3 + $0x4f8] sm:$0xf0] }
 0x117   : > { %2104 = vmatpush.bf16.msra.mxu3 %v11463_v17  ;;  %2088 = vmatpush.bf16.msrb.mxu2 %v11263_v20  ;;  %v15772_v17 = vld [vmem:[%s21017_s3 + $0x750] sm:$0xf0]  ;;  %v11563_v20 = vor.u32 %v15739_v12, %v11560_v14  ;;  %v11466_v25 = vld [vmem:[%s21017_s3 + $0x588] sm:$0xf]  ;;  %v11387_v1 = vor.u32 %v15697_v24, %v11386_v22  ;;  %v15717_v18 = vld [vmem:[%s21017_s3 + $0x598] sm:$0xf0] }
 0x118   : > { %2067 = vmatpush.bf16.msrb.mxu1 %v11639_v21  ;;  %v11687_v21 = vor.u32 %v15772_v17, %v11686_v16  ;;  %v11850_v26 = vld [vmem:[%s21017_s3 + $0x118] sm:$0xf]  ;;  %v15767_v33 = vld [vmem:[%s21017_s3 + $0x728] sm:$0xf0]  ;;  %v11366_v34 = vld [vmem:[%s21017_s3 + $0x4c0] sm:$0xf] }
 0x119   : > { %2121 = vmatpush.bf16.msrb.mxu0 %v11643_v29  ;;  %v15575_v29 = vld [vmem:[%s21017_s3 + $0x128] sm:$0xf0]  ;;  %v11666_v32 = vld [vmem:[%s21017_s3 + $0x718] sm:$0xf]  ;;  %v15692_v35 = vld [vmem:[%s21017_s3 + $0x4d0] sm:$0xf0] }
 0x11a   : > { %1933 = vmatmul.bf16.gmra.mxu1 %v17965_v27  ;;  %1987 = vmatmul.bf16.gmra.mxu0 %v17965_v27  ;;  %v11446_v38 = vld [vmem:[%s21017_s3 + $0x560] sm:$0xf]  ;;  %v15712_v39 = vld [vmem:[%s21017_s3 + $0x570] sm:$0xf0]  ;;  %v11830_v43 = vld [vmem:[%s21017_s3 + $0xf0] sm:$0xf] }
 0x11b   : > { %2105 = vmatpush.bf16.msra.mxu3 %v11443_v30  ;;  %2089 = vmatpush.bf16.msrb.mxu2 %v11243_v31  ;;  %v11467_v30 = vor.u32 %v15717_v18, %v11466_v25  ;;  %v11851_v31 = vor.u32 %v15575_v29, %v11850_v26  ;;  %v15570_v46 = vld [vmem:[%s21017_s3 + $0x100] sm:$0xf0]  ;;  %v11646_v0 = vld [vmem:[%s21017_s3 + $0x6f0] sm:$0xf]  ;;  %v11346_v49 = vld [vmem:[%s21017_s3 + $0x498] sm:$0xf]  ;;  %v11447_v52 = vor.u32 %v15712_v39, %v11446_v38 }
 0x11c   : > { %2068 = vmatpush.bf16.msrb.mxu1 %v11619_v13  ;;  %v11667_v13 = vor.u32 %v15767_v33, %v11666_v32  ;;  %v15687_v50 = vld [vmem:[%s21017_s3 + $0x4a8] sm:$0xf0]  ;;  %v11426_v55 = vld [vmem:[%s21017_s3 + $0x538] sm:$0xf]  ;;  %v11626_v60 = vld [vmem:[%s21017_s3 + $0x6c8] sm:$0xf] }
 0x11d   : > { %2018 = vmatmul.bf16.vlgmr.msra.gmra.mxu2 %v17800_v8  ;;  %2122 = vmatpush.bf16.msrb.mxu0 %v11623_v47  ;;  %v11831_v47 = vor.u32 %v15570_v46, %v11830_v43  ;;  %v15707_v56 = vld [vmem:[%s21017_s3 + $0x548] sm:$0xf0]  ;;  %v11347_v44 = vor.u32 %v15687_v50, %v11346_v49  ;;  %v11406_v45 = vld [vmem:[%s21017_s3 + $0x510] sm:$0xf]  ;;  %v15702_v3 = vld [vmem:[%s21017_s3 + $0x520] sm:$0xf0] }
 0x11e   : > { %v11427_v59 = vor.u32 %v15707_v56, %v11426_v55  ;;  %v11790_v5 = vld [vmem:[%s21017_s3 + $0xa0] sm:$0xf]  ;;  %v15560_v6 = vld [vmem:[%s21017_s3 + $0xb0] sm:$0xf0]  ;;  %v11407_v11 = vor.u32 %v15702_v3, %v11406_v45  ;;  %v11306_v14 = vld [vmem:[%s21017_s3 + $0x448] sm:$0xf] }
 0x11f   : > { %2154 = vmatpush.bf16.msra.mxu2 %v11547_v42  ;;  %2106 = vmatpush.bf16.msra.mxu3 %v11423_v48  ;;  %v11367_v42 = vor.u32 %v15692_v35, %v11366_v34  ;;  %v15762_v48 = vld [vmem:[%s21017_s3 + $0x700] sm:$0xf0]  ;;  %v11606_v7 = vld [vmem:[%s21017_s3 + $0x6a0] sm:$0xf]  ;;  %v11770_v40 = vld [vmem:[%s21017_s3 + $0x78] sm:$0xf] }
 0x120   : > { %2069 = vmatpush.bf16.msrb.mxu1 %v11599_v53  ;;  %v11810_v53 = vld [vmem:[%s21017_s3 + $0xc8] sm:$0xf]  ;;  %v11647_v54 = vor.u32 %v15762_v48, %v11646_v0  ;;  %v15555_v16 = vld [vmem:[%s21017_s3 + $0x88] sm:$0xf0]  ;;  %v12170_v17 = vld [vmem:[%s21017_s3 + $0x398] sm:$0xf] }
 0x121   : > { %2123 = vmatpush.bf16.msrb.mxu0 %v11603_v61  ;;  %v15757_v61 = vld [vmem:[%s21017_s3 + $0x6d8] sm:$0xf0]  ;;  %v11586_v22 = vld [vmem:[%s21017_s3 + $0x678] sm:$0xf]  ;;  %v15747_v24 = vld [vmem:[%s21017_s3 + $0x688] sm:$0xf0] }
 0x122   : > { %v11627_v63 = vor.u32 %v15757_v61, %v11626_v60  ;;  %v11286_v25 = vld [vmem:[%s21017_s3 + $0x420] sm:$0xf]  ;;  %v15672_v18 = vld [vmem:[%s21017_s3 + $0x430] sm:$0xf0]  ;;  %v11750_v26 = vld [vmem:[%s21017_s3 + $0x50] sm:$0xf] }
 0x123   : > { %2155 = vmatpush.bf16.msra.mxu2 %v11527_v57  ;;  %2107 = vmatpush.bf16.msra.mxu3 %v11403_v62  ;;  %v15565_v57 = vld [vmem:[%s21017_s3 + $0xd8] sm:$0xf0]  ;;  %v11326_v62 = vld [vmem:[%s21017_s3 + $0x470] sm:$0xf]  ;;  %v15550_v29 = vld [vmem:[%s21017_s3 + $0x60] sm:$0xf0] }
 0x124   : > { %2036 = vmatmul.bf16.vlgmr.msrb.gmra.mxu3 %v17859_v41  ;;  %2070 = vmatpush.bf16.msrb.mxu1 %v11579_v23  ;;  %v11811_v58 = vor.u32 %v15565_v57, %v11810_v53  ;;  %v15682_v23 = vld [vmem:[%s21017_s3 + $0x480] sm:$0xf0]  ;;  %v12150_v32 = vld [vmem:[%s21017_s3 + $0x370] sm:$0xf]  ;;  %v11266_v38 = vld [vmem:[%s21017_s3 + $0x3f8] sm:$0xf] }
 0x125   : > { %2124 = vmatpush.bf16.msrb.mxu0 %v11583_v9  ;;  %v11791_v9 = vor.u32 %v15560_v6, %v11790_v5  ;;  %v15650_v33 = vld [vmem:[%s21017_s3 + $0x380] sm:$0xf0]  ;;  %v11566_v34 = vld [vmem:[%s21017_s3 + $0x650] sm:$0xf]  ;;  %v15667_v39 = vld [vmem:[%s21017_s3 + $0x408] sm:$0xf0] }
 0x126   : > { %v15742_v35 = vld [vmem:[%s21017_s3 + $0x660] sm:$0xf0]  ;;  %v15545_v43 = vld [vmem:[%s21017_s3 + $0x38] sm:$0xf0]  ;;  %v12130_v46 = vld [vmem:[%s21017_s3 + $0x348] sm:$0xf]  ;;  %v11267_v48 = vor.u32 %v15667_v39, %v11266_v38 }
 0x127   : > { %2156 = vmatpush.bf16.msra.mxu2 %v11507_v4  ;;  %2172 = vmatpush.bf16.msrb.mxu3 %v11707_v2  ;;  %v11327_v4 = vor.u32 %v15682_v23, %v11326_v62  ;;  %v15752_v2 = vld [vmem:[%s21017_s3 + $0x6b0] sm:$0xf0]  ;;  %v11567_v0 = vor.u32 %v15742_v35, %v11566_v34  ;;  %v11852_v53 = vld [vmem:[%s21017_s3 + $0x12c] sm:$0xf0]  ;;  %v15662_v56 = vld [vmem:[%s21017_s3 + $0x3e0] sm:$0xf0] }
 0x128   : > { %2071 = vmatpush.bf16.msrb.mxu1 %v11559_v15  ;;  %v11607_v12 = vor.u32 %v15752_v2, %v11606_v7  ;;  %v15677_v15 = vld [vmem:[%s21017_s3 + $0x458] sm:$0xf0]  ;;  %v11710_v57 = vld [vmem:[%s21017_s3] sm:$0xf]  ;;  %v15640_v61 = vld [vmem:[%s21017_s3 + $0x330] sm:$0xf0] }
 0x129   : > { %2125 = vmatpush.bf16.msrb.mxu0 %v11563_v20  ;;  %v11307_v51 = vor.u32 %v15677_v15, %v11306_v14  ;;  %v11771_v20 = vor.u32 %v15555_v16, %v11770_v40  ;;  %v12110_v60 = vld [vmem:[%s21017_s3 + $0x320] sm:$0xf]  ;;  %v15568_v62 = vld [vmem:[%s21017_s3 + $0xf4] sm:$0xf]  ;;  %v12010_v3 = vld [vmem:[%s21017_s3 + $0x258] sm:$0xf] }
 0x12a   : > { %2000 = vmatmul.bf16.vlgmr.msra.gmra.mxu1 %v17729_v28  ;;  %2054 = vmatmul.bf16.vlgmr.msra.gmra.mxu0 %v17729_v28  ;;  %v12111_v23 = vor.u32 %v15640_v61, %v12110_v60  ;;  %v12090_v5 = vld [vmem:[%s21017_s3 + $0x2f8] sm:$0xf]  ;;  %v15635_v7 = vld [vmem:[%s21017_s3 + $0x308] sm:$0xf0]  ;;  %v12012_v2 = vld [vmem:[%s21017_s3 + $0x26c] sm:$0xf0] }
 0x12b   : > { %2157 = vmatpush.bf16.msra.mxu2 %v11487_v19  ;;  %2173 = vmatpush.bf16.msrb.mxu3 %v11687_v21  ;;  %v15655_v19 = vld [vmem:[%s21017_s3 + $0x3a8] sm:$0xf0]  ;;  %v11812_v15 = vld [vmem:[%s21017_s3 + $0xdc] sm:$0xf0]  ;;  %v11990_v40 = vld [vmem:[%s21017_s3 + $0x230] sm:$0xf] }
 0x12c   : > { %2136 = vmatpush.bf16.msra.mxu1 %v11387_v1  ;;  %v12171_v21 = vor.u32 %v15655_v19, %v12170_v17  ;;  %v11587_v1 = vor.u32 %v15747_v24, %v11586_v22  ;;  %v15563_v14 = vld [vmem:[%s21017_s3 + $0xcc] sm:$0xf]  ;;  %v15610_v16 = vld [vmem:[%s21017_s3 + $0x240] sm:$0xf0]  ;;  %v12070_v17 = vld [vmem:[%s21017_s3 + $0x2d0] sm:$0xf] }
 0x12d   : > { %2023 = vmatmul.bf16.gmra.mxu2 %v17925_v10  ;;  %2814 = vmatpush.bf16.msra.mxu0 %v11851_v31  ;;  %v11751_v31 = vor.u32 %v15550_v29, %v11750_v26  ;;  %v15630_v19 = vld [vmem:[%s21017_s3 + $0x2e0] sm:$0xf0]  ;;  %v11992_v22 = vld [vmem:[%s21017_s3 + $0x244] sm:$0xf0]  ;;  %v15605_v29 = vld [vmem:[%s21017_s3 + $0x218] sm:$0xf0] }
 0x12e   : > { %v15558_v24 = vld [vmem:[%s21017_s3 + $0xa4] sm:$0xf]  ;;  %v11970_v26 = vld [vmem:[%s21017_s3 + $0x208] sm:$0xf]  ;;  %v15553_v39 = vld [vmem:[%s21017_s3 + $0x7c] sm:$0xf] }
 0x12f   : > { %2158 = vmatpush.bf16.msra.mxu2 %v11467_v30  ;;  %2174 = vmatpush.bf16.msrb.mxu3 %v11667_v13  ;;  %v11287_v30 = vor.u32 %v15672_v18, %v11286_v25  ;;  %v12151_v13 = vor.u32 %v15650_v33, %v12150_v32  ;;  %v12071_v25 = vor.u32 %v15630_v19, %v12070_v17  ;;  %v11792_v18 = vld [vmem:[%s21017_s3 + $0xb4] sm:$0xf0]  ;;  %v15625_v32 = vld [vmem:[%s21017_s3 + $0x2b8] sm:$0xf0]  ;;  %v15603_v33 = vld [vmem:[%s21017_s3 + $0x20c] sm:$0xf] }
 0x130   : > { %2137 = vmatpush.bf16.msra.mxu1 %v11367_v42  ;;  %v11730_v42 = vld [vmem:[%s21017_s3 + $0x28] sm:$0xf]  ;;  %v11971_v34 = vor.u32 %v15605_v29, %v11970_v26  ;;  %v11858_v61 = vld [vmem:[%s21017_s3 + $0x120] sm:$0xf]  ;;  %v15585_v17 = vld [vmem:[%s21017_s3 + $0x178] sm:$0xf0] }
 0x131   : > { %2815 = vmatpush.bf16.msra.mxu0 %v11831_v47  ;;  %v15645_v47 = vld [vmem:[%s21017_s3 + $0x358] sm:$0xf0]  ;;  %v11731_v49 = vor.u32 %v15545_v43, %v11730_v42  ;;  %v11772_v42 = vld [vmem:[%s21017_s3 + $0x8c] sm:$0xf0]  ;;  %v11950_v43 = vld [vmem:[%s21017_s3 + $0x1e0] sm:$0xf] }
 0x132   : > { %v12131_v50 = vor.u32 %v15645_v47, %v12130_v46  ;;  %v11775_v46 = vor.u32 %v15553_v39, %v11772_v42  ;;  %v12030_v47 = vld [vmem:[%s21017_s3 + $0x280] sm:$0xf]  ;;  %v15616_v29 = vld [vmem:[%s21017_s3 + $0x270] sm:$0xf0]  ;;  %v11998_v39 = vld [vmem:[%s21017_s3 + $0x238] sm:$0xf] }
 0x133   : > { %2159 = vmatpush.bf16.msra.mxu2 %v11447_v52  ;;  %2175 = vmatpush.bf16.msrb.mxu3 %v11647_v54  ;;  %v15573_v52 = vld [vmem:[%s21017_s3 + $0x11c] sm:$0xf]  ;;  %v11246_v54 = vld [vmem:[%s21017_s3 + $0x3d0] sm:$0xf]  ;;  %v12018_v26 = vld [vmem:[%s21017_s3 + $0x260] sm:$0xf] }
 0x134   : > { %2041 = vmatmul.bf16.gmra.mxu3 %v17965_v27  ;;  %2138 = vmatpush.bf16.msra.mxu1 %v11347_v44  ;;  %v11855_v55 = vor.u32 %v15573_v52, %v11852_v53  ;;  %v15540_v44 = vld [vmem:[%s21017_s3 + $0x10] sm:$0xf0]  ;;  %v11952_v52 = vld [vmem:[%s21017_s3 + $0x1f4] sm:$0xf0]  ;;  %v15611_v42 = vld [vmem:[%s21017_s3 + $0x248] sm:$0xf0] }
 0x135   : > { %2816 = vmatpush.bf16.msra.mxu0 %v11811_v58  ;;  %v11247_v58 = vor.u32 %v15662_v56, %v11246_v54  ;;  %v15548_v53 = vld [vmem:[%s21017_s3 + $0x54] sm:$0xf]  ;;  %v11752_v54 = vld [vmem:[%s21017_s3 + $0x64] sm:$0xf0] }
 0x137   : > { %2160 = vmatpush.bf16.msra.mxu2 %v11427_v59  ;;  %2176 = vmatpush.bf16.msrb.mxu3 %v11627_v63  ;;  %v11711_v59 = vor.u32 %v15540_v44, %v11710_v57  ;;  %v11832_v63 = vld [vmem:[%s21017_s3 + $0x104] sm:$0xf0]  ;;  %v11755_v57 = vor.u32 %v15548_v53, %v11752_v54  ;;  %v11930_v44 = vld [vmem:[%s21017_s3 + $0x1b8] sm:$0xf]  ;;  %v15656_v53 = vld [vmem:[%s21017_s3 + $0x3b0] sm:$0xf0] }
 0x138   : > { %2139 = vmatpush.bf16.msra.mxu1 %v11327_v4  ;;  %v11835_v45 = vor.u32 %v15568_v62, %v11832_v63  ;;  %v15615_v4 = vld [vmem:[%s21017_s3 + $0x268] sm:$0xf0]  ;;  %v15576_v62 = vld [vmem:[%s21017_s3 + $0x130] sm:$0xf0]  ;;  %v11978_v54 = vld [vmem:[%s21017_s3 + $0x210] sm:$0xf] }
 0x139   : > { %2817 = vmatpush.bf16.msra.mxu0 %v11791_v9  ;;  %v12011_v6 = vor.u32 %v15615_v4, %v12010_v3  ;;  %v15613_v9 = vld [vmem:[%s21017_s3 + $0x25c] sm:$0xf]  ;;  %v11732_v3 = vld [vmem:[%s21017_s3 + $0x3c] sm:$0xf0]  ;;  %v11910_v4 = vld [vmem:[%s21017_s3 + $0x190] sm:$0xf] }
 0x13a   : > { %2005 = vmatmul.bf16.gmra.mxu1 %v17853_v37  ;;  %2059 = vmatmul.bf16.gmra.mxu0 %v17853_v37 }
 0x13b   : > { %2161 = vmatpush.bf16.msra.mxu2 %v11407_v11  ;;  %2177 = vmatpush.bf16.msrb.mxu3 %v11607_v12  ;;  %v12091_v11 = vor.u32 %v15635_v7, %v12090_v5  ;;  %v12015_v12 = vor.u32 %v15613_v9, %v12012_v2  ;;  %v15588_v7 = vld [vmem:[%s21017_s3 + $0x194] sm:$0xf]  ;;  %v11912_v9 = vld [vmem:[%s21017_s3 + $0x1a4] sm:$0xf0] }
 0x13c   : > { %2140 = vmatpush.bf16.msra.mxu1 %v11307_v51  ;;  %v11815_v51 = vor.u32 %v15563_v14, %v11812_v15  ;;  %v15538_v14 = vld [vmem:[%s21017_s3 + $0x4] sm:$0xf]  ;;  %v11915_v15 = vor.u32 %v15588_v7, %v11912_v9  ;;  %v12132_v7 = vld [vmem:[%s21017_s3 + $0x35c] sm:$0xf0]  ;;  %v11738_v9 = vld [vmem:[%s21017_s3 + $0x30] sm:$0xf] }
 0x13d   : > { %2090 = vmatmul.bf16.vlgmr.msrb.gmra.mxu2 %v17859_v41  ;;  %2818 = vmatpush.bf16.msra.mxu0 %v11771_v20  ;;  %v11991_v20 = vor.u32 %v15610_v16, %v11990_v40  ;;  %v11890_v16 = vld [vmem:[%s21017_s3 + $0x168] sm:$0xf] }
 0x13f   : > { %2850 = vmatpush.bf16.msrb.mxu2 %v12171_v21  ;;  %2178 = vmatpush.bf16.msrb.mxu3 %v11587_v1  ;;  %v15608_v21 = vld [vmem:[%s21017_s3 + $0x234] sm:$0xf] }
 0x140   : > { %2141 = vmatpush.bf16.msra.mxu1 %v11287_v30  ;;  %v11995_v1 = vor.u32 %v15608_v21, %v11992_v22  ;;  %v11795_v30 = vor.u32 %v15558_v24, %v11792_v18  ;;  %v11892_v21 = vld [vmem:[%s21017_s3 + $0x17c] sm:$0xf0]  ;;  %v11818_v22 = vld [vmem:[%s21017_s3 + $0xd0] sm:$0xf]  ;;  %v11891_v24 = vor.u32 %v15585_v17, %v11890_v16  ;;  %v16674_v16 = vld [vmem:[#allocation2 + $0x28] sm:$0xff] }
 0x141   : > { %2819 = vmatpush.bf16.msra.mxu0 %v11751_v31  ;;  %v12050_v31 = vld [vmem:[%s21017_s3 + $0x2a8] sm:$0xf] }
 0x142   : > { %v12051_v38 = vor.u32 %v15625_v32, %v12050_v31  ;;  %v12019_v31 = vor.u32 %v15616_v29, %v12018_v26  ;;  %v11870_v32 = vld [vmem:[%s21017_s3 + $0x140] sm:$0xf]  ;;  %v15641_v26 = vld [vmem:[%s21017_s3 + $0x338] sm:$0xf0] }
 0x143   : > { %2851 = vmatpush.bf16.msrb.mxu2 %v12151_v13  ;;  %2179 = vmatpush.bf16.msrb.mxu3 %v11567_v0  ;;  %v11972_v13 = vld [vmem:[%s21017_s3 + $0x21c] sm:$0xf0]  ;;  %v15600_v0 = vld [vmem:[%s21017_s3 + $0x1f0] sm:$0xf0] }
 0x144   : > { %2108 = vmatmul.bf16.vlgmr.msra.gmra.mxu3 %v17729_v28  ;;  %2142 = vmatpush.bf16.msra.mxu1 %v11267_v48  ;;  %v11975_v35 = vor.u32 %v15603_v33, %v11972_v13  ;;  %v15620_v48 = vld [vmem:[%s21017_s3 + $0x290] sm:$0xf0]  ;;  %v15561_v13 = vld [vmem:[%s21017_s3 + $0xb8] sm:$0xf0] }
 0x145   : > { %2820 = vmatpush.bf16.msra.mxu0 %v11731_v49  ;;  %v11951_v49 = vor.u32 %v15600_v0, %v11950_v43  ;;  %v15580_v33 = vld [vmem:[%s21017_s3 + $0x150] sm:$0xf0]  ;;  %v15653_v43 = vld [vmem:[%s21017_s3 + $0x39c] sm:$0xf]  ;;  %v12172_v0 = vld [vmem:[%s21017_s3 + $0x3ac] sm:$0xf0] }
 0x147   : > { %2852 = vmatpush.bf16.msrb.mxu2 %v12131_v50  ;;  %2868 = vmatpush.bf16.msra.mxu3 %v11855_v55  ;;  %v15598_v50 = vld [vmem:[%s21017_s3 + $0x1e4] sm:$0xf]  ;;  %v12031_v55 = vor.u32 %v15620_v48, %v12030_v47  ;;  %v11778_v47 = vld [vmem:[%s21017_s3 + $0x80] sm:$0xf]  ;;  %v15556_v48 = vld [vmem:[%s21017_s3 + $0x90] sm:$0xf0] }
 0x148   : > { %2143 = vmatpush.bf16.msra.mxu1 %v11247_v58  ;;  %v11955_v56 = vor.u32 %v15598_v50, %v11952_v52  ;;  %v15595_v58 = vld [vmem:[%s21017_s3 + $0x1c8] sm:$0xf0]  ;;  %v11779_v50 = vor.u32 %v15556_v48, %v11778_v47  ;;  %v12178_v52 = vld [vmem:[%s21017_s3 + $0x3a0] sm:$0xf]  ;;  %v15628_v48 = vld [vmem:[%s21017_s3 + $0x2d4] sm:$0xf] }
 0x149   : > { %2821 = vmatpush.bf16.msra.mxu0 %v11711_v59  ;;  %v15593_v59 = vld [vmem:[%s21017_s3 + $0x1bc] sm:$0xf]  ;;  %v11931_v60 = vor.u32 %v15595_v58, %v11930_v44  ;;  %v15648_v44 = vld [vmem:[%s21017_s3 + $0x374] sm:$0xf]  ;;  %v12152_v58 = vld [vmem:[%s21017_s3 + $0x384] sm:$0xf0] }
 0x14a   : > { %2072 = vmatmul.bf16.vlgmr.msrb.gmra.mxu1 %v17800_v8  ;;  %2126 = vmatmul.bf16.vlgmr.msrb.gmra.mxu0 %v17800_v8 }
 0x14b   : > { %2853 = vmatpush.bf16.msrb.mxu2 %v12111_v23  ;;  %2869 = vmatpush.bf16.msra.mxu3 %v11835_v45  ;;  %v11859_v23 = vor.u32 %v15576_v62, %v11858_v61  ;;  %v15543_v45 = vld [vmem:[%s21017_s3 + $0x2c] sm:$0xf]  ;;  %v12158_v62 = vld [vmem:[%s21017_s3 + $0x378] sm:$0xf] }
 0x14c   : > { %2832 = vmatpush.bf16.msrb.mxu1 %v12011_v6  ;;  %v11735_v5 = vor.u32 %v15543_v45, %v11732_v3  ;;  %v15590_v6 = vld [vmem:[%s21017_s3 + $0x1a0] sm:$0xf0]  ;;  %v15551_v61 = vld [vmem:[%s21017_s3 + $0x68] sm:$0xf0] }
 0x14d   : > { %2095 = vmatmul.bf16.gmra.mxu2 %v17965_v27  ;;  %2886 = vmatpush.bf16.msrb.mxu0 %v12015_v12  ;;  %v11911_v2 = vor.u32 %v15590_v6, %v11910_v4  ;;  %v15571_v12 = vld [vmem:[%s21017_s3 + $0x108] sm:$0xf0]  ;;  %v15601_v4 = vld [vmem:[%s21017_s3 + $0x1f8] sm:$0xf0] }
 0x14f   : > { %2854 = vmatpush.bf16.msrb.mxu2 %v12091_v11  ;;  %2870 = vmatpush.bf16.msra.mxu3 %v11815_v51  ;;  %v11838_v11 = vld [vmem:[%s21017_s3 + $0xf8] sm:$0xf] }
 0x150   : > { %2833 = vmatpush.bf16.msrb.mxu1 %v11991_v20  ;;  %v11839_v40 = vor.u32 %v15571_v12, %v11838_v11  ;;  %v11712_v51 = vld [vmem:[%s21017_s3 + $0x14] sm:$0xf0]  ;;  %v15583_v20 = vld [vmem:[%s21017_s3 + $0x16c] sm:$0xf]  ;;  %v12138_v12 = vld [vmem:[%s21017_s3 + $0x350] sm:$0xf] }
 0x151   : > { %2887 = vmatpush.bf16.msrb.mxu0 %v11995_v1  ;;  %v11715_v19 = vor.u32 %v15538_v14, %v11712_v51  ;;  %v11895_v18 = vor.u32 %v15583_v20, %v11892_v21  ;;  %v15646_v14 = vld [vmem:[%s21017_s3 + $0x360] sm:$0xf0]  ;;  %v15596_v51 = vld [vmem:[%s21017_s3 + $0x1d0] sm:$0xf0] }
 0x153   : > { %2855 = vmatpush.bf16.msrb.mxu2 %v12071_v25  ;;  %2871 = vmatpush.bf16.msra.mxu3 %v11795_v30  ;;  %v15566_v25 = vld [vmem:[%s21017_s3 + $0xe0] sm:$0xf0] }
 0x154   : > { %2113 = vmatmul.bf16.gmra.mxu3 %v17853_v37  ;;  %2834 = vmatpush.bf16.msrb.mxu1 %v11971_v34  ;;  %v11819_v1 = vor.u32 %v15566_v25, %v11818_v22  ;;  %v931_v30 = vld [vmem:[#allocation2] sm:$0xff]  ;;  %v11718_v25 = vld [vmem:[%s21017_s3 + $0x8] sm:$0xf] }
 0x155   : > { %2888 = vmatpush.bf16.msrb.mxu0 %v11975_v35  ;;  %v15578_v34 = vld [vmem:[%s21017_s3 + $0x144] sm:$0xf] }
 0x156   : > { %v15638_v22 = vld [vmem:[%s21017_s3 + $0x324] sm:$0xf] }
 0x157   : > { %2856 = vmatpush.bf16.msrb.mxu2 %v12051_v38  ;;  %2872 = vmatpush.bf16.msra.mxu3 %v11775_v46  ;;  %v11999_v46 = vor.u32 %v15611_v42, %v11998_v39  ;;  %v12020_v39 = vld [vmem:[%s21017_s3 + $0x274] sm:$0xf0]  ;;  %v11898_v42 = vld [vmem:[%s21017_s3 + $0x170] sm:$0xf] }
 0x158   : > { %2835 = vmatpush.bf16.msrb.mxu1 %v11951_v49  ;;  %v12175_v49 = vor.u32 %v15653_v43, %v12172_v0 }
 0x159   : > { %2889 = vmatpush.bf16.msrb.mxu0 %v11955_v56  ;;  %v15606_v56 = vld [vmem:[%s21017_s3 + $0x220] sm:$0xf0] }
 0x15a   : > { %2077 = vmatmul.bf16.gmra.mxu1 %v17925_v10  ;;  %2131 = vmatmul.bf16.gmra.mxu0 %v17925_v10 }
 0x15b   : > { %2857 = vmatpush.bf16.msrb.mxu2 %v12031_v55  ;;  %2873 = vmatpush.bf16.msra.mxu3 %v11755_v57  ;;  %v12179_v55 = vor.u32 %v15656_v53, %v12178_v52  ;;  %v11979_v57 = vor.u32 %v15606_v56, %v11978_v54  ;;  %v15631_v53 = vld [vmem:[%s21017_s3 + $0x2e8] sm:$0xf0]  ;;  %v15609_v54 = vld [vmem:[%s21017_s3 + $0x23c] sm:$0xf] }
 0x15c   : > { %2836 = vmatpush.bf16.msrb.mxu1 %v11931_v60  ;;  %v933_v60 = vld [vmem:[#allocation2 + $0x10] sm:$0xff] }
 0x15d   : > { %2162 = vmatmul.bf16.vlgmr.msra.gmra.mxu2 %v17729_v28  ;;  %v11932_v28 = vld [vmem:[%s21017_s3 + $0x1cc] sm:$0xf0]  ;;  %v18546_v17 = vpack.c.bf16 %v16674_v16, %v933_v60  ;;  %v939_v60 = vld [vmem:[#allocation2 + $0x40] sm:$0x1] }
 0x15e   : > { %v11935_v63 = vor.u32 %v15593_v59, %v11932_v28  ;;  %v11758_v59 = vld [vmem:[%s21017_s3 + $0x58] sm:$0xf]  ;;  %v12155_v28 = vor.u32 %v15648_v44, %v12152_v58  ;;  %v15581_v44 = vld [vmem:[%s21017_s3 + $0x158] sm:$0xf0]  ;;  %v15623_v58 = vld [vmem:[%s21017_s3 + $0x2ac] sm:$0xf] }
 0x15f   : > { %2922 = vmatpush.bf16.msra.mxu2 %v11859_v23  ;;  %2874 = vmatpush.bf16.msra.mxu3 %v11735_v5  ;;  %v937_v23 = vld [vmem:[#allocation2 + $0x30] sm:$0x1]  ;;  %v11759_v45 = vor.u32 %v15551_v61, %v11758_v59  ;;  %v15643_v5 = vld [vmem:[%s21017_s3 + $0x34c] sm:$0xf] }
 0x160   : > { %2890 = vmatpush.bf16.msrb.mxu0 %v11935_v63  ;;  %2837 = vmatpush.bf16.msrb.mxu1 %v11911_v2  ;;  %v15651_v63 = vld [vmem:[%s21017_s3 + $0x388] sm:$0xf0]  ;;  %v15546_v2 = vld [vmem:[%s21017_s3 + $0x40] sm:$0xf0]  ;;  %v12135_v11 = vor.u32 %v15643_v5, %v12132_v7  ;;  %v18548_v21 = vpack.c.bf16 %v937_v23, %v937_v23  ;;  %v15604_v23 = vld [vmem:[%s21017_s3 + $0x214] sm:$0xf] }
 0x161   : > { %v12159_v3 = vor.u32 %v15651_v63, %v12158_v62  ;;  %v932_v59 = vld [vmem:[#allocation2 + $0x8] sm:$0xff]  ;;  %v12058_v63 = vld [vmem:[%s21017_s3 + $0x2b0] sm:$0xf]  ;;  %v12180_v7 = vld [vmem:[%s21017_s3 + $0x3b4] sm:$0xf0] }
 0x163   : > { %2923 = vmatpush.bf16.msra.mxu2 %v11839_v40  ;;  %2875 = vmatpush.bf16.msra.mxu3 %v11715_v19  ;;  %v11739_v40 = vor.u32 %v15546_v2, %v11738_v9  ;;  %v12139_v19 = vor.u32 %v15646_v14, %v12138_v12 }
 0x164   : > { %2180 = vmatmul.bf16.vlgmr.msrb.gmra.mxu3 %v17800_v8  ;;  %2891 = vmatpush.bf16.msrb.mxu0 %v11915_v15  ;;  %v18444_v8 = vpack.c.bf16 %v17745_v36, %v931_v30  ;;  %v11871_v36 = vor.u32 %v15580_v33, %v11870_v32  ;;  %v11938_v15 = vld [vmem:[%s21017_s3 + $0x1c0] sm:$0xf]  ;;  %v15591_v32 = vld [vmem:[%s21017_s3 + $0x1a8] sm:$0xf0]  ;;  %v15633_v33 = vld [vmem:[%s21017_s3 + $0x2fc] sm:$0xf] }
 0x165   : > { %2838 = vmatpush.bf16.msrb.mxu1 %v11891_v24  ;;  %v11939_v20 = vor.u32 %v15596_v51, %v11938_v15  ;;  %v12112_v24 = vld [vmem:[%s21017_s3 + $0x334] sm:$0xf0]  ;;  %v18654_v51 = vpack.c.bf16 %v939_v60, %v939_v60 }
 0x167   : > { %2924 = vmatpush.bf16.msra.mxu2 %v11819_v1  ;;  %2940 = vmatpush.bf16.msrb.mxu3 %v12019_v31  ;;  %v12115_v1 = vor.u32 %v15638_v22, %v12112_v24  ;;  %v11918_v31 = vld [vmem:[%s21017_s3 + $0x198] sm:$0xf]  ;;  %v12038_v22 = vld [vmem:[%s21017_s3 + $0x288] sm:$0xf] }
 0x168   : > { %2892 = vmatpush.bf16.msrb.mxu0 %v11895_v18  ;;  %v12118_v18 = vld [vmem:[%s21017_s3 + $0x328] sm:$0xf] }
 0x169   : > { %2839 = vmatpush.bf16.msrb.mxu1 %v11871_v36  ;;  %v12119_v30 = vor.u32 %v15641_v26, %v12118_v18  ;;  %v11919_v36 = vor.u32 %v15591_v32, %v11918_v31  ;;  %v11960_v18 = vld [vmem:[%s21017_s3 + $0x1fc] sm:$0xf0]  ;;  %v15574_v31 = vld [vmem:[%s21017_s3 + $0x124] sm:$0xf] }
 0x16a   : > { %2144 = vmatmul.bf16.vlgmr.msra.gmra.mxu1 %v17859_v41  ;;  %2822 = vmatmul.bf16.vlgmr.msra.gmra.mxu0 %v18444_v8  ;;  %v11872_v41 = vld [vmem:[%s21017_s3 + $0x154] sm:$0xf0] }
 0x16b   : > { %v11875_v35 = vor.u32 %v15578_v34, %v11872_v41  ;;  %2941 = vmatpush.bf16.msrb.mxu3 %v11999_v46  ;;  %v12092_v41 = vld [vmem:[%s21017_s3 + $0x30c] sm:$0xf0]  ;;  %v15586_v46 = vld [vmem:[%s21017_s3 + $0x180] sm:$0xf0] }
 0x16c   : > { %v11899_v47 = vor.u32 %v15586_v46, %v11898_v42  ;;  %v15644_v42 = vld [vmem:[%s21017_s3 + $0x354] sm:$0xf] }
 0x16d   : > { %2167 = vmatmul.bf16.gmra.mxu2 %v17853_v37  ;;  %v11798_v37 = vld [vmem:[%s21017_s3 + $0xa8] sm:$0xf]  ;;  %2893 = vmatpush.bf16.msrb.mxu0 %v11875_v35  ;;  %v12095_v35 = vor.u32 %v15633_v33, %v12092_v41  ;;  %v11940_v41 = vld [vmem:[%s21017_s3 + $0x1d4] sm:$0xf0] }
 0x16e   : > { %v11799_v38 = vor.u32 %v15561_v13, %v11798_v37  ;;  %2904 = vmatpush.bf16.msra.mxu1 %v12175_v49  ;;  %v12098_v37 = vld [vmem:[%s21017_s3 + $0x300] sm:$0xf]  ;;  %v15636_v13 = vld [vmem:[%s21017_s3 + $0x310] sm:$0xf0]  ;;  %v12072_v49 = vld [vmem:[%s21017_s3 + $0x2e4] sm:$0xf0] }
 0x16f   : > { %2942 = vmatpush.bf16.msrb.mxu3 %v11979_v57  ;;  %v12099_v0 = vor.u32 %v15636_v13, %v12098_v37  ;;  %v12075_v52 = vor.u32 %v15628_v48, %v12072_v49  ;;  %v11878_v57 = vld [vmem:[%s21017_s3 + $0x148] sm:$0xf] }
 0x170   : > { %2925 = vmatpush.bf16.msra.mxu2 %v11799_v38  ;;  %v15614_v38 = vld [vmem:[%s21017_s3 + $0x264] sm:$0xf]  ;;  %v11879_v62 = vor.u32 %v15581_v44, %v11878_v57  ;;  %v11920_v57 = vld [vmem:[%s21017_s3 + $0x1ac] sm:$0xf0]  ;;  %v11846_v44 = vld [vmem:[%s21017_s3 + $0x100] sm:$0xf] }
 0x171   : > { %2958 = vmatpush.bf16.msra.mxu0 %v12179_v55  ;;  %v12023_v43 = vor.u32 %v15614_v38, %v12020_v39  ;;  %v12000_v55 = vld [vmem:[%s21017_s3 + $0x24c] sm:$0xf0]  ;;  %v11866_v38 = vld [vmem:[%s21017_s3 + $0x128] sm:$0xf]  ;;  %v15577_v39 = vld [vmem:[%s21017_s3 + $0x138] sm:$0xf0] }
 0x172   : > { %2905 = vmatpush.bf16.msra.mxu1 %v12155_v28  ;;  %v12003_v56 = vor.u32 %v15609_v54, %v12000_v55  ;;  %v12052_v28 = vld [vmem:[%s21017_s3 + $0x2bc] sm:$0xf0]  ;;  %v11867_v46 = vor.u32 %v15577_v39, %v11866_v38  ;;  %v15589_v54 = vld [vmem:[%s21017_s3 + $0x19c] sm:$0xf]  ;;  %v11786_v38 = vld [vmem:[%s21017_s3 + $0x88] sm:$0xf] }
 0x173   : > { %v11923_v60 = vor.u32 %v15589_v54, %v11920_v57  ;;  %v15557_v39 = vld [vmem:[%s21017_s3 + $0x98] sm:$0xf0] }
 0x174   : > { %2926 = vmatpush.bf16.msra.mxu2 %v11779_v50  ;;  %2185 = vmatmul.bf16.gmra.mxu3 %v17925_v10  ;;  %v11958_v10 = vld [vmem:[%s21017_s3 + $0x1e8] sm:$0xf]  ;;  %v12078_v50 = vld [vmem:[%s21017_s3 + $0x2d8] sm:$0xf] }
 0x175   : > { %v11959_v6 = vor.u32 %v15601_v4, %v11958_v10  ;;  %2959 = vmatpush.bf16.msra.mxu0 %v12159_v3  ;;  %v12079_v61 = vor.u32 %v15631_v53, %v12078_v50  ;;  %v12055_v10 = vor.u32 %v15623_v58, %v12052_v28  ;;  %v15626_v4 = vld [vmem:[%s21017_s3 + $0x2c0] sm:$0xf0]  ;;  %v11840_v53 = vld [vmem:[%s21017_s3 + $0x10c] sm:$0xf0]  ;;  %v15572_v58 = vld [vmem:[%s21017_s3 + $0x110] sm:$0xf0] }
 0x176   : > { %2906 = vmatpush.bf16.msra.mxu1 %v12135_v11  ;;  %v16675_v11 = vld [vmem:[#allocation2 + $0x20] sm:$0xff]  ;;  %v12059_v16 = vor.u32 %v15626_v4, %v12058_v63  ;;  %v11847_v28 = vor.u32 %v15572_v58, %v11846_v44  ;;  %v15564_v63 = vld [vmem:[%s21017_s3 + $0xd4] sm:$0xf]  ;;  %v15549_v44 = vld [vmem:[%s21017_s3 + $0x5c] sm:$0xf] }
 0x177   : > { %2943 = vmatpush.bf16.msrb.mxu3 %v11959_v6  ;;  %v15654_v6 = vld [vmem:[%s21017_s3 + $0x3a4] sm:$0xf]  ;;  %v18650_v12 = vpack.c.bf16 %v16675_v11, %v932_v59  ;;  %v938_v59 = vld [vmem:[#allocation2 + $0x38] sm:$0x1]  ;;  %v11760_v58 = vld [vmem:[%s21017_s3 + $0x6c] sm:$0xf0] }
 0x178   : > { %2927 = vmatpush.bf16.msra.mxu2 %v11759_v45  ;;  %v11980_v45 = vld [vmem:[%s21017_s3 + $0x224] sm:$0xf0]  ;;  %v12183_v14 = vor.u32 %v15654_v6, %v12180_v7  ;;  %v11826_v7 = vld [vmem:[%s21017_s3 + $0xd8] sm:$0xf] }
 0x179   : > { %2960 = vmatpush.bf16.msra.mxu0 %v12139_v19  ;;  %v11983_v5 = vor.u32 %v15604_v23, %v11980_v45  ;;  %v15618_v19 = vld [vmem:[%s21017_s3 + $0x284] sm:$0xf]  ;;  %v11820_v45 = vld [vmem:[%s21017_s3 + $0xe4] sm:$0xf0] }
 0x17a   : > { %2149 = vmatmul.bf16.gmra.mxu1 %v17965_v27  ;;  %2827 = vmatmul.bf16.gmra.mxu0 %v18548_v21  ;;  %v15541_v27 = vld [vmem:[%s21017_s3 + $0x18] sm:$0xf0] }
 0x17b   : > { %2944 = vmatpush.bf16.msrb.mxu3 %v11939_v20  ;;  %v11719_v29 = vor.u32 %v15541_v27, %v11718_v25  ;;  %2907 = vmatpush.bf16.msra.mxu1 %v12115_v1  ;;  %v12032_v20 = vld [vmem:[%s21017_s3 + $0x294] sm:$0xf0]  ;;  %v15621_v1 = vld [vmem:[%s21017_s3 + $0x298] sm:$0xf0]  ;;  %v15599_v27 = vld [vmem:[%s21017_s3 + $0x1ec] sm:$0xf] }
 0x17c   : > { %2928 = vmatpush.bf16.msra.mxu2 %v11739_v40  ;;  %v12035_v25 = vor.u32 %v15618_v19, %v12032_v20  ;;  %v11963_v26 = vor.u32 %v15599_v27, %v11960_v18  ;;  %v12039_v32 = vor.u32 %v15621_v1, %v12038_v22  ;;  %v18764_v22 = vpack.c.bf16 %v938_v59, %v938_v59  ;;  %v15559_v1 = vld [vmem:[%s21017_s3 + $0xac] sm:$0xf]  ;;  %v11800_v27 = vld [vmem:[%s21017_s3 + $0xbc] sm:$0xf0] }
 0x17d   : > { %2858 = vmatmul.bf16.vlgmr.msrb.gmra.mxu2 %v18546_v17  ;;  %2961 = vmatpush.bf16.msra.mxu0 %v12119_v30  ;;  %v12160_v30 = vld [vmem:[%s21017_s3 + $0x38c] sm:$0xf0]  ;;  %v15579_v18 = vld [vmem:[%s21017_s3 + $0x14c] sm:$0xf]  ;;  %v11766_v59 = vld [vmem:[%s21017_s3 + $0x60] sm:$0xf] }
 0x17f   : > { %2945 = vmatpush.bf16.msrb.mxu3 %v11919_v36  ;;  %2908 = vmatpush.bf16.msra.mxu1 %v12095_v35  ;;  %v15594_v36 = vld [vmem:[%s21017_s3 + $0x1c4] sm:$0xf] }
 0x180   : > { %v1947_v34 = vpop.f32.mrf.mxu2  ;;  %2929 = vmatpush.bf16.msra.mxu2 %v11719_v29  ;;  %v15649_v29 = vld [vmem:[%s21017_s3 + $0x37c] sm:$0xf]  ;;  %v11943_v35 = vor.u32 %v15594_v36, %v11940_v41  ;;  %v12080_v41 = vld [vmem:[%s21017_s3 + $0x2ec] sm:$0xf0] }
 0x181   : > { %2962 = vmatpush.bf16.msra.mxu0 %v12099_v0  ;;  %v12163_v33 = vor.u32 %v15649_v29, %v12160_v30  ;;  %v12140_v0 = vld [vmem:[%s21017_s3 + $0x364] sm:$0xf0]  ;;  %v11803_v29 = vor.u32 %v15559_v1, %v11800_v27  ;;  %v11880_v30 = vld [vmem:[%s21017_s3 + $0x15c] sm:$0xf0]  ;;  %v15629_v36 = vld [vmem:[%s21017_s3 + $0x2dc] sm:$0xf] }
 0x182   : > { %v12143_v50 = vor.u32 %v15644_v42, %v12140_v0  ;;  %v12186_v0 = vld [vmem:[%s21017_s3 + $0x3a8] sm:$0xf] }
 0x183   : > { %2946 = vmatpush.bf16.msrb.mxu3 %v11899_v47  ;;  %2909 = vmatpush.bf16.msra.mxu1 %v12075_v52  ;;  %v15569_v52 = vld [vmem:[%s21017_s3 + $0xfc] sm:$0xf] }
 0x184   : > { %2994 = vmatpush.bf16.msrb.mxu2 %v12023_v43  ;;  %2876 = vmatmul.bf16.vlgmr.msra.gmra.mxu3 %v18444_v8 }
 0x185   : > { %2963 = vmatpush.bf16.msra.mxu0 %v12079_v61  ;;  %v15639_v61 = vld [vmem:[%s21017_s3 + $0x32c] sm:$0xf] }
 0x187   : > { %v1965_v9 = vpop.f32.mrf.mxu3  ;;  %v1929_v2 = vpop.f32.mrf.mxu1  ;;  %2947 = vmatpush.bf16.msrb.mxu3 %v11879_v62  ;;  %2910 = vmatpush.bf16.msra.mxu1 %v12055_v10  ;;  %v12120_v62 = vld [vmem:[%s21017_s3 + $0x33c] sm:$0xf0]  ;;  %v11900_v10 = vld [vmem:[%s21017_s3 + $0x184] sm:$0xf0] }
 0x188   : > { %v1949_v3 = vpop.f32.mrf.mxu2  ;;  %2995 = vmatpush.bf16.msrb.mxu2 %v12003_v56  ;;  %v1948_v15 = vadd.f32 %v1947_v34, %v1929_v2  ;;  %v18652_v40 = vpop.f32.mrf.mxu0  ;;  %v11860_v34 = vld [vmem:[%s21017_s3 + $0x134] sm:$0xf0]  ;;  %v11843_v56 = vor.u32 %v15569_v52, %v11840_v53  ;;  %v12123_v23 = vor.u32 %v15639_v61, %v12120_v62  ;;  %v15634_v2 = vld [vmem:[%s21017_s3 + $0x304] sm:$0xf]  ;;  %v12060_v53 = vld [vmem:[%s21017_s3 + $0x2c4] sm:$0xf0] }
 0x189   : > { %2964 = vmatpush.bf16.msra.mxu0 %v12059_v16  ;;  %v11863_v13 = vor.u32 %v15574_v31, %v11860_v34  ;;  %v11806_v31 = vld [vmem:[%s21017_s3 + $0xb0] sm:$0xf]  ;;  %v12166_v61 = vld [vmem:[%s21017_s3 + $0x380] sm:$0xf]  ;;  %v15652_v62 = vld [vmem:[%s21017_s3 + $0x390] sm:$0xf0] }
 0x18a   : > { %v18665_v24 = vadd.f32 %v1965_v9, %v1948_v15  ;;  %2840 = vmatmul.bf16.vlgmr.msrb.gmra.mxu1 %v18650_v12  ;;  %2894 = vmatmul.bf16.vlgmr.msrb.gmra.mxu0 %v18650_v12  ;;  %v15567_v9 = vld [vmem:[%s21017_s3 + $0xe8] sm:$0xf0]  ;;  %v12100_v15 = vld [vmem:[%s21017_s3 + $0x314] sm:$0xf0] }
 0x18b   : > { %3012 = vmatpush.bf16.msra.mxu3 %v12183_v14  ;;  %2911 = vmatpush.bf16.msra.mxu1 %v12035_v25  ;;  %v11827_v14 = vor.u32 %v15567_v9, %v11826_v7  ;;  %v12103_v25 = vor.u32 %v15634_v2, %v12100_v15  ;;  %v12146_v2 = vld [vmem:[%s21017_s3 + $0x358] sm:$0xf] }
 0x18c   : > { %2996 = vmatpush.bf16.msrb.mxu2 %v11983_v5  ;;  %v11823_v5 = vor.u32 %v15564_v63, %v11820_v45  ;;  %v15619_v45 = vld [vmem:[%s21017_s3 + $0x28c] sm:$0xf] }
 0x18d   : > { %2863 = vmatmul.bf16.gmra.mxu2 %v18654_v51  ;;  %2965 = vmatpush.bf16.msra.mxu0 %v12039_v32  ;;  %v15562_v32 = vld [vmem:[%s21017_s3 + $0xc0] sm:$0xf0] }
 0x18e   : > { %v11807_v34 = vor.u32 %v15562_v32, %v11806_v31  ;;  %v11726_v31 = vld [vmem:[%s21017_s3 + $0x10] sm:$0xf]  ;;  %v15542_v32 = vld [vmem:[%s21017_s3 + $0x20] sm:$0xf0] }
 0x18f   : > { %v1967_v43 = vpop.f32.mrf.mxu3  ;;  %v1931_v47 = vpop.f32.mrf.mxu1  ;;  %3013 = vmatpush.bf16.msra.mxu3 %v12163_v33  ;;  %2976 = vmatpush.bf16.msrb.mxu1 %v11863_v13  ;;  %v11883_v33 = vor.u32 %v15579_v18, %v11880_v30  ;;  %v12083_v13 = vor.u32 %v15629_v36, %v12080_v41  ;;  %v11720_v30 = vld [vmem:[%s21017_s3 + $0x1c] sm:$0xf0]  ;;  %v11727_v41 = vor.u32 %v15542_v32, %v11726_v31  ;;  %v15587_v32 = vld [vmem:[%s21017_s3 + $0x188] sm:$0xf0] }
 0x190   : > { %v1952_v37 = vpop.f32.mrf.mxu2  ;;  %2997 = vmatpush.bf16.msrb.mxu2 %v11963_v26  ;;  %v1950_v48 = vadd.f32 %v1949_v3, %v1931_v47  ;;  %v18709_v49 = vpop.f32.mrf.mxu0  ;;  %v15584_v3 = vld [vmem:[%s21017_s3 + $0x174] sm:$0xf]  ;;  %v15657_v47 = vld [vmem:[%s21017_s3 + $0x3b8] sm:$0xf0] }
 0x191   : > { %3030 = vmatpush.bf16.msrb.mxu0 %v11867_v46  ;;  %v11903_v6 = vor.u32 %v15584_v3, %v11900_v10  ;;  %v11787_v46 = vor.u32 %v15557_v39, %v11786_v38  ;;  %v12187_v52 = vor.u32 %v15657_v47, %v12186_v0  ;;  %v12040_v3 = vld [vmem:[%s21017_s3 + $0x29c] sm:$0xf0]  ;;  %v15544_v10 = vld [vmem:[%s21017_s3 + $0x34] sm:$0xf]  ;;  %v12106_v38 = vld [vmem:[%s21017_s3 + $0x308] sm:$0xf] }
 0x192   : > { %v18720_v55 = vadd.f32 %v1967_v43, %v1950_v48  ;;  %v15624_v48 = vld [vmem:[%s21017_s3 + $0x2b4] sm:$0xf]  ;;  %v12043_v7 = vor.u32 %v15619_v45, %v12040_v3 }
 0x193   : > { %3014 = vmatpush.bf16.msra.mxu3 %v12143_v50  ;;  %2977 = vmatpush.bf16.msrb.mxu1 %v11843_v56  ;;  %v12063_v57 = vor.u32 %v15624_v48, %v12060_v53  ;;  %v15612_v53 = vld [vmem:[%s21017_s3 + $0x250] sm:$0xf0] }
 0x194   : > { %2998 = vmatpush.bf16.msrb.mxu2 %v11943_v35  ;;  %2881 = vmatmul.bf16.gmra.mxu3 %v18548_v21  ;;  %v11780_v35 = vld [vmem:[%s21017_s3 + $0x94] sm:$0xf0] }
 0x195   : > { %3031 = vmatpush.bf16.msrb.mxu0 %v11847_v28  ;;  %v15552_v28 = vld [vmem:[%s21017_s3 + $0x70] sm:$0xf0] }
 0x196   : > { %v11767_v63 = vor.u32 %v15552_v28, %v11766_v59  ;;  %v15627_v28 = vld [vmem:[%s21017_s3 + $0x2c8] sm:$0xf0] }
 0x197   : > { %v1970_v11 = vpop.f32.mrf.mxu3  ;;  %v1934_v16 = vpop.f32.mrf.mxu1  ;;  %3015 = vmatpush.bf16.msra.mxu3 %v12123_v23  ;;  %2978 = vmatpush.bf16.msrb.mxu1 %v11823_v5  ;;  %v12167_v23 = vor.u32 %v15652_v62, %v12166_v61  ;;  %v11746_v5 = vld [vmem:[%s21017_s3 + $0x38] sm:$0xf] }
 0x198   : > { %v1954_v4 = vpop.f32.mrf.mxu2  ;;  %2999 = vmatpush.bf16.msrb.mxu2 %v11923_v60  ;;  %v1953_v19 = vadd.f32 %v1952_v37, %v1934_v16  ;;  %v18762_v20 = vpop.f32.mrf.mxu0  ;;  %v15554_v37 = vld [vmem:[%s21017_s3 + $0x84] sm:$0xf]  ;;  %v11763_v60 = vor.u32 %v15549_v44, %v11760_v58  ;;  %v15607_v44 = vld [vmem:[%s21017_s3 + $0x228] sm:$0xf0] }
 0x199   : > { %3032 = vmatpush.bf16.msrb.mxu0 %v11827_v14  ;;  %v11783_v43 = vor.u32 %v15554_v37, %v11780_v35  ;;  %v11740_v4 = vld [vmem:[%s21017_s3 + $0x44] sm:$0xf0]  ;;  %v15617_v35 = vld [vmem:[%s21017_s3 + $0x278] sm:$0xf0] }
 0x19a   : > { %v18775_v26 = vadd.f32 %v1970_v11, %v1953_v19  ;;  %2845 = vmatmul.bf16.gmra.mxu1 %v18764_v22  ;;  %2899 = vmatmul.bf16.gmra.mxu0 %v18764_v22  ;;  %v11743_v9 = vor.u32 %v15544_v10, %v11740_v4  ;;  %v15647_v11 = vld [vmem:[%s21017_s3 + $0x368] sm:$0xf0] }
 0x19b   : > { %3016 = vmatpush.bf16.msra.mxu3 %v12103_v25  ;;  %2979 = vmatpush.bf16.msrb.mxu1 %v11803_v29  ;;  %v12147_v16 = vor.u32 %v15647_v11, %v12146_v2  ;;  %v15539_v29 = vld [vmem:[%s21017_s3 + $0xc] sm:$0xf] }
 0x19c   : > { %3000 = vmatpush.bf16.msrb.mxu2 %v11903_v6  ;;  %v15547_v6 = vld [vmem:[%s21017_s3 + $0x48] sm:$0xf0] }
 0x19d   : > { %2930 = vmatmul.bf16.vlgmr.msra.gmra.mxu2 %v18444_v8  ;;  %3033 = vmatpush.bf16.msrb.mxu0 %v11807_v34  ;;  %v11747_v15 = vor.u32 %v15547_v6, %v11746_v5  ;;  %v15642_v34 = vld [vmem:[%s21017_s3 + $0x340] sm:$0xf0]  ;;  %v11966_v5 = vld [vmem:[%s21017_s3 + $0x1f0] sm:$0xf] }
 0x19e   : > { %v15602_v6 = vld [vmem:[%s21017_s3 + $0x200] sm:$0xf0] }
 0x19f   : > { %v1972_v50 = vpop.f32.mrf.mxu3  ;;  %v1936_v54 = vpop.f32.mrf.mxu1  ;;  %3017 = vmatpush.bf16.msra.mxu3 %v12083_v13  ;;  %2980 = vmatpush.bf16.msrb.mxu1 %v11783_v43  ;;  %v12026_v13 = vld [vmem:[%s21017_s3 + $0x268] sm:$0xf] }
 0x1a0   : > { %v18807_v42 = vpop.f32.mrf.mxu2  ;;  %3001 = vmatpush.bf16.msrb.mxu2 %v11883_v33  ;;  %v1990_v56 = vpop.f32.mrf.mxu0  ;;  %v12126_v33 = vld [vmem:[%s21017_s3 + $0x330] sm:$0xf]  ;;  %v12027_v39 = vor.u32 %v15617_v35, %v12026_v13  ;;  %v12086_v54 = vld [vmem:[%s21017_s3 + $0x2e0] sm:$0xf] }
 0x1a1   : > { %3034 = vmatpush.bf16.msrb.mxu0 %v11787_v46  ;;  %v12127_v37 = vor.u32 %v15642_v34, %v12126_v33 }
 0x1a3   : > { %3018 = vmatpush.bf16.msra.mxu3 %v12063_v57  ;;  %2981 = vmatpush.bf16.msrb.mxu1 %v11763_v60  ;;  %v11986_v57 = vld [vmem:[%s21017_s3 + $0x218] sm:$0xf] }
 0x1a4   : > { %3066 = vmatpush.bf16.msra.mxu2 %v12187_v52  ;;  %2948 = vmatmul.bf16.vlgmr.msrb.gmra.mxu3 %v18650_v12  ;;  %v12006_v52 = vld [vmem:[%s21017_s3 + $0x240] sm:$0xf]  ;;  %v12066_v60 = vld [vmem:[%s21017_s3 + $0x2b8] sm:$0xf]  ;;  %v11987_v61 = vor.u32 %v15607_v44, %v11986_v57 }
 0x1a5   : > { %3035 = vmatpush.bf16.msrb.mxu0 %v11767_v63  ;;  %v12007_v56 = vor.u32 %v15612_v53, %v12006_v52  ;;  %v12067_v63 = vor.u32 %v15627_v28, %v12066_v60 }
 0x1a7   : > { %v2037_v19 = vpop.f32.mrf.mxu3  ;;  %v2001_v25 = vpop.f32.mrf.mxu1  ;;  %3019 = vmatpush.bf16.msra.mxu3 %v12043_v7  ;;  %2982 = vmatpush.bf16.msrb.mxu1 %v11743_v9  ;;  %v12046_v7 = vld [vmem:[%s21017_s3 + $0x290] sm:$0xf]  ;;  %v15622_v9 = vld [vmem:[%s21017_s3 + $0x2a0] sm:$0xf0] }
 0x1a8   : > { %v2021_v14 = vpop.f32.mrf.mxu2  ;;  %3067 = vmatpush.bf16.msra.mxu2 %v12167_v23  ;;  %v2002_v1 = vadd.f32 %v2001_v25, %v18652_v40  ;;  %v2055_v27 = vpop.f32.mrf.mxu0  ;;  %v11723_v40 = vor.u32 %v15539_v29, %v11720_v30  ;;  %v12047_v11 = vor.u32 %v15622_v9, %v12046_v7  ;;  %v11926_v29 = vld [vmem:[%s21017_s3 + $0x1a0] sm:$0xf]  ;;  %v15592_v30 = vld [vmem:[%s21017_s3 + $0x1b0] sm:$0xf0] }
 0x1a9   : > { %v18865_v18 = vadd.f32 %v2055_v27, %v2037_v19  ;;  %3036 = vmatpush.bf16.msrb.mxu0 %v11747_v15  ;;  %v15597_v15 = vld [vmem:[%s21017_s3 + $0x1d8] sm:$0xf0]  ;;  %v11927_v31 = vor.u32 %v15592_v30, %v11926_v29 }
 0x1aa   : > { %2912 = vmatmul.bf16.vlgmr.msra.gmra.mxu1 %v18546_v17  ;;  %v18888_v36 = vadd.f32 %v18807_v42, %v2002_v1  ;;  %2966 = vmatmul.bf16.vlgmr.msra.gmra.mxu0 %v18546_v17  ;;  %v15637_v42 = vld [vmem:[%s21017_s3 + $0x318] sm:$0xf0] }
 0x1ab   : > { %2983 = vmatpush.bf16.msrb.mxu1 %v11723_v40  ;;  %v12107_v46 = vor.u32 %v15637_v42, %v12106_v38  ;;  %v11906_v40 = vld [vmem:[%s21017_s3 + $0x178] sm:$0xf]  ;;  %v11886_v42 = vld [vmem:[%s21017_s3 + $0x150] sm:$0xf] }
 0x1ac   : > { %3068 = vmatpush.bf16.msra.mxu2 %v12147_v16  ;;  %v11907_v33 = vor.u32 %v15587_v32, %v11906_v40 }
 0x1ad   : > { %2935 = vmatmul.bf16.gmra.mxu2 %v18548_v21  ;;  %3037 = vmatpush.bf16.msrb.mxu0 %v11727_v41 }
 0x1af   : > { %v18903_v0 = vpop.f32.mrf.mxu3  ;;  %3048 = vmatpush.bf16.msra.mxu1 %v12027_v39  ;;  %v2003_v47 = vpop.f32.mrf.mxu1 }
 0x1b0   : > { %v2024_v43 = vpop.f32.mrf.mxu2  ;;  %3069 = vmatpush.bf16.msra.mxu2 %v12127_v37  ;;  %v2004_v48 = vadd.f32 %v2003_v47, %v18709_v49  ;;  %v18906_v50 = vpop.f32.mrf.mxu0  ;;  %v15632_v49 = vld [vmem:[%s21017_s3 + $0x2f0] sm:$0xf0] }
 0x1b1   : > { %v12087_v59 = vor.u32 %v15632_v49, %v12086_v54 }
 0x1b2   : > { %v18926_v58 = vadd.f32 %v2021_v14, %v2004_v48  ;;  %v11946_v14 = vld [vmem:[%s21017_s3 + $0x1c8] sm:$0xf] }
 0x1b3   : > { %3049 = vmatpush.bf16.msra.mxu1 %v12007_v56  ;;  %v11947_v16 = vor.u32 %v15597_v15, %v11946_v14  ;;  %v12438_v14 = vld [vmem:[%s21019_s5 + $0x520] sm:$0xf] }
 0x1b4   : > { %3070 = vmatpush.bf16.msra.mxu2 %v12107_v46  ;;  %2953 = vmatmul.bf16.gmra.mxu3 %v18764_v22 }
 0x1b7   : > { %v2042_v23 = vpop.f32.mrf.mxu3  ;;  %v2006_v45 = vpop.f32.mrf.mxu1  ;;  %3050 = vmatpush.bf16.msra.mxu1 %v11987_v61 }
 0x1b8   : > { %v2026_v62 = vpop.f32.mrf.mxu2  ;;  %3071 = vmatpush.bf16.msra.mxu2 %v12087_v59  ;;  %v2007_v3 = vadd.f32 %v2006_v45, %v18762_v20  ;;  %v2060_v10 = vpop.f32.mrf.mxu0  ;;  %v11967_v20 = vor.u32 %v15602_v6, %v11966_v5 }
 0x1b9   : > { %v2061_v4 = vadd.f32 %v2060_v10, %v2042_v23 }
 0x1ba   : > { %2917 = vmatmul.bf16.gmra.mxu1 %v18654_v51  ;;  %v18950_v2 = vadd.f32 %v2024_v43, %v2007_v3  ;;  %2971 = vmatmul.bf16.gmra.mxu0 %v18654_v51  ;;  %v15582_v43 = vld [vmem:[%s21017_s3 + $0x160] sm:$0xf0] }
 0x1bb   : > { %3051 = vmatpush.bf16.msra.mxu1 %v11967_v20 }
 0x1bc   : > { %3072 = vmatpush.bf16.msra.mxu2 %v12067_v63 }
 0x1bd   : > { %3002 = vmatmul.bf16.vlgmr.msrb.gmra.mxu2 %v18650_v12 }
 0x1bf   : > { %v2044_v25 = vpop.f32.mrf.mxu3  ;;  %v2008_v1 = vpop.f32.mrf.mxu1  ;;  %3052 = vmatpush.bf16.msra.mxu1 %v11947_v16  ;;  %v15940_v16 = vld [vmem:[%s21019_s5 + $0x50c] sm:$0xf0] }
 0x1c0   : > { %v2091_v19 = vpop.f32.mrf.mxu2  ;;  %3073 = vmatpush.bf16.msra.mxu2 %v12047_v11  ;;  %v2062_v27 = vpop.f32.mrf.mxu0  ;;  %v16008_v25 = vld [vmem:[%s21019_s5 + $0x72c] sm:$0xf0] }
 0x1c3   : > { %3053 = vmatpush.bf16.msra.mxu1 %v11927_v31 }
 0x1c4   : > { %3020 = vmatmul.bf16.vlgmr.msra.gmra.mxu3 %v18546_v17 }
 0x1c7   : > { %v2109_v41 = vpop.f32.mrf.mxu3  ;;  %v2073_v37 = vpop.f32.mrf.mxu1  ;;  %3054 = vmatpush.bf16.msra.mxu1 %v11907_v33  ;;  %v12406_v33 = vld [vmem:[%s21019_s5 + $0x4e0] sm:$0xf] }
 0x1c8   : > { %v18972_v34 = vpop.f32.mrf.mxu2  ;;  %v2110_v13 = vadd.f32 %v2109_v41, %v2091_v19  ;;  %v18975_v35 = vadd.f32 %v2073_v37, %v18865_v18  ;;  %v2127_v38 = vpop.f32.mrf.mxu0  ;;  %v11887_v18 = vor.u32 %v15582_v43, %v11886_v42  ;;  %v12694_v19 = vld [vmem:[%s21019_s5 + $0x720] sm:$0xf]  ;;  %v15936_v41 = vld [vmem:[%s21019_s5 + $0x4ec] sm:$0xf0] }
 0x1c9   : > { %v12695_v27 = vor.u32 %v16008_v25, %v12694_v19  ;;  %v12407_v37 = vor.u32 %v15936_v41, %v12406_v33  ;;  %v15932_v42 = vld [vmem:[%s21019_s5 + $0x4cc] sm:$0xf0]  ;;  %v12630_v19 = vld [vmem:[%s21019_s5 + $0x6a0] sm:$0xf] }
 0x1ca   : > { %v18977_v39 = vadd.f32 %v2127_v38, %v2110_v13  ;;  %2984 = vmatmul.bf16.vlgmr.msrb.gmra.mxu1 %v18444_v8  ;;  %3038 = vmatmul.bf16.vlgmr.msrb.gmra.mxu0 %v18444_v8  ;;  %v16004_v13 = vld [vmem:[%s21019_s5 + $0x70c] sm:$0xf0]  ;;  %v12390_v38 = vld [vmem:[%s21019_s5 + $0x4c0] sm:$0xf] }
 0x1cb   : > { %3055 = vmatpush.bf16.msra.mxu1 %v11887_v18  ;;  %v12662_v18 = vld [vmem:[%s21019_s5 + $0x6e0] sm:$0xf]  ;;  %v15992_v25 = vld [vmem:[%s21019_s5 + $0x6ac] sm:$0xf0] }
 0x1cd   : > { %3007 = vmatmul.bf16.gmra.mxu2 %v18764_v22 }
 0x1cf   : > { %v18988_v47 = vpop.f32.mrf.mxu3  ;;  %v18990_v48 = vpop.f32.mrf.mxu1  ;;  %4226 = vmatpush.bf16.msrb.mxu1 %v12695_v27 }
 0x1d0   : > { %v2096_v46 = vpop.f32.mrf.mxu2  ;;  %v18992_v52 = vpop.f32.mrf.mxu0 }
 0x1d4   : > { %3025 = vmatmul.bf16.gmra.mxu3 %v18654_v51 }
 0x1d7   : > { %v2114_v54 = vpop.f32.mrf.mxu3  ;;  %v2078_v56 = vpop.f32.mrf.mxu1 }
 0x1d8   : > { %v2098_v53 = vpop.f32.mrf.mxu2  ;;  %v2115_v49 = vadd.f32 %v2114_v54, %v2096_v46  ;;  %v18995_v57 = vadd.f32 %v2078_v56, %v2061_v4  ;;  %v2132_v44 = vpop.f32.mrf.mxu0  ;;  %v16000_v46 = vld [vmem:[%s21019_s5 + $0x6ec] sm:$0xf0]  ;;  %v12566_v54 = vld [vmem:[%s21019_s5 + $0x620] sm:$0xf] }
 0x1d9   : > { %v12391_v53 = vor.u32 %v15932_v42, %v12390_v38  ;;  %v15976_v56 = vld [vmem:[%s21019_s5 + $0x62c] sm:$0xf0]  ;;  %v12534_v38 = vld [vmem:[%s21019_s5 + $0x5e0] sm:$0xf] }
 0x1da   : > { %v18997_v59 = vadd.f32 %v2132_v44, %v2115_v49  ;;  %2989 = vmatmul.bf16.gmra.mxu1 %v18548_v21  ;;  %3043 = vmatmul.bf16.gmra.mxu0 %v18548_v21  ;;  %v12663_v49 = vor.u32 %v16000_v46, %v12662_v18  ;;  %v12374_v44 = vld [vmem:[%s21019_s5 + $0x4a0] sm:$0xf] }
 0x1db   : > { %v12614_v18 = vld [vmem:[%s21019_s5 + $0x680] sm:$0xf] }
 0x1dd   : > { %3074 = vmatmul.bf16.vlgmr.msra.gmra.mxu2 %v18546_v17 }
 0x1df   : > { %v2116_v60 = vpop.f32.mrf.mxu3  ;;  %v2080_v28 = vpop.f32.mrf.mxu1 }
 0x1e0   : > { %v2163_v8 = vpop.f32.mrf.mxu2  ;;  %v2134_v61 = vpop.f32.mrf.mxu0  ;;  %v12567_v60 = vor.u32 %v15976_v56, %v12566_v54  ;;  %v12326_v54 = vld [vmem:[%s21019_s5 + $0x440] sm:$0xf]  ;;  %v15916_v56 = vld [vmem:[%s21019_s5 + $0x44c] sm:$0xf0] }
 0x1e1   : > { %v19073_v61 = vld [vmem:[#allocation8] sm:$0x1f] }
 0x1e2   : > { %4212 = vmatpush.bf16.msra.mxu0 %v12567_v60  ;;  %v15964_v60 = vld [vmem:[%s21019_s5 + $0x5cc] sm:$0xf0] }
 0x1e7   : > { %v2181_v63 = vpop.f32.mrf.mxu3  ;;  %v2145_v23 = vpop.f32.mrf.mxu1 }
 0x1e8   : > { %v19002_v62 = vpop.f32.mrf.mxu2  ;;  %v2164_v45 = vadd.f32 %v2163_v8, %v2145_v23  ;;  %v2823_v3 = vpop.f32.mrf.mxu0  ;;  %v15928_v8 = vld [vmem:[%s21019_s5 + $0x4ac] sm:$0xf0] }
 0x1e9   : > { %v15996_v23 = vld [vmem:[%s21019_s5 + $0x6cc] sm:$0xf0] }
 0x1ea   : > { %v19004_v10 = vadd.f32 %v2181_v63, %v2164_v45  ;;  %3056 = vmatmul.bf16.vlgmr.msra.gmra.mxu1 %v18650_v12  ;;  %v15944_v12 = vld [vmem:[%s21019_s5 + $0x52c] sm:$0xf0]  ;;  %v12646_v63 = vld [vmem:[%s21019_s5 + $0x6c0] sm:$0xf]  ;;  %v2824_v45 = vadd.f32 %v2823_v3, %v18665_v24 }
 0x1eb   : > { %v12439_v15 = vor.u32 %v15944_v12, %v12438_v14  ;;  %v12647_v3 = vor.u32 %v15996_v23, %v12646_v63  ;;  %v12598_v63 = vld [vmem:[%s21019_s5 + $0x660] sm:$0xf]  ;;  %v12327_v23 = vor.u32 %v15916_v56, %v12326_v54 }
 0x1ec   : > { %v12822_v56 = vld [vmem:[%s21019_s5 + $0x820] sm:$0xf] }
 0x1ed   : > { %3079 = vmatmul.bf16.gmra.mxu2 %v18654_v51  ;;  %v12422_v51 = vld [vmem:[%s21019_s5 + $0x500] sm:$0xf]  ;;  %4198 = vmatpush.bf16.msrb.mxu3 %v12439_v15 }
 0x1ee   : > { %v12423_v29 = vor.u32 %v15940_v16, %v12422_v51  ;;  %v19091_v51 = vperm.slane %v19073_v61, 0  ;;  %v12358_v15 = vld [vmem:[%s21019_s5 + $0x480] sm:$0xf]  ;;  %v15924_v16 = vld [vmem:[%s21019_s5 + $0x48c] sm:$0xf0] }
 0x1ef   : > { %v19008_v17 = vpop.f32.mrf.mxu3  ;;  %v19010_v21 = vpop.f32.mrf.mxu1 }
 0x1f0   : > { %v2168_v4 = vpop.f32.mrf.mxu2  ;;  %v19012_v5 = vpop.f32.mrf.mxu0 }
 0x1f1   : > { %4199 = vmatpush.bf16.msrb.mxu3 %v12423_v29  ;;  %v12359_v29 = vor.u32 %v15924_v16, %v12358_v15  ;;  %v2826_v33 = vadd.f32 %v19012_v5, %v18720_v55  ;;  %v12502_v15 = vld [vmem:[%s21019_s5 + $0x5a0] sm:$0xf]  ;;  %v15960_v16 = vld [vmem:[%s21019_s5 + $0x5ac] sm:$0xf0] }
 0x1f5   : > { %4200 = vmatpush.bf16.msrb.mxu3 %v12407_v37 }
 0x1f7   : > { %v2186_v7 = vpop.f32.mrf.mxu3  ;;  %v2150_v20 = vpop.f32.mrf.mxu1 }
 0x1f8   : > { %v2170_v6 = vpop.f32.mrf.mxu2  ;;  %v2169_v9 = vadd.f32 %v2168_v4, %v2150_v20  ;;  %v19014_v11 = vpop.f32.mrf.mxu0 }
 0x1f9   : > { %v12550_v6 = vld [vmem:[%s21019_s5 + $0x600] sm:$0xf]  ;;  %4201 = vmatpush.bf16.msrb.mxu3 %v12391_v53  ;;  %v15988_v53 = vld [vmem:[%s21019_s5 + $0x68c] sm:$0xf0] }
 0x1fa   : > { %v19034_v1 = vadd.f32 %v2186_v7, %v2169_v9  ;;  %3061 = vmatmul.bf16.gmra.mxu1 %v18764_v22  ;;  %v12678_v22 = vld [vmem:[%s21019_s5 + $0x700] sm:$0xf]  ;;  %v15972_v7 = vld [vmem:[%s21019_s5 + $0x60c] sm:$0xf0]  ;;  %v12375_v9 = vor.u32 %v15928_v8, %v12374_v44  ;;  %v12615_v44 = vor.u32 %v15988_v53, %v12614_v18 }
 0x1fb   : > { %v12679_v43 = vor.u32 %v16004_v13, %v12678_v22  ;;  %v12551_v14 = vor.u32 %v15972_v7, %v12550_v6  ;;  %v15920_v13 = vld [vmem:[%s21019_s5 + $0x46c] sm:$0xf0]  ;;  %v12518_v8 = vld [vmem:[%s21019_s5 + $0x5c0] sm:$0xf] }
 0x1fd   : > { %4227 = vmatpush.bf16.msrb.mxu1 %v12679_v43  ;;  %4213 = vmatpush.bf16.msra.mxu0 %v12551_v14  ;;  %v15968_v43 = vld [vmem:[%s21019_s5 + $0x5ec] sm:$0xf0] }
 0x1fe   : > { %4202 = vmatpush.bf16.msrb.mxu3 %v12375_v9  ;;  %v12535_v46 = vor.u32 %v15968_v43, %v12534_v38  ;;  %v2829_v9 = vadd.f32 %v19014_v11, %v18775_v26  ;;  %v12503_v26 = vor.u32 %v15960_v16, %v12502_v15  ;;  %v12582_v11 = vld [vmem:[%s21019_s5 + $0x640] sm:$0xf]  ;;  %v15948_v15 = vld [vmem:[%s21019_s5 + $0x54c] sm:$0xf0]  ;;  %v15942_v16 = vld [vmem:[%s21019_s5 + $0x524] sm:$0xf] }
 0x1ff   : > { %v2188_v31 = vpop.f32.mrf.mxu3  ;;  %v2152_v40 = vpop.f32.mrf.mxu1 }
 0x200   : > { %v2859_v30 = vpop.f32.mrf.mxu2  ;;  %v2830_v32 = vpop.f32.mrf.mxu0  ;;  %v12631_v40 = vor.u32 %v15992_v25, %v12630_v19 }
 0x201   : > { %4228 = vmatpush.bf16.msrb.mxu1 %v12663_v49  ;;  %4214 = vmatpush.bf16.msra.mxu0 %v12535_v46 }
 0x202   : > { %4203 = vmatpush.bf16.msrb.mxu3 %v12359_v29 }
 0x205   : > { %4229 = vmatpush.bf16.msrb.mxu1 %v12647_v3 }
 0x207   : > { %v19082_v4 = vpop.f32.mrf.mxu3  ;;  %v2841_v20 = vpop.f32.mrf.mxu1 }
 0x208   : > { %v2861_v28 = vpop.f32.mrf.mxu2  ;;  %v2842_v12 = vadd.f32 %v2841_v20, %v2824_v45  ;;  %v19093_v24 = vpop.f32.mrf.mxu0  ;;  %v12519_v45 = vor.u32 %v15964_v60, %v12518_v8 }
 0x209   : > { %4230 = vmatpush.bf16.msrb.mxu1 %v12631_v40  ;;  %v12696_v40 = vld [vmem:[%s21019_s5 + $0x730] sm:$0xf0] }
 0x20a   : > { %v2860_v27 = vadd.f32 %v2859_v30, %v2842_v12  ;;  %v12342_v30 = vld [vmem:[%s21019_s5 + $0x460] sm:$0xf]  ;;  %4215 = vmatpush.bf16.msra.mxu0 %v12519_v45 }
 0x20b   : > { %v12343_v5 = vor.u32 %v15920_v13, %v12342_v30  ;;  %v15956_v30 = vld [vmem:[%s21019_s5 + $0x58c] sm:$0xf0]  ;;  %v16002_v13 = vld [vmem:[%s21019_s5 + $0x704] sm:$0xf] }
 0x20c   : > { %v3096_v31 = vadd.f32 %v19091_v51, %v2860_v27  ;;  %v15980_v27 = vld [vmem:[%s21019_s5 + $0x64c] sm:$0xf0] }
 0x20d   : > { %4204 = vmatpush.bf16.msrb.mxu3 %v12343_v5  ;;  %4231 = vmatpush.bf16.msrb.mxu1 %v12615_v44  ;;  %v12583_v29 = vor.u32 %v15980_v27, %v12582_v11 }
 0x20e   : > { %v3111_v41 = vmax.f32 %v3096_v31, 0.0  ;;  %v16006_v31 = vld [vmem:[%s21019_s5 + $0x724] sm:$0xf]  ;;  %4216 = vmatpush.bf16.msra.mxu0 %v12503_v26  ;;  %v12648_v26 = vld [vmem:[%s21019_s5 + $0x6d0] sm:$0xf0] }
 0x20f   : > { %v19110_v22 = vpop.f32.mrf.mxu3  ;;  %v2843_v37 = vpop.f32.mrf.mxu1 }
 0x210   : > { %v2864_v32 = vpop.f32.mrf.mxu2  ;;  %3126 = vst [vmem:[#allocation3] sm:$0xff] %v3111_v41  ;;  %v2844_v42 = vadd.f32 %v2843_v37, %v2826_v33  ;;  %v19121_v55 = vpop.f32.mrf.mxu0  ;;  %v12486_v33 = vld [vmem:[%s21019_s5 + $0x580] sm:$0xf]  ;;  %v12699_v37 = vor.u32 %v16006_v31, %v12696_v40  ;;  %v16032_v31 = vld [vmem:[%s21019_s5 + $0x7ec] sm:$0xf0] }
 0x211   : > { %4205 = vmatpush.bf16.msrb.mxu3 %v12327_v23  ;;  %v12487_v38 = vor.u32 %v15956_v30, %v12486_v33  ;;  %v15998_v23 = vld [vmem:[%s21019_s5 + $0x6e4] sm:$0xf]  ;;  %v12424_v30 = vld [vmem:[%s21019_s5 + $0x510] sm:$0xf0] }
 0x212   : > { %v2862_v49 = vadd.f32 %v2861_v28, %v2844_v42  ;;  %v15984_v28 = vld [vmem:[%s21019_s5 + $0x66c] sm:$0xf0]  ;;  %v12680_v42 = vld [vmem:[%s21019_s5 + $0x710] sm:$0xf0] }
 0x213   : > { %v12599_v7 = vor.u32 %v15984_v28, %v12598_v63  ;;  %v12683_v18 = vor.u32 %v16002_v13, %v12680_v42  ;;  %4217 = vmatpush.bf16.msra.mxu0 %v12487_v38  ;;  %v15952_v63 = vld [vmem:[%s21019_s5 + $0x56c] sm:$0xf0]  ;;  %v12664_v28 = vld [vmem:[%s21019_s5 + $0x6f0] sm:$0xf0]  ;;  %v19250_v38 = vperm.slane %v19073_v61, 1 }
 0x214   : > { %v3101_v6 = vadd.f32 %v19091_v51, %v2862_v49  ;;  %v16040_v49 = vld [vmem:[%s21019_s5 + $0x82c] sm:$0xf0] }
 0x215   : > { %4232 = vmatpush.bf16.msrb.mxu1 %v12599_v7  ;;  %v12823_v60 = vor.u32 %v16040_v49, %v12822_v56  ;;  %v16036_v7 = vld [vmem:[%s21019_s5 + $0x80c] sm:$0xf0] }
 0x216   : > { %v3116_v14 = vmax.f32 %v3101_v6, 0.0  ;;  %v12806_v6 = vld [vmem:[%s21019_s5 + $0x800] sm:$0xf] }
 0x217   : > { %v19153_v12 = vpop.f32.mrf.mxu3  ;;  %v2846_v3 = vpop.f32.mrf.mxu1  ;;  %4240 = vmatpush.bf16.msrb.mxu2 %v12823_v60 }
 0x218   : > { %v2866_v20 = vpop.f32.mrf.mxu2  ;;  %3132 = vst [vmem:[#allocation3 + $0x28] sm:$0xff] %v3116_v14  ;;  %v2847_v19 = vadd.f32 %v2846_v3, %v2829_v9  ;;  %v19161_v25 = vpop.f32.mrf.mxu0  ;;  %v12667_v9 = vor.u32 %v15998_v23, %v12664_v28  ;;  %v12454_v3 = vld [vmem:[%s21019_s5 + $0x540] sm:$0xf]  ;;  %v2880_v23 = vadd.f32 %v19110_v22, %v18926_v58  ;;  %v12616_v58 = vld [vmem:[%s21019_s5 + $0x690] sm:$0xf0] }
 0x219   : > { %4233 = vmatpush.bf16.msrb.mxu1 %v12583_v29  ;;  %v2878_v20 = vadd.f32 %v19082_v4, %v18888_v36  ;;  %v12440_v36 = vld [vmem:[%s21019_s5 + $0x530] sm:$0xf0]  ;;  %v15994_v4 = vld [vmem:[%s21019_s5 + $0x6c4] sm:$0xf]  ;;  %v12790_v29 = vld [vmem:[%s21019_s5 + $0x7e0] sm:$0xf] }
 0x21a   : > { %v2865_v41 = vadd.f32 %v2864_v32, %v2847_v19  ;;  %v3294_v32 = vld [vmem:[#allocation3] sm:$0xfe]  ;;  %v12455_v19 = vor.u32 %v15948_v15, %v12454_v3  ;;  %v12443_v27 = vor.u32 %v15942_v16, %v12440_v36 }
 0x21b   : > { %v19197_v8 = vpack.c.bf16 %v3116_v14, %v3294_v32  ;;  %v12807_v14 = vor.u32 %v16036_v7, %v12806_v6  ;;  %v2896_v13 = vadd.f32 %v19093_v24, %v2878_v20  ;;  %v12632_v32 = vld [vmem:[%s21019_s5 + $0x6b0] sm:$0xf0]  ;;  %v15934_v6 = vld [vmem:[%s21019_s5 + $0x4e4] sm:$0xf] }
 0x21c   : > { %v3106_v5 = vadd.f32 %v19091_v51, %v2865_v41  ;;  %v12470_v51 = vld [vmem:[%s21019_s5 + $0x560] sm:$0xf]  ;;  %v12651_v41 = vor.u32 %v15994_v4, %v12648_v26  ;;  %v12408_v7 = vld [vmem:[%s21019_s5 + $0x4f0] sm:$0xf0] }
 0x21d   : > { %4296 = vmatpush.bf16.msra.mxu1 %v12699_v37  ;;  %v12471_v45 = vor.u32 %v15952_v63, %v12470_v51  ;;  %v3454_v11 = vshll.u32 %v19197_v8, 16  ;;  %v15938_v37 = vld [vmem:[%s21019_s5 + $0x504] sm:$0xf]  ;;  %4241 = vmatpush.bf16.msrb.mxu2 %v12807_v14  ;;  %v2058_v63 = vadd.f32 %v18906_v50, %v18903_v0 }
 0x21e   : > { %v3121_v46 = vmax.f32 %v3106_v5, 0.0  ;;  %v19253_v5 = vperm.slane %v19073_v61, 2  ;;  %v12427_v60 = vor.u32 %v15938_v37, %v12424_v30  ;;  %v15986_v50 = vld [vmem:[%s21019_s5 + $0x684] sm:$0xf]  ;;  %v2883_v30 = vadd.f32 %v19153_v12, %v18950_v2  ;;  %v12392_v2 = vld [vmem:[%s21019_s5 + $0x4d0] sm:$0xf0] }
 0x21f   : > { %v2884_v53 = vpop.f32.mrf.mxu3  ;;  %v2848_v54 = vpop.f32.mrf.mxu1  ;;  %4218 = vmatpush.bf16.msra.mxu0 %v12471_v45  ;;  %v2076_v22 = vadd.f32 %v18990_v48, %v2058_v63  ;;  %v15982_v12 = vld [vmem:[%s21019_s5 + $0x664] sm:$0xf] }
 0x220   : > { %v2931_v43 = vpop.f32.mrf.mxu2  ;;  %3137 = vst [vmem:[#allocation3 + $0x50] sm:$0x1] %v3121_v46  ;;  %v2902_v44 = vpop.f32.mrf.mxu0  ;;  %v12774_v53 = vld [vmem:[%s21019_s5 + $0x7c0] sm:$0xf]  ;;  %v16028_v54 = vld [vmem:[%s21019_s5 + $0x7cc] sm:$0xf0] }
 0x221   : > { %4297 = vmatpush.bf16.msra.mxu1 %v12683_v18  ;;  %v2932_v40 = vadd.f32 %v2931_v43, %v18975_v35  ;;  %v12791_v35 = vor.u32 %v16032_v31, %v12790_v29  ;;  %v15990_v43 = vld [vmem:[%s21019_s5 + $0x6a4] sm:$0xf]  ;;  %v3456_v44 = vrot.slane %v3454_v11, 1  ;;  %v12775_v0 = vor.u32 %v16028_v54, %v12774_v53  ;;  %v12742_v54 = vld [vmem:[%s21019_s5 + $0x780] sm:$0xf] }
 0x222   : > { %v12635_v28 = vor.u32 %v15990_v43, %v12632_v32  ;;  %v12619_v11 = vor.u32 %v15986_v50, %v12616_v58  ;;  %v15926_v63 = vld [vmem:[%s21019_s5 + $0x4a4] sm:$0xf] }
 0x223   : > { %4219 = vmatpush.bf16.msra.mxu0 %v12455_v19  ;;  %4242 = vmatpush.bf16.msrb.mxu2 %v12791_v35  ;;  %v15930_v35 = vld [vmem:[%s21019_s5 + $0x4c4] sm:$0xf] }
 0x225   : > { %4298 = vmatpush.bf16.msra.mxu1 %v12667_v9  ;;  %v3452_v9 = vshrl.u32 %v19197_v8, 16  ;;  %v12411_v8 = vor.u32 %v15934_v6, %v12408_v7 }
 0x227   : > { %v2949_v42 = vpop.f32.mrf.mxu3  ;;  %v2913_v18 = vpop.f32.mrf.mxu1  ;;  %v3299_v24 = vld [vmem:[#allocation3 + $0x50] sm:$0x1]  ;;  %4268 = vmatpush.bf16.msrb.mxu0 %v12443_v27  ;;  %v3457_v16 = vor.u32 %v3456_v44, %v3452_v9  ;;  %v2898_v27 = vadd.f32 %v19121_v55, %v2880_v23  ;;  %4243 = vmatpush.bf16.msrb.mxu2 %v12775_v0  ;;  %v2901_v23 = vadd.f32 %v19161_v25, %v2883_v30  ;;  %v12584_v25 = vld [vmem:[%s21019_s5 + $0x650] sm:$0xf0]  ;;  %v16038_v30 = vld [vmem:[%s21019_s5 + $0x824] sm:$0xf] }
 0x228   : > { %v2933_v33 = vpop.f32.mrf.mxu2  ;;  %v2950_v46 = vadd.f32 %v2949_v42, %v2932_v40  ;;  %v2914_v56 = vadd.f32 %v2913_v18, %v2896_v13  ;;  %v2967_v49 = vpop.f32.mrf.mxu0  ;;  %v3446_v51 = vpack.c.bf16 %v3299_v24, %v3299_v24  ;;  %v12758_v13 = vld [vmem:[%s21019_s5 + $0x7a0] sm:$0xf]  ;;  %v16024_v42 = vld [vmem:[%s21019_s5 + $0x7ac] sm:$0xf0]  ;;  %v12600_v18 = vld [vmem:[%s21019_s5 + $0x670] sm:$0xf0]  ;;  %v12395_v24 = vor.u32 %v15930_v35, %v12392_v2 }
 0x229   : > { %4299 = vmatpush.bf16.msra.mxu1 %v12651_v41  ;;  %v2934_v36 = vadd.f32 %v2933_v33, %v2076_v22  ;;  %v12759_v32 = vor.u32 %v16024_v42, %v12758_v13  ;;  %v12603_v53 = vor.u32 %v15982_v12, %v12600_v18  ;;  %v12726_v22 = vld [vmem:[%s21019_s5 + $0x760] sm:$0xf]  ;;  %v15918_v35 = vld [vmem:[%s21019_s5 + $0x464] sm:$0xf] }
 0x22a   : > { %v2968_v45 = vadd.f32 %v2967_v49, %v2950_v46  ;;  %v3097_v20 = vadd.f32 %v19250_v38, %v2914_v56  ;;  %v3459_v14 = vshll.u32 %v3446_v51, 16  ;;  %v16020_v56 = vld [vmem:[%s21019_s5 + $0x78c] sm:$0xf0]  ;;  %v16034_v18 = vld [vmem:[%s21019_s5 + $0x804] sm:$0xf] }
 0x22b   : > { %4269 = vmatpush.bf16.msrb.mxu0 %v12427_v60  ;;  %4244 = vmatpush.bf16.msrb.mxu2 %v12759_v32  ;;  %v12743_v60 = vor.u32 %v16020_v56, %v12742_v54 }
 0x22c   : > { %v3098_v3 = vadd.f32 %v19253_v5, %v2968_v45  ;;  %v3112_v15 = vmax.f32 %v3097_v20, 0.0  ;;  %v3461_v19 = vrot.slane %v3459_v14, 1 }
 0x22d   : > { %4300 = vmatpush.bf16.msra.mxu1 %v12635_v28  ;;  %v12376_v28 = vld [vmem:[%s21019_s5 + $0x4b0] sm:$0xf0] }
 0x22e   : > { %v3113_v4 = vmax.f32 %v3098_v3, 0.0  ;;  %3127 = vst [vmem:[#allocation3 + $0x8] sm:$0xff] %v3112_v15  ;;  %v19289_v31 = vsel %vm1247_vm3, %v3457_v16, %v3461_v19  ;;  %v12379_v20 = vor.u32 %v15926_v63, %v12376_v28  ;;  %v16016_v3 = vld [vmem:[%s21019_s5 + $0x76c] sm:$0xf0] }
 0x22f   : > { %v2951_v29 = vpop.f32.mrf.mxu3  ;;  %v2915_v48 = vpop.f32.mrf.mxu1  ;;  %4206 = vmatmul.bf16.vlgmr.msrb.gmra.mxu3 %v19289_v31  ;;  %4270 = vmatpush.bf16.msrb.mxu0 %v12411_v8  ;;  %v12727_v8 = vor.u32 %v16016_v3, %v12726_v22  ;;  %v12702_v22 = vld [vmem:[%s21019_s5 + $0x728] sm:$0xf]  ;;  %v16009_v3 = vld [vmem:[%s21019_s5 + $0x734] sm:$0xf0] }
 0x230   : > { %v2936_v26 = vpop.f32.mrf.mxu2  ;;  %3128 = vst [vmem:[#allocation3 + $0x10] sm:$0xff] %v3113_v4  ;;  %v2952_v40 = vadd.f32 %v2951_v29, %v2934_v36  ;;  %v2916_v41 = vadd.f32 %v2915_v48, %v2898_v27  ;;  %v2969_v37 = vpop.f32.mrf.mxu0  ;;  %4245 = vmatpush.bf16.msrb.mxu2 %v12743_v60  ;;  %v12360_v4 = vld [vmem:[%s21019_s5 + $0x490] sm:$0xf0]  ;;  %v16012_v29 = vld [vmem:[%s21019_s5 + $0x74c] sm:$0xf0] }
 0x231   : > { %4301 = vmatpush.bf16.msra.mxu1 %v12619_v11  ;;  %v2937_v49 = vadd.f32 %v2936_v26, %v18995_v57  ;;  %v15978_v57 = vld [vmem:[%s21019_s5 + $0x644] sm:$0xf]  ;;  %v12792_v60 = vld [vmem:[%s21019_s5 + $0x7f0] sm:$0xf0] }
 0x232   : > { %v2970_v33 = vadd.f32 %v2969_v37, %v2952_v40  ;;  %v3102_v55 = vadd.f32 %v19250_v38, %v2916_v41  ;;  %v12587_v0 = vor.u32 %v15978_v57, %v12584_v25  ;;  %v16026_v25 = vld [vmem:[%s21019_s5 + $0x7c4] sm:$0xf] }
 0x233   : > { %4271 = vmatpush.bf16.msrb.mxu0 %v12395_v24  ;;  %v15914_v24 = vld [vmem:[%s21019_s5 + $0x444] sm:$0xf] }
 0x234   : > { %v3103_v43 = vadd.f32 %v19253_v5, %v2970_v33  ;;  %v3117_v46 = vmax.f32 %v3102_v55, 0.0  ;;  %4246 = vmatpush.bf16.msrb.mxu2 %v12727_v8  ;;  %v12824_v55 = vld [vmem:[%s21019_s5 + $0x830] sm:$0xf0] }
 0x235   : > { %4302 = vmatpush.bf16.msra.mxu1 %v12603_v53  ;;  %v3295_v16 = vld [vmem:[#allocation3 + $0x8] sm:$0xfe]  ;;  %v12827_v42 = vor.u32 %v16038_v30, %v12824_v55 }
 0x236   : > { %v3118_v51 = vmax.f32 %v3103_v43, 0.0  ;;  %3133 = vst [vmem:[#allocation3 + $0x30] sm:$0xff] %v3117_v46  ;;  %v3442_v40 = vpack.c.bf16 %v3117_v46, %v3295_v16  ;;  %v12344_v43 = vld [vmem:[%s21019_s5 + $0x470] sm:$0xf0]  ;;  %v19402_v16 = vperm.slane %v19073_v61, 3 }
 0x237   : > { %v2954_v45 = vpop.f32.mrf.mxu3  ;;  %v2918_v6 = vpop.f32.mrf.mxu1  ;;  %4272 = vmatpush.bf16.msrb.mxu0 %v12379_v20  ;;  %v3296_v19 = vld [vmem:[#allocation3 + $0x10] sm:$0xfe]  ;;  %v12347_v32 = vor.u32 %v15918_v35, %v12344_v43  ;;  %v12808_v46 = vld [vmem:[%s21019_s5 + $0x810] sm:$0xf0] }
 0x238   : > { %v2938_v44 = vpop.f32.mrf.mxu2  ;;  %3134 = vst [vmem:[#allocation3 + $0x38] sm:$0xff] %v3118_v51  ;;  %v2955_v7 = vadd.f32 %v2954_v45, %v2937_v49  ;;  %v2919_v9 = vadd.f32 %v2918_v6, %v2901_v23  ;;  %v2972_v14 = vpop.f32.mrf.mxu0  ;;  %v3443_v41 = vpack.c.bf16 %v3118_v51, %v3296_v19  ;;  %v3466_v2 = vshll.u32 %v3442_v40, 16  ;;  %v12328_v53 = vld [vmem:[%s21019_s5 + $0x450] sm:$0xf0]  ;;  %v16030_v49 = vld [vmem:[%s21019_s5 + $0x7e4] sm:$0xf] }
 0x239   : > { %4303 = vmatpush.bf16.msra.mxu1 %v12587_v0  ;;  %v12811_v54 = vor.u32 %v16034_v18, %v12808_v46  ;;  %v12331_v56 = vor.u32 %v15914_v24, %v12328_v53  ;;  %v12795_v57 = vor.u32 %v16030_v49, %v12792_v60  ;;  %v16018_v18 = vld [vmem:[%s21019_s5 + $0x784] sm:$0xf]  ;;  %v12744_v46 = vld [vmem:[%s21019_s5 + $0x790] sm:$0xf0]  ;;  %v12654_v53 = vld [vmem:[%s21019_s5 + $0x6c8] sm:$0xf] }
 0x23a   : > { %v2973_v50 = vadd.f32 %v2972_v14, %v2955_v7  ;;  %v3107_v58 = vadd.f32 %v19250_v38, %v2919_v9  ;;  %v15922_v38 = vld [vmem:[%s21019_s5 + $0x484] sm:$0xf]  ;;  %v3478_v12 = vshll.u32 %v3443_v41, 16  ;;  %v3468_v45 = vrot.slane %v3466_v2, 1  ;;  %v12776_v9 = vld [vmem:[%s21019_s5 + $0x7d0] sm:$0xf0] }
 0x23b   : > { %v12363_v27 = vor.u32 %v15922_v38, %v12360_v4  ;;  %v3476_v19 = vshrl.u32 %v3443_v41, 16  ;;  %v12779_v4 = vor.u32 %v16026_v25, %v12776_v9  ;;  %v15997_v49 = vld [vmem:[%s21019_s5 + $0x6d4] sm:$0xf0] }
 0x23c   : > { %v3108_v15 = vadd.f32 %v19253_v5, %v2973_v50  ;;  %v3122_v36 = vmax.f32 %v3107_v58, 0.0  ;;  %v12710_v5 = vld [vmem:[%s21019_s5 + $0x740] sm:$0xf]  ;;  %v3480_v20 = vrot.slane %v3478_v12, 1  ;;  %v3464_v50 = vshrl.u32 %v3442_v40, 16 }
 0x23d   : > { %v12711_v37 = vor.u32 %v16012_v29, %v12710_v5  ;;  %4273 = vmatpush.bf16.msrb.mxu0 %v12363_v27  ;;  %v12703_v5 = vor.u32 %v16009_v3, %v12702_v22  ;;  %v16022_v29 = vld [vmem:[%s21019_s5 + $0x7a4] sm:$0xf]  ;;  %v16005_v40 = vld [vmem:[%s21019_s5 + $0x714] sm:$0xf0]  ;;  %v12670_v12 = vld [vmem:[%s21019_s5 + $0x6e8] sm:$0xf] }
 0x23e   : > { %v3123_v26 = vmax.f32 %v3108_v15, 0.0  ;;  %3138 = vst [vmem:[#allocation3 + $0x58] sm:$0x1] %v3122_v36  ;;  %v2112_v15 = vadd.f32 %v18988_v47, %v18972_v34  ;;  %v3469_v36 = vor.u32 %v3468_v45, %v3464_v50  ;;  %v12760_v34 = vld [vmem:[%s21019_s5 + $0x7b0] sm:$0xf0]  ;;  %v12655_v50 = vor.u32 %v15997_v49, %v12654_v53 }
 0x23f   : > { %v2956_v48 = vpop.f32.mrf.mxu3  ;;  %v2920_v33 = vpop.f32.mrf.mxu1  ;;  %4247 = vmatpush.bf16.msrb.mxu2 %v12711_v37  ;;  %v16046_v45 = vld [vmem:[%s21019_s5 + $0x864] sm:$0xf]  ;;  %v15993_v22 = vld [vmem:[%s21019_s5 + $0x6b4] sm:$0xf0]  ;;  %v12558_v49 = vld [vmem:[%s21019_s5 + $0x608] sm:$0xf] }
 0x240   : > { %v3003_v11 = vpop.f32.mrf.mxu2  ;;  %3139 = vst [vmem:[#allocation3 + $0x60] sm:$0x1] %v3123_v26  ;;  %v2974_v13 = vpop.f32.mrf.mxu0  ;;  %v3481_v26 = vor.u32 %v3480_v20, %v3476_v19  ;;  %v2130_v33 = vadd.f32 %v18992_v52, %v2112_v15  ;;  %v16001_v52 = vld [vmem:[%s21019_s5 + $0x6f4] sm:$0xf0] }
 0x241   : > { %4274 = vmatpush.bf16.msrb.mxu0 %v12347_v32  ;;  %v12763_v13 = vor.u32 %v16022_v29, %v12760_v34  ;;  %v12840_v29 = vld [vmem:[%s21019_s5 + $0x850] sm:$0xf0] }
 0x243   : > { %4310 = vmatpush.bf16.msra.mxu2 %v12827_v42 }
 0x245   : > { %v3300_v44 = vld [vmem:[#allocation3 + $0x58] sm:$0x1]  ;;  %4275 = vmatpush.bf16.msrb.mxu0 %v12331_v56  ;;  %v12671_v56 = vor.u32 %v16001_v52, %v12670_v12 }
 0x246   : > { %v3447_v23 = vpack.c.bf16 %v3300_v44, %v3300_v44  ;;  %v16014_v44 = vld [vmem:[%s21019_s5 + $0x764] sm:$0xf] }
 0x247   : > { %v3021_v63 = vpop.f32.mrf.mxu3  ;;  %v3301_v28 = vld [vmem:[#allocation3 + $0x60] sm:$0x1]  ;;  %4311 = vmatpush.bf16.msra.mxu2 %v12811_v54  ;;  %v2985_v6 = vpop.f32.mrf.mxu1  ;;  %v12747_v54 = vor.u32 %v16018_v18, %v12744_v46 }
 0x248   : > { %v3005_v51 = vpop.f32.mrf.mxu2  ;;  %v3448_v7 = vpack.c.bf16 %v3301_v28, %v3301_v28  ;;  %v2986_v14 = vadd.f32 %v2985_v6, %v18977_v39  ;;  %v19391_v0 = vpop.f32.mrf.mxu0  ;;  %v3471_v58 = vshll.u32 %v3447_v23, 16  ;;  %v16048_v23 = vld [vmem:[%s21019_s5 + $0x86c] sm:$0xf0]  ;;  %v12856_v6 = vld [vmem:[%s21019_s5 + $0x870] sm:$0xf0] }
 0x249   : > { %v12859_v9 = vor.u32 %v16046_v45, %v12856_v6  ;;  %v12606_v46 = vld [vmem:[%s21019_s5 + $0x668] sm:$0xf] }
 0x24a   : > { %v3483_v39 = vshll.u32 %v3448_v7, 16  ;;  %v3004_v8 = vadd.f32 %v3003_v11, %v2986_v14  ;;  %v3473_v38 = vrot.slane %v3471_v58, 1  ;;  %v12686_v11 = vld [vmem:[%s21019_s5 + $0x708] sm:$0xf] }
 0x24b   : > { %4312 = vmatpush.bf16.msra.mxu2 %v12795_v57  ;;  %v12687_v35 = vor.u32 %v16005_v40, %v12686_v11  ;;  %v12638_v58 = vld [vmem:[%s21019_s5 + $0x6a8] sm:$0xf]  ;;  %v15989_v11 = vld [vmem:[%s21019_s5 + $0x694] sm:$0xf0] }
 0x24c   : > { %v3485_v27 = vrot.slane %v3483_v39, 1  ;;  %v3022_v47 = vadd.f32 %v3021_v63, %v3004_v8  ;;  %v19411_v48 = vsel %vm1247_vm3, %v3469_v36, %v3473_v38  ;;  %v12854_v63 = vld [vmem:[%s21019_s5 + $0x860] sm:$0xf]  ;;  %v16010_v39 = vld [vmem:[%s21019_s5 + $0x744] sm:$0xf] }
 0x24d   : > { %4220 = vmatmul.bf16.vlgmr.msra.gmra.mxu0 %v19411_v48  ;;  %v12855_v57 = vor.u32 %v16048_v23, %v12854_v63  ;;  %v12712_v8 = vld [vmem:[%s21019_s5 + $0x750] sm:$0xf0]  ;;  %v12590_v63 = vld [vmem:[%s21019_s5 + $0x648] sm:$0xf] }
 0x24e   : > { %v19421_v37 = vsel %vm1247_vm3, %v3481_v26, %v3485_v27  ;;  %v3099_v30 = vadd.f32 %v19402_v16, %v3022_v47  ;;  %4330 = vmatpush.bf16.msra.mxu0 %v12859_v9  ;;  %v12715_v38 = vor.u32 %v16010_v39, %v12712_v8  ;;  %v12639_v26 = vor.u32 %v15993_v22, %v12638_v58  ;;  %v12622_v47 = vld [vmem:[%s21019_s5 + $0x688] sm:$0xf]  ;;  %v15969_v9 = vld [vmem:[%s21019_s5 + $0x5f4] sm:$0xf0]  ;;  %v12520_v39 = vld [vmem:[%s21019_s5 + $0x5d0] sm:$0xf0] }
 0x24f   : > { %v3023_v55 = vpop.f32.mrf.mxu3  ;;  %4234 = vmatmul.bf16.vlgmr.msrb.gmra.mxu1 %v19421_v37  ;;  %4313 = vmatpush.bf16.msra.mxu2 %v12779_v4  ;;  %v2987_v42 = vpop.f32.mrf.mxu1  ;;  %v12838_v4 = vld [vmem:[%s21019_s5 + $0x840] sm:$0xf]  ;;  %v12623_v18 = vor.u32 %v15989_v11, %v12622_v47  ;;  %v12542_v6 = vld [vmem:[%s21019_s5 + $0x5e8] sm:$0xf] }
 0x250   : > { %v3008_v41 = vpop.f32.mrf.mxu2  ;;  %4366 = vmatpush.bf16.msrb.mxu1 %v12703_v5  ;;  %v3114_v43 = vmax.f32 %v3099_v30, 0.0  ;;  %v2988_v32 = vadd.f32 %v2987_v42, %v2130_v33  ;;  %v19426_v2 = vpop.f32.mrf.mxu0  ;;  %4260 = vmatpush.bf16.msra.mxu3 %v12855_v57  ;;  %v16042_v5 = vld [vmem:[%s21019_s5 + $0x844] sm:$0xf]  ;;  %v12568_v30 = vld [vmem:[%s21019_s5 + $0x630] sm:$0xf0]  ;;  %v12543_v22 = vor.u32 %v15969_v9, %v12542_v6 }
 0x251   : > { %v12843_v40 = vor.u32 %v16042_v5, %v12840_v29  ;;  %v12536_v57 = vld [vmem:[%s21019_s5 + $0x5f0] sm:$0xf0]  ;;  %v12526_v8 = vld [vmem:[%s21019_s5 + $0x5c8] sm:$0xf]  ;;  %v12560_v5 = vld [vmem:[%s21019_s5 + $0x618] sm:$0xf0] }
 0x252   : > { %3129 = vst [vmem:[#allocation3 + $0x18] sm:$0xff] %v3114_v43  ;;  %v3006_v24 = vadd.f32 %v3005_v51, %v2988_v32  ;;  %v12728_v51 = vld [vmem:[%s21019_s5 + $0x770] sm:$0xf0]  ;;  %v15963_v6 = vld [vmem:[%s21019_s5 + $0x5cc] sm:$0xf] }
 0x253   : > { %4314 = vmatpush.bf16.msra.mxu2 %v12763_v13  ;;  %v12731_v25 = vor.u32 %v16014_v44, %v12728_v51  ;;  %v15977_v13 = vld [vmem:[%s21019_s5 + $0x634] sm:$0xf0]  ;;  %4331 = vmatpush.bf16.msra.mxu0 %v12843_v40  ;;  %v15950_v9 = vld [vmem:[%s21019_s5 + $0x564] sm:$0xf] }
 0x254   : > { %4367 = vmatpush.bf16.msrb.mxu1 %v12687_v35  ;;  %v3024_v60 = vadd.f32 %v3023_v55, %v3006_v24  ;;  %v12574_v55 = vld [vmem:[%s21019_s5 + $0x628] sm:$0xf]  ;;  %v15985_v24 = vld [vmem:[%s21019_s5 + $0x674] sm:$0xf0] }
 0x255   : > { %v12575_v12 = vor.u32 %v15977_v13, %v12574_v55  ;;  %v12607_v45 = vor.u32 %v15985_v24, %v12606_v46 }
 0x256   : > { %v3104_v7 = vadd.f32 %v19402_v16, %v3024_v60  ;;  %v15973_v60 = vld [vmem:[%s21019_s5 + $0x614] sm:$0xf0] }
 0x257   : > { %v3026_v20 = vpop.f32.mrf.mxu3  ;;  %4315 = vmatpush.bf16.msra.mxu2 %v12747_v54  ;;  %v2990_v14 = vpop.f32.mrf.mxu1  ;;  %v12559_v23 = vor.u32 %v15973_v60, %v12558_v49 }
 0x258   : > { %v3010_v28 = vpop.f32.mrf.mxu2  ;;  %4368 = vmatpush.bf16.msrb.mxu1 %v12671_v56  ;;  %v3119_v3 = vmax.f32 %v3104_v7, 0.0  ;;  %v2991_v15 = vadd.f32 %v2990_v14, %v18997_v59  ;;  %v19472_v19 = vpop.f32.mrf.mxu0  ;;  %v16044_v59 = vld [vmem:[%s21019_s5 + $0x84c] sm:$0xf0]  ;;  %v12552_v56 = vld [vmem:[%s21019_s5 + $0x610] sm:$0xf0] }
 0x259   : > { %v12839_v27 = vor.u32 %v16044_v59, %v12838_v4  ;;  %v3297_v43 = vld [vmem:[#allocation3 + $0x18] sm:$0xfe]  ;;  %v15981_v7 = vld [vmem:[%s21019_s5 + $0x654] sm:$0xf0] }
 0x25a   : > { %3135 = vst [vmem:[#allocation3 + $0x40] sm:$0xff] %v3119_v3  ;;  %v3009_v36 = vadd.f32 %v3008_v41, %v2991_v15  ;;  %v15974_v41 = vld [vmem:[%s21019_s5 + $0x624] sm:$0xf]  ;;  %v19530_v44 = vpack.c.bf16 %v3119_v3, %v3297_v43  ;;  %v3040_v15 = vadd.f32 %v19391_v0, %v19004_v10  ;;  %v12591_v59 = vor.u32 %v15981_v7, %v12590_v63 }
 0x25b   : > { %4316 = vmatpush.bf16.msra.mxu2 %v12731_v25  ;;  %4261 = vmatpush.bf16.msra.mxu3 %v12839_v27  ;;  %v12571_v32 = vor.u32 %v15974_v41, %v12568_v30  ;;  %v15966_v28 = vld [vmem:[%s21019_s5 + $0x5e4] sm:$0xf]  ;;  %v19579_v10 = vperm.slane %v19073_v61, 4  ;;  %v15971_v27 = vld [vmem:[%s21019_s5 + $0x60c] sm:$0xf] }
 0x25c   : > { %4369 = vmatpush.bf16.msrb.mxu1 %v12655_v50  ;;  %v3027_v34 = vadd.f32 %v3026_v20, %v3009_v36  ;;  %v15975_v20 = vld [vmem:[%s21019_s5 + $0x62c] sm:$0xf]  ;;  %v12539_v25 = vor.u32 %v15966_v28, %v12536_v57  ;;  %v12576_v50 = vld [vmem:[%s21019_s5 + $0x638] sm:$0xf0]  ;;  %v3490_v58 = vshll.u32 %v19530_v44, 16  ;;  %v12563_v13 = vor.u32 %v15971_v27, %v12560_v5 }
 0x25d   : > { %4276 = vmatmul.bf16.vlgmr.msrb.gmra.mxu0 %v19289_v31  ;;  %v15962_v3 = vld [vmem:[%s21019_s5 + $0x5c4] sm:$0xf]  ;;  %v15965_v36 = vld [vmem:[%s21019_s5 + $0x5d4] sm:$0xf0]  ;;  %v12579_v0 = vor.u32 %v15975_v20, %v12576_v50  ;;  %v12504_v61 = vld [vmem:[%s21019_s5 + $0x5b0] sm:$0xf0] }
 0x25e   : > { %v3109_v42 = vadd.f32 %v19402_v16, %v3027_v34  ;;  %v15970_v16 = vld [vmem:[%s21019_s5 + $0x604] sm:$0xf]  ;;  %4352 = vmatpush.bf16.msrb.mxu0 %v12575_v12  ;;  %v12523_v29 = vor.u32 %v15962_v3, %v12520_v39  ;;  %v3492_v40 = vrot.slane %v3490_v58, 1  ;;  %v12510_v41 = vld [vmem:[%s21019_s5 + $0x5a8] sm:$0xf]  ;;  %v3488_v43 = vshrl.u32 %v19530_v44, 16 }
 0x25f   : > { %v3028_v35 = vpop.f32.mrf.mxu3  ;;  %4304 = vmatmul.bf16.vlgmr.msra.gmra.mxu1 %v19421_v37  ;;  %4317 = vmatpush.bf16.msra.mxu2 %v12715_v38  ;;  %v2992_v52 = vpop.f32.mrf.mxu1  ;;  %v12555_v51 = vor.u32 %v15970_v16, %v12552_v56  ;;  %v2166_v38 = vadd.f32 %v19002_v62, %v19010_v21  ;;  %v12527_v21 = vor.u32 %v15965_v36, %v12526_v8  ;;  %v15958_v34 = vld [vmem:[%s21019_s5 + $0x5a4] sm:$0xf]  ;;  %v15961_v30 = vld [vmem:[%s21019_s5 + $0x5b4] sm:$0xf0]  ;;  %v12544_v12 = vld [vmem:[%s21019_s5 + $0x5f8] sm:$0xf0] }
 0x260   : > { %v19501_v33 = vpop.f32.mrf.mxu2  ;;  %4370 = vmatpush.bf16.msrb.mxu1 %v12639_v26  ;;  %v3124_v53 = vmax.f32 %v3109_v42, 0.0  ;;  %v3046_v54 = vpop.f32.mrf.mxu0  ;;  %4282 = vmatpush.bf16.msrb.mxu3 %v12571_v32  ;;  %v12830_v42 = vld [vmem:[%s21019_s5 + $0x828] sm:$0xf]  ;;  %v12507_v52 = vor.u32 %v15958_v34, %v12504_v61  ;;  %v12511_v24 = vor.u32 %v15961_v30, %v12510_v41  ;;  %v15954_v16 = vld [vmem:[%s21019_s5 + $0x584] sm:$0xf]  ;;  %v3493_v56 = vor.u32 %v3492_v40, %v3488_v43 }
 0x261   : > { %v2184_v55 = vadd.f32 %v19008_v17, %v2166_v38  ;;  %v15967_v17 = vld [vmem:[%s21019_s5 + $0x5ec] sm:$0xf]  ;;  %v12528_v20 = vld [vmem:[%s21019_s5 + $0x5d8] sm:$0xf0]  ;;  %v12472_v50 = vld [vmem:[%s21019_s5 + $0x570] sm:$0xf0] }
 0x262   : > { %3140 = vst [vmem:[#allocation3 + $0x68] sm:$0x1] %v3124_v53  ;;  %4353 = vmatpush.bf16.msrb.mxu0 %v12559_v23  ;;  %v12488_v53 = vld [vmem:[%s21019_s5 + $0x590] sm:$0xf0]  ;;  %v12547_v63 = vor.u32 %v15967_v17, %v12544_v12  ;;  %v12814_v23 = vld [vmem:[%s21019_s5 + $0x808] sm:$0xf]  ;;  %v12531_v36 = vor.u32 %v15963_v6, %v12528_v20 }
 0x263   : > { %v12491_v7 = vor.u32 %v15954_v16, %v12488_v53  ;;  %v12478_v3 = vld [vmem:[%s21019_s5 + $0x568] sm:$0xf]  ;;  %v16033_v8 = vld [vmem:[%s21019_s5 + $0x7f4] sm:$0xf0]  ;;  %v15959_v38 = vld [vmem:[%s21019_s5 + $0x5ac] sm:$0xf] }
 0x264   : > { %4371 = vmatpush.bf16.msrb.mxu1 %v12623_v18  ;;  %4283 = vmatpush.bf16.msrb.mxu3 %v12555_v51  ;;  %v3042_v18 = vadd.f32 %v19426_v2, %v2184_v55  ;;  %v12494_v2 = vld [vmem:[%s21019_s5 + $0x588] sm:$0xf]  ;;  %v15957_v51 = vld [vmem:[%s21019_s5 + $0x594] sm:$0xf0]  ;;  %v15946_v27 = vld [vmem:[%s21019_s5 + $0x544] sm:$0xf] }
 0x265   : > { %v12798_v39 = vld [vmem:[%s21019_s5 + $0x7e8] sm:$0xf]  ;;  %v12456_v5 = vld [vmem:[%s21019_s5 + $0x550] sm:$0xf0]  ;;  %v15949_v61 = vld [vmem:[%s21019_s5 + $0x554] sm:$0xf0] }
 0x266   : > { %4354 = vmatpush.bf16.msrb.mxu0 %v12543_v22  ;;  %v12462_v34 = vld [vmem:[%s21019_s5 + $0x548] sm:$0xf]  ;;  %v12459_v41 = vor.u32 %v15946_v27, %v12456_v5  ;;  %v15955_v30 = vld [vmem:[%s21019_s5 + $0x58c] sm:$0xf]  ;;  %v12496_v55 = vld [vmem:[%s21019_s5 + $0x598] sm:$0xf0] }
 0x267   : > { %v3057_v4 = vpop.f32.mrf.mxu1  ;;  %v16025_v43 = vld [vmem:[%s21019_s5 + $0x7b4] sm:$0xf0]  ;;  %v12499_v17 = vor.u32 %v15955_v30, %v12496_v55  ;;  %v15951_v12 = vld [vmem:[%s21019_s5 + $0x56c] sm:$0xf]  ;;  %v12448_v27 = vld [vmem:[%s21019_s5 + $0x538] sm:$0xf0] }
 0x268   : > { %v19556_v14 = vpop.f32.mrf.mxu2  ;;  %4372 = vmatpush.bf16.msrb.mxu1 %v12607_v45  ;;  %v3058_v26 = vadd.f32 %v3057_v4, %v3040_v15  ;;  %4284 = vmatpush.bf16.msrb.mxu3 %v12539_v25  ;;  %v16037_v45 = vld [vmem:[%s21019_s5 + $0x814] sm:$0xf0]  ;;  %v12495_v25 = vor.u32 %v15957_v51, %v12494_v2  ;;  %v12475_v4 = vor.u32 %v15950_v9, %v12472_v50  ;;  %v12464_v2 = vld [vmem:[%s21019_s5 + $0x558] sm:$0xf0]  ;;  %v15804_v9 = vld [vmem:[%s21019_s5 + $0xcc] sm:$0xf0] }
 0x269   : > { %v3302_v62 = vld [vmem:[#allocation3 + $0x68] sm:$0x1]  ;;  %v12815_v22 = vor.u32 %v16037_v45, %v12814_v23  ;;  %v15953_v15 = vld [vmem:[%s21019_s5 + $0x574] sm:$0xf0]  ;;  %v12734_v23 = vld [vmem:[%s21019_s5 + $0x768] sm:$0xf] }
 0x26a   : > { %v3076_v47 = vadd.f32 %v19501_v33, %v3058_v26  ;;  %v3449_v11 = vpack.c.bf16 %v3302_v62, %v3302_v62  ;;  %v16041_v33 = vld [vmem:[%s21019_s5 + $0x834] sm:$0xf0]  ;;  %4355 = vmatpush.bf16.msrb.mxu0 %v12527_v21  ;;  %v12512_v26 = vld [vmem:[%s21019_s5 + $0x5b8] sm:$0xf0]  ;;  %v12799_v21 = vor.u32 %v16033_v8, %v12798_v39  ;;  %v12718_v50 = vld [vmem:[%s21019_s5 + $0x748] sm:$0xf] }
 0x26b   : > { %v12831_v44 = vor.u32 %v16041_v33, %v12830_v42  ;;  %v12515_v40 = vor.u32 %v15959_v38, %v12512_v26  ;;  %v16021_v16 = vld [vmem:[%s21019_s5 + $0x794] sm:$0xf0]  ;;  %v15939_v55 = vld [vmem:[%s21019_s5 + $0x50c] sm:$0xf] }
 0x26c   : > { %4373 = vmatpush.bf16.msrb.mxu1 %v12591_v59  ;;  %v3100_v35 = vadd.f32 %v19579_v10, %v3076_v47  ;;  %v3495_v32 = vshll.u32 %v3449_v11, 16  ;;  %4285 = vmatpush.bf16.msrb.mxu3 %v12523_v29  ;;  %v3045_v29 = vadd.f32 %v19472_v19, %v19034_v1  ;;  %v12782_v11 = vld [vmem:[%s21019_s5 + $0x7c8] sm:$0xf]  ;;  %v16029_v1 = vld [vmem:[%s21019_s5 + $0x7d4] sm:$0xf0] }
 0x26d   : > { %v12783_v33 = vor.u32 %v16029_v1, %v12782_v11  ;;  %v16017_v45 = vld [vmem:[%s21019_s5 + $0x774] sm:$0xf0]  ;;  %v12688_v11 = vld [vmem:[%s21019_s5 + $0x718] sm:$0xf0] }
 0x26e   : > { %v3115_v54 = vmax.f32 %v3100_v35, 0.0  ;;  %v3497_v49 = vrot.slane %v3495_v32, 1  ;;  %4356 = vmatpush.bf16.msrb.mxu0 %v12511_v24  ;;  %v12766_v35 = vld [vmem:[%s21019_s5 + $0x7a8] sm:$0xf]  ;;  %v12735_v20 = vor.u32 %v16017_v45, %v12734_v23  ;;  %v15945_v38 = vld [vmem:[%s21019_s5 + $0x534] sm:$0xf0] }
 0x26f   : > { %4374 = vmatmul.bf16.vlgmr.msrb.gmra.mxu1 %v19421_v37  ;;  %v3059_v60 = vpop.f32.mrf.mxu1  ;;  %v15931_v45 = vld [vmem:[%s21019_s5 + $0x4cc] sm:$0xf] }
 0x270   : > { %4422 = vmatpush.bf16.msra.mxu1 %v12579_v0  ;;  %v19616_v46 = vpop.f32.mrf.mxu2  ;;  %3131 = vst.msk [vmem:[#allocation3 + $0x20] sm:$0xff] %vm3130_vm4, %v3115_v54  ;;  %v3060_v28 = vadd.f32 %v3059_v60, %v3042_v18  ;;  %v19639_v57 = vsel %vm1247_vm3, %v3493_v56, %v3497_v49  ;;  %4286 = vmatpush.bf16.msrb.mxu3 %v12507_v52  ;;  %v12480_v52 = vld [vmem:[%s21019_s5 + $0x578] sm:$0xf0]  ;;  %v12986_v60 = vld [vmem:[%s21019_s5 + $0xe0] sm:$0xf] }
 0x271   : > { %4248 = vmatmul.bf16.vlgmr.msrb.gmra.mxu2 %v19639_v57  ;;  %v12479_v0 = vor.u32 %v15953_v15, %v12478_v3  ;;  %v12483_v56 = vor.u32 %v15951_v12, %v12480_v52  ;;  %v16007_v3 = vld [vmem:[%s21019_s5 + $0x72c] sm:$0xf]  ;;  %v12704_v15 = vld [vmem:[%s21019_s5 + $0x738] sm:$0xf0]  ;;  %v12414_v52 = vld [vmem:[%s21019_s5 + $0x4e8] sm:$0xf] }
 0x272   : > { %v3078_v58 = vadd.f32 %v19556_v14, %v3060_v28  ;;  %4380 = vmatpush.bf16.msrb.mxu2 %v12831_v44  ;;  %4357 = vmatpush.bf16.msrb.mxu0 %v12495_v25  ;;  %v15947_v44 = vld [vmem:[%s21019_s5 + $0x54c] sm:$0xf]  ;;  %v12970_v25 = vld [vmem:[%s21019_s5 + $0xc0] sm:$0xf]  ;;  %v12707_v5 = vor.u32 %v16007_v3, %v12704_v15  ;;  %v15929_v3 = vld [vmem:[%s21019_s5 + $0x4b4] sm:$0xf0] }
 0x273   : > { %v12467_v28 = vor.u32 %v15947_v44, %v12464_v2  ;;  %v15995_v44 = vld [vmem:[%s21019_s5 + $0x6cc] sm:$0xf]  ;;  %v12656_v2 = vld [vmem:[%s21019_s5 + $0x6d8] sm:$0xf0] }
 0x274   : > { %4423 = vmatpush.bf16.msra.mxu1 %v12563_v13  ;;  %v3105_v14 = vadd.f32 %v19579_v10, %v3078_v58  ;;  %4287 = vmatpush.bf16.msrb.mxu3 %v12491_v7  ;;  %v12463_v13 = vor.u32 %v15949_v61, %v12462_v34  ;;  %v16013_v58 = vld [vmem:[%s21019_s5 + $0x754] sm:$0xf0] }
 0x276   : > { %v3120_v62 = vmax.f32 %v3105_v14, 0.0  ;;  %4381 = vmatpush.bf16.msrb.mxu2 %v12815_v22  ;;  %4358 = vmatpush.bf16.msrb.mxu0 %v12479_v0  ;;  %v12971_v14 = vor.u32 %v15804_v9, %v12970_v25  ;;  %v15943_v0 = vld [vmem:[%s21019_s5 + $0x52c] sm:$0xf] }
 0x277   : > { %v3062_v47 = vpop.f32.mrf.mxu1  ;;  %v3298_v54 = vld [vmem:[#allocation3 + $0x20] sm:$0xfe]  ;;  %v12451_v1 = vor.u32 %v15943_v0, %v12448_v27 }
 0x278   : > { %4424 = vmatpush.bf16.msra.mxu1 %v12547_v63  ;;  %v3082_v59 = vpop.f32.mrf.mxu2  ;;  %3136 = vst.msk [vmem:[#allocation3 + $0x48] sm:$0xff] %vm3130_vm4, %v3120_v62  ;;  %v3063_v19 = vadd.f32 %v3062_v47, %v3045_v29  ;;  %4288 = vmatpush.bf16.msrb.mxu3 %v12475_v4  ;;  %v15808_v63 = vld [vmem:[%s21019_s5 + $0xec] sm:$0xf0]  ;;  %v12719_v4 = vor.u32 %v16013_v58, %v12718_v50  ;;  %v12954_v29 = vld [vmem:[%s21019_s5 + $0xa0] sm:$0xf] }
 0x279   : > { %v12987_v7 = vor.u32 %v15808_v63, %v12986_v60  ;;  %v15800_v62 = vld [vmem:[%s21019_s5 + $0xac] sm:$0xf0]  ;;  %v16003_v47 = vld [vmem:[%s21019_s5 + $0x70c] sm:$0xf]  ;;  %v12398_v60 = vld [vmem:[%s21019_s5 + $0x4c8] sm:$0xf] }
 0x27a   : > { %v3081_v42 = vadd.f32 %v19616_v46, %v3063_v19  ;;  %4382 = vmatpush.bf16.msrb.mxu2 %v12799_v21  ;;  %4359 = vmatpush.bf16.msrb.mxu0 %v12463_v13  ;;  %v12767_v46 = vor.u32 %v16025_v43, %v12766_v35  ;;  %v12430_v19 = vld [vmem:[%s21019_s5 + $0x508] sm:$0xf]  ;;  %v12955_v30 = vor.u32 %v15800_v62, %v12954_v29  ;;  %v12432_v13 = vld [vmem:[%s21019_s5 + $0x518] sm:$0xf0]  ;;  %v15796_v35 = vld [vmem:[%s21019_s5 + $0x8c] sm:$0xf0] }
 0x27b   : > { %v12435_v12 = vor.u32 %v15939_v55, %v12432_v13  ;;  %v15933_v63 = vld [vmem:[%s21019_s5 + $0x4d4] sm:$0xf0]  ;;  %v15991_v9 = vld [vmem:[%s21019_s5 + $0x6ac] sm:$0xf]  ;;  %v12640_v50 = vld [vmem:[%s21019_s5 + $0x6b8] sm:$0xf0] }
 0x27c   : > { %4425 = vmatpush.bf16.msra.mxu1 %v12531_v36  ;;  %v3110_v32 = vadd.f32 %v19579_v10, %v3081_v42  ;;  %4289 = vmatpush.bf16.msrb.mxu3 %v12459_v41  ;;  %v12750_v10 = vld [vmem:[%s21019_s5 + $0x788] sm:$0xf]  ;;  %v12691_v42 = vor.u32 %v16003_v47, %v12688_v11  ;;  %v12399_v25 = vor.u32 %v15933_v63, %v12398_v60  ;;  %v15923_v62 = vld [vmem:[%s21019_s5 + $0x48c] sm:$0xf]  ;;  %v15780_v47 = vld [vmem:[%s21019_s5 + $0xc] sm:$0xf0] }
 0x27d   : > { %v12751_v51 = vor.u32 %v16021_v16, %v12750_v10  ;;  %v12446_v36 = vld [vmem:[%s21019_s5 + $0x528] sm:$0xf]  ;;  %v15935_v10 = vld [vmem:[%s21019_s5 + $0x4ec] sm:$0xf]  ;;  %v13372_v60 = vld [vmem:[%s21019_s5 + $0x3f0] sm:$0xf0] }
 0x27e   : > { %v3125_v18 = vmax.f32 %v3110_v32, 0.0  ;;  %4383 = vmatpush.bf16.msrb.mxu2 %v12783_v33  ;;  %v12447_v61 = vor.u32 %v15945_v38, %v12446_v36  ;;  %v12938_v33 = vld [vmem:[%s21019_s5 + $0x80] sm:$0xf]  ;;  %v15999_v32 = vld [vmem:[%s21019_s5 + $0x6ec] sm:$0xf] }
 0x27f   : > { %v3064_v24 = vpop.f32.mrf.mxu1  ;;  %v19721_v53 = vld [vmem:[#allocation3 + $0x48] sm:$0xff]  ;;  %v12890_v36 = vld [vmem:[%s21019_s5 + $0x20] sm:$0xf]  ;;  %v12366_v27 = vld [vmem:[%s21019_s5 + $0x488] sm:$0xf] }
 0x280   : > { %4426 = vmatpush.bf16.msra.mxu1 %v12515_v40  ;;  %3142 = vst.msk [vmem:[#allocation3 + $0x70] sm:$0x1] %vm3141_vm5, %v3125_v18  ;;  %v3445_v49 = vpack.c.bf16 %v19721_v53, %v3298_v54  ;;  %v15941_v40 = vld [vmem:[%s21019_s5 + $0x514] sm:$0xf0]  ;;  %v12416_v24 = vld [vmem:[%s21019_s5 + $0x4f8] sm:$0xf0] }
 0x281   : > { %4318 = vmatmul.bf16.vlgmr.msra.gmra.mxu2 %v19639_v57  ;;  %v12431_v43 = vor.u32 %v15941_v40, %v12430_v19  ;;  %v15937_v18 = vld [vmem:[%s21019_s5 + $0x4f4] sm:$0xf0]  ;;  %v12922_v54 = vld [vmem:[%s21019_s5 + $0x60] sm:$0xf]  ;;  %v15784_v38 = vld [vmem:[%s21019_s5 + $0x2c] sm:$0xf0] }
 0x282   : > { %4384 = vmatpush.bf16.msrb.mxu2 %v12767_v46  ;;  %v3502_v6 = vshll.u32 %v3445_v49, 16  ;;  %v3500_v59 = vshrl.u32 %v3445_v49, 16  ;;  %v12939_v46 = vor.u32 %v15796_v35, %v12938_v33  ;;  %v12415_v49 = vor.u32 %v15937_v18, %v12414_v52  ;;  %v15983_v11 = vld [vmem:[%s21019_s5 + $0x66c] sm:$0xf]  ;;  %v12608_v19 = vld [vmem:[%s21019_s5 + $0x678] sm:$0xf0] }
 0x283   : > { %v12891_v29 = vor.u32 %v15784_v38, %v12890_v36  ;;  %v13402_v40 = vld [vmem:[%s21019_s5 + $0x420] sm:$0xf]  ;;  %v12350_v13 = vld [vmem:[%s21019_s5 + $0x468] sm:$0xf]  ;;  %v15919_v33 = vld [vmem:[%s21019_s5 + $0x46c] sm:$0xf] }
 0x284   : > { %4427 = vmatpush.bf16.msra.mxu1 %v12499_v17  ;;  %v3504_v8 = vrot.slane %v3502_v6, 1  ;;  %v12672_v17 = vld [vmem:[%s21019_s5 + $0x6f8] sm:$0xf0]  ;;  %v12659_v6 = vor.u32 %v15995_v44, %v12656_v2  ;;  %v13386_v18 = vld [vmem:[%s21019_s5 + $0x400] sm:$0xf] }
 0x285   : > { %v12675_v16 = vor.u32 %v15999_v32, %v12672_v17  ;;  %v12352_v35 = vld [vmem:[%s21019_s5 + $0x478] sm:$0xf0]  ;;  %v15979_v32 = vld [vmem:[%s21019_s5 + $0x64c] sm:$0xf]  ;;  %v12611_v17 = vor.u32 %v15983_v11, %v12608_v19  ;;  %v13114_v44 = vld [vmem:[%s21019_s5 + $0x1e0] sm:$0xf] }
 0x286   : > { %4385 = vmatpush.bf16.msrb.mxu2 %v12751_v51  ;;  %v3505_v21 = vor.u32 %v3504_v8, %v3500_v59  ;;  %v12419_v51 = vor.u32 %v15935_v10, %v12416_v24  ;;  %v12384_v8 = vld [vmem:[%s21019_s5 + $0x4b8] sm:$0xf0]  ;;  %v15987_v59 = vld [vmem:[%s21019_s5 + $0x68c] sm:$0xf]  ;;  %v12334_v24 = vld [vmem:[%s21019_s5 + $0x448] sm:$0xf] }
 0x287   : > { %v3303_v22 = vld [vmem:[#allocation3 + $0x70] sm:$0x1]  ;;  %v12592_v52 = vld [vmem:[%s21019_s5 + $0x658] sm:$0xf0]  ;;  %v15840_v2 = vld [vmem:[%s21019_s5 + $0x1ec] sm:$0xf0] }
 0x288   : > { %4428 = vmatpush.bf16.msra.mxu1 %v12483_v56  ;;  %v3450_v39 = vpack.c.bf16 %v3303_v22, %v3303_v22  ;;  %v15792_v56 = vld [vmem:[%s21019_s5 + $0x6c] sm:$0xf0]  ;;  %v12382_v22 = vld [vmem:[%s21019_s5 + $0x4a8] sm:$0xf]  ;;  %v13356_v36 = vld [vmem:[%s21019_s5 + $0x3d0] sm:$0xf0] }
 0x289   : > { %v12923_v23 = vor.u32 %v15792_v56, %v12922_v54  ;;  %v15915_v54 = vld [vmem:[%s21019_s5 + $0x44c] sm:$0xf]  ;;  %v12355_v56 = vor.u32 %v15919_v33, %v12352_v35  ;;  %v12862_v63 = vld [vmem:[%s21019_s5 + $0x868] sm:$0xf]  ;;  %v13340_v19 = vld [vmem:[%s21019_s5 + $0x3b0] sm:$0xf0] }
 0x28a   : > { %4386 = vmatpush.bf16.msrb.mxu2 %v12735_v20  ;;  %v3507_v26 = vshll.u32 %v3450_v39, 16  ;;  %v15788_v20 = vld [vmem:[%s21019_s5 + $0x4c] sm:$0xf0]  ;;  %v15927_v39 = vld [vmem:[%s21019_s5 + $0x4ac] sm:$0xf] }
 0x28b   : > { %v12387_v0 = vor.u32 %v15927_v39, %v12384_v8  ;;  %v15898_v39 = vld [vmem:[%s21019_s5 + $0x3c4] sm:$0xf]  ;;  %v12846_v38 = vld [vmem:[%s21019_s5 + $0x848] sm:$0xf]  ;;  %v15828_v35 = vld [vmem:[%s21019_s5 + $0x18c] sm:$0xf0] }
 0x28c   : > { %4429 = vmatpush.bf16.msra.mxu1 %v12467_v28  ;;  %v3509_v34 = vrot.slane %v3507_v26, 1  ;;  %v12400_v28 = vld [vmem:[%s21019_s5 + $0x4d8] sm:$0xf0] }
 0x28d   : > { %v12403_v58 = vor.u32 %v15931_v45, %v12400_v28  ;;  %v12624_v26 = vld [vmem:[%s21019_s5 + $0x698] sm:$0xf0]  ;;  %v12595_v28 = vor.u32 %v15979_v32, %v12592_v52  ;;  %v13324_v32 = vld [vmem:[%s21019_s5 + $0x390] sm:$0xf0]  ;;  %v16031_v52 = vld [vmem:[%s21019_s5 + $0x7ec] sm:$0xf] }
 0x28e   : > { %4387 = vmatpush.bf16.msrb.mxu2 %v12719_v4  ;;  %v19793_v41 = vsel %vm1247_vm3, %v3505_v21, %v3509_v34  ;;  %v12383_v4 = vor.u32 %v15929_v3, %v12382_v22  ;;  %v12368_v21 = vld [vmem:[%s21019_s5 + $0x498] sm:$0xf0]  ;;  %v12627_v34 = vor.u32 %v15987_v59, %v12624_v26  ;;  %v13098_v3 = vld [vmem:[%s21019_s5 + $0x1c0] sm:$0xf]  ;;  %v16043_v59 = vld [vmem:[%s21019_s5 + $0x84c] sm:$0xf] }
 0x28f   : > { %4430 = vmatmul.bf16.vlgmr.msra.gmra.mxu1 %v19411_v48  ;;  %12868 = vmatmul.msk.bf16.vlgmr.msra.gmra.mxu3 %vm3130_vm4, %v19793_v41  ;;  %v12371_v55 = vor.u32 %v15923_v62, %v12368_v21  ;;  %v12848_v26 = vld [vmem:[%s21019_s5 + $0x858] sm:$0xf0]  ;;  %v15904_v62 = vld [vmem:[%s21019_s5 + $0x3ec] sm:$0xf0]  ;;  %v13359_v21 = vor.u32 %v15898_v39, %v13356_v36 }
 0x290   : > { %5161 = vmatpush.bf16.msrb.mxu1 %v12987_v7  ;;  %12869 = vmatmul.msk.bf16.vlgmr.msra.gmra.mxu0 %vm3130_vm4, %v19793_v41  ;;  %v12906_v7 = vld [vmem:[%s21019_s5 + $0x40] sm:$0xf]  ;;  %v12851_v11 = vor.u32 %v16043_v59, %v12848_v26  ;;  %v12768_v39 = vld [vmem:[%s21019_s5 + $0x7b8] sm:$0xf0]  ;;  %v15816_v59 = vld [vmem:[%s21019_s5 + $0x12c] sm:$0xf0] }
 0x291   : > { %4338 = vmatpush.bf16.msra.mxu3 %v12447_v61  ;;  %4408 = vmatpush.bf16.msra.mxu0 %v12451_v1  ;;  %v12907_v15 = vor.u32 %v15788_v20, %v12906_v7  ;;  %v12874_v61 = vld [vmem:[%s21019_s5] sm:$0xf]  ;;  %v16049_v7 = vld [vmem:[%s21019_s5 + $0x874] sm:$0xf0]  ;;  %v16047_v20 = vld [vmem:[%s21019_s5 + $0x86c] sm:$0xf] }
 0x292   : > { %4436 = vmatpush.bf16.msra.mxu2 %v12707_v5  ;;  %v15925_v5 = vld [vmem:[%s21019_s5 + $0x494] sm:$0xf0]  ;;  %v12863_v8 = vor.u32 %v16049_v7, %v12862_v63  ;;  %v16027_v63 = vld [vmem:[%s21019_s5 + $0x7cc] sm:$0xf]  ;;  %v13322_v7 = vld [vmem:[%s21019_s5 + $0x380] sm:$0xf] }
 0x293   : > { %4388 = vmatmul.bf16.vlgmr.msrb.gmra.mxu2 %v19639_v57  ;;  %v12367_v1 = vor.u32 %v15925_v5, %v12366_v27  ;;  %v12832_v5 = vld [vmem:[%s21019_s5 + $0x838] sm:$0xf0]  ;;  %v15878_v26 = vld [vmem:[%s21019_s5 + $0x324] sm:$0xf] }
 0x294   : > { %5162 = vmatpush.bf16.msrb.mxu1 %v12971_v14  ;;  %v12643_v14 = vor.u32 %v15991_v9, %v12640_v50  ;;  %v13115_v50 = vor.u32 %v15840_v2, %v13114_v44  ;;  %v13308_v44 = vld [vmem:[%s21019_s5 + $0x370] sm:$0xf0]  ;;  %v3147_v2 = vld [vmem:[#allocation3 + $0x20] sm:$0xff] }
 0x295   : > { %4339 = vmatpush.bf16.msra.mxu3 %v12431_v43  ;;  %4409 = vmatpush.bf16.msra.mxu0 %v12435_v12  ;;  %v3143_v43 = vld [vmem:[#allocation3] sm:$0xff] }
 0x296   : > { %4437 = vmatpush.bf16.msra.mxu2 %v12691_v42  ;;  %v12875_v42 = vor.u32 %v15780_v47, %v12874_v61  ;;  %v15832_v61 = vld [vmem:[%s21019_s5 + $0x1ac] sm:$0xf0] }
 0x298   : > { %5163 = vmatpush.bf16.msrb.mxu1 %v12955_v30  ;;  %v15912_v30 = vld [vmem:[%s21019_s5 + $0x42c] sm:$0xf0] }
 0x299   : > { %4340 = vmatpush.bf16.msra.mxu3 %v12415_v49  ;;  %4410 = vmatpush.bf16.msra.mxu0 %v12419_v51  ;;  %v13403_v12 = vor.u32 %v15912_v30, %v13402_v40  ;;  %v12336_v49 = vld [vmem:[%s21019_s5 + $0x458] sm:$0xf0]  ;;  %v15902_v51 = vld [vmem:[%s21019_s5 + $0x3e4] sm:$0xf] }
 0x29a   : > { %4438 = vmatpush.bf16.msra.mxu2 %v12675_v16  ;;  %v15917_v16 = vld [vmem:[%s21019_s5 + $0x454] sm:$0xf0]  ;;  %v13375_v22 = vor.u32 %v15902_v51, %v13372_v60 }
 0x29b   : > { %v12335_v9 = vor.u32 %v15917_v16, %v12334_v24  ;;  %v15896_v24 = vld [vmem:[%s21019_s5 + $0x3ac] sm:$0xf0] }
 0x29c   : > { %5164 = vmatpush.bf16.msrb.mxu1 %v12939_v46  ;;  %v15908_v46 = vld [vmem:[%s21019_s5 + $0x40c] sm:$0xf0] }
 0x29d   : > { %4341 = vmatpush.bf16.msra.mxu3 %v12399_v25  ;;  %4411 = vmatpush.bf16.msra.mxu0 %v12403_v58  ;;  %v12864_v25 = vld [vmem:[%s21019_s5 + $0x878] sm:$0xf0]  ;;  %v12339_v58 = vor.u32 %v15915_v54, %v12336_v49  ;;  %v13050_v54 = vld [vmem:[%s21019_s5 + $0x160] sm:$0xf]  ;;  %v15886_v49 = vld [vmem:[%s21019_s5 + $0x364] sm:$0xf] }
 0x29e   : > { %4439 = vmatpush.bf16.msra.mxu2 %v12659_v6  ;;  %v13387_v6 = vor.u32 %v15908_v46, %v13386_v18  ;;  %v12800_v46 = vld [vmem:[%s21019_s5 + $0x7f8] sm:$0xf0] }
 0x29f   : > { %4290 = vmatmul.bf16.vlgmr.msrb.gmra.mxu3 %v19411_v48  ;;  %v12803_v51 = vor.u32 %v16031_v52, %v12800_v46  ;;  %v15802_v46 = vld [vmem:[%s21019_s5 + $0xc4] sm:$0xf] }
 0x2a0   : > { %5165 = vmatpush.bf16.msrb.mxu1 %v12923_v23  ;;  %4360 = vmatmul.bf16.vlgmr.msrb.gmra.mxu0 %v19411_v48  ;;  %v15921_v48 = vld [vmem:[%s21019_s5 + $0x474] sm:$0xf0]  ;;  %v16676_v23 = vld [vmem:[#allocation3 + $0x28] sm:$0xff] }
 0x2a1   : > { %4342 = vmatpush.bf16.msra.mxu3 %v12383_v4  ;;  %4412 = vmatpush.bf16.msra.mxu0 %v12387_v0  ;;  %v12351_v10 = vor.u32 %v15921_v48, %v12350_v13  ;;  %v19973_v45 = vpack.c.bf16 %v16676_v23, %v3143_v43  ;;  %v16045_v4 = vld [vmem:[%s21019_s5 + $0x854] sm:$0xf0]  ;;  %v16039_v0 = vld [vmem:[%s21019_s5 + $0x82c] sm:$0xf]  ;;  %v12816_v48 = vld [vmem:[%s21019_s5 + $0x818] sm:$0xf0]  ;;  %v20088_v23 = vpack.c.bf16 %v19721_v53, %v3147_v2 }
 0x2a2   : > { %4440 = vmatpush.bf16.msra.mxu2 %v12643_v14  ;;  %v12867_v14 = vor.u32 %v16047_v20, %v12864_v25  ;;  %v12847_v47 = vor.u32 %v16045_v4, %v12846_v38  ;;  %v12835_v40 = vor.u32 %v16039_v0, %v12832_v5  ;;  %v15890_v43 = vld [vmem:[%s21019_s5 + $0x384] sm:$0xf]  ;;  %v15892_v20 = vld [vmem:[%s21019_s5 + $0x38c] sm:$0xf0]  ;;  %v13311_v25 = vor.u32 %v15886_v49, %v13308_v44  ;;  %v13034_v53 = vld [vmem:[%s21019_s5 + $0x140] sm:$0xf] }
 0x2a3   : > { %v13327_v16 = vor.u32 %v15890_v43, %v13324_v32  ;;  %v13018_v4 = vld [vmem:[%s21019_s5 + $0x120] sm:$0xf]  ;;  %v13276_v0 = vld [vmem:[%s21019_s5 + $0x330] sm:$0xf0]  ;;  %v16011_v49 = vld [vmem:[%s21019_s5 + $0x74c] sm:$0xf] }
 0x2a4   : > { %5166 = vmatpush.bf16.msrb.mxu1 %v12907_v15  ;;  %v15836_v15 = vld [vmem:[%s21019_s5 + $0x1cc] sm:$0xf0]  ;;  %v12720_v44 = vld [vmem:[%s21019_s5 + $0x758] sm:$0xf0]  ;;  %v13258_v2 = vld [vmem:[%s21019_s5 + $0x300] sm:$0xf] }
 0x2a5   : > { %4343 = vmatpush.bf16.msra.mxu3 %v12367_v1  ;;  %4413 = vmatpush.bf16.msra.mxu0 %v12371_v55  ;;  %v13099_v27 = vor.u32 %v15836_v15, %v13098_v3  ;;  %v15894_v1 = vld [vmem:[%s21019_s5 + $0x3a4] sm:$0xf]  ;;  %v16035_v55 = vld [vmem:[%s21019_s5 + $0x80c] sm:$0xf]  ;;  %v13323_v3 = vor.u32 %v15892_v20, %v13322_v7  ;;  %v13244_v20 = vld [vmem:[%s21019_s5 + $0x2f0] sm:$0xf0] }
 0x2a6   : > { %4441 = vmatpush.bf16.msra.mxu2 %v12627_v34  ;;  %v13082_v34 = vld [vmem:[%s21019_s5 + $0x1a0] sm:$0xf]  ;;  %v13343_v33 = vor.u32 %v15894_v1, %v13340_v19  ;;  %v16023_v15 = vld [vmem:[%s21019_s5 + $0x7ac] sm:$0xf]  ;;  %v15874_v1 = vld [vmem:[%s21019_s5 + $0x304] sm:$0xf] }
 0x2a7   : > { %v13083_v13 = vor.u32 %v15832_v61, %v13082_v34  ;;  %v15884_v34 = vld [vmem:[%s21019_s5 + $0x34c] sm:$0xf0]  ;;  %v13019_v61 = vor.u32 %v15816_v59, %v13018_v4  ;;  %v13260_v19 = vld [vmem:[%s21019_s5 + $0x310] sm:$0xf0]  ;;  %v15870_v7 = vld [vmem:[%s21019_s5 + $0x2e4] sm:$0xf] }
 0x2a8   : > { %5167 = vmatpush.bf16.msrb.mxu1 %v12891_v29  ;;  %v13370_v29 = vld [vmem:[%s21019_s5 + $0x3e0] sm:$0xf]  ;;  %v13263_v32 = vor.u32 %v15874_v1, %v13260_v19  ;;  %v13247_v4 = vor.u32 %v15870_v7, %v13244_v20  ;;  %v13218_v59 = vld [vmem:[%s21019_s5 + $0x2a8] sm:$0xf]  ;;  %v15861_v19 = vld [vmem:[%s21019_s5 + $0x294] sm:$0xf0] }
 0x2a9   : > { %4344 = vmatpush.bf16.msra.mxu3 %v12351_v10  ;;  %4414 = vmatpush.bf16.msra.mxu0 %v12355_v56  ;;  %v13371_v30 = vor.u32 %v15904_v62, %v13370_v29  ;;  %v13338_v10 = vld [vmem:[%s21019_s5 + $0x3a0] sm:$0xf]  ;;  %v15824_v56 = vld [vmem:[%s21019_s5 + $0x16c] sm:$0xf0]  ;;  %v16019_v29 = vld [vmem:[%s21019_s5 + $0x78c] sm:$0xf] }
 0x2aa   : > { %4442 = vmatpush.bf16.msra.mxu2 %v12611_v17  ;;  %v12819_v17 = vor.u32 %v16035_v55, %v12816_v48  ;;  %v13339_v60 = vor.u32 %v15896_v24, %v13338_v10  ;;  %v12752_v62 = vld [vmem:[%s21019_s5 + $0x798] sm:$0xf0]  ;;  %v13250_v48 = vld [vmem:[%s21019_s5 + $0x2e8] sm:$0xf]  ;;  %v12972_v10 = vld [vmem:[%s21019_s5 + $0xd0] sm:$0xf0] }
 0x2ab   : > { %v12755_v55 = vor.u32 %v16019_v29, %v12752_v62  ;;  %v13234_v24 = vld [vmem:[%s21019_s5 + $0x2c8] sm:$0xf]  ;;  %v15866_v29 = vld [vmem:[%s21019_s5 + $0x2c4] sm:$0xf]  ;;  %v13228_v62 = vld [vmem:[%s21019_s5 + $0x2d0] sm:$0xf0] }
 0x2ac   : > { %5168 = vmatpush.bf16.msrb.mxu1 %v12875_v42  ;;  %v15900_v42 = vld [vmem:[%s21019_s5 + $0x3cc] sm:$0xf0]  ;;  %v13202_v1 = vld [vmem:[%s21019_s5 + $0x288] sm:$0xf]  ;;  %v15782_v7 = vld [vmem:[%s21019_s5 + $0x24] sm:$0xf] }
 0x2ad   : > { %4345 = vmatpush.bf16.msra.mxu3 %v12335_v9  ;;  %4415 = vmatpush.bf16.msra.mxu0 %v12339_v58  ;;  %v15820_v9 = vld [vmem:[%s21019_s5 + $0x14c] sm:$0xf0]  ;;  %v13292_v58 = vld [vmem:[%s21019_s5 + $0x350] sm:$0xf0] }
 0x2ae   : > { %4443 = vmatpush.bf16.msra.mxu2 %v12595_v28  ;;  %v13051_v28 = vor.u32 %v15824_v56, %v13050_v54  ;;  %v13035_v36 = vor.u32 %v15820_v9, %v13034_v53  ;;  %v15869_v56 = vld [vmem:[%s21019_s5 + $0x2d4] sm:$0xf0]  ;;  %v16678_v9 = vld [vmem:[#allocation3 + $0x40] sm:$0xff]  ;;  %v12892_v20 = vld [vmem:[%s21019_s5 + $0x30] sm:$0xf0] }
 0x2af   : > { %5169 = vmatmul.bf16.vlgmr.msrb.gmra.mxu1 %v19973_v45 }
 0x2b0   : > { %5223 = vmatpush.bf16.msra.mxu1 %v13403_v12  ;;  %4346 = vmatmul.bf16.vlgmr.msra.gmra.mxu3 %v19289_v31 }
 0x2b1   : > { %4400 = vmatpush.bf16.msrb.mxu3 %v12863_v8  ;;  %4470 = vmatpush.bf16.msrb.mxu0 %v12867_v14  ;;  %v13306_v8 = vld [vmem:[%s21019_s5 + $0x360] sm:$0xf]  ;;  %v15888_v14 = vld [vmem:[%s21019_s5 + $0x36c] sm:$0xf0] }
 0x2b2   : > { %5175 = vmatpush.bf16.msrb.mxu2 %v13115_v50  ;;  %4416 = vmatmul.bf16.vlgmr.msra.gmra.mxu0 %v19289_v31  ;;  %v13066_v31 = vld [vmem:[%s21019_s5 + $0x180] sm:$0xf]  ;;  %v15882_v50 = vld [vmem:[%s21019_s5 + $0x344] sm:$0xf]  ;;  %v13307_v5 = vor.u32 %v15888_v14, %v13306_v8 }
 0x2b3   : > { %4444 = vmatmul.bf16.vlgmr.msra.gmra.mxu2 %v19421_v37  ;;  %v13354_v37 = vld [vmem:[%s21019_s5 + $0x3c0] sm:$0xf]  ;;  %v13067_v18 = vor.u32 %v15828_v35, %v13066_v31  ;;  %v13295_v38 = vor.u32 %v15882_v50, %v13292_v58  ;;  %v15880_v35 = vld [vmem:[%s21019_s5 + $0x32c] sm:$0xf0]  ;;  %v12975_v58 = vor.u32 %v15802_v46, %v12972_v10  ;;  %v15798_v14 = vld [vmem:[%s21019_s5 + $0xa4] sm:$0xf] }
 0x2b4   : > { %5224 = vmatpush.bf16.msra.mxu1 %v13387_v6  ;;  %v13355_v12 = vor.u32 %v15900_v42, %v13354_v37  ;;  %v12784_v6 = vld [vmem:[%s21019_s5 + $0x7d8] sm:$0xf0]  ;;  %v15873_v37 = vld [vmem:[%s21019_s5 + $0x2f4] sm:$0xf0]  ;;  %v16015_v42 = vld [vmem:[%s21019_s5 + $0x76c] sm:$0xf] }
 0x2b5   : > { %4401 = vmatpush.bf16.msrb.mxu3 %v12847_v47  ;;  %4471 = vmatpush.bf16.msrb.mxu0 %v12851_v11  ;;  %v13279_v47 = vor.u32 %v15878_v26, %v13276_v0  ;;  %v15812_v11 = vld [vmem:[%s21019_s5 + $0x10c] sm:$0xf0]  ;;  %v13274_v31 = vld [vmem:[%s21019_s5 + $0x320] sm:$0xf]  ;;  %v15865_v26 = vld [vmem:[%s21019_s5 + $0x2b4] sm:$0xf0] }
 0x2b6   : > { %5176 = vmatpush.bf16.msrb.mxu2 %v13099_v27  ;;  %v12771_v27 = vor.u32 %v16023_v15, %v12768_v39  ;;  %v13275_v54 = vor.u32 %v15880_v35, %v13274_v31  ;;  %v12723_v39 = vor.u32 %v16011_v49, %v12720_v44  ;;  %v13226_v0 = vld [vmem:[%s21019_s5 + $0x2c0] sm:$0xf]  ;;  %v15786_v10 = vld [vmem:[%s21019_s5 + $0x44] sm:$0xf]  ;;  %v15853_v49 = vld [vmem:[%s21019_s5 + $0x254] sm:$0xf0] }
 0x2b7   : > { %v13178_v44 = vld [vmem:[%s21019_s5 + $0x260] sm:$0xf] }
 0x2b8   : > { %5273 = vmatpush.bf16.msrb.mxu1 %v13375_v22  ;;  %v12787_v22 = vor.u32 %v16027_v63, %v12784_v6  ;;  %v16677_v63 = vld [vmem:[#allocation3 + $0x30] sm:$0xff]  ;;  %v15872_v6 = vld [vmem:[%s21019_s5 + $0x2ec] sm:$0xf0] }
 0x2b9   : > { %4450 = vmatpush.bf16.msra.mxu3 %v12835_v40  ;;  %5203 = vmatpush.bf16.msra.mxu0 %v13371_v30  ;;  %v15806_v40 = vld [vmem:[%s21019_s5 + $0xe4] sm:$0xf]  ;;  %v12988_v30 = vld [vmem:[%s21019_s5 + $0xf0] sm:$0xf0] }
 0x2ba   : > { %5177 = vmatpush.bf16.msrb.mxu2 %v13083_v13  ;;  %v12991_v52 = vor.u32 %v15806_v40, %v12988_v30  ;;  %v13210_v40 = vld [vmem:[%s21019_s5 + $0x2a0] sm:$0xf]  ;;  %v15864_v30 = vld [vmem:[%s21019_s5 + $0x2ac] sm:$0xf0] }
 0x2bb   : > { %v13211_v31 = vor.u32 %v15864_v30, %v13210_v40 }
 0x2bc   : > { %5274 = vmatpush.bf16.msrb.mxu1 %v13359_v21  ;;  %v13290_v21 = vld [vmem:[%s21019_s5 + $0x340] sm:$0xf] }
 0x2bd   : > { %4451 = vmatpush.bf16.msra.mxu3 %v12819_v17  ;;  %5204 = vmatpush.bf16.msra.mxu0 %v13355_v12  ;;  %v13291_v13 = vor.u32 %v15884_v34, %v13290_v21  ;;  %v3144_v17 = vld [vmem:[#allocation3 + $0x8] sm:$0xff]  ;;  %v3146_v12 = vld [vmem:[#allocation3 + $0x18] sm:$0xff]  ;;  %v13219_v34 = vor.u32 %v15865_v26, %v13218_v59 }
 0x2be   : > { %5178 = vmatpush.bf16.msrb.mxu2 %v13067_v18  ;;  %v13251_v18 = vor.u32 %v15873_v37, %v13250_v48  ;;  %v20227_v50 = vpack.c.bf16 %v16678_v9, %v3146_v12  ;;  %v13203_v37 = vor.u32 %v15861_v19, %v13202_v1  ;;  %v15858_v12 = vld [vmem:[%s21019_s5 + $0x284] sm:$0xf]  ;;  %v13154_v9 = vld [vmem:[%s21019_s5 + $0x228] sm:$0xf]  ;;  %v3145_v19 = vld [vmem:[#allocation3 + $0x10] sm:$0xff] }
 0x2bf   : > { %13416 = vmatmul.msk.bf16.vlgmr.msra.gmra.mxu1 %vm3130_vm4, %v20088_v23 }
 0x2c0   : > { %5275 = vmatpush.bf16.msrb.mxu1 %v13343_v33  ;;  %12870 = vmatmul.msk.bf16.vlgmr.msrb.gmra.mxu3 %vm3130_vm4, %v19793_v41  ;;  %v12736_v33 = vld [vmem:[%s21019_s5 + $0x778] sm:$0xf0] }
 0x2c1   : > { %4452 = vmatpush.bf16.msra.mxu3 %v12803_v51  ;;  %5205 = vmatpush.bf16.msra.mxu0 %v13339_v60  ;;  %v15876_v51 = vld [vmem:[%s21019_s5 + $0x30c] sm:$0xf0]  ;;  %v13242_v60 = vld [vmem:[%s21019_s5 + $0x2e0] sm:$0xf] }
 0x2c2   : > { %5179 = vmatpush.bf16.msrb.mxu2 %v13051_v28  ;;  %12871 = vmatmul.msk.bf16.vlgmr.msrb.gmra.mxu0 %vm3130_vm4, %v19793_v41  ;;  %v13002_v41 = vld [vmem:[%s21019_s5 + $0x100] sm:$0xf]  ;;  %v20216_v28 = vpack.c.bf16 %v16677_v63, %v3144_v17  ;;  %v13259_v8 = vor.u32 %v15876_v51, %v13258_v2  ;;  %v15860_v17 = vld [vmem:[%s21019_s5 + $0x28c] sm:$0xf0]  ;;  %v15854_v51 = vld [vmem:[%s21019_s5 + $0x264] sm:$0xf] }
 0x2c3   : > { %v13003_v43 = vor.u32 %v15812_v11, %v13002_v41  ;;  %v13231_v11 = vor.u32 %v15866_v29, %v13228_v62  ;;  %v15856_v2 = vld [vmem:[%s21019_s5 + $0x26c] sm:$0xf0]  ;;  %v13404_v29 = vld [vmem:[%s21019_s5 + $0x430] sm:$0xf0]  ;;  %v15839_v62 = vld [vmem:[%s21019_s5 + $0x1ec] sm:$0xf] }
 0x2c4   : > { %5276 = vmatpush.bf16.msrb.mxu1 %v13327_v16  ;;  %v12739_v16 = vor.u32 %v16015_v42, %v12736_v33  ;;  %v15790_v42 = vld [vmem:[%s21019_s5 + $0x64] sm:$0xf]  ;;  %v12924_v33 = vld [vmem:[%s21019_s5 + $0x70] sm:$0xf0] }
 0x2c5   : > { %4453 = vmatpush.bf16.msra.mxu3 %v12787_v22  ;;  %5206 = vmatpush.bf16.msra.mxu0 %v13323_v3  ;;  %v13235_v22 = vor.u32 %v15869_v56, %v13234_v24  ;;  %v12908_v24 = vld [vmem:[%s21019_s5 + $0x50] sm:$0xf0]  ;;  %v13170_v56 = vld [vmem:[%s21019_s5 + $0x248] sm:$0xf] }
 0x2c6   : > { %5180 = vmatpush.bf16.msrb.mxu2 %v13035_v36  ;;  %v12956_v36 = vld [vmem:[%s21019_s5 + $0xb0] sm:$0xf0]  ;;  %v12911_v63 = vor.u32 %v15786_v10, %v12908_v24 }
 0x2c7   : > { %v12959_v21 = vor.u32 %v15798_v14, %v12956_v36  ;;  %v15778_v36 = vld [vmem:[%s21019_s5 + $0x4] sm:$0xf] }
 0x2c8   : > { %5277 = vmatpush.bf16.msrb.mxu1 %v13311_v25  ;;  %v4207_v25 = vpop.f32.mrf.mxu3 }
 0x2c9   : > { %4454 = vmatpush.bf16.msra.mxu3 %v12771_v27  ;;  %5207 = vmatpush.bf16.msra.mxu0 %v13307_v5  ;;  %v15868_v5 = vld [vmem:[%s21019_s5 + $0x2cc] sm:$0xf0] }
 0x2ca   : > { %5181 = vmatpush.bf16.msrb.mxu2 %v13019_v61  ;;  %v4221_v53 = vpop.f32.mrf.mxu0  ;;  %v15794_v61 = vld [vmem:[%s21019_s5 + $0x84] sm:$0xf]  ;;  %v13227_v41 = vor.u32 %v15868_v5, %v13226_v0  ;;  %v15845_v0 = vld [vmem:[%s21019_s5 + $0x214] sm:$0xf0] }
 0x2cb   : > { %v4222_v3 = vadd.f32 %v4221_v53, %v4207_v25  ;;  %v13179_v25 = vor.u32 %v15856_v2, %v13178_v44  ;;  %v15910_v5 = vld [vmem:[%s21019_s5 + $0x424] sm:$0xf] }
 0x2cc   : > { %5278 = vmatpush.bf16.msrb.mxu1 %v13295_v38  ;;  %v4235_v15 = vpop.f32.mrf.mxu1  ;;  %v13243_v38 = vor.u32 %v15872_v6, %v13242_v60  ;;  %v13180_v60 = vld [vmem:[%s21019_s5 + $0x270] sm:$0xf0]  ;;  %v13171_v6 = vor.u32 %v15853_v49, %v13170_v56  ;;  %v13407_v40 = vor.u32 %v15910_v5, %v13404_v29 }
 0x2cd   : > { %4455 = vmatpush.bf16.msra.mxu3 %v12755_v55  ;;  %5208 = vmatpush.bf16.msra.mxu0 %v13291_v13  ;;  %v20246_v27 = vadd.f32 %v4235_v15, %v4222_v3  ;;  %v15862_v55 = vld [vmem:[%s21019_s5 + $0x2a4] sm:$0xf]  ;;  %v13212_v13 = vld [vmem:[%s21019_s5 + $0x2b0] sm:$0xf0]  ;;  %v13183_v53 = vor.u32 %v15854_v51, %v13180_v60  ;;  %v15852_v3 = vld [vmem:[%s21019_s5 + $0x24c] sm:$0xf0] }
 0x2ce   : > { %5182 = vmatpush.bf16.msrb.mxu2 %v13003_v43  ;;  %v13215_v35 = vor.u32 %v15862_v55, %v13212_v13  ;;  %v15857_v43 = vld [vmem:[%s21019_s5 + $0x274] sm:$0xf0]  ;;  %v15850_v15 = vld [vmem:[%s21019_s5 + $0x244] sm:$0xf]  ;;  %v13388_v13 = vld [vmem:[%s21019_s5 + $0x410] sm:$0xf0] }
 0x2cf   : > { %v15906_v55 = vld [vmem:[%s21019_s5 + $0x404] sm:$0xf]  ;;  %v15831_v51 = vld [vmem:[%s21019_s5 + $0x1ac] sm:$0xf]  ;;  %v13092_v60 = vld [vmem:[%s21019_s5 + $0x1b8] sm:$0xf0] }
 0x2d0   : > { %5279 = vmatpush.bf16.msrb.mxu1 %v13279_v47  ;;  %v12940_v47 = vld [vmem:[%s21019_s5 + $0x90] sm:$0xf0]  ;;  %v13391_v10 = vor.u32 %v15906_v55, %v13388_v13 }
 0x2d1   : > { %4456 = vmatpush.bf16.msra.mxu3 %v12739_v16  ;;  %5209 = vmatpush.bf16.msra.mxu0 %v13275_v54  ;;  %v12943_v48 = vor.u32 %v15794_v61, %v12940_v47  ;;  %v15848_v61 = vld [vmem:[%s21019_s5 + $0x22c] sm:$0xf0]  ;;  %v15846_v47 = vld [vmem:[%s21019_s5 + $0x224] sm:$0xf] }
 0x2d2   : > { %5231 = vmatpush.bf16.msra.mxu2 %v12991_v52  ;;  %v13196_v52 = vld [vmem:[%s21019_s5 + $0x290] sm:$0xf0] }
 0x2d3   : > { %5183 = vmatmul.bf16.vlgmr.msrb.gmra.mxu2 %v20216_v28  ;;  %v13199_v54 = vor.u32 %v15858_v12, %v13196_v52  ;;  %v15838_v12 = vld [vmem:[%s21019_s5 + $0x1e4] sm:$0xf]  ;;  %v13116_v52 = vld [vmem:[%s21019_s5 + $0x1f0] sm:$0xf0] }
 0x2d4   : > { %5280 = vmatpush.bf16.msrb.mxu1 %v13263_v32  ;;  %v13194_v32 = vld [vmem:[%s21019_s5 + $0x280] sm:$0xf]  ;;  %v13119_v2 = vor.u32 %v15838_v12, %v13116_v52 }
 0x2d5   : > { %4457 = vmatpush.bf16.msra.mxu3 %v12723_v39  ;;  %5210 = vmatpush.bf16.msra.mxu0 %v13259_v8  ;;  %v13195_v16 = vor.u32 %v15860_v17, %v13194_v32  ;;  %v13164_v39 = vld [vmem:[%s21019_s5 + $0x250] sm:$0xf0]  ;;  %v12895_v8 = vor.u32 %v15782_v7, %v12892_v20  ;;  %v13378_v32 = vld [vmem:[%s21019_s5 + $0x3e8] sm:$0xf]  ;;  %v15905_v17 = vld [vmem:[%s21019_s5 + $0x3f4] sm:$0xf0] }
 0x2d6   : > { %5232 = vmatpush.bf16.msra.mxu2 %v12975_v58  ;;  %v15849_v58 = vld [vmem:[%s21019_s5 + $0x234] sm:$0xf0]  ;;  %v13167_v26 = vor.u32 %v15850_v15, %v13164_v39  ;;  %v13379_v44 = vor.u32 %v15905_v17, %v13378_v32  ;;  %v15834_v20 = vld [vmem:[%s21019_s5 + $0x1c4] sm:$0xf]  ;;  %v15827_v15 = vld [vmem:[%s21019_s5 + $0x18c] sm:$0xf] }
 0x2d7   : > { %5281 = vmatmul.bf16.vlgmr.msrb.gmra.mxu1 %v20227_v50  ;;  %v13155_v14 = vor.u32 %v15849_v58, %v13154_v9  ;;  %v15901_v7 = vld [vmem:[%s21019_s5 + $0x3d4] sm:$0xf0]  ;;  %v13095_v58 = vor.u32 %v15831_v51, %v13092_v60  ;;  %v13076_v39 = vld [vmem:[%s21019_s5 + $0x198] sm:$0xf0]  ;;  %v13058_v32 = vld [vmem:[%s21019_s5 + $0x168] sm:$0xf] }
 0x2d8   : > { %5329 = vmatpush.bf16.msra.mxu1 %v13251_v18  ;;  %4458 = vmatmul.bf16.vlgmr.msra.gmra.mxu3 %v19639_v57  ;;  %v13186_v57 = vld [vmem:[%s21019_s5 + $0x268] sm:$0xf]  ;;  %v12927_v18 = vor.u32 %v15790_v42, %v12924_v33  ;;  %v13108_v33 = vld [vmem:[%s21019_s5 + $0x1d8] sm:$0xf0]  ;;  %v15837_v9 = vld [vmem:[%s21019_s5 + $0x1d4] sm:$0xf0]  ;;  %v13079_v5 = vor.u32 %v15827_v15, %v13076_v39 }
 0x2d9   : > { %5189 = vmatpush.bf16.msrb.mxu3 %v13243_v38  ;;  %5259 = vmatpush.bf16.msrb.mxu0 %v13247_v4  ;;  %v13187_v46 = vor.u32 %v15857_v43, %v13186_v57  ;;  %v12876_v38 = vld [vmem:[%s21019_s5 + $0x10] sm:$0xf0]  ;;  %v13138_v4 = vld [vmem:[%s21019_s5 + $0x208] sm:$0xf]  ;;  %v15842_v57 = vld [vmem:[%s21019_s5 + $0x204] sm:$0xf] }
 0x2da   : > { %5211 = vmatmul.bf16.vlgmr.msra.gmra.mxu0 %v20227_v50  ;;  %5233 = vmatpush.bf16.msra.mxu2 %v12959_v21  ;;  %v13124_v21 = vld [vmem:[%s21019_s5 + $0x1f8] sm:$0xf0]  ;;  %v13139_v1 = vor.u32 %v15845_v0, %v13138_v4  ;;  %v13132_v43 = vld [vmem:[%s21019_s5 + $0x210] sm:$0xf0]  ;;  %v20487_v0 = vpop.f32.mrf.mxu0  ;;  %v15825_v17 = vld [vmem:[%s21019_s5 + $0x174] sm:$0xf0] }
 0x2db   : > { %v13127_v30 = vor.u32 %v15839_v62, %v13124_v21  ;;  %v13135_v49 = vor.u32 %v15842_v57, %v13132_v43  ;;  %v13084_v4 = vld [vmem:[%s21019_s5 + $0x1b0] sm:$0xf0]  ;;  %v15823_v21 = vld [vmem:[%s21019_s5 + $0x16c] sm:$0xf]  ;;  %v13042_v51 = vld [vmem:[%s21019_s5 + $0x148] sm:$0xf] }
 0x2dc   : > { %5330 = vmatpush.bf16.msra.mxu1 %v13235_v22  ;;  %v13162_v22 = vld [vmem:[%s21019_s5 + $0x240] sm:$0xf]  ;;  %v13052_v57 = vld [vmem:[%s21019_s5 + $0x170] sm:$0xf0]  ;;  %v15821_v60 = vld [vmem:[%s21019_s5 + $0x154] sm:$0xf0] }
 0x2dd   : > { %5190 = vmatpush.bf16.msrb.mxu3 %v13227_v41  ;;  %5260 = vmatpush.bf16.msrb.mxu0 %v13231_v11  ;;  %v13163_v59 = vor.u32 %v15852_v3, %v13162_v22  ;;  %v13148_v41 = vld [vmem:[%s21019_s5 + $0x230] sm:$0xf0]  ;;  %v12879_v11 = vor.u32 %v15778_v36, %v12876_v38  ;;  %v15897_v36 = vld [vmem:[%s21019_s5 + $0x3b4] sm:$0xf0]  ;;  %v15830_v38 = vld [vmem:[%s21019_s5 + $0x1a4] sm:$0xf] }
 0x2de   : > { %5234 = vmatpush.bf16.msra.mxu2 %v12943_v48  ;;  %v15835_v48 = vld [vmem:[%s21019_s5 + $0x1cc] sm:$0xf]  ;;  %v13151_v42 = vor.u32 %v15846_v47, %v13148_v41  ;;  %v13087_v62 = vor.u32 %v15830_v38, %v13084_v4  ;;  %v15893_v41 = vld [vmem:[%s21019_s5 + $0x394] sm:$0xf0]  ;;  %v13020_v15 = vld [vmem:[%s21019_s5 + $0x130] sm:$0xf0] }
 0x2df   : > { %v13111_v24 = vor.u32 %v15835_v48, %v13108_v33  ;;  %v15819_v48 = vld [vmem:[%s21019_s5 + $0x14c] sm:$0xf]  ;;  %v13026_v39 = vld [vmem:[%s21019_s5 + $0x128] sm:$0xf] }
 0x2e0   : > { %5331 = vmatpush.bf16.msra.mxu1 %v13219_v34  ;;  %v13146_v34 = vld [vmem:[%s21019_s5 + $0x220] sm:$0xf] }
 0x2e1   : > { %5191 = vmatpush.bf16.msrb.mxu3 %v13211_v31  ;;  %5261 = vmatpush.bf16.msrb.mxu0 %v13215_v35  ;;  %v13130_v31 = vld [vmem:[%s21019_s5 + $0x200] sm:$0xf]  ;;  %v15844_v35 = vld [vmem:[%s21019_s5 + $0x20c] sm:$0xf0] }
 0x2e2   : > { %5235 = vmatpush.bf16.msra.mxu2 %v12927_v18  ;;  %v16679_v18 = vld [vmem:[#allocation3 + $0x38] sm:$0xff]  ;;  %v13131_v56 = vor.u32 %v15844_v35, %v13130_v31  ;;  %v15889_v31 = vld [vmem:[%s21019_s5 + $0x374] sm:$0xf0] }
 0x2e3   : > { %v15822_v35 = vld [vmem:[%s21019_s5 + $0x164] sm:$0xf] }
 0x2e4   : > { %5332 = vmatpush.bf16.msra.mxu1 %v13203_v37  ;;  %v13147_v37 = vor.u32 %v15848_v61, %v13146_v34  ;;  %v13060_v34 = vld [vmem:[%s21019_s5 + $0x178] sm:$0xf0]  ;;  %v13330_v61 = vld [vmem:[%s21019_s5 + $0x388] sm:$0xf] }
 0x2e5   : > { %5192 = vmatpush.bf16.msrb.mxu3 %v13195_v16  ;;  %5262 = vmatpush.bf16.msrb.mxu0 %v13199_v54  ;;  %v13122_v16 = vld [vmem:[%s21019_s5 + $0x1e8] sm:$0xf]  ;;  %v15841_v54 = vld [vmem:[%s21019_s5 + $0x1f4] sm:$0xf0]  ;;  %v13331_v55 = vor.u32 %v15893_v41, %v13330_v61  ;;  %v15871_v61 = vld [vmem:[%s21019_s5 + $0x2ec] sm:$0xf] }
 0x2e6   : > { %5236 = vmatpush.bf16.msra.mxu2 %v12911_v63  ;;  %v13362_v63 = vld [vmem:[%s21019_s5 + $0x3c8] sm:$0xf] }
 0x2e7   : > { %v13363_v22 = vor.u32 %v15901_v7, %v13362_v63  ;;  %v20567_v63 = vpop.f32.mrf.mxu1  ;;  %v12994_v41 = vld [vmem:[%s21019_s5 + $0xe8] sm:$0xf] }
 0x2e8   : > { %5333 = vmatpush.bf16.msra.mxu1 %v13187_v46  ;;  %v20427_v46 = vpack.c.bf16 %v16679_v18, %v3145_v19  ;;  %v13074_v19 = vld [vmem:[%s21019_s5 + $0x188] sm:$0xf]  ;;  %v13055_v18 = vor.u32 %v15822_v35, %v13052_v57  ;;  %v13236_v35 = vld [vmem:[%s21019_s5 + $0x2d8] sm:$0xf0] }
 0x2e9   : > { %5193 = vmatpush.bf16.msrb.mxu3 %v13179_v25  ;;  %5263 = vmatpush.bf16.msrb.mxu0 %v13183_v53  ;;  %v13100_v25 = vld [vmem:[%s21019_s5 + $0x1d0] sm:$0xf0]  ;;  %v13106_v53 = vld [vmem:[%s21019_s5 + $0x1c8] sm:$0xf] }
 0x2ea   : > { %5237 = vmatpush.bf16.msra.mxu2 %v12895_v8  ;;  %v13103_v3 = vor.u32 %v15834_v20, %v13100_v25  ;;  %v13346_v8 = vld [vmem:[%s21019_s5 + $0x3a8] sm:$0xf]  ;;  %v15811_v25 = vld [vmem:[%s21019_s5 + $0x10c] sm:$0xf] }
 0x2eb   : > { %v13347_v29 = vor.u32 %v15897_v36, %v13346_v8  ;;  %v15817_v8 = vld [vmem:[%s21019_s5 + $0x134] sm:$0xf0]  ;;  %v12978_v57 = vld [vmem:[%s21019_s5 + $0xc8] sm:$0xf] }
 0x2ec   : > { %5334 = vmatpush.bf16.msra.mxu1 %v13171_v6  ;;  %v13123_v6 = vor.u32 %v15841_v54, %v13122_v16  ;;  %v13298_v16 = vld [vmem:[%s21019_s5 + $0x348] sm:$0xf]  ;;  %v20548_v54 = vpop.f32.mrf.mxu0 }
 0x2ed   : > { %5194 = vmatpush.bf16.msrb.mxu3 %v13163_v59  ;;  %5264 = vmatpush.bf16.msrb.mxu0 %v13167_v26  ;;  %v13090_v59 = vld [vmem:[%s21019_s5 + $0x1a8] sm:$0xf]  ;;  %v15833_v26 = vld [vmem:[%s21019_s5 + $0x1b4] sm:$0xf0] }
 0x2ee   : > { %5238 = vmatpush.bf16.msra.mxu2 %v12879_v11  ;;  %v13091_v47 = vor.u32 %v15833_v26, %v13090_v59  ;;  %v15826_v11 = vld [vmem:[%s21019_s5 + $0x184] sm:$0xf]  ;;  %v13266_v59 = vld [vmem:[%s21019_s5 + $0x308] sm:$0xf]  ;;  %v15877_v26 = vld [vmem:[%s21019_s5 + $0x314] sm:$0xf0] }
 0x2f0   : > { %5335 = vmatpush.bf16.msra.mxu1 %v13155_v14  ;;  %v13107_v14 = vor.u32 %v15837_v9, %v13106_v53  ;;  %v13012_v53 = vld [vmem:[%s21019_s5 + $0x118] sm:$0xf0]  ;;  %v13282_v9 = vld [vmem:[%s21019_s5 + $0x328] sm:$0xf] }
 0x2f1   : > { %5195 = vmatpush.bf16.msrb.mxu3 %v13147_v37  ;;  %5265 = vmatpush.bf16.msrb.mxu0 %v13151_v42  ;;  %v13044_v37 = vld [vmem:[%s21019_s5 + $0x158] sm:$0xf0]  ;;  %v13314_v42 = vld [vmem:[%s21019_s5 + $0x368] sm:$0xf] }
 0x2f2   : > { %5293 = vmatpush.bf16.msrb.mxu2 %v13407_v40  ;;  %v15829_v40 = vld [vmem:[%s21019_s5 + $0x194] sm:$0xf0]  ;;  %v13047_v12 = vor.u32 %v15819_v48, %v13044_v37  ;;  %v13315_v52 = vor.u32 %v15889_v31, %v13314_v42  ;;  %v15867_v31 = vld [vmem:[%s21019_s5 + $0x2cc] sm:$0xf] }
 0x2f3   : > { %5239 = vmatmul.bf16.vlgmr.msra.gmra.mxu2 %v19973_v45  ;;  %v13075_v33 = vor.u32 %v15829_v40, %v13074_v19  ;;  %v15807_v19 = vld [vmem:[%s21019_s5 + $0xec] sm:$0xf]  ;;  %v12996_v40 = vld [vmem:[%s21019_s5 + $0xf8] sm:$0xf0] }
 0x2f4   : > { %5336 = vmatpush.bf16.msra.mxu1 %v13139_v1  ;;  %v13068_v1 = vld [vmem:[%s21019_s5 + $0x190] sm:$0xf0]  ;;  %v20531_v43 = vpop.f32.mrf.mxu2 }
 0x2f5   : > { %5196 = vmatpush.bf16.msrb.mxu3 %v13131_v56  ;;  %5266 = vmatpush.bf16.msrb.mxu0 %v13135_v49  ;;  %v13071_v13 = vor.u32 %v15826_v11, %v13068_v1  ;;  %v13059_v56 = vor.u32 %v15825_v17, %v13058_v32  ;;  %v15885_v49 = vld [vmem:[%s21019_s5 + $0x354] sm:$0xf0]  ;;  %v20622_v11 = vpop.f32.mrf.mxu0  ;;  %v15803_v17 = vld [vmem:[%s21019_s5 + $0xcc] sm:$0xf] }
 0x2f6   : > { %5294 = vmatpush.bf16.msrb.mxu2 %v13391_v10  ;;  %v15815_v10 = vld [vmem:[%s21019_s5 + $0x12c] sm:$0xf]  ;;  %v13299_v7 = vor.u32 %v15885_v49, %v13298_v16  ;;  %v15809_v1 = vld [vmem:[%s21019_s5 + $0xf4] sm:$0xf0]  ;;  %v13220_v49 = vld [vmem:[%s21019_s5 + $0x2b8] sm:$0xf0] }
 0x2f7   : > { %5337 = vmatmul.bf16.vlgmr.msra.gmra.mxu1 %v20427_v46  ;;  %v12995_v42 = vor.u32 %v15809_v1, %v12994_v41  ;;  %v15805_v32 = vld [vmem:[%s21019_s5 + $0xd4] sm:$0xf0]  ;;  %v15851_v1 = vld [vmem:[%s21019_s5 + $0x24c] sm:$0xf] }
 0x2f8   : > { %5385 = vmatpush.bf16.msrb.mxu1 %v13127_v30  ;;  %5197 = vmatmul.bf16.vlgmr.msrb.gmra.mxu3 %v20427_v46  ;;  %v13063_v30 = vor.u32 %v15823_v21, %v13060_v34  ;;  %v13010_v21 = vld [vmem:[%s21019_s5 + $0x108] sm:$0xf]  ;;  %v15813_v34 = vld [vmem:[%s21019_s5 + $0x114] sm:$0xf0] }
 0x2f9   : > { %5245 = vmatpush.bf16.msra.mxu3 %v13119_v2  ;;  %5315 = vmatpush.bf16.msra.mxu0 %v13123_v6  ;;  %v13036_v2 = vld [vmem:[%s21019_s5 + $0x150] sm:$0xf0]  ;;  %v13011_v48 = vor.u32 %v15813_v34, %v13010_v21  ;;  %v12932_v21 = vld [vmem:[%s21019_s5 + $0x78] sm:$0xf0] }
 0x2fa   : > { %5343 = vmatpush.bf16.msra.mxu2 %v13379_v44  ;;  %5267 = vmatmul.bf16.vlgmr.msrb.gmra.mxu0 %v20427_v46  ;;  %v15818_v44 = vld [vmem:[%s21019_s5 + $0x144] sm:$0xf] }
 0x2fb   : > { %v13039_v20 = vor.u32 %v15818_v44, %v13036_v2  ;;  %v12962_v44 = vld [vmem:[%s21019_s5 + $0xa8] sm:$0xf] }
 0x2fc   : > { %5386 = vmatpush.bf16.msrb.mxu1 %v13111_v24  ;;  %v13028_v24 = vld [vmem:[%s21019_s5 + $0x138] sm:$0xf0]  ;;  %v20593_v36 = vpop.f32.mrf.mxu2 }
 0x2fd   : > { %5246 = vmatpush.bf16.msra.mxu3 %v13103_v3  ;;  %5316 = vmatpush.bf16.msra.mxu0 %v13107_v14  ;;  %v13031_v6 = vor.u32 %v15815_v10, %v13028_v24  ;;  %v15814_v3 = vld [vmem:[%s21019_s5 + $0x124] sm:$0xf]  ;;  %v13015_v14 = vor.u32 %v15811_v25, %v13012_v53  ;;  %v12979_v24 = vor.u32 %v15805_v32, %v12978_v57  ;;  %v15859_v53 = vld [vmem:[%s21019_s5 + $0x28c] sm:$0xf]  ;;  %v13156_v32 = vld [vmem:[%s21019_s5 + $0x238] sm:$0xf0] }
 0x2fe   : > { %5344 = vmatpush.bf16.msra.mxu2 %v13363_v22  ;;  %v15881_v22 = vld [vmem:[%s21019_s5 + $0x334] sm:$0xf0]  ;;  %v13023_v4 = vor.u32 %v15814_v3, %v13020_v15  ;;  %v15795_v15 = vld [vmem:[%s21019_s5 + $0x8c] sm:$0xf] }
 0x2ff   : > { %v13283_v38 = vor.u32 %v15881_v22, %v13282_v9  ;;  %v13204_v9 = vld [vmem:[%s21019_s5 + $0x298] sm:$0xf0]  ;;  %v15797_v3 = vld [vmem:[%s21019_s5 + $0x94] sm:$0xf0]  ;;  %v15847_v57 = vld [vmem:[%s21019_s5 + $0x22c] sm:$0xf] }
 0x300   : > { %5387 = vmatpush.bf16.msrb.mxu1 %v13095_v58  ;;  %v13043_v58 = vor.u32 %v15821_v60, %v13042_v51  ;;  %v15801_v51 = vld [vmem:[%s21019_s5 + $0xb4] sm:$0xf0]  ;;  %v15799_v60 = vld [vmem:[%s21019_s5 + $0xac] sm:$0xf] }
 0x301   : > { %5247 = vmatpush.bf16.msra.mxu3 %v13087_v62  ;;  %5317 = vmatpush.bf16.msra.mxu0 %v13091_v47  ;;  %v13004_v62 = vld [vmem:[%s21019_s5 + $0x110] sm:$0xf0]  ;;  %v13252_v47 = vld [vmem:[%s21019_s5 + $0x2f8] sm:$0xf0] }
 0x302   : > { %5345 = vmatpush.bf16.msra.mxu2 %v13347_v29  ;;  %v13027_v29 = vor.u32 %v15817_v8, %v13026_v39  ;;  %v13255_v37 = vor.u32 %v15871_v61, %v13252_v47  ;;  %v12948_v39 = vld [vmem:[%s21019_s5 + $0x98] sm:$0xf0] }
 0x303   : > { %13417 = vmatmul.msk.bf16.vlgmr.msrb.gmra.mxu2 %vm3130_vm4, %v20088_v23 }
 0x304   : > { %5388 = vmatpush.bf16.msrb.mxu1 %v13079_v5  ;;  %v15810_v5 = vld [vmem:[%s21019_s5 + $0x104] sm:$0xf]  ;;  %v20656_v10 = vpop.f32.mrf.mxu2 }
 0x305   : > { %5248 = vmatpush.bf16.msra.mxu3 %v13071_v13  ;;  %5318 = vmatpush.bf16.msra.mxu0 %v13075_v33  ;;  %v20633_v13 = vpop.f32.mrf.mxu1  ;;  %v12999_v33 = vor.u32 %v15807_v19, %v12996_v40  ;;  %v13172_v19 = vld [vmem:[%s21019_s5 + $0x258] sm:$0xf0]  ;;  %v12914_v40 = vld [vmem:[%s21019_s5 + $0x48] sm:$0xf] }
 0x306   : > { %5346 = vmatpush.bf16.msra.mxu2 %v13331_v55  ;;  %v13007_v55 = vor.u32 %v15810_v5, %v13004_v62  ;;  %v15791_v62 = vld [vmem:[%s21019_s5 + $0x6c] sm:$0xf] }
 0x307   : > { %v12935_v41 = vor.u32 %v15791_v62, %v12932_v21  ;;  %v15907_v21 = vld [vmem:[%s21019_s5 + $0x40c] sm:$0xf] }
 0x308   : > { %5389 = vmatpush.bf16.msrb.mxu1 %v13063_v30  ;;  %v13267_v30 = vor.u32 %v15877_v26, %v13266_v59  ;;  %v13188_v59 = vld [vmem:[%s21019_s5 + $0x278] sm:$0xf0]  ;;  %v12930_v26 = vld [vmem:[%s21019_s5 + $0x68] sm:$0xf] }
 0x309   : > { %5249 = vmatpush.bf16.msra.mxu3 %v13055_v18  ;;  %5319 = vmatpush.bf16.msra.mxu0 %v13059_v56  ;;  %v13239_v18 = vor.u32 %v15867_v31, %v13236_v35  ;;  %v15863_v56 = vld [vmem:[%s21019_s5 + $0x2ac] sm:$0xf] }
 0x30a   : > { %5347 = vmatpush.bf16.msra.mxu2 %v13315_v52  ;;  %v20654_v52 = vpop.f32.mrf.mxu3 }
 0x30c   : > { %5390 = vmatpush.bf16.msrb.mxu1 %v13047_v12  ;;  %v12980_v12 = vld [vmem:[%s21019_s5 + $0xd8] sm:$0xf0]  ;;  %v20725_v34 = vpop.f32.mrf.mxu2 }
 0x30d   : > { %5250 = vmatpush.bf16.msra.mxu3 %v13039_v20  ;;  %5320 = vmatpush.bf16.msra.mxu0 %v13043_v58  ;;  %v12983_v16 = vor.u32 %v15803_v17, %v12980_v12  ;;  %v20669_v2 = vpop.f32.mrf.mxu0  ;;  %v12963_v20 = vor.u32 %v15801_v51, %v12962_v44  ;;  %v12946_v58 = vld [vmem:[%s21019_s5 + $0x88] sm:$0xf]  ;;  %v20690_v22 = vpop.f32.mrf.mxu1 }
 0x30e   : > { %5348 = vmatpush.bf16.msra.mxu2 %v13299_v7  ;;  %v13223_v7 = vor.u32 %v15863_v56, %v13220_v49  ;;  %v12898_v17 = vld [vmem:[%s21019_s5 + $0x28] sm:$0xf]  ;;  %v13159_v56 = vor.u32 %v15847_v57, %v13156_v32  ;;  %v15843_v49 = vld [vmem:[%s21019_s5 + $0x20c] sm:$0xf] }
 0x30f   : > { %v15895_v57 = vld [vmem:[%s21019_s5 + $0x3ac] sm:$0xf] }
 0x310   : > { %5391 = vmatpush.bf16.msrb.mxu1 %v13031_v6  ;;  %v12964_v6 = vld [vmem:[%s21019_s5 + $0xb8] sm:$0xf0] }
 0x311   : > { %5251 = vmatpush.bf16.msra.mxu3 %v13023_v4  ;;  %5321 = vmatpush.bf16.msra.mxu0 %v13027_v29  ;;  %v12967_v25 = vor.u32 %v15799_v60, %v12964_v6  ;;  %v15855_v4 = vld [vmem:[%s21019_s5 + $0x26c] sm:$0xf]  ;;  %v15793_v29 = vld [vmem:[%s21019_s5 + $0x74] sm:$0xf0]  ;;  %v13140_v6 = vld [vmem:[%s21019_s5 + $0x218] sm:$0xf0] }
 0x312   : > { %5349 = vmatpush.bf16.msra.mxu2 %v13283_v38  ;;  %v4263_v8 = vpop.f32.mrf.mxu3  ;;  %v13207_v38 = vor.u32 %v15859_v53, %v13204_v9  ;;  %v13191_v61 = vor.u32 %v15855_v4, %v13188_v59  ;;  %v12931_v47 = vor.u32 %v15793_v29, %v12930_v26  ;;  %v12884_v53 = vld [vmem:[%s21019_s5 + $0x18] sm:$0xf0]  ;;  %v13410_v9 = vld [vmem:[%s21019_s5 + $0x428] sm:$0xf] }
 0x313   : > { %v13394_v29 = vld [vmem:[%s21019_s5 + $0x408] sm:$0xf] }
 0x314   : > { %5392 = vmatpush.bf16.msrb.mxu1 %v13015_v14 }
 0x315   : > { %5252 = vmatpush.bf16.msra.mxu3 %v13007_v55  ;;  %5322 = vmatpush.bf16.msra.mxu0 %v13011_v48  ;;  %v20714_v5 = vpop.f32.mrf.mxu0  ;;  %v15787_v55 = vld [vmem:[%s21019_s5 + $0x4c] sm:$0xf]  ;;  %v12916_v48 = vld [vmem:[%s21019_s5 + $0x58] sm:$0xf0] }
 0x316   : > { %5350 = vmatpush.bf16.msra.mxu2 %v13267_v30  ;;  %v15789_v30 = vld [vmem:[%s21019_s5 + $0x54] sm:$0xf0]  ;;  %v12919_v35 = vor.u32 %v15787_v55, %v12916_v48  ;;  %v20772_v44 = vpop.f32.mrf.mxu2 }
 0x317   : > { %5393 = vmatmul.bf16.vlgmr.msrb.gmra.mxu1 %v20216_v28  ;;  %v12915_v31 = vor.u32 %v15789_v30, %v12914_v40 }
 0x318   : > { %5253 = vmatmul.bf16.vlgmr.msra.gmra.mxu3 %v20216_v28  ;;  %5323 = vmatmul.bf16.vlgmr.msra.gmra.mxu0 %v20216_v28  ;;  %v4250_v28 = vadd.f32 %v20531_v43, %v20246_v27  ;;  %v12947_v27 = vor.u32 %v15797_v3, %v12946_v58  ;;  %v12951_v43 = vor.u32 %v15795_v15, %v12948_v39  ;;  %v15911_v3 = vld [vmem:[%s21019_s5 + $0x42c] sm:$0xf]  ;;  %v13412_v15 = vld [vmem:[%s21019_s5 + $0x438] sm:$0xf0] }
 0x319   : > { %5301 = vmatpush.bf16.msrb.mxu3 %v12995_v42  ;;  %5371 = vmatpush.bf16.msrb.mxu0 %v12999_v33  ;;  %v20747_v42 = vpop.f32.mrf.mxu1  ;;  %v13175_v33 = vor.u32 %v15851_v1, %v13172_v19  ;;  %v13415_v62 = vor.u32 %v15911_v3, %v13412_v15  ;;  %v15875_v3 = vld [vmem:[%s21019_s5 + $0x30c] sm:$0xf]  ;;  %v13268_v15 = vld [vmem:[%s21019_s5 + $0x318] sm:$0xf0] }
 0x31a   : > { %5399 = vmatpush.bf16.msrb.mxu2 %v13255_v37  ;;  %v20703_v14 = vadd.f32 %v4263_v8, %v4250_v28  ;;  %v20745_v37 = vpop.f32.mrf.mxu3  ;;  %v15913_v28 = vld [vmem:[%s21019_s5 + $0x434] sm:$0xf0]  ;;  %v13143_v8 = vor.u32 %v15843_v49, %v13140_v6  ;;  %v13332_v49 = vld [vmem:[%s21019_s5 + $0x398] sm:$0xf0]  ;;  %v15887_v6 = vld [vmem:[%s21019_s5 + $0x36c] sm:$0xf] }
 0x31b   : > { %5351 = vmatmul.bf16.vlgmr.msra.gmra.mxu2 %v20227_v50  ;;  %v13411_v26 = vor.u32 %v15913_v28, %v13410_v9  ;;  %v15879_v9 = vld [vmem:[%s21019_s5 + $0x32c] sm:$0xf] }
 0x31d   : > { %5302 = vmatpush.bf16.msrb.mxu3 %v12979_v24  ;;  %5372 = vmatpush.bf16.msrb.mxu0 %v12983_v16  ;;  %v20758_v12 = vpop.f32.mrf.mxu0  ;;  %v15783_v24 = vld [vmem:[%s21019_s5 + $0x2c] sm:$0xf]  ;;  %v12900_v16 = vld [vmem:[%s21019_s5 + $0x38] sm:$0xf0] }
 0x31e   : > { %5400 = vmatpush.bf16.msrb.mxu2 %v13239_v18  ;;  %v15785_v18 = vld [vmem:[%s21019_s5 + $0x34] sm:$0xf0]  ;;  %v12903_v60 = vor.u32 %v15783_v24, %v12900_v16  ;;  %v20829_v30 = vpop.f32.mrf.mxu2 }
 0x31f   : > { %v12899_v51 = vor.u32 %v15785_v18, %v12898_v17 }
 0x321   : > { %5303 = vmatpush.bf16.msrb.mxu3 %v12963_v20  ;;  %5373 = vmatpush.bf16.msrb.mxu0 %v12967_v25  ;;  %v15781_v20 = vld [vmem:[%s21019_s5 + $0x14] sm:$0xf0]  ;;  %v15779_v25 = vld [vmem:[%s21019_s5 + $0xc] sm:$0xf] }
 0x322   : > { %5401 = vmatpush.bf16.msrb.mxu2 %v13223_v7  ;;  %v12882_v7 = vld [vmem:[%s21019_s5 + $0x8] sm:$0xf]  ;;  %v4291_v58 = vpop.f32.mrf.mxu3 }
 0x323   : > { %v4292_v39 = vadd.f32 %v4291_v58, %v20548_v54  ;;  %v15909_v54 = vld [vmem:[%s21019_s5 + $0x414] sm:$0xf0]  ;;  %v13284_v58 = vld [vmem:[%s21019_s5 + $0x338] sm:$0xf0] }
 0x324   : > { %v13395_v1 = vor.u32 %v15909_v54, %v13394_v29 }
 0x325   : > { %5304 = vmatpush.bf16.msrb.mxu3 %v12947_v27  ;;  %5374 = vmatpush.bf16.msrb.mxu0 %v12951_v43  ;;  %v12887_v27 = vor.u32 %v15779_v25, %v12884_v53  ;;  %v20802_v43 = vpop.f32.mrf.mxu1  ;;  %v4306_v4 = vadd.f32 %v20633_v13, %v4292_v39  ;;  %v20805_v59 = vpop.f32.mrf.mxu0  ;;  %v13396_v13 = vld [vmem:[%s21019_s5 + $0x418] sm:$0xf0] }
 0x326   : > { %5402 = vmatpush.bf16.msrb.mxu2 %v13207_v38  ;;  %v12883_v38 = vor.u32 %v15781_v20, %v12882_v7  ;;  %v13399_v19 = vor.u32 %v15907_v21, %v13396_v13  ;;  %v13300_v53 = vld [vmem:[%s21019_s5 + $0x358] sm:$0xf0] }
 0x329   : > { %5305 = vmatpush.bf16.msrb.mxu3 %v12931_v47  ;;  %5375 = vmatpush.bf16.msrb.mxu0 %v12935_v41  ;;  %v13380_v47 = vld [vmem:[%s21019_s5 + $0x3f8] sm:$0xf0]  ;;  %v4320_v41 = vadd.f32 %v20656_v10, %v4306_v4  ;;  %v15899_v10 = vld [vmem:[%s21019_s5 + $0x3cc] sm:$0xf] }
 0x32a   : > { %5403 = vmatpush.bf16.msrb.mxu2 %v13191_v61  ;;  %v15903_v61 = vld [vmem:[%s21019_s5 + $0x3ec] sm:$0xf]  ;;  %v20832_v55 = vpop.f32.mrf.mxu3 }
 0x32b   : > { %v20827_v40 = vadd.f32 %v20669_v2, %v4320_v41  ;;  %v13383_v48 = vor.u32 %v15903_v61, %v13380_v47  ;;  %v13364_v2 = vld [vmem:[%s21019_s5 + $0x3d8] sm:$0xf0] }
 0x32d   : > { %5306 = vmatpush.bf16.msrb.mxu3 %v12915_v31  ;;  %5376 = vmatpush.bf16.msrb.mxu0 %v12919_v35  ;;  %v13367_v35 = vor.u32 %v15899_v10, %v13364_v2 }
 0x32e   : > { %5404 = vmatpush.bf16.msrb.mxu2 %v13175_v33  ;;  %v4431_v33 = vpop.f32.mrf.mxu1 }
 0x32f   : > { %v4417_v31 = vpop.f32.mrf.mxu0 }
 0x331   : > { %5307 = vmatpush.bf16.msrb.mxu3 %v12899_v51  ;;  %5377 = vmatpush.bf16.msrb.mxu0 %v12903_v60 }
 0x332   : > { %5405 = vmatpush.bf16.msrb.mxu2 %v13159_v56  ;;  %v15891_v56 = vld [vmem:[%s21019_s5 + $0x38c] sm:$0xf] }
 0x333   : > { %v4347_v17 = vpop.f32.mrf.mxu3  ;;  %v13335_v60 = vor.u32 %v15891_v56, %v13332_v49 }
 0x334   : > { %v4362_v16 = vadd.f32 %v20758_v12, %v4347_v17  ;;  %v13316_v12 = vld [vmem:[%s21019_s5 + $0x378] sm:$0xf0] }
 0x335   : > { %5308 = vmatpush.bf16.msrb.mxu3 %v12883_v38  ;;  %5378 = vmatpush.bf16.msrb.mxu0 %v12887_v27  ;;  %v13319_v25 = vor.u32 %v15887_v6, %v13316_v12 }
 0x336   : > { %5406 = vmatpush.bf16.msrb.mxu2 %v13143_v8  ;;  %v4445_v32 = vpop.f32.mrf.mxu2  ;;  %v4376_v51 = vadd.f32 %v20747_v42, %v4362_v16  ;;  %v15883_v42 = vld [vmem:[%s21019_s5 + $0x34c] sm:$0xf]  ;;  %v13271_v8 = vor.u32 %v15875_v3, %v13268_v15  ;;  %v20896_v54 = vpop.f32.mrf.mxu1 }
 0x337   : > { %v20891_v27 = vpop.f32.mrf.mxu0 }
 0x338   : > { %5309 = vmatmul.bf16.vlgmr.msrb.gmra.mxu3 %v19973_v45  ;;  %5379 = vmatmul.bf16.vlgmr.msrb.gmra.mxu0 %v19973_v45  ;;  %v13348_v45 = vld [vmem:[%s21019_s5 + $0x3b8] sm:$0xf0]  ;;  %v4390_v7 = vadd.f32 %v20772_v44, %v4376_v51  ;;  %v13303_v44 = vor.u32 %v15883_v42, %v13300_v53  ;;  %v16097_v42 = vld [vmem:[#allocation11 + $0x178] sm:$0xff] }
 0x339   : > { %5363 = vmatpush.bf16.msra.mxu3 %v13411_v26  ;;  %5433 = vmatpush.bf16.msra.mxu0 %v13415_v62  ;;  %v13351_v18 = vor.u32 %v15895_v57, %v13348_v45  ;;  %v16105_v53 = vld [vmem:[#allocation11 + $0x1b8] sm:$0xff] }
 0x33a   : > { %5407 = vmatmul.bf16.vlgmr.msrb.gmra.mxu2 %v20427_v46  ;;  %v4432_v46 = vadd.f32 %v4431_v33, %v4417_v31  ;;  %v20908_v31 = vld [vmem:[#allocation10] sm:$0xf] }
 0x33b   : > { %v20863_v20 = vpop.f32.mrf.mxu3  ;;  %v5443_v17 = vperm.slane %v20908_v31, 0  ;;  %5838 = vmatpush.bf16.msra.mxu2 %v16097_v42  ;;  %v16091_v42 = vld [vmem:[#allocation11 + $0x148] sm:$0xff] }
 0x33c   : > { %v4446_v24 = vadd.f32 %v4445_v32, %v4432_v46 }
 0x33d   : > { %5364 = vmatpush.bf16.msra.mxu3 %v13395_v1  ;;  %5434 = vmatpush.bf16.msra.mxu0 %v13399_v19  ;;  %v4224_v19 = vadd.f32 %v20487_v0, %v20654_v52 }
 0x33e   : > { %v5170_v21 = vpop.f32.mrf.mxu1  ;;  %v20898_v13 = vpop.f32.mrf.mxu2 }
 0x33f   : > { %v4473_v29 = vpop.f32.mrf.mxu0 }
 0x341   : > { %5413 = vmatpush.bf16.msrb.mxu3 %v13383_v48  ;;  %v4238_v48 = vadd.f32 %v20567_v63, %v4224_v19 }
 0x343   : > { %v4403_v28 = vpop.f32.mrf.mxu3  ;;  %v4252_v46 = vadd.f32 %v20593_v36, %v4238_v48 }
 0x344   : > { %v20887_v39 = vadd.f32 %v4403_v28, %v4390_v7 }
 0x345   : > { %5414 = vmatpush.bf16.msrb.mxu3 %v13367_v35  ;;  %v4266_v45 = vadd.f32 %v20745_v37, %v4252_v46  ;;  %v4294_v37 = vadd.f32 %v20832_v55, %v20622_v11  ;;  %v16096_v11 = vld [vmem:[#allocation11 + $0x170] sm:$0xff] }
 0x346   : > { %v5172_v47 = vpop.f32.mrf.mxu1  ;;  %v16104_v55 = vld [vmem:[#allocation11 + $0x1b0] sm:$0xff]  ;;  %5839 = vmatpush.bf16.msra.mxu2 %v16096_v11  ;;  %v16065_v11 = vld [vmem:[#allocation11 + $0x78] sm:$0xff] }
 0x347   : > { %v20900_v61 = vpop.f32.mrf.mxu0  ;;  %v5173_v0 = vadd.f32 %v5172_v47, %v4266_v45  ;;  %v16087_v47 = vld [vmem:[#allocation11 + $0x128] sm:$0xff]  ;;  %v16094_v45 = vld [vmem:[#allocation11 + $0x160] sm:$0xff] }
 0x348   : > { %13418 = vmatmul.msk.bf16.vlgmr.msra.gmra.mxu3 %vm3130_vm4, %v20088_v23  ;;  %13419 = vmatmul.msk.bf16.vlgmr.msra.gmra.mxu0 %vm3130_vm4, %v20088_v23  ;;  %v13287_v23 = vor.u32 %v15879_v9, %v13284_v58  ;;  %v16113_v9 = vld [vmem:[#allocation11 + $0x1f8] sm:$0xff]  ;;  %v4308_v58 = vadd.f32 %v20690_v22, %v4294_v37  ;;  %v16103_v22 = vld [vmem:[#allocation11 + $0x1a8] sm:$0xff]  ;;  %v16108_v37 = vld [vmem:[#allocation11 + $0x1d0] sm:$0xff] }
 0x349   : > { %5415 = vmatpush.bf16.msrb.mxu3 %v13351_v18  ;;  %5864 = vmatpush.bf16.msrb.mxu0 %v16113_v9 }
 0x34a   : > { %v4322_v15 = vadd.f32 %v20725_v34, %v4308_v58  ;;  %v5444_v34 = vperm.slane %v20908_v31, 1  ;;  %v4364_v58 = vadd.f32 %v20805_v59, %v20863_v20  ;;  %v16056_v59 = vld [vmem:[#allocation11 + $0x30] sm:$0xff] }
 0x34b   : > { %v20889_v38 = vpop.f32.mrf.mxu3  ;;  %v16064_v20 = vld [vmem:[#allocation11 + $0x70] sm:$0xff] }
 0x34d   : > { %5416 = vmatpush.bf16.msrb.mxu3 %v13335_v60 }
 0x34e   : > { %v5226_v57 = vpop.f32.mrf.mxu1 }
 0x351   : > { %5417 = vmatpush.bf16.msrb.mxu3 %v13319_v25  ;;  %v16089_v25 = vld [vmem:[#allocation11 + $0x138] sm:$0xff] }
 0x352   : > { %5825 = vmatpush.bf16.msra.mxu1 %v16089_v25  ;;  %v16083_v25 = vld [vmem:[#allocation11 + $0x108] sm:$0xff] }
 0x355   : > { %5418 = vmatpush.bf16.msrb.mxu3 %v13303_v44 }
 0x356   : > { %v5184_v1 = vpop.f32.mrf.mxu2  ;;  %v5228_v60 = vpop.f32.mrf.mxu1 }
 0x357   : > { %v5212_v2 = vpop.f32.mrf.mxu0 }
 0x359   : > { %5419 = vmatpush.bf16.msrb.mxu3 %v13287_v23 }
 0x35b   : > { %v4459_v4 = vpop.f32.mrf.mxu3 }
 0x35c   : > { %v4460_v26 = vadd.f32 %v4459_v4, %v4446_v24  ;;  %v16088_v4 = vld [vmem:[#allocation11 + $0x130] sm:$0xff] }
 0x35d   : > { %5420 = vmatpush.bf16.msrb.mxu3 %v13271_v8  ;;  %5826 = vmatpush.bf16.msra.mxu1 %v16088_v4  ;;  %v16057_v4 = vld [vmem:[#allocation11 + $0x38] sm:$0xff] }
 0x35e   : > { %v20894_v62 = vadd.f32 %v4473_v29, %v4460_v26  ;;  %v5186_v18 = vpop.f32.mrf.mxu2  ;;  %v5282_v26 = vpop.f32.mrf.mxu1  ;;  %v16112_v29 = vld [vmem:[#allocation11 + $0x1f0] sm:$0xff] }
 0x35f   : > { %v5214_v49 = vpop.f32.mrf.mxu0  ;;  %5865 = vmatpush.bf16.msrb.mxu0 %v16112_v29  ;;  %v4378_v29 = vadd.f32 %v20802_v43, %v4364_v58 }
 0x360   : > { %5421 = vmatmul.bf16.vlgmr.msrb.gmra.mxu3 %v20227_v50  ;;  %v5171_v50 = vadd.f32 %v5170_v21, %v20703_v14  ;;  %v5187_v14 = vadd.f32 %v5186_v18, %v5173_v0  ;;  %v16110_v18 = vld [vmem:[#allocation11 + $0x1e0] sm:$0xff] }
 0x361   : > { %5851 = vmatpush.bf16.msra.mxu3 %v16105_v53  ;;  %5827 = vmatpush.bf16.msra.mxu1 %v16087_v47  ;;  %v16099_v53 = vld [vmem:[#allocation11 + $0x188] sm:$0xff]  ;;  %v16072_v47 = vld [vmem:[#allocation11 + $0xb0] sm:$0xff] }
 0x362   : > { %v5185_v10 = vadd.f32 %v5184_v1, %v5171_v50  ;;  %v16095_v1 = vld [vmem:[#allocation11 + $0x168] sm:$0xff]  ;;  %v4336_v50 = vadd.f32 %v20714_v5, %v4322_v15  ;;  %v16085_v5 = vld [vmem:[#allocation11 + $0x118] sm:$0xff] }
 0x363   : > { %v20902_v41 = vpop.f32.mrf.mxu3  ;;  %5840 = vmatpush.bf16.msra.mxu2 %v16095_v1  ;;  %v16080_v1 = vld [vmem:[#allocation11 + $0xf0] sm:$0xff] }
 0x365   : > { %5852 = vmatpush.bf16.msra.mxu3 %v16104_v55  ;;  %v16073_v55 = vld [vmem:[#allocation11 + $0xb8] sm:$0xff] }
 0x367   : > { %5841 = vmatpush.bf16.msra.mxu2 %v16094_v45 }
 0x369   : > { %5853 = vmatpush.bf16.msra.mxu3 %v16103_v22  ;;  %v4392_v22 = vadd.f32 %v20829_v30, %v4378_v29  ;;  %v16062_v30 = vld [vmem:[#allocation11 + $0x60] sm:$0xff] }
 0x36a   : > { %v16066_v29 = vld [vmem:[#allocation11 + $0x80] sm:$0xff] }
 0x36b   : > { %v4406_v43 = vadd.f32 %v20889_v38, %v4392_v22  ;;  %v5445_v38 = vperm.slane %v20908_v31, 2  ;;  %v5446_v22 = vperm.slane %v20908_v31, 3 }
 0x376   : > { %v5240_v36 = vpop.f32.mrf.mxu2 }
 0x377   : > { %v5241_v23 = vadd.f32 %v5240_v36, %v20827_v40  ;;  %v5268_v28 = vpop.f32.mrf.mxu0  ;;  %v16111_v40 = vld [vmem:[#allocation11 + $0x1e8] sm:$0xff] }
 0x378   : > { %5866 = vmatpush.bf16.msrb.mxu0 %v16111_v40 }
 0x37b   : > { %v5198_v33 = vpop.f32.mrf.mxu3 }
 0x37c   : > { %v5199_v35 = vadd.f32 %v5198_v33, %v5185_v10  ;;  %5867 = vmatpush.bf16.msrb.mxu0 %v16110_v18 }
 0x37e   : > { %v5213_v32 = vadd.f32 %v5212_v2, %v5199_v35  ;;  %v5242_v44 = vpop.f32.mrf.mxu2 }
 0x37f   : > { %v5243_v10 = vadd.f32 %v5242_v44, %v4336_v50  ;;  %v16107_v44 = vld [vmem:[#allocation11 + $0x1c8] sm:$0xff] }
 0x380   : > { %v5227_v52 = vadd.f32 %v5226_v57, %v5213_v32  ;;  %v16086_v57 = vld [vmem:[#allocation11 + $0x120] sm:$0xff] }
 0x381   : > { %v16102_v32 = vld [vmem:[#allocation11 + $0x1a0] sm:$0xff]  ;;  %5828 = vmatpush.bf16.msra.mxu1 %v16086_v57 }
 0x382   : > { %v5451_v24 = vadd.f32 %v5443_v17, %v5227_v52  ;;  %5854 = vmatpush.bf16.msra.mxu3 %v16102_v32  ;;  %v16054_v57 = vld [vmem:[#allocation11 + $0x20] sm:$0xff] }
 0x383   : > { %v5200_v63 = vpop.f32.mrf.mxu3  ;;  %v16070_v32 = vld [vmem:[#allocation11 + $0xa0] sm:$0xff] }
 0x384   : > { %v5459_v16 = vmax.f32 %v5451_v24, 0.0  ;;  %v5201_v56 = vadd.f32 %v5200_v63, %v5187_v14  ;;  %v16093_v14 = vld [vmem:[#allocation11 + $0x158] sm:$0xff]  ;;  %v5284_v24 = vpop.f32.mrf.mxu1 }
 0x385   : > { %v16101_v63 = vld [vmem:[#allocation11 + $0x198] sm:$0xff]  ;;  %5829 = vmatpush.bf16.msra.mxu1 %v16085_v5  ;;  %5842 = vmatpush.bf16.msra.mxu2 %v16093_v14 }
 0x386   : > { %5467 = vst [vmem:[#allocation4] sm:$0xff] %v5459_v16  ;;  %v5215_v51 = vadd.f32 %v5214_v49, %v5201_v56  ;;  %v5296_v19 = vpop.f32.mrf.mxu2  ;;  %v16109_v16 = vld [vmem:[#allocation11 + $0x1d8] sm:$0xff]  ;;  %5855 = vmatpush.bf16.msra.mxu3 %v16101_v63 }
 0x387   : > { %5868 = vmatpush.bf16.msrb.mxu0 %v16109_v16  ;;  %v16053_v16 = vld [vmem:[#allocation11 + $0x18] sm:$0xff] }
 0x388   : > { %v5229_v6 = vadd.f32 %v5228_v60, %v5215_v51 }
 0x38a   : > { %v5455_v12 = vadd.f32 %v5443_v17, %v5229_v6  ;;  %v5270_v17 = vpop.f32.mrf.mxu0  ;;  %v16084_v6 = vld [vmem:[#allocation11 + $0x110] sm:$0xff] }
 0x38b   : > { %5830 = vmatpush.bf16.msra.mxu1 %v16084_v6  ;;  %5869 = vmatpush.bf16.msrb.mxu0 %v16108_v37  ;;  %v16052_v6 = vld [vmem:[#allocation11 + $0x10] sm:$0xff] }
 0x38c   : > { %v5463_v7 = vmax.f32 %v5455_v12, 0.0  ;;  %v16092_v12 = vld [vmem:[#allocation11 + $0x150] sm:$0xff]  ;;  %v5338_v50 = vpop.f32.mrf.mxu1 }
 0x38d   : > { %5843 = vmatpush.bf16.msra.mxu2 %v16092_v12  ;;  %v16060_v12 = vld [vmem:[#allocation11 + $0x50] sm:$0xff] }
 0x38e   : > { %5471 = vst [vmem:[#allocation4 + $0x20] sm:$0xff] %v5463_v7  ;;  %v5298_v49 = vpop.f32.mrf.mxu2  ;;  %v16100_v7 = vld [vmem:[#allocation11 + $0x190] sm:$0xff] }
 0x38f   : > { %5856 = vmatpush.bf16.msra.mxu3 %v16100_v7  ;;  %5831 = vmatpush.bf16.msra.mxu1 %v16083_v25  ;;  %v16068_v7 = vld [vmem:[#allocation11 + $0x90] sm:$0xff]  ;;  %v4434_v25 = vadd.f32 %v20896_v54, %v20891_v27 }
 0x390   : > { %5870 = vmatpush.bf16.msrb.mxu0 %v16107_v44  ;;  %v16076_v37 = vld [vmem:[#allocation11 + $0xd0] sm:$0xff] }
 0x391   : > { %5844 = vmatpush.bf16.msra.mxu2 %v16091_v42 }
 0x393   : > { %5857 = vmatpush.bf16.msra.mxu3 %v16099_v53 }
 0x394   : > { %v5340_v14 = vpop.f32.mrf.mxu1 }
 0x395   : > { %v5324_v9 = vpop.f32.mrf.mxu0 }
 0x39b   : > { %v5254_v3 = vpop.f32.mrf.mxu3 }
 0x39c   : > { %v5255_v8 = vadd.f32 %v5254_v3, %v5241_v23  ;;  %v16082_v23 = vld [vmem:[#allocation11 + $0x100] sm:$0xff] }
 0x39d   : > { %v16098_v3 = vld [vmem:[#allocation11 + $0x180] sm:$0xff]  ;;  %5832 = vmatpush.bf16.msra.mxu1 %v16082_v23 }
 0x39e   : > { %v5269_v21 = vadd.f32 %v5268_v28, %v5255_v8  ;;  %v16090_v28 = vld [vmem:[#allocation11 + $0x140] sm:$0xff]  ;;  %5858 = vmatpush.bf16.msra.mxu3 %v16098_v3  ;;  %v16059_v3 = vld [vmem:[#allocation11 + $0x48] sm:$0xff] }
 0x39f   : > { %v16106_v8 = vld [vmem:[#allocation11 + $0x1c0] sm:$0xff]  ;;  %5845 = vmatpush.bf16.msra.mxu2 %v16090_v28  ;;  %v16051_v28 = vld [vmem:[#allocation11 + $0x8] sm:$0xff] }
 0x3a0   : > { %v5283_v48 = vadd.f32 %v5282_v26, %v5269_v21  ;;  %v16081_v26 = vld [vmem:[#allocation11 + $0xf8] sm:$0xff]  ;;  %5871 = vmatpush.bf16.msrb.mxu0 %v16106_v8  ;;  %v16067_v8 = vld [vmem:[#allocation11 + $0x88] sm:$0xff] }
 0x3a1   : > { %6069 = vmatpush.bf16.msrb.mxu1 %v16057_v4  ;;  %v16075_v4 = vld [vmem:[#allocation11 + $0xc8] sm:$0xff] }
 0x3a2   : > { %v5297_v2 = vadd.f32 %v5296_v19, %v5283_v48  ;;  %6095 = vmatpush.bf16.msrb.mxu3 %v16073_v55  ;;  %v5326_v19 = vpop.f32.mrf.mxu0 }
 0x3a3   : > { %v5256_v33 = vpop.f32.mrf.mxu3  ;;  %6082 = vmatpush.bf16.msrb.mxu2 %v16065_v11 }
 0x3a4   : > { %v5452_v46 = vadd.f32 %v5444_v34, %v5297_v2  ;;  %v5257_v35 = vadd.f32 %v5256_v33, %v5243_v10  ;;  %6108 = vmatpush.bf16.msra.mxu0 %v16081_v26  ;;  %v16055_v2 = vld [vmem:[#allocation11 + $0x28] sm:$0xff] }
 0x3a5   : > { %6070 = vmatpush.bf16.msrb.mxu1 %v16056_v59  ;;  %v16063_v33 = vld [vmem:[#allocation11 + $0x68] sm:$0xff] }
 0x3a6   : > { %v5460_v0 = vmax.f32 %v5452_v46, 0.0  ;;  %v5271_v52 = vadd.f32 %v5270_v17, %v5257_v35  ;;  %6096 = vmatpush.bf16.msrb.mxu3 %v16072_v47  ;;  %v16071_v46 = vld [vmem:[#allocation11 + $0xa8] sm:$0xff]  ;;  %v16078_v17 = vld [vmem:[#allocation11 + $0xe0] sm:$0xff] }
 0x3a7   : > { %6083 = vmatpush.bf16.msrb.mxu2 %v16064_v20  ;;  %v16079_v35 = vld [vmem:[#allocation11 + $0xe8] sm:$0xff] }
 0x3a8   : > { %5468 = vst [vmem:[#allocation4 + $0x8] sm:$0xff] %v5460_v0  ;;  %v5285_v56 = vadd.f32 %v5284_v24, %v5271_v52  ;;  %6109 = vmatpush.bf16.msra.mxu0 %v16080_v1 }
 0x3a9   : > { %6071 = vmatpush.bf16.msrb.mxu1 %v16055_v2 }
 0x3aa   : > { %v5299_v51 = vadd.f32 %v5298_v49, %v5285_v56  ;;  %6097 = vmatpush.bf16.msrb.mxu3 %v16071_v46  ;;  %v16061_v56 = vld [vmem:[#allocation11 + $0x58] sm:$0xff] }
 0x3ab   : > { %6084 = vmatpush.bf16.msrb.mxu2 %v16063_v33  ;;  %v16069_v49 = vld [vmem:[#allocation11 + $0x98] sm:$0xff] }
 0x3ac   : > { %v5456_v60 = vadd.f32 %v5444_v34, %v5299_v51  ;;  %6110 = vmatpush.bf16.msra.mxu0 %v16079_v35 }
 0x3ad   : > { %6072 = vmatpush.bf16.msrb.mxu1 %v16054_v57 }
 0x3ae   : > { %v5464_v36 = vmax.f32 %v5456_v60, 0.0  ;;  %6098 = vmatpush.bf16.msrb.mxu3 %v16070_v32  ;;  %v16077_v60 = vld [vmem:[#allocation11 + $0xd8] sm:$0xff] }
 0x3af   : > { %6085 = vmatpush.bf16.msrb.mxu2 %v16062_v30 }
 0x3b0   : > { %5472 = vst [vmem:[#allocation4 + $0x28] sm:$0xff] %v5464_v36  ;;  %6111 = vmatpush.bf16.msra.mxu0 %v16078_v17 }
 0x3b1   : > { %6073 = vmatpush.bf16.msrb.mxu1 %v16053_v16  ;;  %v16120_v16 = vld [vmem:[#allocation11 + $0x230] sm:$0xff] }
 0x3b2   : > { %6099 = vmatpush.bf16.msrb.mxu3 %v16069_v49  ;;  %v16136_v49 = vld [vmem:[#allocation11 + $0x2b0] sm:$0xff] }
 0x3b3   : > { %6086 = vmatpush.bf16.msrb.mxu2 %v16061_v56  ;;  %v16128_v56 = vld [vmem:[#allocation11 + $0x270] sm:$0xff] }
 0x3b4   : > { %6112 = vmatpush.bf16.msra.mxu0 %v16077_v60  ;;  %v16119_v60 = vld [vmem:[#allocation11 + $0x228] sm:$0xff] }
 0x3b5   : > { %v5380_v45 = vpop.f32.mrf.mxu0  ;;  %6074 = vmatpush.bf16.msrb.mxu1 %v16052_v6  ;;  %v16135_v6 = vld [vmem:[#allocation11 + $0x2a8] sm:$0xff] }
 0x3b6   : > { %v5381_v58 = vadd.f32 %v5380_v45, %v20894_v62  ;;  %6100 = vmatpush.bf16.msrb.mxu3 %v16068_v7  ;;  %v16058_v62 = vld [vmem:[#allocation11 + $0x40] sm:$0xff] }
 0x3b7   : > { %6087 = vmatpush.bf16.msrb.mxu2 %v16060_v12  ;;  %v16143_v12 = vld [vmem:[#allocation11 + $0x2e8] sm:$0xff] }
 0x3b8   : > { %6113 = vmatpush.bf16.msra.mxu0 %v16076_v37  ;;  %v16118_v37 = vld [vmem:[#allocation11 + $0x220] sm:$0xff] }
 0x3b9   : > { %6075 = vmatpush.bf16.msrb.mxu1 %v16051_v28 }
 0x3ba   : > { %6101 = vmatpush.bf16.msrb.mxu3 %v16067_v8  ;;  %v16125_v8 = vld [vmem:[#allocation11 + $0x258] sm:$0xff] }
 0x3bb   : > { %v5310_v15 = vpop.f32.mrf.mxu3  ;;  %6088 = vmatpush.bf16.msrb.mxu2 %v16059_v3 }
 0x3bc   : > { %v5311_v21 = vadd.f32 %v5310_v15, %v20887_v39  ;;  %v5352_v39 = vpop.f32.mrf.mxu2  ;;  %v5394_v15 = vpop.f32.mrf.mxu1  ;;  %6114 = vmatpush.bf16.msra.mxu0 %v16075_v4 }
 0x3bd   : > { %v5382_v53 = vpop.f32.mrf.mxu0  ;;  %v5395_v55 = vadd.f32 %v5394_v15, %v5381_v58  ;;  %v16117_v15 = vld [vmem:[#allocation11 + $0x218] sm:$0xff] }
 0x3be   : > { %v5325_v40 = vadd.f32 %v5324_v9, %v5311_v21  ;;  %v4448_v9 = vadd.f32 %v20898_v13, %v4434_v25  ;;  %v16050_v13 = vld [vmem:[#allocation11] sm:$0xff]  ;;  %6102 = vmatpush.bf16.msrb.mxu3 %v16066_v29  ;;  %v16115_v29 = vld [vmem:[#allocation11 + $0x208] sm:$0xff] }
 0x3bf   : > { %v16074_v21 = vld [vmem:[#allocation11 + $0xc0] sm:$0xff]  ;;  %6076 = vmatpush.bf16.msrb.mxu1 %v16050_v13  ;;  %6089 = vmatpush.bf16.msrb.mxu2 %v16058_v62  ;;  %v16132_v13 = vld [vmem:[#allocation11 + $0x290] sm:$0xff] }
 0x3c0   : > { %v5339_v10 = vadd.f32 %v5338_v50, %v5325_v40  ;;  %v4462_v27 = vadd.f32 %v20902_v41, %v4448_v9  ;;  %6115 = vmatpush.bf16.msra.mxu0 %v16074_v21  ;;  %v16126_v25 = vld [vmem:[#allocation11 + $0x260] sm:$0xff]  ;;  %v16140_v62 = vld [vmem:[#allocation11 + $0x2d0] sm:$0xff]  ;;  %v16123_v21 = vld [vmem:[#allocation11 + $0x248] sm:$0xff] }
 0x3c1   : > { %v16142_v9 = vld [vmem:[#allocation11 + $0x2e0] sm:$0xff] }
 0x3c2   : > { %v5353_v0 = vadd.f32 %v5352_v39, %v5339_v10  ;;  %v4476_v59 = vadd.f32 %v20900_v61, %v4462_v27 }
 0x3c3   : > { %v5312_v48 = vpop.f32.mrf.mxu3 }
 0x3c4   : > { %v5313_v34 = vadd.f32 %v5312_v48, %v4406_v43  ;;  %v5354_v51 = vpop.f32.mrf.mxu2  ;;  %v5383_v47 = vadd.f32 %v5382_v53, %v4476_v59  ;;  %v5396_v40 = vpop.f32.mrf.mxu1  ;;  %v16131_v59 = vld [vmem:[#allocation11 + $0x288] sm:$0xff] }
 0x3c5   : > { %v5436_v41 = vpop.f32.mrf.mxu0 }
 0x3c6   : > { %v5327_v18 = vadd.f32 %v5326_v19, %v5313_v34  ;;  %v5397_v50 = vadd.f32 %v5396_v40, %v5383_v47  ;;  %v16153_v40 = vld [vmem:[#allocation11 + $0x338] sm:$0xff] }
 0x3c8   : > { %v5341_v63 = vadd.f32 %v5340_v14, %v5327_v18  ;;  %v16129_v14 = vld [vmem:[#allocation11 + $0x278] sm:$0xff] }
 0x3ca   : > { %v5355_v42 = vadd.f32 %v5354_v51, %v5341_v63  ;;  %v16145_v63 = vld [vmem:[#allocation11 + $0x2f8] sm:$0xff]  ;;  %v16144_v51 = vld [vmem:[#allocation11 + $0x2f0] sm:$0xff] }
 0x3cb   : > { %v5366_v52 = vpop.f32.mrf.mxu3 }
 0x3cc   : > { %v5367_v5 = vadd.f32 %v5366_v52, %v5353_v0  ;;  %v5408_v11 = vpop.f32.mrf.mxu2 }
 0x3cd   : > { %v5409_v20 = vadd.f32 %v5408_v11, %v5395_v55  ;;  %v5438_v33 = vpop.f32.mrf.mxu0  ;;  %v16141_v11 = vld [vmem:[#allocation11 + $0x2d8] sm:$0xff]  ;;  %v16116_v55 = vld [vmem:[#allocation11 + $0x210] sm:$0xff] }
 0x3ce   : > { %v5453_v24 = vadd.f32 %v5445_v38, %v5367_v5  ;;  %v16121_v5 = vld [vmem:[#allocation11 + $0x238] sm:$0xff] }
 0x3d0   : > { %v5461_v36 = vmax.f32 %v5453_v24, 0.0  ;;  %v16137_v24 = vld [vmem:[#allocation11 + $0x2b8] sm:$0xff] }
 0x3d2   : > { %5469 = vst [vmem:[#allocation4 + $0x10] sm:$0xff] %v5461_v36  ;;  %v16127_v36 = vld [vmem:[#allocation11 + $0x268] sm:$0xff] }
 0x3d3   : > { %v5368_v44 = vpop.f32.mrf.mxu3 }
 0x3d4   : > { %v5369_v23 = vadd.f32 %v5368_v44, %v5355_v42  ;;  %v5410_v43 = vpop.f32.mrf.mxu2  ;;  %v16134_v44 = vld [vmem:[#allocation11 + $0x2a0] sm:$0xff] }
 0x3d5   : > { %v5411_v34 = vadd.f32 %v5410_v43, %v5397_v50  ;;  %v16161_v50 = vld [vmem:[#allocation11 + $0x378] sm:$0xff] }
 0x3d6   : > { %v5457_v54 = vadd.f32 %v5445_v38, %v5369_v23 }
 0x3d8   : > { %v5465_v26 = vmax.f32 %v5457_v54, 0.0  ;;  %v16133_v54 = vld [vmem:[#allocation11 + $0x298] sm:$0xff] }
 0x3da   : > { %5473 = vst [vmem:[#allocation4 + $0x30] sm:$0xff] %v5465_v26  ;;  %v16124_v26 = vld [vmem:[#allocation11 + $0x250] sm:$0xff] }
 0x3e3   : > { %v5422_v1 = vpop.f32.mrf.mxu3 }
 0x3e4   : > { %v5423_v19 = vadd.f32 %v5422_v1, %v5409_v20  ;;  %v16139_v20 = vld [vmem:[#allocation11 + $0x2c8] sm:$0xff]  ;;  %v16122_v1 = vld [vmem:[#allocation11 + $0x240] sm:$0xff] }
 0x3e6   : > { %v5437_v48 = vadd.f32 %v5436_v41, %v5423_v19  ;;  %v16114_v41 = vld [vmem:[#allocation11 + $0x200] sm:$0xff] }
 0x3e7   : > { %v16130_v19 = vld [vmem:[#allocation11 + $0x280] sm:$0xff] }
 0x3e8   : > { %v5454_v39 = vadd.f32 %v5446_v22, %v5437_v48 }
 0x3ea   : > { %v5462_v10 = vmax.f32 %v5454_v39, 0.0  ;;  %v16169_v39 = vld [vmem:[#allocation11 + $0x3b8] sm:$0xff] }
 0x3eb   : > { %v5424_v61 = vpop.f32.mrf.mxu3 }
 0x3ec   : > { %5470 = vst [vmem:[#allocation4 + $0x18] sm:$0xff] %v5462_v10  ;;  %v5425_v2 = vadd.f32 %v5424_v61, %v5411_v34  ;;  %v16177_v34 = vld [vmem:[#allocation11 + $0x3f8] sm:$0xff] }
 0x3ee   : > { %v5439_v46 = vadd.f32 %v5438_v33, %v5425_v2 }
 0x3f0   : > { %v5458_v35 = vadd.f32 %v5446_v22, %v5439_v46  ;;  %v16138_v22 = vld [vmem:[#allocation11 + $0x2c0] sm:$0xff]  ;;  %v16152_v46 = vld [vmem:[#allocation11 + $0x330] sm:$0xff] }
 0x3f2   : > { %v5466_v57 = vmax.f32 %v5458_v35, 0.0  ;;  %v16160_v35 = vld [vmem:[#allocation11 + $0x370] sm:$0xff] }
 0x3f3   : > { %v5554_v30 = vld [vmem:[#allocation4 + $0x1] ss:$8 sm:$0xf]  ;;  %v5475_v7 = vld [vmem:[#allocation4] ss:$8 sm:$0xf] }
 0x3f4   : > { %5474 = vst [vmem:[#allocation4 + $0x38] sm:$0xff] %v5466_v57  ;;  %v5621_v45 = vperm.slane %v5554_v30, 0  ;;  %v5622_v32 = vperm.slane %v5554_v30, 1  ;;  %v5623_v17 = vperm.slane %v5554_v30, 2  ;;  %v5624_v31 = vperm.slane %v5554_v30, 3 }
 0x3f5   : > { %v5541_v42 = vperm.slane %v5475_v7, 0  ;;  %v5542_v53 = vperm.slane %v5475_v7, 1  ;;  %v5543_v58 = vperm.slane %v5475_v7, 2  ;;  %v5544_v23 = vperm.slane %v5475_v7, 3  ;;  %v16163_v7 = vld [vmem:[#allocation11 + $0x388] sm:$0xff] }
 0x3f6   : > { %v5629_v18 = vpack.c.bf16 %v5621_v45, %v5621_v45  ;;  %v5630_v0 = vpack.c.bf16 %v5622_v32, %v5622_v32  ;;  %v5631_v38 = vpack.c.bf16 %v5623_v17, %v5623_v17  ;;  %v5632_v52 = vpack.c.bf16 %v5624_v31, %v5624_v31  ;;  %v6122_v47 = vld [vmem:[#allocation4 + $0x2] ss:$8 sm:$0xf] }
 0x3f7   : > { %v5549_v28 = vpack.c.bf16 %v5541_v42, %v5541_v42  ;;  %v5550_v3 = vpack.c.bf16 %v5542_v53, %v5542_v53  ;;  %v5551_v4 = vpack.c.bf16 %v5543_v58, %v5543_v58  ;;  %v5552_v27 = vpack.c.bf16 %v5544_v23, %v5544_v23  ;;  %v16168_v45 = vld [vmem:[#allocation11 + $0x3b0] sm:$0xff]  ;;  %v16151_v17 = vld [vmem:[#allocation11 + $0x328] sm:$0xff]  ;;  %v16146_v42 = vld [vmem:[#allocation11 + $0x300] sm:$0xff] }
 0x3f8   : > { %5833 = vmatmul.bf16.vlgmr.msra.gmra.mxu1 %v5629_v18  ;;  %5846 = vmatmul.bf16.vlgmr.msra.gmra.mxu2 %v5630_v0  ;;  %v6189_v48 = vperm.slane %v6122_v47, 0  ;;  %v6190_v43 = vperm.slane %v6122_v47, 1  ;;  %v6191_v10 = vperm.slane %v6122_v47, 2  ;;  %v6192_v61 = vperm.slane %v6122_v47, 3  ;;  %v16176_v32 = vld [vmem:[#allocation11 + $0x3f0] sm:$0xff]  ;;  %v16159_v31 = vld [vmem:[#allocation11 + $0x368] sm:$0xff] }
 0x3f9   : > { %5859 = vmatmul.bf16.vlgmr.msra.gmra.mxu3 %v5631_v38  ;;  %5872 = vmatmul.bf16.vlgmr.msrb.gmra.mxu0 %v5632_v52  ;;  %v16167_v18 = vld [vmem:[#allocation11 + $0x3a8] sm:$0xff]  ;;  %v16150_v38 = vld [vmem:[#allocation11 + $0x320] sm:$0xff]  ;;  %v16185_v58 = vld [vmem:[#allocation11 + $0x438] sm:$0xff] }
 0x3fa   : > { %6393 = vmatpush.bf16.msra.mxu1 %v16121_v5  ;;  %6406 = vmatpush.bf16.msra.mxu2 %v16129_v14  ;;  %v6197_v2 = vpack.c.bf16 %v6189_v48, %v6189_v48  ;;  %v6198_v33 = vpack.c.bf16 %v6190_v43, %v6190_v43  ;;  %v6199_v57 = vpack.c.bf16 %v6191_v10, %v6191_v10  ;;  %v16175_v0 = vld [vmem:[#allocation11 + $0x3e8] sm:$0xff]  ;;  %v16158_v52 = vld [vmem:[#allocation11 + $0x360] sm:$0xff]  ;;  %v16193_v23 = vld [vmem:[#allocation11 + $0x478] sm:$0xff] }
 0x3fb   : > { %6419 = vmatpush.bf16.msra.mxu3 %v16137_v24  ;;  %6432 = vmatpush.bf16.msrb.mxu0 %v16145_v63  ;;  %v6200_v30 = vpack.c.bf16 %v6192_v61, %v6192_v61  ;;  %v16166_v5 = vld [vmem:[#allocation11 + $0x3a0] sm:$0xff]  ;;  %v16149_v24 = vld [vmem:[#allocation11 + $0x318] sm:$0xff]  ;;  %v16199_v47 = vld [vmem:[#allocation11 + $0x4a8] sm:$0xff] }
 0x3fc   : > { %v16174_v14 = vld [vmem:[#allocation11 + $0x3e0] sm:$0xff]  ;;  %v16157_v63 = vld [vmem:[#allocation11 + $0x358] sm:$0xff]  ;;  %v16188_v10 = vld [vmem:[#allocation11 + $0x450] sm:$0xff] }
 0x3fd   : > { %v16154_v53 = vld [vmem:[#allocation11 + $0x340] sm:$0xff]  ;;  %v16189_v48 = vld [vmem:[#allocation11 + $0x458] sm:$0xff]  ;;  %v16196_v61 = vld [vmem:[#allocation11 + $0x490] sm:$0xff] }
 0x3fe   : > { %6394 = vmatpush.bf16.msra.mxu1 %v16120_v16  ;;  %6407 = vmatpush.bf16.msra.mxu2 %v16128_v56  ;;  %v16165_v16 = vld [vmem:[#allocation11 + $0x398] sm:$0xff] }
 0x3ff   : > { %6420 = vmatpush.bf16.msra.mxu3 %v16136_v49  ;;  %6433 = vmatpush.bf16.msrb.mxu0 %v16144_v51  ;;  %v16173_v56 = vld [vmem:[#allocation11 + $0x3d8] sm:$0xff]  ;;  %v16148_v49 = vld [vmem:[#allocation11 + $0x310] sm:$0xff] }
 0x400   : > { %v16156_v51 = vld [vmem:[#allocation11 + $0x350] sm:$0xff]  ;;  %v16197_v43 = vld [vmem:[#allocation11 + $0x498] sm:$0xff] }
 0x402   : > { %6395 = vmatpush.bf16.msra.mxu1 %v16119_v60  ;;  %6408 = vmatpush.bf16.msra.mxu2 %v16127_v36  ;;  %v16164_v60 = vld [vmem:[#allocation11 + $0x390] sm:$0xff] }
 0x403   : > { %6421 = vmatpush.bf16.msra.mxu3 %v16135_v6  ;;  %6434 = vmatpush.bf16.msrb.mxu0 %v16143_v12  ;;  %v16172_v36 = vld [vmem:[#allocation11 + $0x3d0] sm:$0xff]  ;;  %v16147_v6 = vld [vmem:[#allocation11 + $0x308] sm:$0xff] }
 0x404   : > { %v16155_v12 = vld [vmem:[#allocation11 + $0x348] sm:$0xff] }
 0x406   : > { %6396 = vmatpush.bf16.msra.mxu1 %v16118_v37  ;;  %6409 = vmatpush.bf16.msra.mxu2 %v16126_v25  ;;  %v16171_v37 = vld [vmem:[#allocation11 + $0x3c8] sm:$0xff] }
 0x407   : > { %6422 = vmatpush.bf16.msra.mxu3 %v16134_v44  ;;  %6435 = vmatpush.bf16.msrb.mxu0 %v16142_v9  ;;  %v6447_v25 = vld [vmem:[#allocation4 + $0x3] ss:$8 sm:$0xf] }
 0x408   : > { %6077 = vmatmul.bf16.vlgmr.msrb.gmra.mxu1 %v5549_v28  ;;  %6090 = vmatmul.bf16.vlgmr.msrb.gmra.mxu2 %v5550_v3  ;;  %v16162_v44 = vld [vmem:[#allocation11 + $0x380] sm:$0xff]  ;;  %v6514_v28 = vperm.slane %v6447_v25, 0  ;;  %v6515_v3 = vperm.slane %v6447_v25, 1 }
 0x409   : > { %6103 = vmatmul.bf16.vlgmr.msrb.gmra.mxu3 %v5551_v4  ;;  %6116 = vmatmul.bf16.vlgmr.msra.gmra.mxu0 %v5552_v27  ;;  %v16170_v9 = vld [vmem:[#allocation11 + $0x3c0] sm:$0xff]  ;;  %v6516_v4 = vperm.slane %v6447_v25, 2  ;;  %v6517_v27 = vperm.slane %v6447_v25, 3  ;;  %v16231_v25 = vld [vmem:[#allocation11 + $0x5a8] sm:$0xff] }
 0x40a   : > { %6397 = vmatpush.bf16.msra.mxu1 %v16117_v15  ;;  %6410 = vmatpush.bf16.msra.mxu2 %v16125_v8  ;;  %v16201_v15 = vld [vmem:[#allocation11 + $0x4b8] sm:$0xff] }
 0x40b   : > { %6423 = vmatpush.bf16.msra.mxu3 %v16133_v54  ;;  %6436 = vmatpush.bf16.msrb.mxu0 %v16141_v11  ;;  %v16209_v8 = vld [vmem:[#allocation11 + $0x4f8] sm:$0xff]  ;;  %v6522_v54 = vpack.c.bf16 %v6514_v28, %v6514_v28  ;;  %v6523_v11 = vpack.c.bf16 %v6515_v3, %v6515_v3 }
 0x40c   : > { %v16221_v28 = vld [vmem:[#allocation11 + $0x558] sm:$0xff] }
 0x40d   : > { %v16229_v3 = vld [vmem:[#allocation11 + $0x598] sm:$0xff] }
 0x40e   : > { %6398 = vmatpush.bf16.msra.mxu1 %v16116_v55  ;;  %6411 = vmatpush.bf16.msra.mxu2 %v16124_v26  ;;  %v16184_v55 = vld [vmem:[#allocation11 + $0x430] sm:$0xff] }
 0x40f   : > { %6424 = vmatpush.bf16.msra.mxu3 %v16132_v13  ;;  %6437 = vmatpush.bf16.msrb.mxu0 %v16140_v62  ;;  %v16192_v26 = vld [vmem:[#allocation11 + $0x470] sm:$0xff]  ;;  %v6524_v13 = vpack.c.bf16 %v6516_v4, %v6516_v4  ;;  %v6525_v62 = vpack.c.bf16 %v6517_v27, %v6517_v27 }
 0x410   : > { %v16220_v4 = vld [vmem:[#allocation11 + $0x550] sm:$0xff] }
 0x411   : > { %v16228_v27 = vld [vmem:[#allocation11 + $0x590] sm:$0xff] }
 0x412   : > { %6399 = vmatpush.bf16.msra.mxu1 %v16115_v29  ;;  %6412 = vmatpush.bf16.msra.mxu2 %v16123_v21  ;;  %v16200_v29 = vld [vmem:[#allocation11 + $0x4b0] sm:$0xff] }
 0x413   : > { %6425 = vmatpush.bf16.msra.mxu3 %v16131_v59  ;;  %6438 = vmatpush.bf16.msrb.mxu0 %v16139_v20  ;;  %v16208_v21 = vld [vmem:[#allocation11 + $0x4f0] sm:$0xff]  ;;  %v16183_v59 = vld [vmem:[#allocation11 + $0x428] sm:$0xff] }
 0x414   : > { %v16191_v20 = vld [vmem:[#allocation11 + $0x468] sm:$0xff] }
 0x416   : > { %6400 = vmatpush.bf16.msra.mxu1 %v16114_v41  ;;  %6413 = vmatpush.bf16.msra.mxu2 %v16122_v1  ;;  %v16207_v41 = vld [vmem:[#allocation11 + $0x4e8] sm:$0xff]  ;;  %v16182_v1 = vld [vmem:[#allocation11 + $0x420] sm:$0xff] }
 0x417   : > { %6426 = vmatpush.bf16.msra.mxu3 %v16130_v19  ;;  %6439 = vmatpush.bf16.msrb.mxu0 %v16138_v22  ;;  %v16190_v19 = vld [vmem:[#allocation11 + $0x460] sm:$0xff] }
 0x418   : > { %v16198_v22 = vld [vmem:[#allocation11 + $0x4a0] sm:$0xff] }
 0x419   : > { %6401 = vmatmul.bf16.vlgmr.msra.gmra.mxu1 %v6197_v2  ;;  %6414 = vmatmul.bf16.vlgmr.msra.gmra.mxu2 %v6198_v33  ;;  %v16204_v2 = vld [vmem:[#allocation11 + $0x4d0] sm:$0xff]  ;;  %v16179_v33 = vld [vmem:[#allocation11 + $0x408] sm:$0xff] }
 0x41a   : > { %6718 = vmatpush.bf16.msrb.mxu1 %v16153_v40  ;;  %6731 = vmatpush.bf16.msrb.mxu2 %v16161_v50  ;;  %v16206_v40 = vld [vmem:[#allocation11 + $0x4e0] sm:$0xff]  ;;  %v16181_v50 = vld [vmem:[#allocation11 + $0x418] sm:$0xff] }
 0x41b   : > { %6744 = vmatpush.bf16.msrb.mxu3 %v16169_v39  ;;  %6757 = vmatpush.bf16.msra.mxu0 %v16177_v34  ;;  %v16205_v39 = vld [vmem:[#allocation11 + $0x4d8] sm:$0xff]  ;;  %v16180_v34 = vld [vmem:[#allocation11 + $0x410] sm:$0xff] }
 0x41c   : > { %6427 = vmatmul.bf16.vlgmr.msra.gmra.mxu3 %v6199_v57  ;;  %6440 = vmatmul.bf16.vlgmr.msrb.gmra.mxu0 %v6200_v30  ;;  %v16203_v57 = vld [vmem:[#allocation11 + $0x4c8] sm:$0xff] }
 0x41d   : > { %v6772_v30 = vld [vmem:[#allocation4 + $0x4] ss:$8 sm:$0xf] }
 0x41e   : > { %6719 = vmatpush.bf16.msrb.mxu1 %v16152_v46  ;;  %6732 = vmatpush.bf16.msrb.mxu2 %v16160_v35  ;;  %v16187_v46 = vld [vmem:[#allocation11 + $0x448] sm:$0xff] }
 0x41f   : > { %6745 = vmatpush.bf16.msrb.mxu3 %v16168_v45  ;;  %6758 = vmatpush.bf16.msra.mxu0 %v16176_v32  ;;  %v16195_v35 = vld [vmem:[#allocation11 + $0x488] sm:$0xff]  ;;  %v16178_v45 = vld [vmem:[#allocation11 + $0x400] sm:$0xff] }
 0x420   : > { %v16186_v32 = vld [vmem:[#allocation11 + $0x440] sm:$0xff] }
 0x422   : > { %6720 = vmatpush.bf16.msrb.mxu1 %v16151_v17  ;;  %6733 = vmatpush.bf16.msrb.mxu2 %v16159_v31  ;;  %v16194_v17 = vld [vmem:[#allocation11 + $0x480] sm:$0xff] }
 0x423   : > { %6746 = vmatpush.bf16.msrb.mxu3 %v16167_v18  ;;  %6759 = vmatpush.bf16.msra.mxu0 %v16175_v0  ;;  %v16202_v31 = vld [vmem:[#allocation11 + $0x4c0] sm:$0xff]  ;;  %v16217_v18 = vld [vmem:[#allocation11 + $0x538] sm:$0xff] }
 0x424   : > { %v16225_v0 = vld [vmem:[#allocation11 + $0x578] sm:$0xff] }
 0x426   : > { %6721 = vmatpush.bf16.msrb.mxu1 %v16150_v38  ;;  %6734 = vmatpush.bf16.msrb.mxu2 %v16158_v52  ;;  %v6839_v38 = vperm.slane %v6772_v30, 0  ;;  %v6840_v52 = vperm.slane %v6772_v30, 1 }
 0x427   : > { %6747 = vmatpush.bf16.msrb.mxu3 %v16166_v5  ;;  %6760 = vmatpush.bf16.msra.mxu0 %v16174_v14  ;;  %v16233_v5 = vld [vmem:[#allocation11 + $0x5b8] sm:$0xff] }
 0x428   : > { %v16241_v14 = vld [vmem:[#allocation11 + $0x5f8] sm:$0xff] }
 0x42a   : > { %6722 = vmatpush.bf16.msrb.mxu1 %v16149_v24  ;;  %6735 = vmatpush.bf16.msrb.mxu2 %v16157_v63  ;;  %v6841_v24 = vperm.slane %v6772_v30, 2  ;;  %v6842_v63 = vperm.slane %v6772_v30, 3  ;;  %v16255_v30 = vld [vmem:[#allocation11 + $0x668] sm:$0xff] }
 0x42b   : > { %6748 = vmatpush.bf16.msrb.mxu3 %v16165_v16  ;;  %6761 = vmatpush.bf16.msra.mxu0 %v16173_v56  ;;  %v6847_v16 = vpack.c.bf16 %v6839_v38, %v6839_v38  ;;  %v6848_v56 = vpack.c.bf16 %v6840_v52, %v6840_v52  ;;  %v16270_v38 = vld [vmem:[#allocation11 + $0x6e0] sm:$0xff] }
 0x42e   : > { %6723 = vmatpush.bf16.msrb.mxu1 %v16148_v49  ;;  %6736 = vmatpush.bf16.msrb.mxu2 %v16156_v51  ;;  %v16216_v49 = vld [vmem:[#allocation11 + $0x530] sm:$0xff] }
 0x42f   : > { %6749 = vmatpush.bf16.msrb.mxu3 %v16164_v60  ;;  %6762 = vmatpush.bf16.msra.mxu0 %v16172_v36  ;;  %v16224_v51 = vld [vmem:[#allocation11 + $0x570] sm:$0xff]  ;;  %v6849_v60 = vpack.c.bf16 %v6841_v24, %v6841_v24  ;;  %v6850_v36 = vpack.c.bf16 %v6842_v63, %v6842_v63 }
 0x432   : > { %6724 = vmatpush.bf16.msrb.mxu1 %v16147_v6  ;;  %6737 = vmatpush.bf16.msrb.mxu2 %v16155_v12  ;;  %v16232_v6 = vld [vmem:[#allocation11 + $0x5b0] sm:$0xff] }
 0x433   : > { %6750 = vmatpush.bf16.msrb.mxu3 %v16163_v7  ;;  %6763 = vmatpush.bf16.msra.mxu0 %v16171_v37  ;;  %v16240_v12 = vld [vmem:[#allocation11 + $0x5f0] sm:$0xff]  ;;  %v16215_v7 = vld [vmem:[#allocation11 + $0x528] sm:$0xff] }
 0x434   : > { %v16223_v37 = vld [vmem:[#allocation11 + $0x568] sm:$0xff] }
 0x436   : > { %6725 = vmatpush.bf16.msrb.mxu1 %v16146_v42  ;;  %6738 = vmatpush.bf16.msrb.mxu2 %v16154_v53  ;;  %v16239_v42 = vld [vmem:[#allocation11 + $0x5e8] sm:$0xff]  ;;  %v16214_v53 = vld [vmem:[#allocation11 + $0x520] sm:$0xff] }
 0x437   : > { %6751 = vmatpush.bf16.msrb.mxu3 %v16162_v44  ;;  %6764 = vmatpush.bf16.msra.mxu0 %v16170_v9  ;;  %v16222_v44 = vld [vmem:[#allocation11 + $0x560] sm:$0xff] }
 0x438   : > { %v16230_v9 = vld [vmem:[#allocation11 + $0x5a0] sm:$0xff] }
 0x439   : > { %6726 = vmatmul.bf16.vlgmr.msrb.gmra.mxu1 %v6522_v54  ;;  %6739 = vmatmul.bf16.vlgmr.msrb.gmra.mxu2 %v6523_v11  ;;  %v16236_v54 = vld [vmem:[#allocation11 + $0x5d0] sm:$0xff]  ;;  %v16211_v11 = vld [vmem:[#allocation11 + $0x508] sm:$0xff] }
 0x43a   : > { %7043 = vmatpush.bf16.msra.mxu1 %v16185_v58  ;;  %7056 = vmatpush.bf16.msra.mxu2 %v16193_v23  ;;  %v16238_v58 = vld [vmem:[#allocation11 + $0x5e0] sm:$0xff]  ;;  %v16213_v23 = vld [vmem:[#allocation11 + $0x518] sm:$0xff] }
 0x43b   : > { %7069 = vmatpush.bf16.msra.mxu3 %v16201_v15  ;;  %7082 = vmatpush.bf16.msrb.mxu0 %v16209_v8  ;;  %v16237_v15 = vld [vmem:[#allocation11 + $0x5d8] sm:$0xff]  ;;  %v16212_v8 = vld [vmem:[#allocation11 + $0x510] sm:$0xff] }
 0x43c   : > { %6752 = vmatmul.bf16.vlgmr.msrb.gmra.mxu3 %v6524_v13  ;;  %6765 = vmatmul.bf16.vlgmr.msra.gmra.mxu0 %v6525_v62  ;;  %v16235_v13 = vld [vmem:[#allocation11 + $0x5c8] sm:$0xff] }
 0x43d   : > { %v7097_v62 = vld [vmem:[#allocation4 + $0x5] ss:$8 sm:$0xf] }
 0x43e   : > { %7044 = vmatpush.bf16.msra.mxu1 %v16184_v55  ;;  %7057 = vmatpush.bf16.msra.mxu2 %v16192_v26  ;;  %v16219_v55 = vld [vmem:[#allocation11 + $0x548] sm:$0xff] }
 0x43f   : > { %7070 = vmatpush.bf16.msra.mxu3 %v16200_v29  ;;  %7083 = vmatpush.bf16.msrb.mxu0 %v16208_v21  ;;  %v16227_v26 = vld [vmem:[#allocation11 + $0x588] sm:$0xff]  ;;  %v16210_v29 = vld [vmem:[#allocation11 + $0x500] sm:$0xff] }
 0x440   : > { %v16218_v21 = vld [vmem:[#allocation11 + $0x540] sm:$0xff] }
 0x442   : > { %7045 = vmatpush.bf16.msra.mxu1 %v16183_v59  ;;  %7058 = vmatpush.bf16.msra.mxu2 %v16191_v20  ;;  %v16226_v59 = vld [vmem:[#allocation11 + $0x580] sm:$0xff] }
 0x443   : > { %7071 = vmatpush.bf16.msra.mxu3 %v16199_v47  ;;  %7084 = vmatpush.bf16.msrb.mxu0 %v16207_v41  ;;  %v16234_v20 = vld [vmem:[#allocation11 + $0x5c0] sm:$0xff]  ;;  %v16249_v47 = vld [vmem:[#allocation11 + $0x638] sm:$0xff] }
 0x444   : > { %v16257_v41 = vld [vmem:[#allocation11 + $0x678] sm:$0xff] }
 0x446   : > { %7046 = vmatpush.bf16.msra.mxu1 %v16182_v1  ;;  %7059 = vmatpush.bf16.msra.mxu2 %v16190_v19  ;;  %v7164_v1 = vperm.slane %v7097_v62, 0  ;;  %v7165_v19 = vperm.slane %v7097_v62, 1 }
 0x447   : > { %7072 = vmatpush.bf16.msra.mxu3 %v16198_v22  ;;  %7085 = vmatpush.bf16.msrb.mxu0 %v16206_v40  ;;  %v16265_v22 = vld [vmem:[#allocation11 + $0x6b8] sm:$0xff] }
 0x448   : > { %v16273_v40 = vld [vmem:[#allocation11 + $0x6f8] sm:$0xff] }
 0x44a   : > { %7047 = vmatpush.bf16.msra.mxu1 %v16181_v50  ;;  %7060 = vmatpush.bf16.msra.mxu2 %v16189_v48  ;;  %v7166_v50 = vperm.slane %v7097_v62, 2  ;;  %v7167_v48 = vperm.slane %v7097_v62, 3 }
 0x44b   : > { %7073 = vmatpush.bf16.msra.mxu3 %v16197_v43  ;;  %7086 = vmatpush.bf16.msrb.mxu0 %v16205_v39  ;;  %v7172_v43 = vpack.c.bf16 %v7164_v1, %v7164_v1  ;;  %v7173_v39 = vpack.c.bf16 %v7165_v19, %v7165_v19 }
 0x44e   : > { %7048 = vmatpush.bf16.msra.mxu1 %v16180_v34  ;;  %7061 = vmatpush.bf16.msra.mxu2 %v16188_v10  ;;  %v16248_v34 = vld [vmem:[#allocation11 + $0x630] sm:$0xff] }
 0x44f   : > { %7074 = vmatpush.bf16.msra.mxu3 %v16196_v61  ;;  %7087 = vmatpush.bf16.msrb.mxu0 %v16204_v2  ;;  %v16256_v10 = vld [vmem:[#allocation11 + $0x670] sm:$0xff]  ;;  %v7174_v61 = vpack.c.bf16 %v7166_v50, %v7166_v50  ;;  %v7175_v2 = vpack.c.bf16 %v7167_v48, %v7167_v48 }
 0x452   : > { %7049 = vmatpush.bf16.msra.mxu1 %v16179_v33  ;;  %7062 = vmatpush.bf16.msra.mxu2 %v16187_v46  ;;  %v16264_v33 = vld [vmem:[#allocation11 + $0x6b0] sm:$0xff] }
 0x453   : > { %7075 = vmatpush.bf16.msra.mxu3 %v16195_v35  ;;  %7088 = vmatpush.bf16.msrb.mxu0 %v16203_v57  ;;  %v16272_v46 = vld [vmem:[#allocation11 + $0x6f0] sm:$0xff]  ;;  %v16247_v57 = vld [vmem:[#allocation11 + $0x628] sm:$0xff] }
 0x456   : > { %7050 = vmatpush.bf16.msra.mxu1 %v16178_v45  ;;  %7063 = vmatpush.bf16.msra.mxu2 %v16186_v32  ;;  %v16263_v32 = vld [vmem:[#allocation11 + $0x6a8] sm:$0xff] }
 0x457   : > { %7076 = vmatpush.bf16.msra.mxu3 %v16194_v17  ;;  %7089 = vmatpush.bf16.msrb.mxu0 %v16202_v31  ;;  %v16271_v17 = vld [vmem:[#allocation11 + $0x6e8] sm:$0xff]  ;;  %v16246_v31 = vld [vmem:[#allocation11 + $0x620] sm:$0xff] }
 0x459   : > { %7051 = vmatmul.bf16.vlgmr.msra.gmra.mxu1 %v6847_v16  ;;  %7064 = vmatmul.bf16.vlgmr.msra.gmra.mxu2 %v6848_v56  ;;  %v16245_v16 = vld [vmem:[#allocation11 + $0x618] sm:$0xff] }
 0x45a   : > { %7368 = vmatpush.bf16.msrb.mxu1 %v16217_v18  ;;  %7381 = vmatpush.bf16.msrb.mxu2 %v16225_v0  ;;  %v16254_v18 = vld [vmem:[#allocation11 + $0x660] sm:$0xff]  ;;  %v16253_v56 = vld [vmem:[#allocation11 + $0x658] sm:$0xff] }
 0x45b   : > { %7394 = vmatpush.bf16.msrb.mxu3 %v16233_v5  ;;  %7407 = vmatpush.bf16.msra.mxu0 %v16241_v14  ;;  %v16262_v0 = vld [vmem:[#allocation11 + $0x6a0] sm:$0xff] }
 0x45c   : > { %7077 = vmatmul.bf16.vlgmr.msra.gmra.mxu3 %v6849_v60  ;;  %7090 = vmatmul.bf16.vlgmr.msrb.gmra.mxu0 %v6850_v36  ;;  %v16269_v60 = vld [vmem:[#allocation11 + $0x6d8] sm:$0xff] }
 0x45e   : > { %7369 = vmatpush.bf16.msrb.mxu1 %v16216_v49  ;;  %7382 = vmatpush.bf16.msrb.mxu2 %v16224_v51  ;;  %v16261_v51 = vld [vmem:[#allocation11 + $0x698] sm:$0xff] }
 0x45f   : > { %7395 = vmatpush.bf16.msrb.mxu3 %v16232_v6  ;;  %7408 = vmatpush.bf16.msra.mxu0 %v16240_v12  ;;  %v16244_v6 = vld [vmem:[#allocation11 + $0x610] sm:$0xff] }
 0x460   : > { %v16252_v12 = vld [vmem:[#allocation11 + $0x650] sm:$0xff] }
 0x462   : > { %7370 = vmatpush.bf16.msrb.mxu1 %v16215_v7  ;;  %7383 = vmatpush.bf16.msrb.mxu2 %v16223_v37  ;;  %v16260_v7 = vld [vmem:[#allocation11 + $0x690] sm:$0xff] }
 0x463   : > { %7396 = vmatpush.bf16.msrb.mxu3 %v16231_v25  ;;  %7409 = vmatpush.bf16.msra.mxu0 %v16239_v42  ;;  %v16268_v37 = vld [vmem:[#allocation11 + $0x6d0] sm:$0xff] }
 0x466   : > { %7371 = vmatpush.bf16.msrb.mxu1 %v16214_v53  ;;  %7384 = vmatpush.bf16.msrb.mxu2 %v16222_v44  ;;  %v16243_v44 = vld [vmem:[#allocation11 + $0x608] sm:$0xff] }
 0x467   : > { %7397 = vmatpush.bf16.msrb.mxu3 %v16230_v9  ;;  %7410 = vmatpush.bf16.msra.mxu0 %v16238_v58  ;;  %v16251_v9 = vld [vmem:[#allocation11 + $0x648] sm:$0xff] }
 0x46a   : > { %7372 = vmatpush.bf16.msrb.mxu1 %v16213_v23  ;;  %7385 = vmatpush.bf16.msrb.mxu2 %v16221_v28  ;;  %v16259_v28 = vld [vmem:[#allocation11 + $0x688] sm:$0xff] }
 0x46b   : > { %7398 = vmatpush.bf16.msrb.mxu3 %v16229_v3  ;;  %7411 = vmatpush.bf16.msra.mxu0 %v16237_v15  ;;  %v16267_v3 = vld [vmem:[#allocation11 + $0x6c8] sm:$0xff] }
 0x46c   : > { %v7422_v15 = vld [vmem:[#allocation4 + $0x6] ss:$8 sm:$0xf] }
 0x46e   : > { %7373 = vmatpush.bf16.msrb.mxu1 %v16212_v8  ;;  %7386 = vmatpush.bf16.msrb.mxu2 %v16220_v4  ;;  %v16242_v8 = vld [vmem:[#allocation11 + $0x600] sm:$0xff] }
 0x46f   : > { %7399 = vmatpush.bf16.msrb.mxu3 %v16228_v27  ;;  %7412 = vmatpush.bf16.msra.mxu0 %v16236_v54  ;;  %v16250_v4 = vld [vmem:[#allocation11 + $0x640] sm:$0xff] }
 0x470   : > { %v16258_v27 = vld [vmem:[#allocation11 + $0x680] sm:$0xff] }
 0x471   : > { %v16266_v54 = vld [vmem:[#allocation11 + $0x6c0] sm:$0xff] }
 0x472   : > { %7374 = vmatpush.bf16.msrb.mxu1 %v16211_v11  ;;  %7387 = vmatpush.bf16.msrb.mxu2 %v16219_v55  ;;  %v16281_v55 = vld [vmem:[#allocation11 + $0x738] sm:$0xff] }
 0x473   : > { %7400 = vmatpush.bf16.msrb.mxu3 %v16227_v26  ;;  %7413 = vmatpush.bf16.msra.mxu0 %v16235_v13  ;;  %v16289_v26 = vld [vmem:[#allocation11 + $0x778] sm:$0xff] }
 0x475   : > { %v5834_v35 = vpop.f32.mrf.mxu1 }
 0x476   : > { %7375 = vmatpush.bf16.msrb.mxu1 %v16210_v29  ;;  %7388 = vmatpush.bf16.msrb.mxu2 %v16218_v21  ;;  %v5873_v45 = vpop.f32.mrf.mxu0  ;;  %v7489_v29 = vperm.slane %v7422_v15, 0  ;;  %v7490_v21 = vperm.slane %v7422_v15, 1 }
 0x477   : > { %7401 = vmatpush.bf16.msrb.mxu3 %v16226_v59  ;;  %7414 = vmatpush.bf16.msra.mxu0 %v16234_v20  ;;  %v16297_v59 = vld [vmem:[#allocation11 + $0x7b8] sm:$0xff] }
 0x478   : > { %v16305_v20 = vld [vmem:[#allocation11 + $0x7f8] sm:$0xff]  ;;  %v7497_v50 = vpack.c.bf16 %v7489_v29, %v7489_v29  ;;  %v7498_v48 = vpack.c.bf16 %v7490_v21, %v7490_v21 }
 0x479   : > { %7376 = vmatmul.bf16.vlgmr.msrb.gmra.mxu1 %v7172_v43  ;;  %7389 = vmatmul.bf16.vlgmr.msrb.gmra.mxu2 %v7173_v39  ;;  %v16280_v43 = vld [vmem:[#allocation11 + $0x730] sm:$0xff] }
 0x47a   : > { %7693 = vmatpush.bf16.msra.mxu1 %v16249_v47  ;;  %7706 = vmatpush.bf16.msra.mxu2 %v16257_v41  ;;  %v7491_v47 = vperm.slane %v7422_v15, 2  ;;  %v7492_v41 = vperm.slane %v7422_v15, 3  ;;  %v16288_v39 = vld [vmem:[#allocation11 + $0x770] sm:$0xff]  ;;  %v16282_v15 = vld [vmem:[#allocation11 + $0x740] sm:$0xff] }
 0x47b   : > { %7719 = vmatpush.bf16.msra.mxu3 %v16265_v22  ;;  %7732 = vmatpush.bf16.msrb.mxu0 %v16273_v40  ;;  %v5847_v52 = vpop.f32.mrf.mxu2 }
 0x47c   : > { %7402 = vmatmul.bf16.vlgmr.msrb.gmra.mxu3 %v7174_v61  ;;  %7415 = vmatmul.bf16.vlgmr.msra.gmra.mxu0 %v7175_v2  ;;  %v5848_v5 = vadd.f32 %v5847_v52, %v5834_v35  ;;  %v5860_v14 = vpop.f32.mrf.mxu3  ;;  %v16296_v61 = vld [vmem:[#allocation11 + $0x7b0] sm:$0xff]  ;;  %v16287_v35 = vld [vmem:[#allocation11 + $0x768] sm:$0xff]  ;;  %v16277_v52 = vld [vmem:[#allocation11 + $0x718] sm:$0xff] }
 0x47d   : > { %v5836_v24 = vpop.f32.mrf.mxu1  ;;  %v16304_v2 = vld [vmem:[#allocation11 + $0x7f0] sm:$0xff] }
 0x47e   : > { %7694 = vmatpush.bf16.msra.mxu1 %v16248_v34  ;;  %7707 = vmatpush.bf16.msra.mxu2 %v16256_v10  ;;  %v5861_v63 = vadd.f32 %v5860_v14, %v5848_v5  ;;  %v5875_v49 = vpop.f32.mrf.mxu0  ;;  %v7499_v34 = vpack.c.bf16 %v7491_v47, %v7491_v47  ;;  %v7500_v10 = vpack.c.bf16 %v7492_v41, %v7492_v41  ;;  %v16285_v5 = vld [vmem:[#allocation11 + $0x758] sm:$0xff]  ;;  %v16320_v47 = vld [vmem:[#allocation11 + $0x870] sm:$0xff] }
 0x47f   : > { %7720 = vmatpush.bf16.msra.mxu3 %v16264_v33  ;;  %7733 = vmatpush.bf16.msrb.mxu0 %v16272_v46  ;;  %v16279_v46 = vld [vmem:[#allocation11 + $0x728] sm:$0xff]  ;;  %v16293_v14 = vld [vmem:[#allocation11 + $0x798] sm:$0xff] }
 0x480   : > { %v5874_v36 = vadd.f32 %v5873_v45, %v5861_v63  ;;  %v16303_v45 = vld [vmem:[#allocation11 + $0x7e8] sm:$0xff]  ;;  %v16301_v24 = vld [vmem:[#allocation11 + $0x7d8] sm:$0xff] }
 0x482   : > { %7695 = vmatpush.bf16.msra.mxu1 %v16247_v57  ;;  %7708 = vmatpush.bf16.msra.mxu2 %v16255_v30  ;;  %v16295_v30 = vld [vmem:[#allocation11 + $0x7a8] sm:$0xff] }
 0x483   : > { %7721 = vmatpush.bf16.msra.mxu3 %v16263_v32  ;;  %7734 = vmatpush.bf16.msrb.mxu0 %v16271_v17  ;;  %v5849_v25 = vpop.f32.mrf.mxu2 }
 0x484   : > { %v5862_v42 = vpop.f32.mrf.mxu3 }
 0x485   : > { %v6078_v53 = vpop.f32.mrf.mxu1  ;;  %v16275_v42 = vld [vmem:[#allocation11 + $0x708] sm:$0xff] }
 0x486   : > { %7696 = vmatpush.bf16.msra.mxu1 %v16246_v31  ;;  %7709 = vmatpush.bf16.msra.mxu2 %v16254_v18  ;;  %v6079_v58 = vadd.f32 %v6078_v53, %v5874_v36  ;;  %v6117_v23 = vpop.f32.mrf.mxu0  ;;  %v16278_v31 = vld [vmem:[#allocation11 + $0x720] sm:$0xff]  ;;  %v16276_v36 = vld [vmem:[#allocation11 + $0x710] sm:$0xff]  ;;  %v16283_v53 = vld [vmem:[#allocation11 + $0x748] sm:$0xff] }
 0x487   : > { %7722 = vmatpush.bf16.msra.mxu3 %v16262_v0  ;;  %7735 = vmatpush.bf16.msrb.mxu0 %v16270_v38  ;;  %v16286_v18 = vld [vmem:[#allocation11 + $0x760] sm:$0xff] }
 0x488   : > { %v16294_v0 = vld [vmem:[#allocation11 + $0x7a0] sm:$0xff] }
 0x489   : > { %v16302_v38 = vld [vmem:[#allocation11 + $0x7e0] sm:$0xff] }
 0x48a   : > { %7697 = vmatpush.bf16.msra.mxu1 %v16245_v16  ;;  %7710 = vmatpush.bf16.msra.mxu2 %v16253_v56 }
 0x48b   : > { %7723 = vmatpush.bf16.msra.mxu3 %v16261_v51  ;;  %7736 = vmatpush.bf16.msrb.mxu0 %v16269_v60  ;;  %v6091_v11 = vpop.f32.mrf.mxu2 }
 0x48c   : > { %v6092_v13 = vadd.f32 %v6091_v11, %v6079_v58  ;;  %v6104_v62 = vpop.f32.mrf.mxu3 }
 0x48d   : > { %v6080_v1 = vpop.f32.mrf.mxu1 }
 0x48e   : > { %7698 = vmatpush.bf16.msra.mxu1 %v16244_v6  ;;  %7711 = vmatpush.bf16.msra.mxu2 %v16252_v12  ;;  %v6105_v19 = vadd.f32 %v6104_v62, %v6092_v13  ;;  %v6119_v22 = vpop.f32.mrf.mxu0  ;;  %v16284_v6 = vld [vmem:[#allocation11 + $0x750] sm:$0xff]  ;;  %v16337_v13 = vld [vmem:[#allocation11 + $0x8f8] sm:$0xff] }
 0x48f   : > { %7724 = vmatpush.bf16.msra.mxu3 %v16260_v7  ;;  %7737 = vmatpush.bf16.msrb.mxu0 %v16268_v37  ;;  %v16292_v12 = vld [vmem:[#allocation11 + $0x790] sm:$0xff] }
 0x490   : > { %v6118_v40 = vadd.f32 %v6117_v23, %v6105_v19  ;;  %v16300_v7 = vld [vmem:[#allocation11 + $0x7d0] sm:$0xff] }
 0x491   : > { %v16328_v19 = vld [vmem:[#allocation11 + $0x8b0] sm:$0xff] }
 0x492   : > { %7699 = vmatpush.bf16.msra.mxu1 %v16243_v44  ;;  %7712 = vmatpush.bf16.msra.mxu2 %v16251_v9  ;;  %v16291_v44 = vld [vmem:[#allocation11 + $0x788] sm:$0xff]  ;;  %v16336_v22 = vld [vmem:[#allocation11 + $0x8f0] sm:$0xff] }
 0x493   : > { %7725 = vmatpush.bf16.msra.mxu3 %v16259_v28  ;;  %7738 = vmatpush.bf16.msrb.mxu0 %v16267_v3  ;;  %v6093_v33 = vpop.f32.mrf.mxu2  ;;  %v16299_v9 = vld [vmem:[#allocation11 + $0x7c8] sm:$0xff]  ;;  %v16274_v3 = vld [vmem:[#allocation11 + $0x700] sm:$0xff] }
 0x494   : > { %v6106_v57 = vpop.f32.mrf.mxu3  ;;  %v7747_v28 = vld [vmem:[#allocation4 + $0x7] ss:$8 sm:$0xf] }
 0x495   : > { %v7814_v11 = vperm.slane %v7747_v28, 0  ;;  %v7816_v62 = vperm.slane %v7747_v28, 2  ;;  %v7817_v29 = vperm.slane %v7747_v28, 3  ;;  %v16334_v33 = vld [vmem:[#allocation11 + $0x8e0] sm:$0xff]  ;;  %v16325_v57 = vld [vmem:[#allocation11 + $0x898] sm:$0xff] }
 0x496   : > { %7700 = vmatpush.bf16.msra.mxu1 %v16242_v8  ;;  %7713 = vmatpush.bf16.msra.mxu2 %v16250_v4  ;;  %v6402_v32 = vpop.f32.mrf.mxu1  ;;  %v16290_v8 = vld [vmem:[#allocation11 + $0x780] sm:$0xff] }
 0x497   : > { %7726 = vmatpush.bf16.msra.mxu3 %v16258_v27  ;;  %7739 = vmatpush.bf16.msrb.mxu0 %v16266_v54  ;;  %v16298_v4 = vld [vmem:[#allocation11 + $0x7c0] sm:$0xff]  ;;  %v16313_v27 = vld [vmem:[#allocation11 + $0x838] sm:$0xff]  ;;  %v7822_v21 = vpack.c.bf16 %v7814_v11, %v7814_v11  ;;  %v7824_v41 = vpack.c.bf16 %v7816_v62, %v7816_v62  ;;  %v7825_v1 = vpack.c.bf16 %v7817_v29, %v7817_v29  ;;  %v16351_v62 = vld [vmem:[#allocation11 + $0x968] sm:$0xff] }
 0x498   : > { %v16321_v54 = vld [vmem:[#allocation11 + $0x878] sm:$0xff]  ;;  %v16359_v29 = vld [vmem:[#allocation11 + $0x9a8] sm:$0xff] }
 0x499   : > { %7701 = vmatmul.bf16.vlgmr.msra.gmra.mxu1 %v7497_v50  ;;  %7714 = vmatmul.bf16.vlgmr.msra.gmra.mxu2 %v7498_v48  ;;  %v6441_v17 = vpop.f32.mrf.mxu0  ;;  %v16319_v50 = vld [vmem:[#allocation11 + $0x868] sm:$0xff] }
 0x49a   : > { %8018 = vmatpush.bf16.msrb.mxu1 %v16281_v55  ;;  %8031 = vmatpush.bf16.msrb.mxu2 %v16289_v26  ;;  %v7815_v55 = vperm.slane %v7747_v28, 1  ;;  %v16329_v26 = vld [vmem:[#allocation11 + $0x8b8] sm:$0xff]  ;;  %v16327_v48 = vld [vmem:[#allocation11 + $0x8a8] sm:$0xff] }
 0x49b   : > { %8044 = vmatpush.bf16.msrb.mxu3 %v16297_v59  ;;  %8057 = vmatpush.bf16.msra.mxu0 %v16305_v20  ;;  %v16312_v20 = vld [vmem:[#allocation11 + $0x830] sm:$0xff] }
 0x49c   : > { %7727 = vmatmul.bf16.vlgmr.msra.gmra.mxu3 %v7499_v34  ;;  %7740 = vmatmul.bf16.vlgmr.msrb.gmra.mxu0 %v7500_v10  ;;  %v6415_v63 = vpop.f32.mrf.mxu2  ;;  %v7823_v59 = vpack.c.bf16 %v7815_v55, %v7815_v55  ;;  %v16310_v10 = vld [vmem:[#allocation11 + $0x820] sm:$0xff]  ;;  %v16360_v55 = vld [vmem:[#allocation11 + $0x9b0] sm:$0xff] }
 0x49d   : > { %v6416_v16 = vadd.f32 %v6415_v63, %v6402_v32 }
 0x49e   : > { %8019 = vmatpush.bf16.msrb.mxu1 %v16280_v43  ;;  %8032 = vmatpush.bf16.msrb.mxu2 %v16288_v39  ;;  %v6404_v49 = vpop.f32.mrf.mxu1  ;;  %v16335_v43 = vld [vmem:[#allocation11 + $0x8e8] sm:$0xff] }
 0x49f   : > { %8045 = vmatpush.bf16.msrb.mxu3 %v16296_v61  ;;  %8058 = vmatpush.bf16.msra.mxu0 %v16304_v2  ;;  %v6428_v56 = vpop.f32.mrf.mxu3  ;;  %v16318_v61 = vld [vmem:[#allocation11 + $0x860] sm:$0xff]  ;;  %v16323_v49 = vld [vmem:[#allocation11 + $0x888] sm:$0xff] }
 0x4a0   : > { %v6429_v51 = vadd.f32 %v6428_v56, %v6416_v16  ;;  %v16326_v2 = vld [vmem:[#allocation11 + $0x8a0] sm:$0xff]  ;;  %v16307_v16 = vld [vmem:[#allocation11 + $0x808] sm:$0xff] }
 0x4a1   : > { %v6443_v60 = vpop.f32.mrf.mxu0  ;;  %v16315_v56 = vld [vmem:[#allocation11 + $0x848] sm:$0xff] }
 0x4a2   : > { %8020 = vmatpush.bf16.msrb.mxu1 %v16279_v46  ;;  %8033 = vmatpush.bf16.msrb.mxu2 %v16287_v35  ;;  %v6442_v37 = vadd.f32 %v6441_v17, %v6429_v51  ;;  %v16309_v46 = vld [vmem:[#allocation11 + $0x818] sm:$0xff]  ;;  %v16331_v51 = vld [vmem:[#allocation11 + $0x8c8] sm:$0xff] }
 0x4a3   : > { %8046 = vmatpush.bf16.msrb.mxu3 %v16295_v30  ;;  %8059 = vmatpush.bf16.msra.mxu0 %v16303_v45  ;;  %v16317_v35 = vld [vmem:[#allocation11 + $0x858] sm:$0xff] }
 0x4a4   : > { %v20934_v25 = vadd.f32 %v6442_v37, %v6118_v40  ;;  %v6417_v58 = vpop.f32.mrf.mxu2  ;;  %v16311_v40 = vld [vmem:[#allocation11 + $0x828] sm:$0xff]  ;;  %v16333_v30 = vld [vmem:[#allocation11 + $0x8d8] sm:$0xff]  ;;  %v16322_v37 = vld [vmem:[#allocation11 + $0x880] sm:$0xff] }
 0x4a5   : > { %v16361_v58 = vld [vmem:[#allocation11 + $0x9b8] sm:$0xff] }
 0x4a6   : > { %8021 = vmatpush.bf16.msrb.mxu1 %v16278_v31  ;;  %8034 = vmatpush.bf16.msrb.mxu2 %v16286_v18 }
 0x4a7   : > { %8047 = vmatpush.bf16.msrb.mxu3 %v16294_v0  ;;  %8060 = vmatpush.bf16.msra.mxu0 %v16302_v38  ;;  %v6430_v23 = vpop.f32.mrf.mxu3  ;;  %v16308_v38 = vld [vmem:[#allocation11 + $0x810] sm:$0xff] }
 0x4a8   : > { %v16369_v23 = vld [vmem:[#allocation11 + $0x9f8] sm:$0xff] }
 0x4aa   : > { %8022 = vmatpush.bf16.msrb.mxu1 %v16277_v52  ;;  %8035 = vmatpush.bf16.msrb.mxu2 %v16285_v5  ;;  %v16316_v52 = vld [vmem:[#allocation11 + $0x850] sm:$0xff] }
 0x4ab   : > { %8048 = vmatpush.bf16.msrb.mxu3 %v16293_v14  ;;  %8061 = vmatpush.bf16.msra.mxu0 %v16301_v24  ;;  %v16324_v5 = vld [vmem:[#allocation11 + $0x890] sm:$0xff] }
 0x4ac   : > { %v16332_v14 = vld [vmem:[#allocation11 + $0x8d0] sm:$0xff] }
 0x4ae   : > { %8023 = vmatpush.bf16.msrb.mxu1 %v16276_v36  ;;  %8036 = vmatpush.bf16.msrb.mxu2 %v16284_v6  ;;  %v8072_v6 = vld [vmem:[#allocation4 + $0x20] ss:$8 sm:$0xf] }
 0x4af   : > { %8049 = vmatpush.bf16.msrb.mxu3 %v16292_v12  ;;  %8062 = vmatpush.bf16.msra.mxu0 %v16300_v7  ;;  %v16306_v12 = vld [vmem:[#allocation11 + $0x800] sm:$0xff]  ;;  %v8141_v28 = vperm.slane %v8072_v6, 2 }
 0x4b0   : > { %v16314_v7 = vld [vmem:[#allocation11 + $0x840] sm:$0xff] }
 0x4b2   : > { %8024 = vmatpush.bf16.msrb.mxu1 %v16275_v42  ;;  %8037 = vmatpush.bf16.msrb.mxu2 %v16283_v53  ;;  %v16345_v42 = vld [vmem:[#allocation11 + $0x938] sm:$0xff] }
 0x4b3   : > { %8050 = vmatpush.bf16.msrb.mxu3 %v16291_v44  ;;  %8063 = vmatpush.bf16.msra.mxu0 %v16299_v9  ;;  %v16353_v53 = vld [vmem:[#allocation11 + $0x978] sm:$0xff]  ;;  %v8139_v44 = vperm.slane %v8072_v6, 0  ;;  %v8140_v9 = vperm.slane %v8072_v6, 1 }
 0x4b6   : > { %8025 = vmatpush.bf16.msrb.mxu1 %v16274_v3  ;;  %8038 = vmatpush.bf16.msrb.mxu2 %v16282_v15  ;;  %v6727_v39 = vpop.f32.mrf.mxu1  ;;  %v8142_v3 = vperm.slane %v8072_v6, 3  ;;  %v8147_v15 = vpack.c.bf16 %v8139_v44, %v8139_v44 }
 0x4b7   : > { %8051 = vmatpush.bf16.msrb.mxu3 %v16290_v8  ;;  %8064 = vmatpush.bf16.msra.mxu0 %v16298_v4  ;;  %v8148_v8 = vpack.c.bf16 %v8140_v9, %v8140_v9  ;;  %v16344_v4 = vld [vmem:[#allocation11 + $0x930] sm:$0xff] }
 0x4b8   : > { %v8150_v11 = vpack.c.bf16 %v8142_v3, %v8142_v3  ;;  %v16392_v9 = vld [vmem:[#allocation11 + $0xab0] sm:$0xff]  ;;  %v16391_v3 = vld [vmem:[#allocation11 + $0xaa8] sm:$0xff] }
 0x4b9   : > { %8026 = vmatmul.bf16.vlgmr.msrb.gmra.mxu1 %v7822_v21  ;;  %8039 = vmatmul.bf16.vlgmr.msrb.gmra.mxu2 %v7823_v59  ;;  %v6766_v34 = vpop.f32.mrf.mxu0  ;;  %v16367_v21 = vld [vmem:[#allocation11 + $0x9e8] sm:$0xff] }
 0x4ba   : > { %8343 = vmatpush.bf16.msra.mxu1 %v16313_v27  ;;  %8356 = vmatpush.bf16.msra.mxu2 %v16321_v54  ;;  %v16352_v27 = vld [vmem:[#allocation11 + $0x970] sm:$0xff]  ;;  %v8149_v54 = vpack.c.bf16 %v8141_v28, %v8141_v28  ;;  %v16383_v28 = vld [vmem:[#allocation11 + $0xa68] sm:$0xff] }
 0x4bb   : > { %8369 = vmatpush.bf16.msra.mxu3 %v16329_v26  ;;  %8382 = vmatpush.bf16.msrb.mxu0 %v16337_v13  ;;  %v16368_v26 = vld [vmem:[#allocation11 + $0x9f0] sm:$0xff]  ;;  %v16343_v13 = vld [vmem:[#allocation11 + $0x928] sm:$0xff] }
 0x4bc   : > { %8052 = vmatmul.bf16.vlgmr.msrb.gmra.mxu3 %v7824_v41  ;;  %8065 = vmatmul.bf16.vlgmr.msra.gmra.mxu0 %v7825_v1  ;;  %v6740_v45 = vpop.f32.mrf.mxu2  ;;  %v16350_v41 = vld [vmem:[#allocation11 + $0x960] sm:$0xff] }
 0x4bd   : > { %v6741_v32 = vadd.f32 %v6740_v45, %v6727_v39  ;;  %v16358_v1 = vld [vmem:[#allocation11 + $0x9a0] sm:$0xff] }
 0x4be   : > { %8344 = vmatpush.bf16.msra.mxu1 %v16312_v20  ;;  %8357 = vmatpush.bf16.msra.mxu2 %v16320_v47  ;;  %v6729_v31 = vpop.f32.mrf.mxu1  ;;  %v16342_v47 = vld [vmem:[#allocation11 + $0x920] sm:$0xff] }
 0x4bf   : > { %8370 = vmatpush.bf16.msra.mxu3 %v16328_v19  ;;  %8383 = vmatpush.bf16.msrb.mxu0 %v16336_v22  ;;  %v6753_v17 = vpop.f32.mrf.mxu3  ;;  %v16366_v19 = vld [vmem:[#allocation11 + $0x9e0] sm:$0xff]  ;;  %v16341_v22 = vld [vmem:[#allocation11 + $0x918] sm:$0xff]  ;;  %v16355_v31 = vld [vmem:[#allocation11 + $0x988] sm:$0xff] }
 0x4c0   : > { %v6754_v18 = vadd.f32 %v6753_v17, %v6741_v32  ;;  %v16339_v32 = vld [vmem:[#allocation11 + $0x908] sm:$0xff] }
 0x4c1   : > { %v6768_v0 = vpop.f32.mrf.mxu0  ;;  %v16347_v17 = vld [vmem:[#allocation11 + $0x948] sm:$0xff] }
 0x4c2   : > { %8345 = vmatpush.bf16.msra.mxu1 %v16311_v40  ;;  %8358 = vmatpush.bf16.msra.mxu2 %v16319_v50  ;;  %v6767_v24 = vadd.f32 %v6766_v34, %v6754_v18  ;;  %v16349_v40 = vld [vmem:[#allocation11 + $0x958] sm:$0xff]  ;;  %v16363_v18 = vld [vmem:[#allocation11 + $0x9c8] sm:$0xff] }
 0x4c3   : > { %8371 = vmatpush.bf16.msra.mxu3 %v16327_v48  ;;  %8384 = vmatpush.bf16.msrb.mxu0 %v16335_v43  ;;  %v16357_v50 = vld [vmem:[#allocation11 + $0x998] sm:$0xff] }
 0x4c4   : > { %v20937_v63 = vadd.f32 %v6767_v24, %v20934_v25  ;;  %v6742_v60 = vpop.f32.mrf.mxu2  ;;  %v16330_v25 = vld [vmem:[#allocation11 + $0x8c0] sm:$0xff]  ;;  %v16365_v48 = vld [vmem:[#allocation11 + $0x9d8] sm:$0xff] }
 0x4c5   : > { %v16354_v24 = vld [vmem:[#allocation11 + $0x980] sm:$0xff]  ;;  %v16393_v60 = vld [vmem:[#allocation11 + $0xab8] sm:$0xff] }
 0x4c6   : > { %8346 = vmatpush.bf16.msra.mxu1 %v16310_v10  ;;  %8359 = vmatpush.bf16.msra.mxu2 %v16318_v61 }
 0x4c7   : > { %8372 = vmatpush.bf16.msra.mxu3 %v16326_v2  ;;  %8385 = vmatpush.bf16.msrb.mxu0 %v16334_v33  ;;  %v6755_v36 = vpop.f32.mrf.mxu3  ;;  %v16340_v33 = vld [vmem:[#allocation11 + $0x910] sm:$0xff] }
 0x4c8   : > { %v16401_v36 = vld [vmem:[#allocation11 + $0xaf8] sm:$0xff] }
 0x4ca   : > { %8347 = vmatpush.bf16.msra.mxu1 %v16309_v46  ;;  %8360 = vmatpush.bf16.msra.mxu2 %v16317_v35  ;;  %v16348_v46 = vld [vmem:[#allocation11 + $0x950] sm:$0xff] }
 0x4cb   : > { %8373 = vmatpush.bf16.msra.mxu3 %v16325_v57  ;;  %8386 = vmatpush.bf16.msrb.mxu0 %v16333_v30  ;;  %v16356_v35 = vld [vmem:[#allocation11 + $0x990] sm:$0xff] }
 0x4cc   : > { %v16364_v57 = vld [vmem:[#allocation11 + $0x9d0] sm:$0xff] }
 0x4ce   : > { %8348 = vmatpush.bf16.msra.mxu1 %v16308_v38  ;;  %8361 = vmatpush.bf16.msra.mxu2 %v16316_v52  ;;  %v8397_v52 = vld [vmem:[#allocation4 + $0x21] ss:$8 sm:$0xf] }
 0x4cf   : > { %8374 = vmatpush.bf16.msra.mxu3 %v16324_v5  ;;  %8387 = vmatpush.bf16.msrb.mxu0 %v16332_v14  ;;  %v16338_v5 = vld [vmem:[#allocation11 + $0x900] sm:$0xff]  ;;  %v8466_v6 = vperm.slane %v8397_v52, 2 }
 0x4d0   : > { %v16346_v14 = vld [vmem:[#allocation11 + $0x940] sm:$0xff] }
 0x4d2   : > { %8349 = vmatpush.bf16.msra.mxu1 %v16307_v16  ;;  %8362 = vmatpush.bf16.msra.mxu2 %v16315_v56  ;;  %v16377_v16 = vld [vmem:[#allocation11 + $0xa38] sm:$0xff] }
 0x4d3   : > { %8375 = vmatpush.bf16.msra.mxu3 %v16323_v49  ;;  %8388 = vmatpush.bf16.msrb.mxu0 %v16331_v51  ;;  %v16385_v56 = vld [vmem:[#allocation11 + $0xa78] sm:$0xff]  ;;  %v8464_v49 = vperm.slane %v8397_v52, 0  ;;  %v8465_v51 = vperm.slane %v8397_v52, 1 }
 0x4d6   : > { %8350 = vmatpush.bf16.msra.mxu1 %v16306_v12  ;;  %8363 = vmatpush.bf16.msra.mxu2 %v16314_v7  ;;  %v7052_v59 = vpop.f32.mrf.mxu1  ;;  %v8467_v12 = vperm.slane %v8397_v52, 3  ;;  %v8472_v7 = vpack.c.bf16 %v8464_v49, %v8464_v49 }
 0x4d7   : > { %8376 = vmatpush.bf16.msra.mxu3 %v16322_v37  ;;  %8389 = vmatpush.bf16.msrb.mxu0 %v16330_v25  ;;  %v8473_v37 = vpack.c.bf16 %v8465_v51, %v8465_v51  ;;  %v16376_v25 = vld [vmem:[#allocation11 + $0xa30] sm:$0xff] }
 0x4d8   : > { %v8475_v44 = vpack.c.bf16 %v8467_v12, %v8467_v12  ;;  %v16424_v51 = vld [vmem:[#allocation11 + $0xbb0] sm:$0xff]  ;;  %v16423_v12 = vld [vmem:[#allocation11 + $0xba8] sm:$0xff] }
 0x4d9   : > { %8351 = vmatmul.bf16.vlgmr.msra.gmra.mxu1 %v8147_v15  ;;  %8364 = vmatmul.bf16.vlgmr.msra.gmra.mxu2 %v8148_v8  ;;  %v7091_v20 = vpop.f32.mrf.mxu0  ;;  %v16399_v15 = vld [vmem:[#allocation11 + $0xae8] sm:$0xff] }
 0x4da   : > { %8668 = vmatpush.bf16.msrb.mxu1 %v16345_v42  ;;  %8681 = vmatpush.bf16.msrb.mxu2 %v16353_v53  ;;  %v16384_v42 = vld [vmem:[#allocation11 + $0xa70] sm:$0xff]  ;;  %v8474_v53 = vpack.c.bf16 %v8466_v6, %v8466_v6  ;;  %v16415_v6 = vld [vmem:[#allocation11 + $0xb68] sm:$0xff] }
 0x4db   : > { %8694 = vmatpush.bf16.msrb.mxu3 %v16361_v58  ;;  %8707 = vmatpush.bf16.msra.mxu0 %v16369_v23  ;;  %v16400_v58 = vld [vmem:[#allocation11 + $0xaf0] sm:$0xff]  ;;  %v16375_v23 = vld [vmem:[#allocation11 + $0xa28] sm:$0xff] }
 0x4dc   : > { %8377 = vmatmul.bf16.vlgmr.msra.gmra.mxu3 %v8149_v54  ;;  %8390 = vmatmul.bf16.vlgmr.msrb.gmra.mxu0 %v8150_v11  ;;  %v7065_v43 = vpop.f32.mrf.mxu2  ;;  %v16382_v54 = vld [vmem:[#allocation11 + $0xa60] sm:$0xff] }
 0x4dd   : > { %v7066_v39 = vadd.f32 %v7065_v43, %v7052_v59  ;;  %v16390_v11 = vld [vmem:[#allocation11 + $0xaa0] sm:$0xff] }
 0x4de   : > { %8669 = vmatpush.bf16.msrb.mxu1 %v16344_v4  ;;  %8682 = vmatpush.bf16.msrb.mxu2 %v16352_v27  ;;  %v7054_v10 = vpop.f32.mrf.mxu1  ;;  %v16374_v27 = vld [vmem:[#allocation11 + $0xa20] sm:$0xff] }
 0x4df   : > { %8695 = vmatpush.bf16.msrb.mxu3 %v16360_v55  ;;  %8708 = vmatpush.bf16.msra.mxu0 %v16368_v26  ;;  %v7078_v34 = vpop.f32.mrf.mxu3  ;;  %v16398_v55 = vld [vmem:[#allocation11 + $0xae0] sm:$0xff]  ;;  %v16373_v26 = vld [vmem:[#allocation11 + $0xa18] sm:$0xff]  ;;  %v16387_v10 = vld [vmem:[#allocation11 + $0xa88] sm:$0xff] }
 0x4e0   : > { %v7079_v61 = vadd.f32 %v7078_v34, %v7066_v39  ;;  %v16371_v39 = vld [vmem:[#allocation11 + $0xa08] sm:$0xff] }
 0x4e1   : > { %v7093_v2 = vpop.f32.mrf.mxu0  ;;  %v16379_v34 = vld [vmem:[#allocation11 + $0xa48] sm:$0xff] }
 0x4e2   : > { %8670 = vmatpush.bf16.msrb.mxu1 %v16343_v13  ;;  %8683 = vmatpush.bf16.msrb.mxu2 %v16351_v62  ;;  %v7092_v30 = vadd.f32 %v7091_v20, %v7079_v61  ;;  %v16381_v13 = vld [vmem:[#allocation11 + $0xa58] sm:$0xff]  ;;  %v16395_v61 = vld [vmem:[#allocation11 + $0xac8] sm:$0xff] }
 0x4e3   : > { %8696 = vmatpush.bf16.msrb.mxu3 %v16359_v29  ;;  %8709 = vmatpush.bf16.msra.mxu0 %v16367_v21  ;;  %v16389_v62 = vld [vmem:[#allocation11 + $0xa98] sm:$0xff] }
 0x4e4   : > { %v20940_v45 = vadd.f32 %v7092_v30, %v20937_v63  ;;  %v7067_v0 = vpop.f32.mrf.mxu2  ;;  %v16362_v63 = vld [vmem:[#allocation11 + $0x9c0] sm:$0xff]  ;;  %v16397_v29 = vld [vmem:[#allocation11 + $0xad8] sm:$0xff] }
 0x4e5   : > { %v16386_v30 = vld [vmem:[#allocation11 + $0xa80] sm:$0xff]  ;;  %v16425_v0 = vld [vmem:[#allocation11 + $0xbb8] sm:$0xff] }
 0x4e6   : > { %8671 = vmatpush.bf16.msrb.mxu1 %v16342_v47  ;;  %8684 = vmatpush.bf16.msrb.mxu2 %v16350_v41 }
 0x4e7   : > { %8697 = vmatpush.bf16.msrb.mxu3 %v16358_v1  ;;  %8710 = vmatpush.bf16.msra.mxu0 %v16366_v19  ;;  %v7080_v38 = vpop.f32.mrf.mxu3  ;;  %v16372_v19 = vld [vmem:[#allocation11 + $0xa10] sm:$0xff] }
 0x4e8   : > { %v16433_v38 = vld [vmem:[#allocation11 + $0xbf8] sm:$0xff] }
 0x4ea   : > { %8672 = vmatpush.bf16.msrb.mxu1 %v16341_v22  ;;  %8685 = vmatpush.bf16.msrb.mxu2 %v16349_v40  ;;  %v16380_v22 = vld [vmem:[#allocation11 + $0xa50] sm:$0xff] }
 0x4eb   : > { %8698 = vmatpush.bf16.msrb.mxu3 %v16357_v50  ;;  %8711 = vmatpush.bf16.msra.mxu0 %v16365_v48  ;;  %v16388_v40 = vld [vmem:[#allocation11 + $0xa90] sm:$0xff] }
 0x4ec   : > { %v16396_v50 = vld [vmem:[#allocation11 + $0xad0] sm:$0xff] }
 0x4ee   : > { %8673 = vmatpush.bf16.msrb.mxu1 %v16340_v33  ;;  %8686 = vmatpush.bf16.msrb.mxu2 %v16348_v46  ;;  %v8722_v46 = vld [vmem:[#allocation4 + $0x22] ss:$8 sm:$0xf] }
 0x4ef   : > { %8699 = vmatpush.bf16.msrb.mxu3 %v16356_v35  ;;  %8712 = vmatpush.bf16.msra.mxu0 %v16364_v57  ;;  %v16370_v35 = vld [vmem:[#allocation11 + $0xa00] sm:$0xff]  ;;  %v8791_v52 = vperm.slane %v8722_v46, 2 }
 0x4f0   : > { %v16378_v57 = vld [vmem:[#allocation11 + $0xa40] sm:$0xff] }
 0x4f2   : > { %8674 = vmatpush.bf16.msrb.mxu1 %v16339_v32  ;;  %8687 = vmatpush.bf16.msrb.mxu2 %v16347_v17  ;;  %v16409_v32 = vld [vmem:[#allocation11 + $0xb38] sm:$0xff] }
 0x4f3   : > { %8700 = vmatpush.bf16.msrb.mxu3 %v16355_v31  ;;  %8713 = vmatpush.bf16.msra.mxu0 %v16363_v18  ;;  %v16417_v17 = vld [vmem:[#allocation11 + $0xb78] sm:$0xff]  ;;  %v8789_v31 = vperm.slane %v8722_v46, 0  ;;  %v8790_v18 = vperm.slane %v8722_v46, 1 }
 0x4f6   : > { %8675 = vmatpush.bf16.msrb.mxu1 %v16338_v5  ;;  %8688 = vmatpush.bf16.msrb.mxu2 %v16346_v14  ;;  %v7377_v8 = vpop.f32.mrf.mxu1  ;;  %v8792_v5 = vperm.slane %v8722_v46, 3  ;;  %v8797_v14 = vpack.c.bf16 %v8789_v31, %v8789_v31 }
 0x4f7   : > { %8701 = vmatpush.bf16.msrb.mxu3 %v16354_v24  ;;  %8714 = vmatpush.bf16.msra.mxu0 %v16362_v63  ;;  %v8798_v24 = vpack.c.bf16 %v8790_v18, %v8790_v18  ;;  %v16408_v63 = vld [vmem:[#allocation11 + $0xb30] sm:$0xff] }
 0x4f8   : > { %v8800_v49 = vpack.c.bf16 %v8792_v5, %v8792_v5  ;;  %v16456_v18 = vld [vmem:[#allocation11 + $0xcb0] sm:$0xff]  ;;  %v16455_v5 = vld [vmem:[#allocation11 + $0xca8] sm:$0xff] }
 0x4f9   : > { %8676 = vmatmul.bf16.vlgmr.msrb.gmra.mxu1 %v8472_v7  ;;  %8689 = vmatmul.bf16.vlgmr.msrb.gmra.mxu2 %v8473_v37  ;;  %v7416_v4 = vpop.f32.mrf.mxu0  ;;  %v16431_v7 = vld [vmem:[#allocation11 + $0xbe8] sm:$0xff] }
 0x4fa   : > { %8993 = vmatpush.bf16.msra.mxu1 %v16377_v16  ;;  %9006 = vmatpush.bf16.msra.mxu2 %v16385_v56  ;;  %v16416_v16 = vld [vmem:[#allocation11 + $0xb70] sm:$0xff]  ;;  %v8799_v56 = vpack.c.bf16 %v8791_v52, %v8791_v52  ;;  %v16447_v52 = vld [vmem:[#allocation11 + $0xc68] sm:$0xff] }
 0x4fb   : > { %9019 = vmatpush.bf16.msra.mxu3 %v16393_v60  ;;  %9032 = vmatpush.bf16.msrb.mxu0 %v16401_v36  ;;  %v16432_v60 = vld [vmem:[#allocation11 + $0xbf0] sm:$0xff]  ;;  %v16407_v36 = vld [vmem:[#allocation11 + $0xb28] sm:$0xff] }
 0x4fc   : > { %8702 = vmatmul.bf16.vlgmr.msrb.gmra.mxu3 %v8474_v53  ;;  %8715 = vmatmul.bf16.vlgmr.msra.gmra.mxu0 %v8475_v44  ;;  %v7390_v21 = vpop.f32.mrf.mxu2  ;;  %v16414_v53 = vld [vmem:[#allocation11 + $0xb60] sm:$0xff] }
 0x4fd   : > { %v7391_v59 = vadd.f32 %v7390_v21, %v7377_v8  ;;  %v16422_v44 = vld [vmem:[#allocation11 + $0xba0] sm:$0xff] }
 0x4fe   : > { %8994 = vmatpush.bf16.msra.mxu1 %v16376_v25  ;;  %9007 = vmatpush.bf16.msra.mxu2 %v16384_v42  ;;  %v7379_v47 = vpop.f32.mrf.mxu1  ;;  %v16406_v42 = vld [vmem:[#allocation11 + $0xb20] sm:$0xff] }
 0x4ff   : > { %9020 = vmatpush.bf16.msra.mxu3 %v16392_v9  ;;  %9033 = vmatpush.bf16.msrb.mxu0 %v16400_v58  ;;  %v7403_v20 = vpop.f32.mrf.mxu3  ;;  %v16430_v9 = vld [vmem:[#allocation11 + $0xbe0] sm:$0xff]  ;;  %v16405_v58 = vld [vmem:[#allocation11 + $0xb18] sm:$0xff]  ;;  %v16419_v47 = vld [vmem:[#allocation11 + $0xb88] sm:$0xff] }
 0x500   : > { %v7404_v41 = vadd.f32 %v7403_v20, %v7391_v59  ;;  %v16403_v59 = vld [vmem:[#allocation11 + $0xb08] sm:$0xff] }
 0x501   : > { %v7418_v1 = vpop.f32.mrf.mxu0  ;;  %v16411_v20 = vld [vmem:[#allocation11 + $0xb48] sm:$0xff] }
 0x502   : > { %8995 = vmatpush.bf16.msra.mxu1 %v16375_v23  ;;  %9008 = vmatpush.bf16.msra.mxu2 %v16383_v28  ;;  %v7417_v48 = vadd.f32 %v7416_v4, %v7404_v41  ;;  %v16413_v23 = vld [vmem:[#allocation11 + $0xb58] sm:$0xff]  ;;  %v16427_v41 = vld [vmem:[#allocation11 + $0xbc8] sm:$0xff] }
 0x503   : > { %9021 = vmatpush.bf16.msra.mxu3 %v16391_v3  ;;  %9034 = vmatpush.bf16.msrb.mxu0 %v16399_v15  ;;  %v16421_v28 = vld [vmem:[#allocation11 + $0xb98] sm:$0xff] }
 0x504   : > { %v20943_v43 = vadd.f32 %v7417_v48, %v20940_v45  ;;  %v7392_v2 = vpop.f32.mrf.mxu2  ;;  %v16394_v45 = vld [vmem:[#allocation11 + $0xac0] sm:$0xff]  ;;  %v16429_v3 = vld [vmem:[#allocation11 + $0xbd8] sm:$0xff] }
 0x505   : > { %v16418_v48 = vld [vmem:[#allocation11 + $0xb80] sm:$0xff]  ;;  %v16457_v2 = vld [vmem:[#allocation11 + $0xcb8] sm:$0xff] }
 0x506   : > { %8996 = vmatpush.bf16.msra.mxu1 %v16374_v27  ;;  %9009 = vmatpush.bf16.msra.mxu2 %v16382_v54 }
 0x507   : > { %9022 = vmatpush.bf16.msra.mxu3 %v16390_v11  ;;  %9035 = vmatpush.bf16.msrb.mxu0 %v16398_v55  ;;  %v7405_v33 = vpop.f32.mrf.mxu3  ;;  %v16404_v55 = vld [vmem:[#allocation11 + $0xb10] sm:$0xff] }
 0x508   : > { %v16465_v33 = vld [vmem:[#allocation11 + $0xcf8] sm:$0xff] }
 0x50a   : > { %8997 = vmatpush.bf16.msra.mxu1 %v16373_v26  ;;  %9010 = vmatpush.bf16.msra.mxu2 %v16381_v13  ;;  %v16412_v26 = vld [vmem:[#allocation11 + $0xb50] sm:$0xff] }
 0x50b   : > { %9023 = vmatpush.bf16.msra.mxu3 %v16389_v62  ;;  %9036 = vmatpush.bf16.msrb.mxu0 %v16397_v29  ;;  %v16420_v13 = vld [vmem:[#allocation11 + $0xb90] sm:$0xff] }
 0x50c   : > { %v16428_v62 = vld [vmem:[#allocation11 + $0xbd0] sm:$0xff] }
 0x50e   : > { %8998 = vmatpush.bf16.msra.mxu1 %v16372_v19  ;;  %9011 = vmatpush.bf16.msra.mxu2 %v16380_v22  ;;  %v9047_v22 = vld [vmem:[#allocation4 + $0x23] ss:$8 sm:$0xf] }
 0x50f   : > { %9024 = vmatpush.bf16.msra.mxu3 %v16388_v40  ;;  %9037 = vmatpush.bf16.msrb.mxu0 %v16396_v50  ;;  %v16402_v40 = vld [vmem:[#allocation11 + $0xb00] sm:$0xff]  ;;  %v9116_v46 = vperm.slane %v9047_v22, 2 }
 0x510   : > { %v16410_v50 = vld [vmem:[#allocation11 + $0xb40] sm:$0xff] }
 0x512   : > { %8999 = vmatpush.bf16.msra.mxu1 %v16371_v39  ;;  %9012 = vmatpush.bf16.msra.mxu2 %v16379_v34  ;;  %v16441_v39 = vld [vmem:[#allocation11 + $0xc38] sm:$0xff] }
 0x513   : > { %9025 = vmatpush.bf16.msra.mxu3 %v16387_v10  ;;  %9038 = vmatpush.bf16.msrb.mxu0 %v16395_v61  ;;  %v16449_v34 = vld [vmem:[#allocation11 + $0xc78] sm:$0xff]  ;;  %v9114_v10 = vperm.slane %v9047_v22, 0  ;;  %v9115_v61 = vperm.slane %v9047_v22, 1 }
 0x516   : > { %9000 = vmatpush.bf16.msra.mxu1 %v16370_v35  ;;  %9013 = vmatpush.bf16.msra.mxu2 %v16378_v57  ;;  %v7702_v37 = vpop.f32.mrf.mxu1  ;;  %v9117_v35 = vperm.slane %v9047_v22, 3  ;;  %v9122_v57 = vpack.c.bf16 %v9114_v10, %v9114_v10 }
 0x517   : > { %9026 = vmatpush.bf16.msra.mxu3 %v16386_v30  ;;  %9039 = vmatpush.bf16.msrb.mxu0 %v16394_v45  ;;  %v9123_v30 = vpack.c.bf16 %v9115_v61, %v9115_v61  ;;  %v16440_v45 = vld [vmem:[#allocation11 + $0xc30] sm:$0xff] }
 0x518   : > { %v9125_v31 = vpack.c.bf16 %v9117_v35, %v9117_v35  ;;  %v16488_v61 = vld [vmem:[#allocation11 + $0xdb0] sm:$0xff]  ;;  %v16487_v35 = vld [vmem:[#allocation11 + $0xda8] sm:$0xff] }
 0x519   : > { %9001 = vmatmul.bf16.vlgmr.msra.gmra.mxu1 %v8797_v14  ;;  %9014 = vmatmul.bf16.vlgmr.msra.gmra.mxu2 %v8798_v24  ;;  %v7741_v25 = vpop.f32.mrf.mxu0  ;;  %v16463_v14 = vld [vmem:[#allocation11 + $0xce8] sm:$0xff] }
 0x51a   : > { %9318 = vmatpush.bf16.msrb.mxu1 %v16409_v32  ;;  %9331 = vmatpush.bf16.msrb.mxu2 %v16417_v17  ;;  %v16448_v32 = vld [vmem:[#allocation11 + $0xc70] sm:$0xff]  ;;  %v9124_v17 = vpack.c.bf16 %v9116_v46, %v9116_v46  ;;  %v16479_v46 = vld [vmem:[#allocation11 + $0xd68] sm:$0xff] }
 0x51b   : > { %9344 = vmatpush.bf16.msrb.mxu3 %v16425_v0  ;;  %9357 = vmatpush.bf16.msra.mxu0 %v16433_v38  ;;  %v16464_v0 = vld [vmem:[#allocation11 + $0xcf0] sm:$0xff]  ;;  %v16439_v38 = vld [vmem:[#allocation11 + $0xc28] sm:$0xff] }
 0x51c   : > { %9027 = vmatmul.bf16.vlgmr.msra.gmra.mxu3 %v8799_v56  ;;  %9040 = vmatmul.bf16.vlgmr.msrb.gmra.mxu0 %v8800_v49  ;;  %v7715_v15 = vpop.f32.mrf.mxu2  ;;  %v16446_v56 = vld [vmem:[#allocation11 + $0xc60] sm:$0xff] }
 0x51d   : > { %v7716_v8 = vadd.f32 %v7715_v15, %v7702_v37  ;;  %v16454_v49 = vld [vmem:[#allocation11 + $0xca0] sm:$0xff] }
 0x51e   : > { %9319 = vmatpush.bf16.msrb.mxu1 %v16408_v63  ;;  %9332 = vmatpush.bf16.msrb.mxu2 %v16416_v16  ;;  %v7704_v27 = vpop.f32.mrf.mxu1  ;;  %v16438_v16 = vld [vmem:[#allocation11 + $0xc20] sm:$0xff] }
 0x51f   : > { %9345 = vmatpush.bf16.msrb.mxu3 %v16424_v51  ;;  %9358 = vmatpush.bf16.msra.mxu0 %v16432_v60  ;;  %v7728_v4 = vpop.f32.mrf.mxu3  ;;  %v16462_v51 = vld [vmem:[#allocation11 + $0xce0] sm:$0xff]  ;;  %v16437_v60 = vld [vmem:[#allocation11 + $0xc18] sm:$0xff]  ;;  %v16451_v27 = vld [vmem:[#allocation11 + $0xc88] sm:$0xff] }
 0x520   : > { %v7729_v54 = vadd.f32 %v7728_v4, %v7716_v8  ;;  %v16435_v8 = vld [vmem:[#allocation11 + $0xc08] sm:$0xff] }
 0x521   : > { %v7743_v11 = vpop.f32.mrf.mxu0  ;;  %v16443_v4 = vld [vmem:[#allocation11 + $0xc48] sm:$0xff] }
 0x522   : > { %9320 = vmatpush.bf16.msrb.mxu1 %v16407_v36  ;;  %9333 = vmatpush.bf16.msrb.mxu2 %v16415_v6  ;;  %v7742_v29 = vadd.f32 %v7741_v25, %v7729_v54  ;;  %v16445_v36 = vld [vmem:[#allocation11 + $0xc58] sm:$0xff]  ;;  %v16459_v54 = vld [vmem:[#allocation11 + $0xcc8] sm:$0xff] }
 0x523   : > { %9346 = vmatpush.bf16.msrb.mxu3 %v16423_v12  ;;  %9359 = vmatpush.bf16.msra.mxu0 %v16431_v7  ;;  %v16453_v6 = vld [vmem:[#allocation11 + $0xc98] sm:$0xff] }
 0x524   : > { %v20946_v21 = vadd.f32 %v7742_v29, %v20943_v43  ;;  %v7717_v1 = vpop.f32.mrf.mxu2  ;;  %v16426_v43 = vld [vmem:[#allocation11 + $0xbc0] sm:$0xff]  ;;  %v16461_v12 = vld [vmem:[#allocation11 + $0xcd8] sm:$0xff] }
 0x525   : > { %v16450_v29 = vld [vmem:[#allocation11 + $0xc80] sm:$0xff]  ;;  %v16489_v1 = vld [vmem:[#allocation11 + $0xdb8] sm:$0xff] }
 0x526   : > { %9321 = vmatpush.bf16.msrb.mxu1 %v16406_v42  ;;  %9334 = vmatpush.bf16.msrb.mxu2 %v16414_v53 }
 0x527   : > { %9347 = vmatpush.bf16.msrb.mxu3 %v16422_v44  ;;  %9360 = vmatpush.bf16.msra.mxu0 %v16430_v9  ;;  %v7730_v19 = vpop.f32.mrf.mxu3  ;;  %v16436_v9 = vld [vmem:[#allocation11 + $0xc10] sm:$0xff] }
 0x528   : > { %v16497_v19 = vld [vmem:[#allocation11 + $0xdf8] sm:$0xff] }
 0x52a   : > { %9322 = vmatpush.bf16.msrb.mxu1 %v16405_v58  ;;  %9335 = vmatpush.bf16.msrb.mxu2 %v16413_v23  ;;  %v16444_v58 = vld [vmem:[#allocation11 + $0xc50] sm:$0xff] }
 0x52b   : > { %9348 = vmatpush.bf16.msrb.mxu3 %v16421_v28  ;;  %9361 = vmatpush.bf16.msra.mxu0 %v16429_v3  ;;  %v16452_v23 = vld [vmem:[#allocation11 + $0xc90] sm:$0xff] }
 0x52c   : > { %v16460_v28 = vld [vmem:[#allocation11 + $0xcd0] sm:$0xff] }
 0x52e   : > { %9323 = vmatpush.bf16.msrb.mxu1 %v16404_v55  ;;  %9336 = vmatpush.bf16.msrb.mxu2 %v16412_v26  ;;  %v9372_v26 = vld [vmem:[#allocation4 + $0x24] ss:$8 sm:$0xf] }
 0x52f   : > { %9349 = vmatpush.bf16.msrb.mxu3 %v16420_v13  ;;  %9362 = vmatpush.bf16.msra.mxu0 %v16428_v62  ;;  %v16434_v13 = vld [vmem:[#allocation11 + $0xc00] sm:$0xff]  ;;  %v9441_v22 = vperm.slane %v9372_v26, 2 }
 0x530   : > { %v16442_v62 = vld [vmem:[#allocation11 + $0xc40] sm:$0xff] }
 0x532   : > { %9324 = vmatpush.bf16.msrb.mxu1 %v16403_v59  ;;  %9337 = vmatpush.bf16.msrb.mxu2 %v16411_v20  ;;  %v16473_v59 = vld [vmem:[#allocation11 + $0xd38] sm:$0xff] }
 0x533   : > { %9350 = vmatpush.bf16.msrb.mxu3 %v16419_v47  ;;  %9363 = vmatpush.bf16.msra.mxu0 %v16427_v41  ;;  %v16481_v20 = vld [vmem:[#allocation11 + $0xd78] sm:$0xff]  ;;  %v9439_v47 = vperm.slane %v9372_v26, 0  ;;  %v9440_v41 = vperm.slane %v9372_v26, 1 }
 0x536   : > { %9325 = vmatpush.bf16.msrb.mxu1 %v16402_v40  ;;  %9338 = vmatpush.bf16.msrb.mxu2 %v16410_v50  ;;  %v8027_v24 = vpop.f32.mrf.mxu1  ;;  %v9442_v40 = vperm.slane %v9372_v26, 3  ;;  %v9447_v50 = vpack.c.bf16 %v9439_v47, %v9439_v47 }
 0x537   : > { %9351 = vmatpush.bf16.msrb.mxu3 %v16418_v48  ;;  %9364 = vmatpush.bf16.msra.mxu0 %v16426_v43  ;;  %v9448_v48 = vpack.c.bf16 %v9440_v41, %v9440_v41  ;;  %v16472_v43 = vld [vmem:[#allocation11 + $0xd30] sm:$0xff] }
 0x538   : > { %v9450_v10 = vpack.c.bf16 %v9442_v40, %v9442_v40  ;;  %v16520_v41 = vld [vmem:[#allocation11 + $0xeb0] sm:$0xff]  ;;  %v16519_v40 = vld [vmem:[#allocation11 + $0xea8] sm:$0xff] }
 0x539   : > { %9326 = vmatmul.bf16.vlgmr.msrb.gmra.mxu1 %v9122_v57  ;;  %9339 = vmatmul.bf16.vlgmr.msrb.gmra.mxu2 %v9123_v30  ;;  %v8066_v63 = vpop.f32.mrf.mxu0  ;;  %v16495_v57 = vld [vmem:[#allocation11 + $0xde8] sm:$0xff] }
 0x53a   : > { %9643 = vmatpush.bf16.msra.mxu1 %v16441_v39  ;;  %9656 = vmatpush.bf16.msra.mxu2 %v16449_v34  ;;  %v16480_v39 = vld [vmem:[#allocation11 + $0xd70] sm:$0xff]  ;;  %v9449_v34 = vpack.c.bf16 %v9441_v22, %v9441_v22  ;;  %v16511_v22 = vld [vmem:[#allocation11 + $0xe68] sm:$0xff] }
 0x53b   : > { %9669 = vmatpush.bf16.msra.mxu3 %v16457_v2  ;;  %9682 = vmatpush.bf16.msrb.mxu0 %v16465_v33  ;;  %v16496_v2 = vld [vmem:[#allocation11 + $0xdf0] sm:$0xff]  ;;  %v16471_v33 = vld [vmem:[#allocation11 + $0xd28] sm:$0xff] }
 0x53c   : > { %9352 = vmatmul.bf16.vlgmr.msrb.gmra.mxu3 %v9124_v17  ;;  %9365 = vmatmul.bf16.vlgmr.msra.gmra.mxu0 %v9125_v31  ;;  %v8040_v7 = vpop.f32.mrf.mxu2  ;;  %v16478_v17 = vld [vmem:[#allocation11 + $0xd60] sm:$0xff] }
 0x53d   : > { %v8041_v37 = vadd.f32 %v8040_v7, %v8027_v24  ;;  %v16486_v31 = vld [vmem:[#allocation11 + $0xda0] sm:$0xff] }
 0x53e   : > { %9644 = vmatpush.bf16.msra.mxu1 %v16440_v45  ;;  %9657 = vmatpush.bf16.msra.mxu2 %v16448_v32  ;;  %v8029_v42 = vpop.f32.mrf.mxu1  ;;  %v16470_v32 = vld [vmem:[#allocation11 + $0xd20] sm:$0xff] }
 0x53f   : > { %9670 = vmatpush.bf16.msra.mxu3 %v16456_v18  ;;  %9683 = vmatpush.bf16.msrb.mxu0 %v16464_v0  ;;  %v8053_v25 = vpop.f32.mrf.mxu3  ;;  %v16494_v18 = vld [vmem:[#allocation11 + $0xde0] sm:$0xff]  ;;  %v16469_v0 = vld [vmem:[#allocation11 + $0xd18] sm:$0xff]  ;;  %v16483_v42 = vld [vmem:[#allocation11 + $0xd88] sm:$0xff] }
 0x540   : > { %v8054_v53 = vadd.f32 %v8053_v25, %v8041_v37  ;;  %v16467_v37 = vld [vmem:[#allocation11 + $0xd08] sm:$0xff] }
 0x541   : > { %v8068_v44 = vpop.f32.mrf.mxu0  ;;  %v16475_v25 = vld [vmem:[#allocation11 + $0xd48] sm:$0xff] }
 0x542   : > { %9645 = vmatpush.bf16.msra.mxu1 %v16439_v38  ;;  %9658 = vmatpush.bf16.msra.mxu2 %v16447_v52  ;;  %v8067_v3 = vadd.f32 %v8066_v63, %v8054_v53  ;;  %v16477_v38 = vld [vmem:[#allocation11 + $0xd58] sm:$0xff]  ;;  %v16491_v53 = vld [vmem:[#allocation11 + $0xdc8] sm:$0xff] }
 0x543   : > { %9671 = vmatpush.bf16.msra.mxu3 %v16455_v5  ;;  %9684 = vmatpush.bf16.msrb.mxu0 %v16463_v14  ;;  %v16485_v52 = vld [vmem:[#allocation11 + $0xd98] sm:$0xff] }
 0x544   : > { %v20949_v15 = vadd.f32 %v8067_v3, %v20946_v21  ;;  %v8042_v11 = vpop.f32.mrf.mxu2  ;;  %v16458_v21 = vld [vmem:[#allocation11 + $0xcc0] sm:$0xff]  ;;  %v16493_v5 = vld [vmem:[#allocation11 + $0xdd8] sm:$0xff] }
 0x545   : > { %v16482_v3 = vld [vmem:[#allocation11 + $0xd80] sm:$0xff]  ;;  %v16521_v11 = vld [vmem:[#allocation11 + $0xeb8] sm:$0xff] }
 0x546   : > { %9646 = vmatpush.bf16.msra.mxu1 %v16438_v16  ;;  %9659 = vmatpush.bf16.msra.mxu2 %v16446_v56 }
 0x547   : > { %9672 = vmatpush.bf16.msra.mxu3 %v16454_v49  ;;  %9685 = vmatpush.bf16.msrb.mxu0 %v16462_v51  ;;  %v8055_v55 = vpop.f32.mrf.mxu3  ;;  %v16468_v51 = vld [vmem:[#allocation11 + $0xd10] sm:$0xff] }
 0x548   : > { %v16529_v55 = vld [vmem:[#allocation11 + $0xef8] sm:$0xff] }
 0x54a   : > { %9647 = vmatpush.bf16.msra.mxu1 %v16437_v60  ;;  %9660 = vmatpush.bf16.msra.mxu2 %v16445_v36  ;;  %v16476_v60 = vld [vmem:[#allocation11 + $0xd50] sm:$0xff] }
 0x54b   : > { %9673 = vmatpush.bf16.msra.mxu3 %v16453_v6  ;;  %9686 = vmatpush.bf16.msrb.mxu0 %v16461_v12  ;;  %v16484_v36 = vld [vmem:[#allocation11 + $0xd90] sm:$0xff] }
 0x54c   : > { %v16492_v6 = vld [vmem:[#allocation11 + $0xdd0] sm:$0xff] }
 0x54e   : > { %9648 = vmatpush.bf16.msra.mxu1 %v16436_v9  ;;  %9661 = vmatpush.bf16.msra.mxu2 %v16444_v58  ;;  %v9697_v58 = vld [vmem:[#allocation4 + $0x25] ss:$8 sm:$0xf] }
 0x54f   : > { %9674 = vmatpush.bf16.msra.mxu3 %v16452_v23  ;;  %9687 = vmatpush.bf16.msrb.mxu0 %v16460_v28  ;;  %v16466_v23 = vld [vmem:[#allocation11 + $0xd00] sm:$0xff]  ;;  %v9766_v26 = vperm.slane %v9697_v58, 2 }
 0x550   : > { %v16474_v28 = vld [vmem:[#allocation11 + $0xd40] sm:$0xff] }
 0x552   : > { %9649 = vmatpush.bf16.msra.mxu1 %v16435_v8  ;;  %9662 = vmatpush.bf16.msra.mxu2 %v16443_v4  ;;  %v16505_v8 = vld [vmem:[#allocation11 + $0xe38] sm:$0xff] }
 0x553   : > { %9675 = vmatpush.bf16.msra.mxu3 %v16451_v27  ;;  %9688 = vmatpush.bf16.msrb.mxu0 %v16459_v54  ;;  %v16513_v4 = vld [vmem:[#allocation11 + $0xe78] sm:$0xff]  ;;  %v9764_v27 = vperm.slane %v9697_v58, 0  ;;  %v9765_v54 = vperm.slane %v9697_v58, 1 }
 0x556   : > { %9650 = vmatpush.bf16.msra.mxu1 %v16434_v13  ;;  %9663 = vmatpush.bf16.msra.mxu2 %v16442_v62  ;;  %v8352_v30 = vpop.f32.mrf.mxu1  ;;  %v9767_v13 = vperm.slane %v9697_v58, 3  ;;  %v9772_v62 = vpack.c.bf16 %v9764_v27, %v9764_v27 }
 0x557   : > { %9676 = vmatpush.bf16.msra.mxu3 %v16450_v29  ;;  %9689 = vmatpush.bf16.msrb.mxu0 %v16458_v21  ;;  %v9773_v29 = vpack.c.bf16 %v9765_v54, %v9765_v54  ;;  %v16504_v21 = vld [vmem:[#allocation11 + $0xe30] sm:$0xff] }
 0x558   : > { %v9775_v47 = vpack.c.bf16 %v9767_v13, %v9767_v13  ;;  %v16552_v54 = vld [vmem:[#allocation11 + $0xfb0] sm:$0xff]  ;;  %v16551_v13 = vld [vmem:[#allocation11 + $0xfa8] sm:$0xff] }
 0x559   : > { %9651 = vmatmul.bf16.vlgmr.msra.gmra.mxu1 %v9447_v50  ;;  %9664 = vmatmul.bf16.vlgmr.msra.gmra.mxu2 %v9448_v48  ;;  %v8391_v45 = vpop.f32.mrf.mxu0  ;;  %v16527_v50 = vld [vmem:[#allocation11 + $0xee8] sm:$0xff] }
 0x55a   : > { %9968 = vmatpush.bf16.msrb.mxu1 %v16473_v59  ;;  %9981 = vmatpush.bf16.msrb.mxu2 %v16481_v20  ;;  %v16512_v59 = vld [vmem:[#allocation11 + $0xe70] sm:$0xff]  ;;  %v9774_v20 = vpack.c.bf16 %v9766_v26, %v9766_v26  ;;  %v16543_v26 = vld [vmem:[#allocation11 + $0xf68] sm:$0xff] }
 0x55b   : > { %9994 = vmatpush.bf16.msrb.mxu3 %v16489_v1  ;;  %10007 = vmatpush.bf16.msra.mxu0 %v16497_v19  ;;  %v16528_v1 = vld [vmem:[#allocation11 + $0xef0] sm:$0xff]  ;;  %v16503_v19 = vld [vmem:[#allocation11 + $0xe28] sm:$0xff] }
 0x55c   : > { %9677 = vmatmul.bf16.vlgmr.msra.gmra.mxu3 %v9449_v34  ;;  %9690 = vmatmul.bf16.vlgmr.msrb.gmra.mxu0 %v9450_v10  ;;  %v8365_v14 = vpop.f32.mrf.mxu2  ;;  %v16510_v34 = vld [vmem:[#allocation11 + $0xe60] sm:$0xff] }
 0x55d   : > { %v8366_v24 = vadd.f32 %v8365_v14, %v8352_v30  ;;  %v16518_v10 = vld [vmem:[#allocation11 + $0xea0] sm:$0xff] }
 0x55e   : > { %9969 = vmatpush.bf16.msrb.mxu1 %v16472_v43  ;;  %9982 = vmatpush.bf16.msrb.mxu2 %v16480_v39  ;;  %v8354_v16 = vpop.f32.mrf.mxu1  ;;  %v16502_v39 = vld [vmem:[#allocation11 + $0xe20] sm:$0xff] }
 0x55f   : > { %9995 = vmatpush.bf16.msrb.mxu3 %v16488_v61  ;;  %10008 = vmatpush.bf16.msra.mxu0 %v16496_v2  ;;  %v8378_v63 = vpop.f32.mrf.mxu3  ;;  %v16526_v61 = vld [vmem:[#allocation11 + $0xee0] sm:$0xff]  ;;  %v16501_v2 = vld [vmem:[#allocation11 + $0xe18] sm:$0xff]  ;;  %v16515_v16 = vld [vmem:[#allocation11 + $0xe88] sm:$0xff] }
 0x560   : > { %v8379_v56 = vadd.f32 %v8378_v63, %v8366_v24  ;;  %v16499_v24 = vld [vmem:[#allocation11 + $0xe08] sm:$0xff] }
 0x561   : > { %v8393_v49 = vpop.f32.mrf.mxu0  ;;  %v16507_v63 = vld [vmem:[#allocation11 + $0xe48] sm:$0xff] }
 0x562   : > { %9970 = vmatpush.bf16.msrb.mxu1 %v16471_v33  ;;  %9983 = vmatpush.bf16.msrb.mxu2 %v16479_v46  ;;  %v8392_v12 = vadd.f32 %v8391_v45, %v8379_v56  ;;  %v16509_v33 = vld [vmem:[#allocation11 + $0xe58] sm:$0xff]  ;;  %v16523_v56 = vld [vmem:[#allocation11 + $0xec8] sm:$0xff] }
 0x563   : > { %9996 = vmatpush.bf16.msrb.mxu3 %v16487_v35  ;;  %10009 = vmatpush.bf16.msra.mxu0 %v16495_v57  ;;  %v16517_v46 = vld [vmem:[#allocation11 + $0xe98] sm:$0xff] }
 0x564   : > { %v20952_v7 = vadd.f32 %v8392_v12, %v20949_v15  ;;  %v8367_v44 = vpop.f32.mrf.mxu2  ;;  %v16490_v15 = vld [vmem:[#allocation11 + $0xdc0] sm:$0xff]  ;;  %v16525_v35 = vld [vmem:[#allocation11 + $0xed8] sm:$0xff] }
 0x565   : > { %v16514_v12 = vld [vmem:[#allocation11 + $0xe80] sm:$0xff]  ;;  %v16553_v44 = vld [vmem:[#allocation11 + $0xfb8] sm:$0xff] }
 0x566   : > { %9971 = vmatpush.bf16.msrb.mxu1 %v16470_v32  ;;  %9984 = vmatpush.bf16.msrb.mxu2 %v16478_v17 }
 0x567   : > { %9997 = vmatpush.bf16.msrb.mxu3 %v16486_v31  ;;  %10010 = vmatpush.bf16.msra.mxu0 %v16494_v18  ;;  %v8380_v9 = vpop.f32.mrf.mxu3  ;;  %v16500_v18 = vld [vmem:[#allocation11 + $0xe10] sm:$0xff] }
 0x568   : > { %v16561_v9 = vld [vmem:[#allocation11 + $0xff8] sm:$0xff] }
 0x56a   : > { %9972 = vmatpush.bf16.msrb.mxu1 %v16469_v0  ;;  %9985 = vmatpush.bf16.msrb.mxu2 %v16477_v38  ;;  %v16508_v0 = vld [vmem:[#allocation11 + $0xe50] sm:$0xff] }
 0x56b   : > { %9998 = vmatpush.bf16.msrb.mxu3 %v16485_v52  ;;  %10011 = vmatpush.bf16.msra.mxu0 %v16493_v5  ;;  %v16516_v38 = vld [vmem:[#allocation11 + $0xe90] sm:$0xff] }
 0x56c   : > { %v16524_v52 = vld [vmem:[#allocation11 + $0xed0] sm:$0xff] }
 0x56e   : > { %9973 = vmatpush.bf16.msrb.mxu1 %v16468_v51  ;;  %9986 = vmatpush.bf16.msrb.mxu2 %v16476_v60  ;;  %v10022_v60 = vld [vmem:[#allocation4 + $0x26] ss:$8 sm:$0xf] }
 0x56f   : > { %9999 = vmatpush.bf16.msrb.mxu3 %v16484_v36  ;;  %10012 = vmatpush.bf16.msra.mxu0 %v16492_v6  ;;  %v16498_v36 = vld [vmem:[#allocation11 + $0xe00] sm:$0xff]  ;;  %v10091_v58 = vperm.slane %v10022_v60, 2 }
 0x570   : > { %v16506_v6 = vld [vmem:[#allocation11 + $0xe40] sm:$0xff] }
 0x572   : > { %9974 = vmatpush.bf16.msrb.mxu1 %v16467_v37  ;;  %9987 = vmatpush.bf16.msrb.mxu2 %v16475_v25  ;;  %v16537_v37 = vld [vmem:[#allocation11 + $0xf38] sm:$0xff] }
 0x573   : > { %10000 = vmatpush.bf16.msrb.mxu3 %v16483_v42  ;;  %10013 = vmatpush.bf16.msra.mxu0 %v16491_v53  ;;  %v16545_v25 = vld [vmem:[#allocation11 + $0xf78] sm:$0xff]  ;;  %v10089_v42 = vperm.slane %v10022_v60, 0  ;;  %v10090_v53 = vperm.slane %v10022_v60, 1 }
 0x576   : > { %9975 = vmatpush.bf16.msrb.mxu1 %v16466_v23  ;;  %9988 = vmatpush.bf16.msrb.mxu2 %v16474_v28  ;;  %v8677_v48 = vpop.f32.mrf.mxu1  ;;  %v10092_v23 = vperm.slane %v10022_v60, 3  ;;  %v10097_v28 = vpack.c.bf16 %v10089_v42, %v10089_v42 }
 0x577   : > { %10001 = vmatpush.bf16.msrb.mxu3 %v16482_v3  ;;  %10014 = vmatpush.bf16.msra.mxu0 %v16490_v15  ;;  %v10098_v3 = vpack.c.bf16 %v10090_v53, %v10090_v53  ;;  %v16536_v15 = vld [vmem:[#allocation11 + $0xf30] sm:$0xff] }
 0x578   : > { %v10100_v27 = vpack.c.bf16 %v10092_v23, %v10092_v23 }
 0x579   : > { %9976 = vmatmul.bf16.vlgmr.msrb.gmra.mxu1 %v9772_v62  ;;  %9989 = vmatmul.bf16.vlgmr.msrb.gmra.mxu2 %v9773_v29  ;;  %v8716_v43 = vpop.f32.mrf.mxu0  ;;  %v16559_v62 = vld [vmem:[#allocation11 + $0xfe8] sm:$0xff] }
 0x57a   : > { %10293 = vmatpush.bf16.msra.mxu1 %v16505_v8  ;;  %10306 = vmatpush.bf16.msra.mxu2 %v16513_v4  ;;  %v16544_v8 = vld [vmem:[#allocation11 + $0xf70] sm:$0xff]  ;;  %v10099_v4 = vpack.c.bf16 %v10091_v58, %v10091_v58 }
 0x57b   : > { %10319 = vmatpush.bf16.msra.mxu3 %v16521_v11  ;;  %10332 = vmatpush.bf16.msrb.mxu0 %v16529_v55  ;;  %v16560_v11 = vld [vmem:[#allocation11 + $0xff0] sm:$0xff]  ;;  %v16535_v55 = vld [vmem:[#allocation11 + $0xf28] sm:$0xff] }
 0x57c   : > { %10002 = vmatmul.bf16.vlgmr.msrb.gmra.mxu3 %v9774_v20  ;;  %10015 = vmatmul.bf16.vlgmr.msra.gmra.mxu0 %v9775_v47  ;;  %v8690_v57 = vpop.f32.mrf.mxu2  ;;  %v16542_v20 = vld [vmem:[#allocation11 + $0xf60] sm:$0xff] }
 0x57d   : > { %v8691_v30 = vadd.f32 %v8690_v57, %v8677_v48  ;;  %v16550_v47 = vld [vmem:[#allocation11 + $0xfa0] sm:$0xff] }
 0x57e   : > { %10294 = vmatpush.bf16.msra.mxu1 %v16504_v21  ;;  %10307 = vmatpush.bf16.msra.mxu2 %v16512_v59  ;;  %v8679_v32 = vpop.f32.mrf.mxu1  ;;  %v16534_v59 = vld [vmem:[#allocation11 + $0xf20] sm:$0xff] }
 0x57f   : > { %10320 = vmatpush.bf16.msra.mxu3 %v16520_v41  ;;  %10333 = vmatpush.bf16.msrb.mxu0 %v16528_v1  ;;  %v8703_v45 = vpop.f32.mrf.mxu3  ;;  %v16558_v41 = vld [vmem:[#allocation11 + $0xfe0] sm:$0xff]  ;;  %v16533_v1 = vld [vmem:[#allocation11 + $0xf18] sm:$0xff]  ;;  %v16547_v32 = vld [vmem:[#allocation11 + $0xf88] sm:$0xff] }
 0x580   : > { %v8704_v17 = vadd.f32 %v8703_v45, %v8691_v30  ;;  %v16531_v30 = vld [vmem:[#allocation11 + $0xf08] sm:$0xff] }
 0x581   : > { %v8718_v31 = vpop.f32.mrf.mxu0  ;;  %v16539_v45 = vld [vmem:[#allocation11 + $0xf48] sm:$0xff] }
 0x582   : > { %10295 = vmatpush.bf16.msra.mxu1 %v16503_v19  ;;  %10308 = vmatpush.bf16.msra.mxu2 %v16511_v22  ;;  %v8717_v5 = vadd.f32 %v8716_v43, %v8704_v17  ;;  %v16541_v19 = vld [vmem:[#allocation11 + $0xf58] sm:$0xff]  ;;  %v16555_v17 = vld [vmem:[#allocation11 + $0xfc8] sm:$0xff] }
 0x583   : > { %10321 = vmatpush.bf16.msra.mxu3 %v16519_v40  ;;  %10334 = vmatpush.bf16.msrb.mxu0 %v16527_v50  ;;  %v16549_v22 = vld [vmem:[#allocation11 + $0xf98] sm:$0xff] }
 0x584   : > { %v20955_v14 = vadd.f32 %v8717_v5, %v20952_v7  ;;  %v8692_v49 = vpop.f32.mrf.mxu2  ;;  %v16522_v7 = vld [vmem:[#allocation11 + $0xec0] sm:$0xff]  ;;  %v16557_v40 = vld [vmem:[#allocation11 + $0xfd8] sm:$0xff] }
 0x585   : > { %v16546_v5 = vld [vmem:[#allocation11 + $0xf80] sm:$0xff] }
 0x586   : > { %10296 = vmatpush.bf16.msra.mxu1 %v16502_v39  ;;  %10309 = vmatpush.bf16.msra.mxu2 %v16510_v34 }
 0x587   : > { %10322 = vmatpush.bf16.msra.mxu3 %v16518_v10  ;;  %10335 = vmatpush.bf16.msrb.mxu0 %v16526_v61  ;;  %v8705_v51 = vpop.f32.mrf.mxu3  ;;  %v16532_v61 = vld [vmem:[#allocation11 + $0xf10] sm:$0xff] }
 0x58a   : > { %10297 = vmatpush.bf16.msra.mxu1 %v16501_v2  ;;  %10310 = vmatpush.bf16.msra.mxu2 %v16509_v33  ;;  %v16540_v2 = vld [vmem:[#allocation11 + $0xf50] sm:$0xff] }
 0x58b   : > { %10323 = vmatpush.bf16.msra.mxu3 %v16517_v46  ;;  %10336 = vmatpush.bf16.msrb.mxu0 %v16525_v35  ;;  %v16548_v33 = vld [vmem:[#allocation11 + $0xf90] sm:$0xff] }
 0x58c   : > { %v16556_v46 = vld [vmem:[#allocation11 + $0xfd0] sm:$0xff] }
 0x58e   : > { %10298 = vmatpush.bf16.msra.mxu1 %v16500_v18  ;;  %10311 = vmatpush.bf16.msra.mxu2 %v16508_v0  ;;  %v10347_v0 = vld [vmem:[#allocation4 + $0x27] ss:$8 sm:$0xf] }
 0x58f   : > { %10324 = vmatpush.bf16.msra.mxu3 %v16516_v38  ;;  %10337 = vmatpush.bf16.msrb.mxu0 %v16524_v52  ;;  %v16530_v38 = vld [vmem:[#allocation11 + $0xf00] sm:$0xff] }
 0x590   : > { %v16538_v52 = vld [vmem:[#allocation11 + $0xf40] sm:$0xff] }
 0x592   : > { %10299 = vmatpush.bf16.msra.mxu1 %v16499_v24  ;;  %10312 = vmatpush.bf16.msra.mxu2 %v16507_v63  ;;  %v16554_v24 = vld [vmem:[#allocation11 + $0xfc0] sm:$0xff]  ;;  %v10415_v63 = vperm.slane %v10347_v0, 1 }
 0x593   : > { %10325 = vmatpush.bf16.msra.mxu3 %v16515_v16  ;;  %10338 = vmatpush.bf16.msrb.mxu0 %v16523_v56  ;;  %v10416_v16 = vperm.slane %v10347_v0, 2  ;;  %v10417_v56 = vperm.slane %v10347_v0, 3 }
 0x594   : > { %v10423_v51 = vpack.c.bf16 %v10415_v63, %v10415_v63 }
 0x595   : > { %v10424_v60 = vpack.c.bf16 %v10416_v16, %v10416_v16 }
 0x596   : > { %10300 = vmatpush.bf16.msra.mxu1 %v16498_v36  ;;  %10313 = vmatpush.bf16.msra.mxu2 %v16506_v6  ;;  %v9002_v29 = vpop.f32.mrf.mxu1  ;;  %v10425_v36 = vpack.c.bf16 %v10417_v56, %v10417_v56 }
 0x597   : > { %10326 = vmatpush.bf16.msra.mxu3 %v16514_v12  ;;  %10339 = vmatpush.bf16.msrb.mxu0 %v16522_v7 }
 0x599   : > { %10301 = vmatmul.bf16.vlgmr.msra.gmra.mxu1 %v10097_v28  ;;  %10314 = vmatmul.bf16.vlgmr.msra.gmra.mxu2 %v10098_v3  ;;  %v9041_v21 = vpop.f32.mrf.mxu0 }
 0x59a   : > { %10618 = vmatpush.bf16.msrb.mxu1 %v16537_v37  ;;  %10631 = vmatpush.bf16.msrb.mxu2 %v16545_v25 }
 0x59b   : > { %10644 = vmatpush.bf16.msrb.mxu3 %v16553_v44  ;;  %10657 = vmatpush.bf16.msra.mxu0 %v16561_v9 }
 0x59c   : > { %10327 = vmatmul.bf16.vlgmr.msra.gmra.mxu3 %v10099_v4  ;;  %10340 = vmatmul.bf16.vlgmr.msrb.gmra.mxu0 %v10100_v27  ;;  %v9015_v50 = vpop.f32.mrf.mxu2 }
 0x59d   : > { %v9016_v48 = vadd.f32 %v9015_v50, %v9002_v29 }
 0x59e   : > { %10619 = vmatpush.bf16.msrb.mxu1 %v16536_v15  ;;  %10632 = vmatpush.bf16.msrb.mxu2 %v16544_v8  ;;  %v9004_v39 = vpop.f32.mrf.mxu1 }
 0x59f   : > { %10645 = vmatpush.bf16.msrb.mxu3 %v16552_v54  ;;  %10658 = vmatpush.bf16.msra.mxu0 %v16560_v11  ;;  %v9028_v43 = vpop.f32.mrf.mxu3 }
 0x5a0   : > { %v9029_v34 = vadd.f32 %v9028_v43, %v9016_v48  ;;  %v16569_v48 = vld [vmem:[%s21023_s9 + $0x38] sm:$0xff] }
 0x5a1   : > { %v9043_v10 = vpop.f32.mrf.mxu0 }
 0x5a2   : > { %10620 = vmatpush.bf16.msrb.mxu1 %v16535_v55  ;;  %10633 = vmatpush.bf16.msrb.mxu2 %v16543_v26  ;;  %v9042_v35 = vadd.f32 %v9041_v21, %v9029_v34  ;;  %v16568_v34 = vld [vmem:[%s21023_s9 + $0x30] sm:$0xff]  ;;  %v16567_v10 = vld [vmem:[%s21023_s9 + $0x28] sm:$0xff] }
 0x5a3   : > { %10646 = vmatpush.bf16.msrb.mxu3 %v16551_v13  ;;  %10659 = vmatpush.bf16.msra.mxu0 %v16559_v62 }
 0x5a4   : > { %v9045_v57 = vadd.f32 %v9042_v35, %v20955_v14  ;;  %v9017_v31 = vpop.f32.mrf.mxu2  ;;  %v10414_v14 = vperm.slane %v10347_v0, 0  ;;  %v16562_v0 = vld [vmem:[%s21023_s9] sm:$0xff] }
 0x5a5   : > { %v16564_v31 = vld [vmem:[%s21023_s9 + $0x10] sm:$0xff] }
 0x5a6   : > { %10621 = vmatpush.bf16.msrb.mxu1 %v16534_v59  ;;  %10634 = vmatpush.bf16.msrb.mxu2 %v16542_v20  ;;  %v10422_v49 = vpack.c.bf16 %v10414_v14, %v10414_v14 }
 0x5a7   : > { %10647 = vmatpush.bf16.msrb.mxu3 %v16550_v47  ;;  %10660 = vmatpush.bf16.msra.mxu0 %v16558_v41  ;;  %v9030_v18 = vpop.f32.mrf.mxu3 }
 0x5a8   : > { %v16563_v18 = vld [vmem:[%s21023_s9 + $0x8] sm:$0xff] }
 0x5aa   : > { %10622 = vmatpush.bf16.msrb.mxu1 %v16533_v1  ;;  %10635 = vmatpush.bf16.msrb.mxu2 %v16541_v19 }
 0x5ab   : > { %10648 = vmatpush.bf16.msrb.mxu3 %v16549_v22  ;;  %10661 = vmatpush.bf16.msra.mxu0 %v16557_v40 }
 0x5ae   : > { %10623 = vmatpush.bf16.msrb.mxu1 %v16532_v61  ;;  %10636 = vmatpush.bf16.msrb.mxu2 %v16540_v2  ;;  %v16566_v61 = vld [vmem:[%s21023_s9 + $0x20] sm:$0xff] }
 0x5af   : > { %10649 = vmatpush.bf16.msrb.mxu3 %v16548_v33  ;;  %10662 = vmatpush.bf16.msra.mxu0 %v16556_v46 }
 0x5b2   : > { %10624 = vmatpush.bf16.msrb.mxu1 %v16531_v30  ;;  %10637 = vmatpush.bf16.msrb.mxu2 %v16539_v45  ;;  %v16565_v45 = vld [vmem:[%s21023_s9 + $0x18] sm:$0xff] }
 0x5b3   : > { %10650 = vmatpush.bf16.msrb.mxu3 %v16547_v32  ;;  %10663 = vmatpush.bf16.msra.mxu0 %v16555_v17 }
 0x5b6   : > { %10625 = vmatpush.bf16.msrb.mxu1 %v16530_v38  ;;  %10638 = vmatpush.bf16.msrb.mxu2 %v16538_v52  ;;  %v9327_v6 = vpop.f32.mrf.mxu1 }
 0x5b7   : > { %10651 = vmatpush.bf16.msrb.mxu3 %v16546_v5  ;;  %10664 = vmatpush.bf16.msra.mxu0 %v16554_v24 }
 0x5b9   : > { %10626 = vmatmul.bf16.vlgmr.msrb.gmra.mxu1 %v10422_v49  ;;  %10639 = vmatmul.bf16.vlgmr.msrb.gmra.mxu2 %v10423_v51  ;;  %v9366_v12 = vpop.f32.mrf.mxu0 }
 0x5ba   : > { %10652 = vmatmul.bf16.vlgmr.msrb.gmra.mxu3 %v10424_v60  ;;  %10665 = vmatmul.bf16.vlgmr.msra.gmra.mxu0 %v10425_v36 }
 0x5bb   : > { %10740 = vmatpush.bf16.msra.mxu1 %v16569_v48 }
 0x5bc   : > { %v9340_v7 = vpop.f32.mrf.mxu2 }
 0x5bd   : > { %v9341_v37 = vadd.f32 %v9340_v7, %v9327_v6 }
 0x5be   : > { %v9329_v42 = vpop.f32.mrf.mxu1 }
 0x5bf   : > { %v9353_v25 = vpop.f32.mrf.mxu3  ;;  %10741 = vmatpush.bf16.msra.mxu1 %v16568_v34 }
 0x5c0   : > { %v9354_v53 = vadd.f32 %v9353_v25, %v9341_v37 }
 0x5c1   : > { %v9368_v44 = vpop.f32.mrf.mxu0 }
 0x5c2   : > { %v9367_v9 = vadd.f32 %v9366_v12, %v9354_v53  ;;  %v10671_v12 = vld [vmem:[#allocation13] sm:$0x1] }
 0x5c3   : > { %10742 = vmatpush.bf16.msra.mxu1 %v16567_v10 }
 0x5c4   : > { %v9370_v58 = vadd.f32 %v9367_v9, %v9045_v57  ;;  %v9342_v23 = vpop.f32.mrf.mxu2  ;;  %v10691_v9 = vld [vmem:[#allocation14] sm:$0x1] }
 0x5c7   : > { %v9355_v28 = vpop.f32.mrf.mxu3  ;;  %10743 = vmatpush.bf16.msra.mxu1 %v16566_v61 }
 0x5cb   : > { %10744 = vmatpush.bf16.msra.mxu1 %v16565_v45 }
 0x5cf   : > { %10745 = vmatpush.bf16.msra.mxu1 %v16564_v31 }
 0x5d3   : > { %10746 = vmatpush.bf16.msra.mxu1 %v16563_v18 }
 0x5d6   : > { %v9652_v3 = vpop.f32.mrf.mxu1 }
 0x5d7   : > { %10747 = vmatpush.bf16.msra.mxu1 %v16562_v0 }
 0x5d9   : > { %v9691_v15 = vpop.f32.mrf.mxu0 }
 0x5dc   : > { %v9665_v8 = vpop.f32.mrf.mxu2 }
 0x5dd   : > { %v9666_v4 = vadd.f32 %v9665_v8, %v9652_v3 }
 0x5de   : > { %v9654_v54 = vpop.f32.mrf.mxu1 }
 0x5df   : > { %v9678_v27 = vpop.f32.mrf.mxu3 }
 0x5e0   : > { %v9679_v11 = vadd.f32 %v9678_v27, %v9666_v4 }
 0x5e1   : > { %v9693_v55 = vpop.f32.mrf.mxu0 }
 0x5e2   : > { %v9692_v26 = vadd.f32 %v9691_v15, %v9679_v11 }
 0x5e4   : > { %v9695_v13 = vadd.f32 %v9692_v26, %v9370_v58  ;;  %v9667_v62 = vpop.f32.mrf.mxu2 }
 0x5e7   : > { %v9680_v29 = vpop.f32.mrf.mxu3 }
 0x5f6   : > { %v9977_v21 = vpop.f32.mrf.mxu1 }
 0x5f9   : > { %v10016_v59 = vpop.f32.mrf.mxu0 }
 0x5fc   : > { %v9990_v20 = vpop.f32.mrf.mxu2 }
 0x5fd   : > { %v9991_v47 = vadd.f32 %v9990_v20, %v9977_v21 }
 0x5fe   : > { %v9979_v1 = vpop.f32.mrf.mxu1 }
 0x5ff   : > { %v10003_v41 = vpop.f32.mrf.mxu3 }
 0x600   : > { %v10004_v19 = vadd.f32 %v10003_v41, %v9991_v47 }
 0x601   : > { %v10018_v22 = vpop.f32.mrf.mxu0 }
 0x602   : > { %v10017_v40 = vadd.f32 %v10016_v59, %v10004_v19 }
 0x604   : > { %v10020_v50 = vadd.f32 %v10017_v40, %v9695_v13  ;;  %v9992_v43 = vpop.f32.mrf.mxu2 }
 0x607   : > { %v10005_v39 = vpop.f32.mrf.mxu3 }
 0x616   : > { %v10302_v2 = vpop.f32.mrf.mxu1 }
 0x619   : > { %v10341_v33 = vpop.f32.mrf.mxu0 }
 0x61c   : > { %v10315_v46 = vpop.f32.mrf.mxu2 }
 0x61d   : > { %v10316_v38 = vadd.f32 %v10315_v46, %v10302_v2 }
 0x61e   : > { %v10304_v57 = vpop.f32.mrf.mxu1 }
 0x61f   : > { %v10328_v35 = vpop.f32.mrf.mxu3 }
 0x620   : > { %v10329_v24 = vadd.f32 %v10328_v35, %v10316_v38 }
 0x621   : > { %v10343_v30 = vpop.f32.mrf.mxu0 }
 0x622   : > { %v10342_v63 = vadd.f32 %v10341_v33, %v10329_v24 }
 0x624   : > { %v10317_v32 = vpop.f32.mrf.mxu2  ;;  %v10345_v36 = vadd.f32 %v10342_v63, %v10020_v50 }
 0x627   : > { %v10330_v17 = vpop.f32.mrf.mxu3 }
 0x636   : > { %v10627_v52 = vpop.f32.mrf.mxu1 }
 0x637   : > { %v10666_v5 = vpop.f32.mrf.mxu0 }
 0x63c   : > { %v10640_v14 = vpop.f32.mrf.mxu2 }
 0x63d   : > { %v10641_v16 = vadd.f32 %v10640_v14, %v10627_v52  ;;  %v10653_v56 = vpop.f32.mrf.mxu3 }
 0x63e   : > { %v10629_v49 = vpop.f32.mrf.mxu1 }
 0x63f   : > { %v10654_v51 = vadd.f32 %v10653_v56, %v10641_v16  ;;  %v10668_v60 = vpop.f32.mrf.mxu0 }
 0x641   : > { %v10667_v6 = vadd.f32 %v10666_v5, %v10654_v51 }
 0x643   : > { %v10670_v7 = vadd.f32 %v10667_v6, %v10345_v36 }
 0x644   : > { %v10642_v37 = vpop.f32.mrf.mxu2 }
 0x645   : > { %v10672_v25 = vadd.f32 %v10671_v12, %v10670_v7  ;;  %v10655_v42 = vpop.f32.mrf.mxu3 }
 0x647   : > { %v10673_v53 = vmax.f32 %v10672_v25, 0.0 }
 0x649   : > { %v10690_v44 = vpack.c.bf16 %v10673_v53, %v10673_v53 }
 0x64b   : > { %10748 = vmatmul.bf16.vlgmr.msra.gmra.mxu1 %v10690_v44 }
 0x6c8   : > { %v10749_v58 = vpop.f32.mrf.mxu1 }
 0x6c9   : > { %v10750_v23 = vadd.f32 %v10749_v58, %v10691_v9 }
 0x6cb   : > { %10753 = vst [vmem:[%s468_s29] sm:$0x1] %v10750_v23 }
 0x6cc   : > { %16887 = shalt.err (!%p16884_p8)
}
 0x6cd   : > { %16595 = dma.vmem_to_hbm [thread:$0]  (%p17047_p5), %s10766_s25, 16, %s10768_s22, %s10755_s30  }
 0x6d0   : > { %v10751_v28 = vpop.f32.mrf.mxu1 }
 0x6d1 PF: > { %p16632_p9 = scmp.ge.s32.totalorder %s16938_s20, 2  ;;  %s10779_s23 = sand.u32 1, %s16926_s17  }
 0x6d2   : > { %s10780_s28 = scalar_lea.sflag [#allocation7], %s10779_s23 }
 0x6d3   : > { %p16617_p10 = pnand %p16632_p9, %p17051_p6 }
 0x6d5   : > { %p16618_p11 = pneg %p16617_p10 }
 0x6d7   : > { %16921 = dma.done.wait (%p16618_p11), %s10780_s28, 16  }
 0x6d8   : > { %16923 = vsyncadd (%p16618_p11), %s10780_s28, 4294967280  ;;  %s21043_s20 = sld [smem:[#allocation23_spill]]  ;;  %s21046_s17 = smov %s16930_s18 }
 0x6d9   : > { %s21044_s7 = sld [smem:[#allocation22_spill]] }
 0x6da   : > { %s21045_s19 = sld [smem:[#allocation24_spill]] }
 0x6de   : > { %p25_p12 = scmp.ge.s32.totalorder %s21043_s20, 4  }
 0x6df   : > { %s21047_s18 = smov %s21044_s7 }
 0x6e0   :  { %27 = sbr.rel (!%p25_p12) target bundleno = 10 (0xa), region = 159 }
 0x6e5   :  { %10785 = vsyncpa [#allocation6], 1 }
 0x6e6   :  { %10787 = vsyncpa [#allocation6 + $0x1], 1 }
 0x6e7   :  { %10788 = vsyncpa [#allocation9], 1 }
 0x6e8   :  { %10789 = vsyncpa [#allocation12], 1 }
 0x6e9   :  { %10790 = vsyncpa [#allocation15], 1 }
 0x6ea   :  { %10791 = vsyncpa [#allocation7], 1 }
 0x6eb   :  { %10793 = vsyncpa [#allocation7 + $0x1], 1 }

</bundles_post_ra>
